<compile_context>
chip_gen: v7x
topology: tpu7x:2x2x1
jax: 0.10.0
libtpu: 0.0.40
codegen_flags: <defaults>
</compile_context>

<pallas_src>
import numpy as np
import jax
import jax.numpy as jnp
from jax import lax
from jax.experimental import pallas as pl
from jax.experimental.pallas import tpu as pltpu

# ----------------------------------------------------------------------------
# Static sizes implied by the module (input length 178 -> 16*41 flat features)
# ----------------------------------------------------------------------------
L_IN = 178                 # conv1: 174 -> pool: 87 -> conv2: 83 -> pool: 41
C1, C2 = 6, 16
L_AUG = 184                # input rows: 0..177 data, row 178 = constant 1, pad to 184
ONE_COL = 178
T_PAD = 48                 # per-(channel, parity) pooled length 44/43 padded to 48
NP1 = C1 * 2 * T_PAD       # 576 rows of pooled-conv1 features (incl. carry row)
Q_ONE = NP1 - 1            # 575: unused padding row repurposed to carry constant 1
N_FEAT = C2 * 41           # 656 = PyTorch flatten size
N_FEAT_AUG = 664           # 656 features + carry row @656 + pad to 664


# ----------------------------------------------------------------------------
# Kernel: the whole forward pass, fused; everything is (features, TB) matrices
# ----------------------------------------------------------------------------
def mycnn_kernel(x_ref, w1_ref, w2e_ref, w2o_ref,
                 f1_ref, f2_ref, f3_ref, f4_ref, f5_ref, out_ref):
    def mxu(w_ref, act_bf16):
        # bf16 x bf16 matmul on the MXU, f32 accumulation.
        return jnp.dot(w_ref[...], act_bf16, preferred_element_type=jnp.float32)

    x = x_ref[...]                                           # (184, TB) bf16

    # conv1 (+bias) with the two members of every maxpool(2) pair stacked as
    # the top/bottom halves of the output -> pool1 is one elementwise max.
    a = mxu(w1_ref, x)                                       # (1152, TB) f32
    p1 = jnp.maximum(jnp.maximum(a[:NP1], a[NP1:]), 0.0)     # (576, TB) pooled+relu
    p1 = p1.astype(jnp.bfloat16)

    # conv2 (+bias): even / odd output positions as two banded matmuls,
    # pool2 is their elementwise max; rows are already PyTorch flatten order.
    feat = jnp.maximum(jnp.maximum(mxu(w2e_ref, p1), mxu(w2o_ref, p1)), 0.0)

    # fc1..fc4 with ReLU (biases + the carried constant-1 row are inside the
    # augmented weight matrices), then fc5 without ReLU.
    h = feat
    for w_ref in (f1_ref, f2_ref, f3_ref, f4_ref):
        h = jnp.maximum(mxu(w_ref, h.astype(jnp.bfloat16)), 0.0)
    out_ref[...] = mxu(f5_ref, h.astype(jnp.bfloat16))       # (8, TB), rows 0..4 = logits


# ----------------------------------------------------------------------------
# Host-side weight preparation (PyTorch layouts in, bf16 kernel matrices out)
# ----------------------------------------------------------------------------
def prepare_weights(p):
    f32 = np.float32
    w1 = np.asarray(p["conv1_w"], f32).reshape(C1, 5)        # (6, 5)
    b1 = np.asarray(p["conv1_b"], f32)                       # (6,)
    w2 = np.asarray(p["conv2_w"], f32)                       # (16, 6, 5)
    b2 = np.asarray(p["conv2_b"], f32)                       # (16,)

    # conv1+pool1 banded matrix.  Output row q = c*96 + parity*48 + t holds the
    # pooled value p1[c, 2t + parity]; the two conv outputs that feed that max
    # live in the top half (rows q) and bottom half (rows NP1 + q).
    W1 = np.zeros((2 * NP1, L_AUG), f32)
    for c in range(C1):
        for par in range(2):                  # 0: even pooled position, 1: odd
            t_max = 44 if par == 0 else 43
            for t in range(t_max):
                q = c * (2 * T_PAD) + par * T_PAD + t
                for half in range(2):         # the two conv1 outputs being pooled
                    l = 4 * t + 2 * par + half      # conv1 output position
                    row = half * NP1 + q
                    W1[row, l:l + 5] += w1[c]       # taps hit x[l .. l+4]
                    W1[row, ONE_COL] += b1[c]       # bias via the constant-1 input row
    W1[Q_ONE, ONE_COL] = 1.0                  # carry the constant 1 through pool1
    W1[NP1 + Q_ONE, ONE_COL] = 1.0

    # conv2+pool2 banded matrices (even/odd conv2 outputs); output feature
    # index f = o*41 + m matches PyTorch's .view(-1, 16*41).
    def p1_row(c, pos):                       # kernel row holding p1[c, pos]
        return c * (2 * T_PAD) + (pos % 2) * T_PAD + pos // 2

    W2E = np.zeros((N_FEAT_AUG, NP1), f32)
    W2O = np.zeros((N_FEAT_AUG, NP1), f32)
    for o in range(C2):
        for m in range(41):
            f = o * 41 + m
            for c in range(C1):
                for k in range(5):
                    W2E[f, p1_row(c, 2 * m + k)] += w2[o, c, k]
                    W2O[f, p1_row(c, 2 * m + 1 + k)] += w2[o, c, k]
            W2E[f, Q_ONE] += b2[o]
            W2O[f, Q_ONE] += b2[o]
    W2E[N_FEAT, Q_ONE] = 1.0                  # carry the constant 1 into FEAT
    W2O[N_FEAT, Q_ONE] = 1.0

    # FC layers, augmented: bias folded into the constant-1 column, plus one
    # extra output row that regenerates the constant 1 (relu(1) == 1).
    def fc_aug(w, b, in_aug, one_col, out_aug, carry_row):
        W = np.zeros((out_aug, in_aug), f32)
        o_dim, i_dim = np.asarray(w).shape
        W[:o_dim, :i_dim] = np.asarray(w, f32)
        W[:o_dim, one_col] = np.asarray(b, f32)
        if carry_row is not None:
            W[carry_row, one_col] = 1.0
        return W

    F1 = fc_aug(p["fc1_w"], p["fc1_b"], N_FEAT_AUG, N_FEAT, 520, 512)
    F2 = fc_aug(p["fc2_w"], p["fc2_b"], 520, 512, 264, 256)
    F3 = fc_aug(p["fc3_w"], p["fc3_b"], 264, 256, 136, 128)
    F4 = fc_aug(p["fc4_w"], p["fc4_b"], 136, 128, 72, 64)
    F5 = fc_aug(p["fc5_w"], p["fc5_b"], 72, 64, 8, None)     # no relu, no carry

    mats = (W1, W2E, W2O, F1, F2, F3, F4, F5)
    return tuple(jnp.asarray(m, dtype=jnp.bfloat16) for m in mats)


# ----------------------------------------------------------------------------
# Wrapper: batch tiling, host-side transpose/augmentation, pallas_call
# ----------------------------------------------------------------------------
def my_cnn_forward(x, mats):
    if x.ndim == 3:                           # (B, 1, 178) -> (B, 178)
        x = x.reshape(x.shape[0], x.shape[-1])
    B = x.shape[0]
    assert x.shape[1] == L_IN

    # Batch tile: lane-aligned 128/256-wide tiles for big batches (fills the
    # MXU and gives >=2 parallel grid steps); one full block for small batches.
    if B <= 128:
        TB = B
    elif B <= 1024:
        TB = 128
    else:
        TB = 256
    Bp = pl.cdiv(B, TB) * TB

    # Host prep (tiny XLA ops): transpose to (features, batch), append the
    # constant-1 row used for all bias folding, pad rows to 184 and batch to Bp.
    xT = jnp.zeros((L_AUG, Bp), jnp.float32)
    xT = xT.at[:L_IN, :B].set(x.T)
    xT = xT.at[ONE_COL, :].set(1.0)
    xT = xT.astype(jnp.bfloat16)

    def wspec(shape):
        return pl.BlockSpec(shape, lambda i: (0, 0))   # VMEM-resident constants

    out = pl.pallas_call(
        mycnn_kernel,
        out_shape=jax.ShapeDtypeStruct((8, Bp), jnp.float32),
        grid_spec=pltpu.PrefetchScalarGridSpec(
            num_scalar_prefetch=0,
            grid=(Bp // TB,),
            in_specs=[pl.BlockSpec((L_AUG, TB), lambda i: (0, i))]
                     + [wspec(m.shape) for m in mats],
            out_specs=pl.BlockSpec((8, TB), lambda i: (0, i)),
        ),
        compiler_params=pltpu.CompilerParams(
            dimension_semantics=("parallel",),
            vmem_limit_bytes=32 * 1024 * 1024),
    )(xT, *mats)

    return out[:5, :B].T                       # (B, 5)


# ----------------------------------------------------------------------------
# PyTorch-default init (PyTorch layouts) and an independent JAX reference
# ----------------------------------------------------------------------------
def init_params(key):
    def u(k, shape, fan_in):
        b = 1.0 / np.sqrt(fan_in)
        return jax.random.uniform(k, shape, jnp.float32, -b, b)

    ks = jax.random.split(key, 14)
    return {
        "conv1_w": u(ks[0], (C1, 1, 5), 5),   "conv1_b": u(ks[1], (C1,), 5),
        "conv2_w": u(ks[2], (C2, C1, 5), 30), "conv2_b": u(ks[3], (C2,), 30),
        "fc1_w": u(ks[4], (512, N_FEAT), N_FEAT), "fc1_b": u(ks[5], (512,), N_FEAT),
        "fc2_w": u(ks[6], (256, 512), 512),   "fc2_b": u(ks[7], (256,), 512),
        "fc3_w": u(ks[8], (128, 256), 256),   "fc3_b": u(ks[9], (128,), 256),
        "fc4_w": u(ks[10], (64, 128), 128),   "fc4_b": u(ks[11], (64,), 128),
        "fc5_w": u(ks[12], (5, 64), 64),      "fc5_b": u(ks[13], (5,), 64),
    }


def reference_forward(x, p):
    """Pure-JAX reference with PyTorch semantics (channel-major flatten)."""
    B = x.shape[0]
    y = x[:, None, :]
    y = lax.conv_general_dilated(y, p["conv1_w"], (1,), "VALID",
                                 dimension_numbers=("NCH", "OIH", "NCH"))
    y = jnp.maximum(y + p["conv1_b"][None, :, None], 0.0)
    y = lax.reduce_window(y, -jnp.inf, lax.max, (1, 1, 2), (1, 1, 2), "VALID")
    y = lax.conv_general_dilated(y, p["conv2_w"], (1,), "VALID",
                                 dimension_numbers=("NCH", "OIH", "NCH"))
    y = jnp.maximum(y + p["conv2_b"][None, :, None], 0.0)
    y = lax.reduce_window(y, -jnp.inf, lax.max, (1, 1, 2), (1, 1, 2), "VALID")
    feat = y.reshape(B, N_FEAT)                           # == PyTorch .view(-1, 16*41)
    h = jnp.maximum(feat @ p["fc1_w"].T + p["fc1_b"], 0.0)
    h = jnp.maximum(h @ p["fc2_w"].T + p["fc2_b"], 0.0)
    h = jnp.maximum(h @ p["fc3_w"].T + p["fc3_b"], 0.0)
    h = jnp.maximum(h @ p["fc4_w"].T + p["fc4_b"], 0.0)
    return h @ p["fc5_w"].T + p["fc5_b"]


if __name__ == "__main__":
    key = jax.random.PRNGKey(0)
    k_param, k_data = jax.random.split(key)
    params = init_params(k_param)
    mats = prepare_weights(params)

    B = 200                                   # pads to 256 -> 2 parallel 128-row tiles
    x = jax.random.normal(k_data, (B, 1, L_IN), dtype=jnp.float32)

    out = jax.block_until_ready(my_cnn_forward(x, mats))
    ref = reference_forward(x.reshape(B, L_IN), params)

    assert out.shape == (B, 5), out.shape
    max_err = float(jnp.max(jnp.abs(out - ref)))
    assert max_err < 3e-2, f"max abs err {max_err}"       # bf16-matmul tolerance

    print("KERNEL_OK")
</pallas_src>

<mosaic_0001>
module attributes {stable_mosaic.version = 11 : i64} {
  func.func @mycnn_kernel(%arg0: i32, %arg1: memref<184x128xbf16, #tpu.memory_space<vmem>>, %arg2: memref<1152x184xbf16, #tpu.memory_space<vmem>>, %arg3: memref<664x576xbf16, #tpu.memory_space<vmem>>, %arg4: memref<664x576xbf16, #tpu.memory_space<vmem>>, %arg5: memref<520x664xbf16, #tpu.memory_space<vmem>>, %arg6: memref<264x520xbf16, #tpu.memory_space<vmem>>, %arg7: memref<136x264xbf16, #tpu.memory_space<vmem>>, %arg8: memref<72x136xbf16, #tpu.memory_space<vmem>>, %arg9: memref<8x72xbf16, #tpu.memory_space<vmem>>, %arg10: memref<8x128xf32, #tpu.memory_space<vmem>>) attributes {dimension_semantics = [#tpu.dimension_semantics<parallel>], iteration_bounds = array<i64: 2>, scalar_prefetch = 0 : i64, scratch_operands = 0 : i64, tpu.core_type = #tpu.core_type<tc>, window_params = [{transform_indices = @transform_0, window_bounds = array<i64: 184, 128>}, {pipeline_mode = #tpu.pipeline_mode<synchronous>, transform_indices = @transform_1, window_bounds = array<i64: 1152, 184>}, {pipeline_mode = #tpu.pipeline_mode<synchronous>, transform_indices = @transform_2, window_bounds = array<i64: 664, 576>}, {pipeline_mode = #tpu.pipeline_mode<synchronous>, transform_indices = @transform_3, window_bounds = array<i64: 664, 576>}, {pipeline_mode = #tpu.pipeline_mode<synchronous>, transform_indices = @transform_4, window_bounds = array<i64: 520, 664>}, {pipeline_mode = #tpu.pipeline_mode<synchronous>, transform_indices = @transform_5, window_bounds = array<i64: 264, 520>}, {pipeline_mode = #tpu.pipeline_mode<synchronous>, transform_indices = @transform_6, window_bounds = array<i64: 136, 264>}, {pipeline_mode = #tpu.pipeline_mode<synchronous>, transform_indices = @transform_7, window_bounds = array<i64: 72, 136>}, {pipeline_mode = #tpu.pipeline_mode<synchronous>, transform_indices = @transform_8, window_bounds = array<i64: 8, 72>}, {transform_indices = @transform_9, window_bounds = array<i64: 8, 128>}]} {
    %c0 = arith.constant 0 : index
    %c0_0 = arith.constant 0 : index
    %0 = vector.load %arg1[%c0, %c0_0] : memref<184x128xbf16, #tpu.memory_space<vmem>>, vector<184x128xbf16>
    %c0_1 = arith.constant 0 : index
    %c0_2 = arith.constant 0 : index
    %1 = vector.load %arg2[%c0_1, %c0_2] : memref<1152x184xbf16, #tpu.memory_space<vmem>>, vector<1152x184xbf16>
    %cst = arith.constant dense<0.000000e+00> : vector<1152x128xf32>
    %2 = tpu.matmul %1, %0, %cst {dimension_numbers = #tpu.dot_dimension_numbers<[1], [0], [0], [1], [0, 0, 1, 1], [], []>} : vector<1152x184xbf16>, vector<184x128xbf16>, vector<1152x128xf32> -> vector<1152x128xf32>
    %3 = vector.extract_strided_slice %2 {offsets = [0, 0], sizes = [576, 128], strides = [1, 1]} : vector<1152x128xf32> to vector<576x128xf32>
    %4 = vector.extract_strided_slice %2 {offsets = [576, 0], sizes = [576, 128], strides = [1, 1]} : vector<1152x128xf32> to vector<576x128xf32>
    %5 = arith.maximumf %3, %4 : vector<576x128xf32>
    %cst_3 = arith.constant 0.000000e+00 : f32
    %6 = vector.broadcast %cst_3 : f32 to vector<576x128xf32>
    %7 = arith.maximumf %5, %6 : vector<576x128xf32>
    %8 = arith.truncf %7 : vector<576x128xf32> to vector<576x128xbf16>
    %c0_4 = arith.constant 0 : index
    %c0_5 = arith.constant 0 : index
    %9 = vector.load %arg3[%c0_4, %c0_5] : memref<664x576xbf16, #tpu.memory_space<vmem>>, vector<664x576xbf16>
    %cst_6 = arith.constant dense<0.000000e+00> : vector<664x128xf32>
    %10 = tpu.matmul %9, %8, %cst_6 {dimension_numbers = #tpu.dot_dimension_numbers<[1], [0], [0], [1], [0, 0, 1, 1], [], []>} : vector<664x576xbf16>, vector<576x128xbf16>, vector<664x128xf32> -> vector<664x128xf32>
    %c0_7 = arith.constant 0 : index
    %c0_8 = arith.constant 0 : index
    %11 = vector.load %arg4[%c0_7, %c0_8] : memref<664x576xbf16, #tpu.memory_space<vmem>>, vector<664x576xbf16>
    %cst_9 = arith.constant dense<0.000000e+00> : vector<664x128xf32>
    %12 = tpu.matmul %11, %8, %cst_9 {dimension_numbers = #tpu.dot_dimension_numbers<[1], [0], [0], [1], [0, 0, 1, 1], [], []>} : vector<664x576xbf16>, vector<576x128xbf16>, vector<664x128xf32> -> vector<664x128xf32>
    %13 = arith.maximumf %10, %12 : vector<664x128xf32>
    %cst_10 = arith.constant 0.000000e+00 : f32
    %14 = vector.broadcast %cst_10 : f32 to vector<664x128xf32>
    %15 = arith.maximumf %13, %14 : vector<664x128xf32>
    %16 = arith.truncf %15 : vector<664x128xf32> to vector<664x128xbf16>
    %c0_11 = arith.constant 0 : index
    %c0_12 = arith.constant 0 : index
    %17 = vector.load %arg5[%c0_11, %c0_12] : memref<520x664xbf16, #tpu.memory_space<vmem>>, vector<520x664xbf16>
    %cst_13 = arith.constant dense<0.000000e+00> : vector<520x128xf32>
    %18 = tpu.matmul %17, %16, %cst_13 {dimension_numbers = #tpu.dot_dimension_numbers<[1], [0], [0], [1], [0, 0, 1, 1], [], []>} : vector<520x664xbf16>, vector<664x128xbf16>, vector<520x128xf32> -> vector<520x128xf32>
    %cst_14 = arith.constant 0.000000e+00 : f32
    %19 = vector.broadcast %cst_14 : f32 to vector<520x128xf32>
    %20 = arith.maximumf %18, %19 : vector<520x128xf32>
    %21 = arith.truncf %20 : vector<520x128xf32> to vector<520x128xbf16>
    %c0_15 = arith.constant 0 : index
    %c0_16 = arith.constant 0 : index
    %22 = vector.load %arg6[%c0_15, %c0_16] : memref<264x520xbf16, #tpu.memory_space<vmem>>, vector<264x520xbf16>
    %cst_17 = arith.constant dense<0.000000e+00> : vector<264x128xf32>
    %23 = tpu.matmul %22, %21, %cst_17 {dimension_numbers = #tpu.dot_dimension_numbers<[1], [0], [0], [1], [0, 0, 1, 1], [], []>} : vector<264x520xbf16>, vector<520x128xbf16>, vector<264x128xf32> -> vector<264x128xf32>
    %cst_18 = arith.constant 0.000000e+00 : f32
    %24 = vector.broadcast %cst_18 : f32 to vector<264x128xf32>
    %25 = arith.maximumf %23, %24 : vector<264x128xf32>
    %26 = arith.truncf %25 : vector<264x128xf32> to vector<264x128xbf16>
    %c0_19 = arith.constant 0 : index
    %c0_20 = arith.constant 0 : index
    %27 = vector.load %arg7[%c0_19, %c0_20] : memref<136x264xbf16, #tpu.memory_space<vmem>>, vector<136x264xbf16>
    %cst_21 = arith.constant dense<0.000000e+00> : vector<136x128xf32>
    %28 = tpu.matmul %27, %26, %cst_21 {dimension_numbers = #tpu.dot_dimension_numbers<[1], [0], [0], [1], [0, 0, 1, 1], [], []>} : vector<136x264xbf16>, vector<264x128xbf16>, vector<136x128xf32> -> vector<136x128xf32>
    %cst_22 = arith.constant 0.000000e+00 : f32
    %29 = vector.broadcast %cst_22 : f32 to vector<136x128xf32>
    %30 = arith.maximumf %28, %29 : vector<136x128xf32>
    %31 = arith.truncf %30 : vector<136x128xf32> to vector<136x128xbf16>
    %c0_23 = arith.constant 0 : index
    %c0_24 = arith.constant 0 : index
    %32 = vector.load %arg8[%c0_23, %c0_24] : memref<72x136xbf16, #tpu.memory_space<vmem>>, vector<72x136xbf16>
    %cst_25 = arith.constant dense<0.000000e+00> : vector<72x128xf32>
    %33 = tpu.matmul %32, %31, %cst_25 {dimension_numbers = #tpu.dot_dimension_numbers<[1], [0], [0], [1], [0, 0, 1, 1], [], []>} : vector<72x136xbf16>, vector<136x128xbf16>, vector<72x128xf32> -> vector<72x128xf32>
    %cst_26 = arith.constant 0.000000e+00 : f32
    %34 = vector.broadcast %cst_26 : f32 to vector<72x128xf32>
    %35 = arith.maximumf %33, %34 : vector<72x128xf32>
    %36 = arith.truncf %35 : vector<72x128xf32> to vector<72x128xbf16>
    %c0_27 = arith.constant 0 : index
    %c0_28 = arith.constant 0 : index
    %37 = vector.load %arg9[%c0_27, %c0_28] : memref<8x72xbf16, #tpu.memory_space<vmem>>, vector<8x72xbf16>
    %cst_29 = arith.constant dense<0.000000e+00> : vector<8x128xf32>
    %38 = tpu.matmul %37, %36, %cst_29 {dimension_numbers = #tpu.dot_dimension_numbers<[1], [0], [0], [1], [0, 0, 1, 1], [], []>} : vector<8x72xbf16>, vector<72x128xbf16>, vector<8x128xf32> -> vector<8x128xf32>
    %c0_30 = arith.constant 0 : index
    %c0_31 = arith.constant 0 : index
    %39 = vector.load %arg10[%c0_30, %c0_31] : memref<8x128xf32, #tpu.memory_space<vmem>>, vector<8x128xf32>
    tpu.vector_store %arg10[%c0_30, %c0_31], %38 {strides = array<i32>} : memref<8x128xf32, #tpu.memory_space<vmem>>, vector<8x128xf32>,
    return
  }
  func.func @transform_0(%arg0: i32) -> (i32, i32) {
    %c0_i32 = arith.constant 0 : i32
    %c0_i32_0 = arith.constant 0 : i32
    return %c0_i32, %arg0 : i32, i32
  }
  func.func @transform_1(%arg0: i32) -> (i32, i32) {
    %c0_i32 = arith.constant 0 : i32
    %c0_i32_0 = arith.constant 0 : i32
    %c0_i32_1 = arith.constant 0 : i32
    return %c0_i32, %c0_i32_0 : i32, i32
  }
  func.func @transform_2(%arg0: i32) -> (i32, i32) {
    %c0_i32 = arith.constant 0 : i32
    %c0_i32_0 = arith.constant 0 : i32
    %c0_i32_1 = arith.constant 0 : i32
    return %c0_i32, %c0_i32_0 : i32, i32
  }
  func.func @transform_3(%arg0: i32) -> (i32, i32) {
    %c0_i32 = arith.constant 0 : i32
    %c0_i32_0 = arith.constant 0 : i32
    %c0_i32_1 = arith.constant 0 : i32
    return %c0_i32, %c0_i32_0 : i32, i32
  }
  func.func @transform_4(%arg0: i32) -> (i32, i32) {
    %c0_i32 = arith.constant 0 : i32
    %c0_i32_0 = arith.constant 0 : i32
    %c0_i32_1 = arith.constant 0 : i32
    return %c0_i32, %c0_i32_0 : i32, i32
  }
  func.func @transform_5(%arg0: i32) -> (i32, i32) {
    %c0_i32 = arith.constant 0 : i32
    %c0_i32_0 = arith.constant 0 : i32
    %c0_i32_1 = arith.constant 0 : i32
    return %c0_i32, %c0_i32_0 : i32, i32
  }
  func.func @transform_6(%arg0: i32) -> (i32, i32) {
    %c0_i32 = arith.constant 0 : i32
    %c0_i32_0 = arith.constant 0 : i32
    %c0_i32_1 = arith.constant 0 : i32
    return %c0_i32, %c0_i32_0 : i32, i32
  }
  func.func @transform_7(%arg0: i32) -> (i32, i32) {
    %c0_i32 = arith.constant 0 : i32
    %c0_i32_0 = arith.constant 0 : i32
    %c0_i32_1 = arith.constant 0 : i32
    return %c0_i32, %c0_i32_0 : i32, i32
  }
  func.func @transform_8(%arg0: i32) -> (i32, i32) {
    %c0_i32 = arith.constant 0 : i32
    %c0_i32_0 = arith.constant 0 : i32
    %c0_i32_1 = arith.constant 0 : i32
    return %c0_i32, %c0_i32_0 : i32, i32
  }
  func.func @transform_9(%arg0: i32) -> (i32, i32) {
    %c0_i32 = arith.constant 0 : i32
    %c0_i32_0 = arith.constant 0 : i32
    return %c0_i32, %arg0 : i32, i32
  }
}

</mosaic_0001>

<bundles_post_ra>
// kernel: tpu_custom_call.1
= control target key start
LH: loop header
LB: loop body
LE: loop exit
PB: predicated region body
PF: predicated region fallthrough
CT: control target
= control target key end

     0   :  { %s18756_s0 = inlined_call_operand.vmem [shape: bf16[184,256], index: 0, kind: input, shape index: {}]   ;;  %s18757_s1 = inlined_call_operand.vmem [shape: bf16[1152,184], index: 1, kind: input, shape index: {}]   ;;  %s18758_s2 = inlined_call_operand.vmem [shape: bf16[664,576], index: 2, kind: input, shape index: {}]   ;;  %s18759_s3 = inlined_call_operand.hbm [shape: bf16[664,576], index: 3, kind: input, shape index: {}]   ;;  %s18760_s4 = inlined_call_operand.hbm [shape: bf16[520,664], index: 4, kind: input, shape index: {}]   ;;  %s18761_s5 = inlined_call_operand.hbm [shape: bf16[264,520], index: 5, kind: input, shape index: {}]   ;;  %s18762_s6 = inlined_call_operand.vmem [shape: bf16[136,264], index: 6, kind: input, shape index: {}]   ;;  %s18763_s7 = inlined_call_operand.vmem [shape: bf16[72,136], index: 7, kind: input, shape index: {}]   ;;  %s18764_s8 = inlined_call_operand.vmem [shape: bf16[8,72], index: 8, kind: input, shape index: {}]   ;;  %s18765_s9 = inlined_call_operand.hbm [shape: f32[8,256], index: 9, kind: output, shape index: {}]  }
   0x1   :  { %18776 = sst [smem:[#allocation92_spill]] %s18760_s4 }
   0x2   :  { %18777 = sst [smem:[#allocation93_spill]] %s18765_s9 }
   0x3   :  { %14 = vsyncpa [#allocation4], 0 }
   0x4   :  { %15 = vsyncpa [#allocation7], 0 }
   0x5   :  { %16 = vsyncpa [#allocation5], 0 }
   0x6   :  { %18 = vsyncpa [#allocation5 + $0x1], 0  ;;  %s15680_s30 = smov 0   ;;  %s15682_s10 = smov 0  }
   0x7   :  { %s15684_s11 = smov 0   ;;  %s15686_s12 = smov 0  }
   0x8 LB: > { %18778 = sst [smem:[#allocation13_spill]] %s15605_s30  ;;  %s15701_s13 = sadd.s32 4294967295, %s15617_s12   ;;  %s15617_s12 = sphi %s15686_s12, %s18999_s12   ;;  %s15613_s11 = sphi %s15684_s11, %s19003_s11   ;;  %s15609_s10 = sphi %s15682_s10, %s19002_s10   ;;  %s15605_s30 = sphi %s15680_s30, %s19001_s30  }
   0x9   : > { %s11749_s14 = sadd.s32 4294967294, %s15617_s12   ;;  %s15705_s15 = sadd.s32 1, %s15617_s12  }
   0xa   : > { %18779 = sst [smem:[#allocation14_spill]] %s15705_s15  ;;  %s31_s16 = sadd.s32 1, %s15613_s11 }
   0xb   : > { %s28_s17 = ssub.s32 %s15617_s12, %s15705_s15  ;;  %p38_p0 = scmp.ne.s32.totalorder %s15613_s11, %s15609_s10 }
   0xc   : > { %p29_p1 = scmp.eq.s32.totalorder %s28_s17, 0  ;;  %p39_p2 = scmp.eq.s32.totalorder %s15617_s12, 0 }
   0xd   : > { %p236_p3 = scmp.eq.s32.totalorder %s15701_s13, 1  ;;  %p241_p4 = scmp.ne.s32.totalorder %s15609_s10, %s15605_s30 }
   0xe   : > { %s15717_s18 = scalar_select %p29_p1, %s15613_s11, %s31_s16  }
   0xf   : > { %p15719_p5 = por %p39_p2, %p38_p0  ;;  %p15723_p6 = por %p236_p3, %p38_p0 }
  0x10   : > { %18780 = sst [smem:[#allocation15_spill]] %s15717_s18  ;;  %p242_p7 = scmp.eq.s32.totalorder %s11749_s14, 1 }
  0x11   : > { %s18781_s19 = scalar_select %p15719_p5, 1, 0 }
  0x12   : > { %s18782_s20 = scalar_select %p15723_p6, 1, 0 }
  0x13   : > { %p11750_p8 = scmp.ge.s32.totalorder %s15617_s12, 1  ;;  %p249_p9 = scmp.lt.s32.totalorder %s15617_s12, 3 }
  0x14   : > { %p15729_p10 = por %p242_p7, %p241_p4  ;;  %p18766_p11 = scmp.eq.s32.totalorder %s15701_s13, 0 }
  0x15   : > { %p15734_p12 = pnand %p11750_p8, %p249_p9  ;;  %s15619_s23 = smov [#allocation6]  }
  0x16   : > { %s18783_s21 = scalar_select %p15729_p10, 1, 0 }
  0x17   : > { %s18785_s22 = scalar_select %p15734_p12, 1, 0 }
  0x18   : > { %18784 = sst [smem:[#allocation16_spill]] %s18783_s21  ;;  %s280_s24 = sshll.u32 %s15619_s23, 4  ;;  %s281_s24 = int_to_ptr.vmem [resolvable:$true] %s280_s24 }
  0x19   : > { %p14128_p13 = pneg %p15734_p12  ;;  %s15620_s26 = smov [#allocation3]  }
  0x1a   : > { %s267_s27 = sshll.u32 %s15620_s26, 4  ;;  %s18787_s4 = sld [smem:[#allocation92_spill]]  ;;  %s15746_s27 = int_to_ptr.vmem [resolvable:$true] %s267_s27 }
  0x1b   : > { %p15742_p0 = pnand %p18766_p11, %p14128_p13 }
  0x1d   : > { %p15756_p2 = pneg %p15742_p0 }
  0x20   : > { %s15463_s14 = scalar_lea.hbm %s18787_s4, 24960 }
  0x21   : > { %p15464_p1 = scmp.ne.s32.totalorder %s18787_s4, %s15463_s14  ;;  %p15470_p7 = scmp.lt.u32.totalorder %s15463_s14, %s18787_s4 }
  0x23   : > { %p15466_p3 = pnand %p15756_p2, %p15464_p1 }
  0x25   : > { %p15467_p4 = pneg %p15466_p3 }
  0x27   : > { %p15472_p8 = pnand %p15470_p7, %p15467_p4 }
  0x29   : > { %15475 = shalt.err (!%p15472_p8)
}
  0x2a   : > { %s15476_s28 = scalar_lea.vmem %s281_s24, 24960  ;;  %p15484_p10 = scmp.lt.s32.totalorder %s281_s24, %s281_s24 }
  0x2b   : > { %p15477_p9 = scmp.ne.s32.totalorder %s281_s24, %s15476_s28  ;;  %p15485_p6 = scmp.lt.s32.totalorder %s15476_s28, %s15476_s28 }
  0x2d   : > { %p15479_p13 = pnand %p15477_p9, %p15756_p2  ;;  %p15486_p12 = por %p15485_p6, %p15484_p10 }
  0x2f   : > { %p15480_p11 = pneg %p15479_p13 }
  0x31   : > { %p15487_p5 = pnand %p15486_p12, %p15480_p11 }
  0x33   : > { %15490 = shalt.err (!%p15487_p5)
}
  0x34   : > { %s15621_s29 = smov 384   ;;  %s15622_s16 = smov 24  }
  0x35   : > { %14134 = dma.hbm_to_vmem [thread:$0]  (!%p15742_p0), %s18787_s4, 24960, %s281_s24, [#allocation7], %s15621_s29, %s15621_s29, %s15622_s16  }
  0x36   : > { %s15491_s15 = scalar_lea.hbm %s18759_s3, 26560 }
  0x37   : > { %p15492_p1 = scmp.ne.s32.totalorder %s18759_s3, %s15491_s15  ;;  %p15498_p10 = scmp.lt.u32.totalorder %s15491_s15, %s18759_s3 }
  0x39   : > { %p15494_p6 = pnand %p15492_p1, %p15756_p2 }
  0x3b   : > { %p15495_p5 = pneg %p15494_p6 }
  0x3d   : > { %p15500_p11 = pnand %p15498_p10, %p15495_p5 }
  0x3f   : > { %15503 = shalt.err (!%p15500_p11)
}
  0x40   : > { %s15504_s24 = scalar_lea.vmem %s15746_s27, 26560  ;;  %p15512_p7 = scmp.lt.s32.totalorder %s15746_s27, %s15746_s27 }
  0x41   : > { %p15505_p12 = scmp.ne.s32.totalorder %s15746_s27, %s15504_s24  ;;  %p15513_p8 = scmp.lt.s32.totalorder %s15504_s24, %s15504_s24 }
  0x43   : > { %p15507_p3 = pnand %p15505_p12, %p15756_p2  ;;  %p15514_p9 = por %p15513_p8, %p15512_p7 }
  0x45   : > { %p15508_p4 = pneg %p15507_p3 }
  0x47   : > { %p15515_p13 = pnand %p15514_p9, %p15508_p4 }
  0x49   : > { %15518 = shalt.err (!%p15515_p13)
}
  0x4a   : > { %s15623_s30 = smov 320   ;;  %s15624_s9 = smov 20  }
  0x4b   : > { %14131 = dma.hbm_to_vmem [thread:$0]  (!%p15742_p0), %s18759_s3, 26560, %s15746_s27, [#allocation4], %s15623_s30, %s15623_s30, %s15624_s9  }
  0x4c   : > { %s15625_s29 = smov [#allocation8]   ;;  %s15519_s17 = scalar_lea.hbm %s18761_s5, 10560 }
  0x4d   : > { %s293_s16 = sshll.u32 %s15625_s29, 4  ;;  %p15520_p1 = scmp.ne.s32.totalorder %s18761_s5, %s15519_s17  ;;  %s294_s16 = int_to_ptr.vmem [resolvable:$true] %s293_s16 }
  0x4e   : > { %p15526_p10 = scmp.lt.u32.totalorder %s15519_s17, %s18761_s5 }
  0x4f   : > { %p15522_p6 = pnand %p15520_p1, %p15756_p2 }
  0x51   : > { %p15523_p5 = pneg %p15522_p6 }
  0x53   : > { %p15528_p11 = pnand %p15526_p10, %p15523_p5 }
  0x55   : > { %15531 = shalt.err (!%p15528_p11)
}
  0x56   : > { %s15532_s27 = scalar_lea.vmem %s294_s16, 10560  ;;  %p15540_p7 = scmp.lt.s32.totalorder %s294_s16, %s294_s16 }
  0x57   : > { %p15533_p12 = scmp.ne.s32.totalorder %s294_s16, %s15532_s27  ;;  %p15541_p8 = scmp.lt.s32.totalorder %s15532_s27, %s15532_s27 }
  0x59   : > { %p15535_p3 = pnand %p15533_p12, %p15756_p2  ;;  %p15542_p9 = por %p15541_p8, %p15540_p7 }
  0x5b   : > { %p15536_p4 = pneg %p15535_p3 }
  0x5d   : > { %p15543_p13 = pnand %p15542_p9, %p15536_p4 }
  0x5f   : > { %15546 = shalt.err (!%p15543_p13)
}
  0x60   : > { %14137 = dma.hbm_to_vmem [thread:$0]  (!%p15742_p0), %s18761_s5, 10560, %s294_s16, [#allocation7], %s15623_s30, %s15623_s30, %s15624_s9  }
  0x61   : > { %p11754_p1 = scmp.ge.s32.totalorder %s15617_s12, 2 }
  0x62   : > { %p18789_p6 = scmp.ne.s32.totalorder (!%p11754_p1), %s18781_s19, 0 }
  0x63   : > { %312 = sbr.rel (%p11754_p1) target bundleno = 125 (0x7d), region = 48 }
  0x6a   : > { %315 = sbr.rel (!%p18789_p6) target bundleno = 125 (0x7d), region = 52  ;;  %s317_s4 = sand.u32 (%p18789_p6), 1, %s15613_s11  }
  0x6b   : > { %s11755_s23 = sshll.u32 (%p18789_p6), %s15617_s12, 2  ;;  %s14112_s29 = smul.u32 (%p18789_p6), 92, %s317_s4 }
  0x6c   : > { %s15823_s25 = scalar_lea.vmem (%p18789_p6), %s18756_s0, %s11755_s23 }
  0x6d   : > { %v337_v0 = vld [vmem:[%s15823_s25] sm:$0xf] (%p18789_p6)  ;;  %v339_v1 = vld [vmem:[%s15823_s25 + $0x8] sm:$0xf] (%p18789_p6)  ;;  %v341_v2 = vld [vmem:[%s15823_s25 + $0x10] sm:$0xf] (%p18789_p6) }
  0x6e   : > { %v343_v3 = vld [vmem:[%s15823_s25 + $0x18] sm:$0xf] (%p18789_p6)  ;;  %v345_v4 = vld [vmem:[%s15823_s25 + $0x20] sm:$0xf] (%p18789_p6)  ;;  %s15830_s19 = scalar_lea.vmem (%p18789_p6), [#allocation2], %s14112_s29 }
  0x6f   : > { %338 = vst [vmem:[%s15830_s19] sm:$0xf] (%p18789_p6), %v337_v0  ;;  %340 = vst [vmem:[%s15830_s19 + $0x4] sm:$0xf] (%p18789_p6), %v339_v1  ;;  %v347_v5 = vld [vmem:[%s15823_s25 + $0x28] sm:$0xf] (%p18789_p6) }
  0x70   : > { %342 = vst [vmem:[%s15830_s19 + $0x8] sm:$0xf] (%p18789_p6), %v341_v2  ;;  %344 = vst [vmem:[%s15830_s19 + $0xc] sm:$0xf] (%p18789_p6), %v343_v3  ;;  %v349_v6 = vld [vmem:[%s15823_s25 + $0x30] sm:$0xf] (%p18789_p6) }
  0x71   : > { %346 = vst [vmem:[%s15830_s19 + $0x10] sm:$0xf] %v345_v4  ;;  %v351_v7 = vld [vmem:[%s15823_s25 + $0x38] sm:$0xf]  ;;  %348 = vst [vmem:[%s15830_s19 + $0x14] sm:$0xf] %v347_v5 }
  0x72   : > { %350 = vst [vmem:[%s15830_s19 + $0x18] sm:$0xf] %v349_v6  ;;  %352 = vst [vmem:[%s15830_s19 + $0x1c] sm:$0xf] %v351_v7  ;;  %v353_v8 = vld [vmem:[%s15823_s25 + $0x40] sm:$0xf] }
  0x73   : > { %v355_v9 = vld [vmem:[%s15823_s25 + $0x48] sm:$0xf]  ;;  %v357_v10 = vld [vmem:[%s15823_s25 + $0x50] sm:$0xf]  ;;  %354 = vst [vmem:[%s15830_s19 + $0x20] sm:$0xf] %v353_v8 }
  0x74   : > { %356 = vst [vmem:[%s15830_s19 + $0x24] sm:$0xf] %v355_v9  ;;  %358 = vst [vmem:[%s15830_s19 + $0x28] sm:$0xf] %v357_v10  ;;  %v359_v11 = vld [vmem:[%s15823_s25 + $0x58] sm:$0xf] }
  0x75   : > { %v361_v12 = vld [vmem:[%s15823_s25 + $0x60] sm:$0xf]  ;;  %v363_v13 = vld [vmem:[%s15823_s25 + $0x68] sm:$0xf]  ;;  %360 = vst [vmem:[%s15830_s19 + $0x2c] sm:$0xf] %v359_v11 }
  0x76   : > { %362 = vst [vmem:[%s15830_s19 + $0x30] sm:$0xf] %v361_v12  ;;  %364 = vst [vmem:[%s15830_s19 + $0x34] sm:$0xf] %v363_v13  ;;  %v365_v14 = vld [vmem:[%s15823_s25 + $0x70] sm:$0xf] }
  0x77   : > { %v367_v15 = vld [vmem:[%s15823_s25 + $0x78] sm:$0xf]  ;;  %v369_v16 = vld [vmem:[%s15823_s25 + $0x80] sm:$0xf]  ;;  %366 = vst [vmem:[%s15830_s19 + $0x38] sm:$0xf] %v365_v14 }
  0x78   : > { %368 = vst [vmem:[%s15830_s19 + $0x3c] sm:$0xf] %v367_v15  ;;  %370 = vst [vmem:[%s15830_s19 + $0x40] sm:$0xf] %v369_v16  ;;  %v371_v17 = vld [vmem:[%s15823_s25 + $0x88] sm:$0xf] }
  0x79   : > { %v373_v18 = vld [vmem:[%s15823_s25 + $0x90] sm:$0xf]  ;;  %v375_v19 = vld [vmem:[%s15823_s25 + $0x98] sm:$0xf]  ;;  %372 = vst [vmem:[%s15830_s19 + $0x44] sm:$0xf] %v371_v17 }
  0x7a   : > { %374 = vst [vmem:[%s15830_s19 + $0x48] sm:$0xf] %v373_v18  ;;  %376 = vst [vmem:[%s15830_s19 + $0x4c] sm:$0xf] %v375_v19  ;;  %v377_v20 = vld [vmem:[%s15823_s25 + $0xa0] sm:$0xf] }
  0x7b   : > { %v379_v21 = vld [vmem:[%s15823_s25 + $0xa8] sm:$0xf]  ;;  %v381_v22 = vld [vmem:[%s15823_s25 + $0xb0] sm:$0xf]  ;;  %378 = vst [vmem:[%s15830_s19 + $0x50] sm:$0xf] %v377_v20 }
  0x7c   : > { %380 = vst [vmem:[%s15830_s19 + $0x54] sm:$0xf] %v379_v21  ;;  %382 = vst [vmem:[%s15830_s19 + $0x58] sm:$0xf] %v381_v22 }
  0x7d PF: > { %p18790_p0 = scmp.ne.s32.totalorder %s18785_s22, 0 }
  0x7f   : > { %454 = sbr.rel (%p18790_p0) target bundleno = 4429 (0x114d), region = 93 }
  0x86   : > { %s15876_s30 = sand.u32 1, %s15609_s10   ;;  %p18791_p2 = scmp.eq.s32.totalorder %s15701_s13, 0 }
  0x87   : > { %s14113_s9 = smul.u32 92, %s15876_s30 }
  0x89   : > { %s15879_s16 = scalar_lea.vmem [#allocation2], %s14113_s9 }
  0x8a   : > { %15592 = dma.done.wait (%p18791_p2), [#allocation4], 26560   ;;  %p18792_p5 = pmov %p18791_p2 }
  0x8b   : > { %p18793_p10 = pmov %p18791_p2 }
  0x8c   : > { %15594 = vsyncadd (%p18792_p5), [#allocation4], 4294940736 }
  0x8d   : > { %15596 = dma.done.wait (%p18793_p10), [#allocation7], 35520   ;;  %p18794_p11 = pmov %p18791_p2 }
  0x8e   : > { %v18774_v23 = vmov 0   ;;  %v14191_v24 = vld [vmem:[%s15879_s16] sm:$0xff]   ;;  %v14192_v25 = vld [vmem:[%s15879_s16 + $0x8] sm:$0xff]   ;;  %v14193_v26 = vld [vmem:[%s15879_s16 + $0x10] sm:$0xff]   ;;  %vm1389_vm0 = vcmask 457728   ;;  %vm1606_vm1 = vcmask 1043456  }
  0x8f   : > { %15598 = vsyncadd (%p18794_p11), [#allocation7], 4294931776  ;;  %1610 = vmatprep.subr.bf16.mxu0 %v18774_v23  ;;  %3817 = vmatprep.subr.bf16.mxu1 %v18774_v23  ;;  %v14194_v27 = vld [vmem:[%s15879_s16 + $0x18] sm:$0xff]   ;;  %v14205_v28 = vld [vmem:[%s18757_s1 + $0x4] ss:$8 sps:$4 sm:$0xff]   ;;  %vm3690_vm2 = vcmask 523264  }
  0x90   : > { %1611 = vmatpush1.bf16.msra.mxu0 %v14191_v24  ;;  %v14195_v29 = vld [vmem:[%s15879_s16 + $0x20] sm:$0xff]   ;;  %11917 = vmatprep.mubr.msk.bf16.mxu0 %vm1389_vm0, %v14205_v28  ;;  %v14196_v30 = vld [vmem:[%s15879_s16 + $0x28] sm:$0xff]   ;;  %v14197_v31 = vld [vmem:[%s15879_s16 + $0x30] sm:$0xff]   ;;  %vm8793_vm3 = vcmask 195584   ;;  %vm15628_vm4 = vmmov 0   ;;  %vm10398_vm5 = vcmask 64512  }
  0x91   : > { %1612 = vmatprep.subr.bf16.mxu0 %v18774_v23  ;;  %v14198_v32 = vld [vmem:[%s15879_s16 + $0x38] sm:$0xff]   ;;  %v14199_v33 = vld [vmem:[%s15879_s16 + $0x40] sm:$0xff]   ;;  %v14200_v34 = vld [vmem:[%s15879_s16 + $0x48] sm:$0xff]   ;;  %vm11591_vm6 = vcmask 588800   ;;  %s11760_s18 = sshll.u32 %s15876_s30, 3  ;;  %s12879_s19 = sshll.u32 %s15701_s13, 7 }
  0x92   : > { %v14201_v35 = vld [vmem:[%s15879_s16 + $0x50] sm:$0xff]   ;;  %v14202_v36 = vld [vmem:[%s15879_s16 + $0x58] ss:$0 sps:$4 sm:$0xff]   ;;  %v14203_v38 = vld [vmem:[%s18757_s1] ss:$8 sps:$4 sm:$0xff]   ;;  %s503_s14 = scalar_lea.vmem [#allocation9], %s11760_s18 }
  0x93   : > { %v1608_v37 = vsel %vm1606_vm1, %v14202_v36, 0  ;;  %v14206_v39 = vld [vmem:[%s18757_s1 + $0x14] ss:$8 sps:$4 sm:$0xff]   ;;  %v14208_v40 = vld [vmem:[%s18757_s1 + $0x10] ss:$8 sps:$4 sm:$0xff]   ;;  %s11653_s25 = sshll.u32 %s503_s14, 4  ;;  %s18709_s25 = int_to_ptr.vmem [resolvable:$true] %s11653_s25 }
  0x94   : > { %1613 = vmatpush1.bf16.msra.mxu0 %v14192_v25  ;;  %v14209_v41 = vld [vmem:[%s18757_s1 + $0x24] ss:$8 sps:$4 sm:$0xff]   ;;  %v14211_v42 = vld [vmem:[%s18757_s1 + $0x20] ss:$8 sps:$4 sm:$0xff]   ;;  %v14212_v43 = vld [vmem:[%s18757_s1 + $0x34] ss:$8 sps:$4 sm:$0xff]  }
  0x95   : > { %1614 = vmatprep.subr.bf16.mxu0 %v18774_v23  ;;  %v14214_v44 = vld [vmem:[%s18757_s1 + $0x30] ss:$8 sps:$4 sm:$0xff]   ;;  %v14215_v45 = vld [vmem:[%s18757_s1 + $0x44] ss:$8 sps:$4 sm:$0xff]   ;;  %v14217_v46 = vld [vmem:[%s18757_s1 + $0x40] ss:$8 sps:$4 sm:$0xff]  }
  0x96   : > { %v14218_v47 = vld [vmem:[%s18757_s1 + $0x54] ss:$8 sps:$4 sm:$0xff]   ;;  %v14220_v48 = vld [vmem:[%s18757_s1 + $0x50] ss:$8 sps:$4 sm:$0xff]   ;;  %v14221_v49 = vld [vmem:[%s18757_s1 + $0x64] ss:$8 sps:$4 sm:$0xff]  }
  0x97   : > { %v14223_v50 = vld [vmem:[%s18757_s1 + $0x60] ss:$8 sps:$4 sm:$0xff]   ;;  %v14224_v51 = vld [vmem:[%s18757_s1 + $0x74] ss:$8 sps:$4 sm:$0xff]   ;;  %v14226_v52 = vld [vmem:[%s18757_s1 + $0x70] ss:$8 sps:$4 sm:$0xff]  }
  0x98   : > { %1615 = vmatpush1.bf16.msra.mxu0 %v14193_v26  ;;  %v14227_v53 = vld [vmem:[%s18757_s1 + $0x84] ss:$8 sps:$4 sm:$0xff]   ;;  %v14229_v54 = vld [vmem:[%s18757_s1 + $0x80] ss:$8 sps:$4 sm:$0xff]   ;;  %v14230_v55 = vld [vmem:[%s18757_s1 + $0x94] ss:$8 sps:$4 sm:$0xff]  }
  0x99   : > { %1616 = vmatprep.subr.bf16.mxu0 %v18774_v23  ;;  %v14232_v56 = vld [vmem:[%s18757_s1 + $0x90] ss:$8 sps:$4 sm:$0xff]   ;;  %v14233_v57 = vld [vmem:[%s18757_s1 + $0xa4] ss:$8 sps:$4 sm:$0xff]   ;;  %v14235_v58 = vld [vmem:[%s18757_s1 + $0xa0] ss:$8 sps:$4 sm:$0xff]  }
  0x9a   : > { %v14236_v59 = vld [vmem:[%s18757_s1 + $0xb4] ss:$8 sps:$4 sm:$0xff]   ;;  %v14238_v60 = vld [vmem:[%s18757_s1 + $0xb0] ss:$8 sps:$4 sm:$0xff]   ;;  %v14239_v61 = vld [vmem:[%s18757_s1 + $0xc4] ss:$8 sps:$4 sm:$0xff]  }
  0x9b   : > { %v14241_v62 = vld [vmem:[%s18757_s1 + $0xc0] ss:$8 sps:$4 sm:$0xff]   ;;  %v14242_v63 = vld [vmem:[%s18757_s1 + $0xd4] ss:$8 sps:$4 sm:$0xff]   ;;  %v14244_v0 = vld [vmem:[%s18757_s1 + $0xd0] ss:$8 sps:$4 sm:$0xff]  }
  0x9c   : > { %1617 = vmatpush1.bf16.msra.mxu0 %v14194_v27  ;;  %v14245_v1 = vld [vmem:[%s18757_s1 + $0xe4] ss:$8 sps:$4 sm:$0xff]   ;;  %v14247_v2 = vld [vmem:[%s18757_s1 + $0xe0] ss:$8 sps:$4 sm:$0xff]   ;;  %v14248_v3 = vld [vmem:[%s18757_s1 + $0xf4] ss:$8 sps:$4 sm:$0xff]  }
  0x9d   : > { %1618 = vmatprep.subr.bf16.mxu0 %v18774_v23  ;;  %v14250_v4 = vld [vmem:[%s18757_s1 + $0xf0] ss:$8 sps:$4 sm:$0xff]   ;;  %v14251_v5 = vld [vmem:[%s18757_s1 + $0x104] ss:$8 sps:$4 sm:$0xff]   ;;  %v14253_v6 = vld [vmem:[%s18757_s1 + $0x100] ss:$8 sps:$4 sm:$0xff]  }
  0x9e   : > { %v14254_v7 = vld [vmem:[%s18757_s1 + $0x114] ss:$8 sps:$4 sm:$0xff]   ;;  %v14256_v8 = vld [vmem:[%s18757_s1 + $0x110] ss:$8 sps:$4 sm:$0xff]   ;;  %v14257_v9 = vld [vmem:[%s18757_s1 + $0x124] ss:$8 sps:$4 sm:$0xff]  }
  0x9f   : > { %v14259_v10 = vld [vmem:[%s18757_s1 + $0x120] ss:$8 sps:$4 sm:$0xff]   ;;  %v14260_v11 = vld [vmem:[%s18757_s1 + $0x134] ss:$8 sps:$4 sm:$0xff]   ;;  %v14262_v12 = vld [vmem:[%s18757_s1 + $0x130] ss:$8 sps:$4 sm:$0xff]  }
  0xa0   : > { %1619 = vmatpush1.bf16.msra.mxu0 %v14195_v29  ;;  %v14263_v13 = vld [vmem:[%s18757_s1 + $0x144] ss:$8 sps:$4 sm:$0xff]   ;;  %v14265_v14 = vld [vmem:[%s18757_s1 + $0x140] ss:$8 sps:$4 sm:$0xff]   ;;  %v14266_v15 = vld [vmem:[%s18757_s1 + $0x154] ss:$8 sps:$4 sm:$0xff]  }
  0xa1   : > { %1620 = vmatprep.subr.bf16.mxu0 %v18774_v23  ;;  %v14268_v16 = vld [vmem:[%s18757_s1 + $0x150] ss:$8 sps:$4 sm:$0xff]   ;;  %v14269_v17 = vld [vmem:[%s18757_s1 + $0x164] ss:$8 sps:$4 sm:$0xff]   ;;  %v14271_v18 = vld [vmem:[%s18757_s1 + $0x160] ss:$8 sps:$4 sm:$0xff]  }
  0xa2   : > { %v14272_v19 = vld [vmem:[%s18757_s1 + $0x174] ss:$8 sps:$4 sm:$0xff]   ;;  %v14274_v20 = vld [vmem:[%s18757_s1 + $0x170] ss:$8 sps:$4 sm:$0xff]   ;;  %v14275_v21 = vld [vmem:[%s18757_s1 + $0x184] ss:$8 sps:$4 sm:$0xff]  }
  0xa3   : > { %v14277_v22 = vld [vmem:[%s18757_s1 + $0x180] ss:$8 sps:$4 sm:$0xff]   ;;  %v14278_v24 = vld [vmem:[%s18757_s1 + $0x194] ss:$8 sps:$4 sm:$0xff]   ;;  %v14280_v25 = vld [vmem:[%s18757_s1 + $0x190] ss:$8 sps:$4 sm:$0xff]  }
  0xa4   : > { %1621 = vmatpush1.bf16.msra.mxu0 %v14196_v30  ;;  %v14281_v26 = vld [vmem:[%s18757_s1 + $0x1a4] ss:$8 sps:$4 sm:$0xff]   ;;  %v14283_v27 = vld [vmem:[%s18757_s1 + $0x1a0] ss:$8 sps:$4 sm:$0xff]   ;;  %v14284_v28 = vld [vmem:[%s18757_s1 + $0x1b4] ss:$8 sps:$4 sm:$0xff]  }
  0xa5   : > { %1622 = vmatprep.subr.bf16.mxu0 %v18774_v23  ;;  %v14286_v29 = vld [vmem:[%s18757_s1 + $0x1b0] ss:$8 sps:$4 sm:$0xff]   ;;  %s18994_s22 = sld [smem:[#allocation93_spill]]  ;;  %s11640_s26 = scalar_lea.sflag [#allocation5], %s15876_s30 }
  0xa6   : > { %s15547_s28 = scalar_lea.vmem %s18709_s25, 128  ;;  %p18995_p3 = scmp.ne.s32.totalorder %s18782_s20, 0 }
  0xa7   : > { %p15548_p12 = scmp.ne.s32.totalorder %s18709_s25, %s15547_s28  ;;  %s15629_s13 = smov [#allocation9]  }
  0xa8   : > { %1623 = vmatpush1.bf16.msra.mxu0 %v14197_v31  ;;  %s15551_s24 = sshll.u32 %s15629_s13, 4  ;;  %s15552_s24 = int_to_ptr.vmem [resolvable:$false] %s15551_s24 }
  0xa9   : > { %1624 = vmatprep.subr.bf16.mxu0 %v18774_v23  ;;  %p15549_p4 = pnand %p15548_p12, %p18995_p3  ;;  %s15553_s27 = scalar_lea.vmem %s15552_s24, 256 }
  0xaa   : > { %p15554_p8 = scmp.lt.s32.totalorder %s18709_s25, %s15552_s24  ;;  %p15555_p9 = scmp.lt.s32.totalorder %s15553_s27, %s15547_s28 }
  0xab   : > { %s18714_s17 = scalar_lea.hbm %s18994_s22, %s12879_s19  ;;  %p15550_p7 = pneg %p15549_p4 }
  0xac   : > { %1625 = vmatpush1.bf16.msra.mxu0 %v14198_v32  ;;  %p15556_p13 = por %p15555_p9, %p15554_p8 }
  0xad   : > { %1626 = vmatprep.subr.bf16.mxu0 %v18774_v23 }
  0xae   : > { %p15557_p6 = pnand %p15556_p13, %p15550_p7 }
  0xb0   : > { %1627 = vmatpush1.bf16.msra.mxu0 %v14199_v33  ;;  %v14287_v33 = vld [vmem:[%s18757_s1 + $0x1c4] ss:$8 sps:$4 sm:$0xff]  }
  0xb1   : > { %1628 = vmatprep.subr.bf16.mxu0 %v18774_v23 }
  0xb4   : > { %1629 = vmatpush1.bf16.msra.mxu0 %v14200_v34 }
  0xb5   : > { %1630 = vmatprep.subr.bf16.mxu0 %v18774_v23 }
  0xb8   : > { %1631 = vmatpush1.bf16.msra.mxu0 %v14201_v35  ;;  %v14289_v35 = vld [vmem:[%s18757_s1 + $0x1c0] ss:$8 sps:$4 sm:$0xff]  }
  0xb9   : > { %1632 = vmatprep.subr.bf16.mxu0 %v18774_v23  ;;  %v14371_v23 = vld [vmem:[%s18757_s1 + $0x384] ss:$8 sps:$4 sm:$0xff]  }
  0xbc   : > { %1633 = vmatpush1.bf16.msra.mxu0 %v1608_v37 }
  0xbf   : > { %1643 = vmatmul.mubr.bf16.vlgmr.msra.gmra.mrb[0].mxu0 %v14203_v38 }
  0xc0   : > { %11918 = vmatprep.mubr.msk.bf16.mxu0 %vm1389_vm0, %v14206_v39  ;;  %v14290_v39 = vld [vmem:[%s18757_s1 + $0x1d4] ss:$8 sps:$4 sm:$0xff]  }
  0xc7   : > { %1651 = vmatmul.mubr.bf16.gmra.mrb[4].mxu0 %v14208_v40 }
  0xc8   : > { %11919 = vmatprep.mubr.msk.bf16.mxu0 %vm1389_vm0, %v14209_v41  ;;  %v14292_v41 = vld [vmem:[%s18757_s1 + $0x1d0] ss:$8 sps:$4 sm:$0xff]  }
  0xcf   : > { %1659 = vmatmul.mubr.bf16.gmra.mrb[8].mxu0 %v14211_v42 }
  0xd0   : > { %11920 = vmatprep.mubr.msk.bf16.mxu0 %vm1389_vm0, %v14212_v43 }
  0xd7   : > { %1667 = vmatmul.mubr.bf16.gmra.mrb[12].mxu0 %v14214_v44 }
  0xd8   : > { %11921 = vmatprep.mubr.msk.bf16.mxu0 %vm1389_vm0, %v14215_v45  ;;  %v14293_v45 = vld [vmem:[%s18757_s1 + $0x1e4] ss:$8 sps:$4 sm:$0xff]  }
  0xdf   : > { %1675 = vmatmul.mubr.bf16.gmra.mrb[16].mxu0 %v14217_v46 }
  0xe0   : > { %11922 = vmatprep.mubr.msk.bf16.mxu0 %vm1389_vm0, %v14218_v47  ;;  %v14295_v47 = vld [vmem:[%s18757_s1 + $0x1e0] ss:$8 sps:$4 sm:$0xff]  }
  0xe7   : > { %1683 = vmatmul.mubr.bf16.gmra.mrb[20].mxu0 %v14220_v48 }
  0xe8   : > { %11923 = vmatprep.mubr.msk.bf16.mxu0 %vm1389_vm0, %v14221_v49 }
  0xef   : > { %1691 = vmatmul.mubr.bf16.gmra.mrb[24].mxu0 %v14223_v50 }
  0xf0   : > { %11924 = vmatprep.mubr.msk.bf16.mxu0 %vm1389_vm0, %v14224_v51  ;;  %v14296_v51 = vld [vmem:[%s18757_s1 + $0x1f4] ss:$8 sps:$4 sm:$0xff]  }
  0xf7   : > { %1699 = vmatmul.mubr.bf16.gmra.mrb[28].mxu0 %v14226_v52 }
  0xf8   : > { %11925 = vmatprep.mubr.msk.bf16.mxu0 %vm1389_vm0, %v14227_v53  ;;  %v14298_v53 = vld [vmem:[%s18757_s1 + $0x1f0] ss:$8 sps:$4 sm:$0xff]  }
  0xff   : > { %1707 = vmatmul.mubr.bf16.gmra.mrb[32].mxu0 %v14229_v54 }
 0x100   : > { %11926 = vmatprep.mubr.msk.bf16.mxu0 %vm1389_vm0, %v14230_v55 }
 0x107   : > { %1715 = vmatmul.mubr.bf16.gmra.mrb[36].mxu0 %v14232_v56 }
 0x108   : > { %11927 = vmatprep.mubr.msk.bf16.mxu0 %vm1389_vm0, %v14233_v57  ;;  %v14299_v57 = vld [vmem:[%s18757_s1 + $0x204] ss:$8 sps:$4 sm:$0xff]  }
 0x10f   : > { %1723 = vmatmul.mubr.bf16.gmra.mrb[40].mxu0 %v14235_v58 }
 0x110   : > { %11928 = vmatprep.mubr.msk.bf16.mxu0 %vm1389_vm0, %v14236_v59  ;;  %v14301_v59 = vld [vmem:[%s18757_s1 + $0x200] ss:$8 sps:$4 sm:$0xff]  }
 0x117   : > { %1731 = vmatmul.mubr.bf16.gmra.mrb[44].mxu0 %v14238_v60 }
 0x118   : > { %11929 = vmatprep.mubr.msk.bf16.mxu0 %vm1389_vm0, %v14239_v61 }
 0x11f   : > { %1739 = vmatmul.mubr.bf16.gmra.mrb[48].mxu0 %v14241_v62 }
 0x120   : > { %11930 = vmatprep.mubr.msk.bf16.mxu0 %vm1389_vm0, %v14242_v63  ;;  %v14302_v63 = vld [vmem:[%s18757_s1 + $0x214] ss:$8 sps:$4 sm:$0xff]  }
 0x127   : > { %1747 = vmatmul.mubr.bf16.gmra.mrb[52].mxu0 %v14244_v0 }
 0x128   : > { %11931 = vmatprep.mubr.msk.bf16.mxu0 %vm1389_vm0, %v14245_v1  ;;  %v14304_v1 = vld [vmem:[%s18757_s1 + $0x210] ss:$8 sps:$4 sm:$0xff]  }
 0x12f   : > { %1755 = vmatmul.mubr.bf16.gmra.mrb[56].mxu0 %v14247_v2 }
 0x130   : > { %11932 = vmatprep.mubr.msk.bf16.mxu0 %vm1389_vm0, %v14248_v3 }
 0x137   : > { %1763 = vmatmul.mubr.bf16.gmra.mrb[60].mxu0 %v14250_v4 }
 0x138   : > { %11933 = vmatprep.mubr.msk.bf16.mxu0 %vm1389_vm0, %v14251_v5  ;;  %v14305_v5 = vld [vmem:[%s18757_s1 + $0x224] ss:$8 sps:$4 sm:$0xff]  }
 0x13f   : > { %1771 = vmatmul.mubr.bf16.gmra.mrb[64].mxu0 %v14253_v6 }
 0x140   : > { %11934 = vmatprep.mubr.msk.bf16.mxu0 %vm1389_vm0, %v14254_v7  ;;  %v14307_v7 = vld [vmem:[%s18757_s1 + $0x220] ss:$8 sps:$4 sm:$0xff]  }
 0x147   : > { %1779 = vmatmul.mubr.bf16.gmra.mrb[68].mxu0 %v14256_v8 }
 0x148   : > { %11935 = vmatprep.mubr.msk.bf16.mxu0 %vm1389_vm0, %v14257_v9 }
 0x14f   : > { %1787 = vmatmul.mubr.bf16.gmra.mrb[72].mxu0 %v14259_v10 }
 0x150   : > { %11936 = vmatprep.mubr.msk.bf16.mxu0 %vm1389_vm0, %v14260_v11  ;;  %v14308_v11 = vld [vmem:[%s18757_s1 + $0x234] ss:$8 sps:$4 sm:$0xff]  }
 0x157   : > { %1795 = vmatmul.mubr.bf16.gmra.mrb[76].mxu0 %v14262_v12 }
 0x158   : > { %11937 = vmatprep.mubr.msk.bf16.mxu0 %vm1389_vm0, %v14263_v13  ;;  %v14310_v13 = vld [vmem:[%s18757_s1 + $0x230] ss:$8 sps:$4 sm:$0xff]  }
 0x15f   : > { %1803 = vmatmul.mubr.bf16.gmra.mrb[80].mxu0 %v14265_v14 }
 0x160   : > { %11938 = vmatprep.mubr.msk.bf16.mxu0 %vm1389_vm0, %v14266_v15 }
 0x167   : > { %1811 = vmatmul.mubr.bf16.gmra.mrb[84].mxu0 %v14268_v16 }
 0x168   : > { %11939 = vmatprep.mubr.msk.bf16.mxu0 %vm1389_vm0, %v14269_v17  ;;  %v14311_v17 = vld [vmem:[%s18757_s1 + $0x244] ss:$8 sps:$4 sm:$0xff]  }
 0x16f   : > { %1819 = vmatmul.mubr.bf16.gmra.mrb[88].mxu0 %v14271_v18 }
 0x170   : > { %11940 = vmatprep.mubr.msk.bf16.mxu0 %vm1389_vm0, %v14272_v19  ;;  %v14313_v19 = vld [vmem:[%s18757_s1 + $0x240] ss:$8 sps:$4 sm:$0xff]  }
 0x177   : > { %1827 = vmatmul.mubr.bf16.gmra.mrb[92].mxu0 %v14274_v20 }
 0x178   : > { %11941 = vmatprep.mubr.msk.bf16.mxu0 %vm1389_vm0, %v14275_v21 }
 0x17f   : > { %1835 = vmatmul.mubr.bf16.gmra.mrb[96].mxu0 %v14277_v22 }
 0x180   : > { %11942 = vmatprep.mubr.msk.bf16.mxu0 %vm1389_vm0, %v14278_v24  ;;  %v14314_v24 = vld [vmem:[%s18757_s1 + $0x254] ss:$8 sps:$4 sm:$0xff]  }
 0x187   : > { %1843 = vmatmul.mubr.bf16.gmra.mrb[100].mxu0 %v14280_v25 }
 0x188   : > { %11943 = vmatprep.mubr.msk.bf16.mxu0 %vm1389_vm0, %v14281_v26  ;;  %v14316_v26 = vld [vmem:[%s18757_s1 + $0x250] ss:$8 sps:$4 sm:$0xff]  }
 0x18f   : > { %1851 = vmatmul.mubr.bf16.gmra.mrb[104].mxu0 %v14283_v27 }
 0x190   : > { %11944 = vmatprep.mubr.msk.bf16.mxu0 %vm1389_vm0, %v14284_v28 }
 0x192   : > { %v16111_v30 = vpop.f32.mrb[0].mxu0 }
 0x193   : > { %v1646_v31 = vpop.f32.mrb[1].mxu0 }
 0x194   : > { %v16113_v32 = vpop.f32.mrb[2].mxu0  ;;  %v14317_v31 = vld [vmem:[%s18757_s1 + $0x264] ss:$8 sps:$4 sm:$0xff]  }
 0x195   : > { %v1649_v34 = vpop.f32.mrb[3].mxu0 }
 0x196   : > { %v14319_v34 = vld [vmem:[%s18757_s1 + $0x260] ss:$8 sps:$4 sm:$0xff]  }
 0x197   : > { %1859 = vmatmul.mubr.bf16.gmra.mrb[108].mxu0 %v14286_v29 }
 0x198   : > { %11945 = vmatprep.mubr.msk.bf16.mxu0 %vm1389_vm0, %v14287_v33 }
 0x19a   : > { %v16122_v36 = vpop.f32.mrb[4].mxu0 }
 0x19b   : > { %v1654_v37 = vpop.f32.mrb[5].mxu0 }
 0x19c   : > { %v16124_v38 = vpop.f32.mrb[6].mxu0 }
 0x19d   : > { %v1657_v40 = vpop.f32.mrb[7].mxu0 }
 0x19e   : > { %v14320_v40 = vld [vmem:[%s18757_s1 + $0x274] ss:$8 sps:$4 sm:$0xff]  }
 0x19f   : > { %1867 = vmatmul.mubr.bf16.gmra.mrb[112].mxu0 %v14289_v35 }
 0x1a0   : > { %11946 = vmatprep.mubr.msk.bf16.mxu0 %vm1389_vm0, %v14290_v39 }
 0x1a2   : > { %v16133_v42 = vpop.f32.mrb[8].mxu0 }
 0x1a3   : > { %v1662_v43 = vpop.f32.mrb[9].mxu0 }
 0x1a4   : > { %v16135_v44 = vpop.f32.mrb[10].mxu0  ;;  %v14322_v43 = vld [vmem:[%s18757_s1 + $0x270] ss:$8 sps:$4 sm:$0xff]  }
 0x1a5   : > { %v1665_v46 = vpop.f32.mrb[11].mxu0 }
 0x1a7   : > { %1875 = vmatmul.mubr.bf16.gmra.mrb[116].mxu0 %v14292_v41 }
 0x1a8   : > { %11947 = vmatprep.mubr.msk.bf16.mxu0 %vm1389_vm0, %v14293_v45 }
 0x1aa   : > { %v16144_v48 = vpop.f32.mrb[12].mxu0 }
 0x1ab   : > { %v1670_v49 = vpop.f32.mrb[13].mxu0 }
 0x1ac   : > { %v16146_v50 = vpop.f32.mrb[14].mxu0  ;;  %v14323_v49 = vld [vmem:[%s18757_s1 + $0x284] ss:$8 sps:$4 sm:$0xff]  }
 0x1ad   : > { %v1673_v52 = vpop.f32.mrb[15].mxu0 }
 0x1ae   : > { %v14325_v52 = vld [vmem:[%s18757_s1 + $0x280] ss:$8 sps:$4 sm:$0xff]  }
 0x1af   : > { %1883 = vmatmul.mubr.bf16.gmra.mrb[120].mxu0 %v14295_v47 }
 0x1b0   : > { %11948 = vmatprep.mubr.msk.bf16.mxu0 %vm1389_vm0, %v14296_v51 }
 0x1b2   : > { %v16155_v54 = vpop.f32.mrb[16].mxu0 }
 0x1b3   : > { %v1678_v55 = vpop.f32.mrb[17].mxu0 }
 0x1b4   : > { %v16157_v56 = vpop.f32.mrb[18].mxu0 }
 0x1b5   : > { %v1681_v58 = vpop.f32.mrb[19].mxu0 }
 0x1b6   : > { %v14326_v58 = vld [vmem:[%s18757_s1 + $0x294] ss:$8 sps:$4 sm:$0xff]  }
 0x1b7   : > { %1891 = vmatmul.mubr.bf16.gmra.mrb[124].mxu0 %v14298_v53 }
 0x1b8   : > { %11949 = vmatprep.mubr.msk.bf16.mxu0 %vm1389_vm0, %v14299_v57 }
 0x1ba   : > { %v16166_v60 = vpop.f32.mrb[20].mxu0 }
 0x1bb   : > { %v1686_v61 = vpop.f32.mrb[21].mxu0 }
 0x1bc   : > { %v16168_v62 = vpop.f32.mrb[22].mxu0 }
 0x1bd   : > { %v1689_v0 = vpop.f32.mrb[23].mxu0 }
 0x1be   : > { %v14328_v0 = vld [vmem:[%s18757_s1 + $0x290] ss:$8 sps:$4 sm:$0xff]  }
 0x1bf   : > { %1899 = vmatmul.mubr.bf16.gmra.mrb[128].mxu0 %v14301_v59 }
 0x1c0   : > { %11950 = vmatprep.mubr.msk.bf16.mxu0 %vm1389_vm0, %v14302_v63 }
 0x1c2   : > { %v16177_v2 = vpop.f32.mrb[24].mxu0 }
 0x1c3   : > { %v1694_v3 = vpop.f32.mrb[25].mxu0 }
 0x1c4   : > { %v16179_v4 = vpop.f32.mrb[26].mxu0  ;;  %v14329_v3 = vld [vmem:[%s18757_s1 + $0x2a4] ss:$8 sps:$4 sm:$0xff]  }
 0x1c5   : > { %v1697_v6 = vpop.f32.mrb[27].mxu0 }
 0x1c7   : > { %1907 = vmatmul.mubr.bf16.gmra.mrb[132].mxu0 %v14304_v1 }
 0x1c8   : > { %11951 = vmatprep.mubr.msk.bf16.mxu0 %vm1389_vm0, %v14305_v5 }
 0x1ca   : > { %v16188_v8 = vpop.f32.mrb[28].mxu0 }
 0x1cb   : > { %v1702_v9 = vpop.f32.mrb[29].mxu0 }
 0x1cc   : > { %v16190_v10 = vpop.f32.mrb[30].mxu0  ;;  %v14331_v9 = vld [vmem:[%s18757_s1 + $0x2a0] ss:$8 sps:$4 sm:$0xff]  }
 0x1cd   : > { %v1705_v12 = vpop.f32.mrb[31].mxu0 }
 0x1ce   : > { %v14332_v12 = vld [vmem:[%s18757_s1 + $0x2b4] ss:$8 sps:$4 sm:$0xff]  }
 0x1cf   : > { %1915 = vmatmul.mubr.bf16.gmra.mrb[136].mxu0 %v14307_v7 }
 0x1d0   : > { %11952 = vmatprep.mubr.msk.bf16.mxu0 %vm1389_vm0, %v14308_v11 }
 0x1d2   : > { %v16199_v14 = vpop.f32.mrb[32].mxu0 }
 0x1d3   : > { %v1710_v15 = vpop.f32.mrb[33].mxu0 }
 0x1d4   : > { %v16201_v16 = vpop.f32.mrb[34].mxu0 }
 0x1d5   : > { %v1713_v18 = vpop.f32.mrb[35].mxu0 }
 0x1d6   : > { %v14334_v18 = vld [vmem:[%s18757_s1 + $0x2b0] ss:$8 sps:$4 sm:$0xff]  }
 0x1d7   : > { %1923 = vmatmul.mubr.bf16.gmra.mrb[140].mxu0 %v14310_v13 }
 0x1d8   : > { %11953 = vmatprep.mubr.msk.bf16.mxu0 %vm1389_vm0, %v14311_v17 }
 0x1da   : > { %v16210_v20 = vpop.f32.mrb[36].mxu0 }
 0x1db   : > { %v1718_v21 = vpop.f32.mrb[37].mxu0 }
 0x1dc   : > { %v16212_v22 = vpop.f32.mrb[38].mxu0  ;;  %v14335_v21 = vld [vmem:[%s18757_s1 + $0x2c4] ss:$8 sps:$4 sm:$0xff]  }
 0x1dd   : > { %v1721_v25 = vpop.f32.mrb[39].mxu0 }
 0x1df   : > { %1931 = vmatmul.mubr.bf16.gmra.mrb[144].mxu0 %v14313_v19 }
 0x1e0   : > { %11954 = vmatprep.mubr.msk.bf16.mxu0 %vm1389_vm0, %v14314_v24 }
 0x1e2   : > { %v16221_v27 = vpop.f32.mrb[40].mxu0 }
 0x1e3   : > { %v1726_v28 = vpop.f32.mrb[41].mxu0 }
 0x1e4   : > { %v16223_v29 = vpop.f32.mrb[42].mxu0  ;;  %v14337_v28 = vld [vmem:[%s18757_s1 + $0x2c0] ss:$8 sps:$4 sm:$0xff]  }
 0x1e5   : > { %v1729_v33 = vpop.f32.mrb[43].mxu0 }
 0x1e6   : > { %v14338_v33 = vld [vmem:[%s18757_s1 + $0x2d4] ss:$8 sps:$4 sm:$0xff]  }
 0x1e7   : > { %1939 = vmatmul.mubr.bf16.gmra.mrb[148].mxu0 %v14316_v26 }
 0x1e8   : > { %11955 = vmatprep.mubr.msk.bf16.mxu0 %vm1389_vm0, %v14317_v31 }
 0x1ea   : > { %v16232_v35 = vpop.f32.mrb[44].mxu0 }
 0x1eb   : > { %v1734_v37 = vpop.f32.mrb[45].mxu0 }
 0x1ec   : > { %v16234_v39 = vpop.f32.mrb[46].mxu0 }
 0x1ed   : > { %v1737_v41 = vpop.f32.mrb[47].mxu0 }
 0x1ee   : > { %v14340_v41 = vld [vmem:[%s18757_s1 + $0x2d0] ss:$8 sps:$4 sm:$0xff]  }
 0x1ef   : > { %1947 = vmatmul.mubr.bf16.gmra.mrb[152].mxu0 %v14319_v34 }
 0x1f0   : > { %11956 = vmatprep.mubr.msk.bf16.mxu0 %vm1389_vm0, %v14320_v40 }
 0x1f2   : > { %v16243_v45 = vpop.f32.mrb[48].mxu0 }
 0x1f3   : > { %v1742_v46 = vpop.f32.mrb[49].mxu0 }
 0x1f4   : > { %v16245_v47 = vpop.f32.mrb[50].mxu0  ;;  %v14341_v46 = vld [vmem:[%s18757_s1 + $0x2e4] ss:$8 sps:$4 sm:$0xff]  }
 0x1f5   : > { %v1745_v51 = vpop.f32.mrb[51].mxu0 }
 0x1f7   : > { %1955 = vmatmul.mubr.bf16.gmra.mrb[156].mxu0 %v14322_v43 }
 0x1f8   : > { %11957 = vmatprep.mubr.msk.bf16.mxu0 %vm1389_vm0, %v14323_v49 }
 0x1fa   : > { %v16254_v53 = vpop.f32.mrb[52].mxu0 }
 0x1fb   : > { %v1750_v55 = vpop.f32.mrb[53].mxu0 }
 0x1fc   : > { %v16256_v57 = vpop.f32.mrb[54].mxu0  ;;  %v14343_v55 = vld [vmem:[%s18757_s1 + $0x2e0] ss:$8 sps:$4 sm:$0xff]  }
 0x1fd   : > { %v1753_v59 = vpop.f32.mrb[55].mxu0 }
 0x1fe   : > { %v14344_v59 = vld [vmem:[%s18757_s1 + $0x2f4] ss:$8 sps:$4 sm:$0xff]  }
 0x1ff   : > { %1963 = vmatmul.mubr.bf16.gmra.mrb[160].mxu0 %v14325_v52 }
 0x200   : > { %11958 = vmatprep.mubr.msk.bf16.mxu0 %vm1389_vm0, %v14326_v58 }
 0x202   : > { %v16262_v61 = vpop.f32.mrb[56].mxu0 }
 0x203   : > { %v1758_v63 = vpop.f32.mrb[57].mxu0 }
 0x204   : > { %v16267_v1 = vpop.f32.mrb[58].mxu0 }
 0x205   : > { %v1761_v5 = vpop.f32.mrb[59].mxu0 }
 0x206   : > { %v14346_v5 = vld [vmem:[%s18757_s1 + $0x2f0] ss:$8 sps:$4 sm:$0xff]  }
 0x207   : > { %1971 = vmatmul.mubr.bf16.gmra.mrb[164].mxu0 %v14328_v0 }
 0x208   : > { %11959 = vmatprep.mubr.msk.bf16.mxu0 %vm1389_vm0, %v14329_v3 }
 0x20a   : > { %v16273_v6 = vpop.f32.mrb[60].mxu0 }
 0x20b   : > { %v1766_v7 = vpop.f32.mrb[61].mxu0 }
 0x20c   : > { %v16278_v11 = vpop.f32.mrb[62].mxu0 }
 0x20d   : > { %v1769_v13 = vpop.f32.mrb[63].mxu0 }
 0x20f   : > { %1979 = vmatmul.mubr.bf16.gmra.mrb[168].mxu0 %v14331_v9  ;;  %v14347_v9 = vld [vmem:[%s18757_s1 + $0x304] ss:$8 sps:$4 sm:$0xff]  }
 0x210   : > { %11960 = vmatprep.mubr.msk.bf16.mxu0 %vm1389_vm0, %v14332_v12 }
 0x212   : > { %v16284_v15 = vpop.f32.mrb[64].mxu0 }
 0x213   : > { %v1774_v17 = vpop.f32.mrb[65].mxu0 }
 0x214   : > { %v16289_v19 = vpop.f32.mrb[66].mxu0 }
 0x215   : > { %v1777_v24 = vpop.f32.mrb[67].mxu0 }
 0x216   : > { %v14350_v24 = vld [vmem:[%s18757_s1 + $0x314] ss:$8 sps:$4 sm:$0xff]  }
 0x217   : > { %1987 = vmatmul.mubr.bf16.gmra.mrb[172].mxu0 %v14334_v18  ;;  %v14349_v18 = vld [vmem:[%s18757_s1 + $0x300] ss:$8 sps:$4 sm:$0xff]  }
 0x218   : > { %11961 = vmatprep.mubr.msk.bf16.mxu0 %vm1389_vm0, %v14335_v21 }
 0x21a   : > { %v16295_v25 = vpop.f32.mrb[68].mxu0 }
 0x21b   : > { %v1782_v26 = vpop.f32.mrb[69].mxu0 }
 0x21c   : > { %v16300_v31 = vpop.f32.mrb[70].mxu0 }
 0x21d   : > { %v1785_v34 = vpop.f32.mrb[71].mxu0 }
 0x21e   : > { %v14352_v34 = vld [vmem:[%s18757_s1 + $0x310] ss:$8 sps:$4 sm:$0xff]  }
 0x21f   : > { %1995 = vmatmul.mubr.bf16.gmra.mrb[176].mxu0 %v14337_v28 }
 0x220   : > { %11962 = vmatprep.mubr.msk.bf16.mxu0 %vm1389_vm0, %v14338_v33 }
 0x222   : > { %v16306_v37 = vpop.f32.mrb[72].mxu0 }
 0x223   : > { %v1790_v40 = vpop.f32.mrb[73].mxu0 }
 0x224   : > { %v16311_v43 = vpop.f32.mrb[74].mxu0 }
 0x225   : > { %v1793_v49 = vpop.f32.mrb[75].mxu0 }
 0x227   : > { %2003 = vmatmul.mubr.bf16.gmra.mrb[180].mxu0 %v14340_v41  ;;  %v14353_v41 = vld [vmem:[%s18757_s1 + $0x324] ss:$8 sps:$4 sm:$0xff]  }
 0x228   : > { %11963 = vmatprep.mubr.msk.bf16.mxu0 %vm1389_vm0, %v14341_v46 }
 0x22a   : > { %v16317_v51 = vpop.f32.mrb[76].mxu0 }
 0x22b   : > { %v1798_v52 = vpop.f32.mrb[77].mxu0 }
 0x22c   : > { %v16322_v58 = vpop.f32.mrb[78].mxu0 }
 0x22d   : > { %v1801_v63 = vpop.f32.mrb[79].mxu0 }
 0x22e   : > { %v14356_v63 = vld [vmem:[%s18757_s1 + $0x334] ss:$8 sps:$4 sm:$0xff]  }
 0x22f   : > { %2011 = vmatmul.mubr.bf16.gmra.mrb[184].mxu0 %v14343_v55  ;;  %v14355_v55 = vld [vmem:[%s18757_s1 + $0x320] ss:$8 sps:$4 sm:$0xff]  }
 0x230   : > { %11964 = vmatprep.mubr.msk.bf16.mxu0 %vm1389_vm0, %v14344_v59 }
 0x232   : > { %v16328_v0 = vpop.f32.mrb[80].mxu0 }
 0x233   : > { %v1806_v3 = vpop.f32.mrb[81].mxu0 }
 0x234   : > { %v16333_v7 = vpop.f32.mrb[82].mxu0 }
 0x235   : > { %v1809_v12 = vpop.f32.mrb[83].mxu0 }
 0x236   : > { %v14358_v12 = vld [vmem:[%s18757_s1 + $0x330] ss:$8 sps:$4 sm:$0xff]  }
 0x237   : > { %2019 = vmatmul.mubr.bf16.gmra.mrb[188].mxu0 %v14346_v5 }
 0x238   : > { %11965 = vmatprep.mubr.msk.bf16.mxu0 %vm1389_vm0, %v14347_v9 }
 0x23a   : > { %v16339_v13 = vpop.f32.mrb[84].mxu0 }
 0x23b   : > { %v1814_v17 = vpop.f32.mrb[85].mxu0 }
 0x23c   : > { %v16344_v21 = vpop.f32.mrb[86].mxu0 }
 0x23d   : > { %v1817_v26 = vpop.f32.mrb[87].mxu0 }
 0x23f   : > { %2027 = vmatmul.mubr.bf16.gmra.mrb[192].mxu0 %v14349_v18  ;;  %v14359_v18 = vld [vmem:[%s18757_s1 + $0x344] ss:$8 sps:$4 sm:$0xff]  }
 0x240   : > { %11966 = vmatprep.mubr.msk.bf16.mxu0 %vm1389_vm0, %v14350_v24 }
 0x242   : > { %v16350_v28 = vpop.f32.mrb[88].mxu0 }
 0x243   : > { %v1822_v33 = vpop.f32.mrb[89].mxu0 }
 0x244   : > { %v16355_v40 = vpop.f32.mrb[90].mxu0 }
 0x245   : > { %v1825_v46 = vpop.f32.mrb[91].mxu0 }
 0x246   : > { %v14362_v46 = vld [vmem:[%s18757_s1 + $0x354] ss:$8 sps:$4 sm:$0xff]  }
 0x247   : > { %2035 = vmatmul.mubr.bf16.gmra.mrb[196].mxu0 %v14352_v34  ;;  %v14361_v34 = vld [vmem:[%s18757_s1 + $0x340] ss:$8 sps:$4 sm:$0xff]  }
 0x248   : > { %11967 = vmatprep.mubr.msk.bf16.mxu0 %vm1389_vm0, %v14353_v41 }
 0x24a   : > { %v16361_v49 = vpop.f32.mrb[92].mxu0 }
 0x24b   : > { %v1830_v52 = vpop.f32.mrb[93].mxu0 }
 0x24c   : > { %v16366_v59 = vpop.f32.mrb[94].mxu0 }
 0x24d   : > { %v1833_v3 = vpop.f32.mrb[95].mxu0 }
 0x24e   : > { %v14364_v3 = vld [vmem:[%s18757_s1 + $0x350] ss:$8 sps:$4 sm:$0xff]  }
 0x24f   : > { %2043 = vmatmul.mubr.bf16.gmra.mrb[200].mxu0 %v14355_v55 }
 0x250   : > { %11968 = vmatprep.mubr.msk.bf16.mxu0 %vm1389_vm0, %v14356_v63 }
 0x252   : > { %v16372_v5 = vpop.f32.mrb[96].mxu0 }
 0x253   : > { %v1838_v9 = vpop.f32.mrb[97].mxu0 }
 0x254   : > { %v16377_v17 = vpop.f32.mrb[98].mxu0 }
 0x255   : > { %v1841_v24 = vpop.f32.mrb[99].mxu0 }
 0x257   : > { %2051 = vmatmul.mubr.bf16.gmra.mrb[204].mxu0 %v14358_v12  ;;  %v14365_v12 = vld [vmem:[%s18757_s1 + $0x364] ss:$8 sps:$4 sm:$0xff]  }
 0x258   : > { %11969 = vmatprep.mubr.msk.bf16.mxu0 %vm1389_vm0, %v14359_v18 }
 0x25a   : > { %v16383_v26 = vpop.f32.mrb[100].mxu0 }
 0x25b   : > { %v1846_v33 = vpop.f32.mrb[101].mxu0 }
 0x25c   : > { %v16388_v41 = vpop.f32.mrb[102].mxu0 }
 0x25d   : > { %18795 = vst [vmem:[#allocation17_spill] sm:$0xff] %v16388_v41  ;;  %v1849_v52 = vpop.f32.mrb[103].mxu0  ;;  %v14395_v41 = vld [vmem:[%s18757_s1 + $0x400] ss:$8 sps:$4 sm:$0xff]  }
 0x25e   : > { %v14368_v52 = vld [vmem:[%s18757_s1 + $0x374] ss:$8 sps:$4 sm:$0xff]  }
 0x25f   : > { %2059 = vmatmul.mubr.bf16.gmra.mrb[208].mxu0 %v14361_v34  ;;  %v14367_v34 = vld [vmem:[%s18757_s1 + $0x360] ss:$8 sps:$4 sm:$0xff]  }
 0x260   : > { %11970 = vmatprep.mubr.msk.bf16.mxu0 %vm1389_vm0, %v14362_v46 }
 0x262   : > { %v16394_v55 = vpop.f32.mrb[104].mxu0 }
 0x263   : > { %18796 = vst [vmem:[#allocation18_spill] sm:$0xff] %v16394_v55  ;;  %v1854_v63 = vpop.f32.mrb[105].mxu0 }
 0x264   : > { %v16399_v9 = vpop.f32.mrb[106].mxu0 }
 0x265   : > { %18797 = vst [vmem:[#allocation19_spill] sm:$0xff] %v16399_v9  ;;  %v1857_v18 = vpop.f32.mrb[107].mxu0 }
 0x266   : > { %v14370_v18 = vld [vmem:[%s18757_s1 + $0x370] ss:$8 sps:$4 sm:$0xff]  }
 0x267   : > { %2067 = vmatmul.mubr.bf16.gmra.mrb[212].mxu0 %v14364_v3 }
 0x268   : > { %11971 = vmatprep.mubr.msk.bf16.mxu0 %vm1389_vm0, %v14365_v12 }
 0x26a   : > { %v16405_v24 = vpop.f32.mrb[108].mxu0 }
 0x26b   : > { %18798 = vst [vmem:[#allocation20_spill] sm:$0xff] %v16405_v24  ;;  %v1862_v33 = vpop.f32.mrb[109].mxu0 }
 0x26c   : > { %v16410_v46 = vpop.f32.mrb[110].mxu0 }
 0x26d   : > { %18799 = vst [vmem:[#allocation21_spill] sm:$0xff] %v16410_v46  ;;  %v1865_v63 = vpop.f32.mrb[111].mxu0 }
 0x26e   : > { %v14373_v63 = vld [vmem:[%s18757_s1 + $0x380] ss:$8 sps:$4 sm:$0xff]  }
 0x26f   : > { %2075 = vmatmul.mubr.bf16.gmra.mrb[216].mxu0 %v14367_v34 }
 0x270   : > { %11972 = vmatprep.mubr.msk.bf16.mxu0 %vm1389_vm0, %v14368_v52 }
 0x272   : > { %v16416_v3 = vpop.f32.mrb[112].mxu0 }
 0x273   : > { %18800 = vst [vmem:[#allocation22_spill] sm:$0xff] %v16416_v3  ;;  %v1870_v12 = vpop.f32.mrb[113].mxu0 }
 0x274   : > { %v16421_v33 = vpop.f32.mrb[114].mxu0 }
 0x275   : > { %18801 = vst [vmem:[#allocation23_spill] sm:$0xff] %v16421_v33  ;;  %v1873_v46 = vpop.f32.mrb[115].mxu0  ;;  %v14374_v33 = vld [vmem:[%s18757_s1 + $0x394] ss:$8 sps:$4 sm:$0xff]  }
 0x277   : > { %2083 = vmatmul.mubr.bf16.gmra.mrb[220].mxu0 %v14370_v18  ;;  %v14376_v18 = vld [vmem:[%s18757_s1 + $0x390] ss:$8 sps:$4 sm:$0xff]  }
 0x278   : > { %11973 = vmatprep.mubr.msk.bf16.mxu0 %vm1389_vm0, %v14371_v23 }
 0x27a   : > { %v16427_v34 = vpop.f32.mrb[116].mxu0 }
 0x27b   : > { %18802 = vst [vmem:[#allocation24_spill] sm:$0xff] %v16427_v34  ;;  %v1878_v52 = vpop.f32.mrb[117].mxu0 }
 0x27c   : > { %v16432_v12 = vpop.f32.mrb[118].mxu0 }
 0x27d   : > { %18803 = vst [vmem:[#allocation25_spill] sm:$0xff] %v16432_v12  ;;  %v1881_v3 = vpop.f32.mrb[119].mxu0  ;;  %v14377_v12 = vld [vmem:[%s18757_s1 + $0x3a4] ss:$8 sps:$4 sm:$0xff]  }
 0x27f   : > { %2091 = vmatmul.mubr.bf16.gmra.mrb[224].mxu0 %v14373_v63  ;;  %v14379_v63 = vld [vmem:[%s18757_s1 + $0x3a0] ss:$8 sps:$4 sm:$0xff]  }
 0x280   : > { %11974 = vmatprep.mubr.msk.bf16.mxu0 %vm1389_vm0, %v14374_v33 }
 0x282   : > { %v16438_v46 = vpop.f32.mrb[120].mxu0 }
 0x283   : > { %18804 = vst [vmem:[#allocation26_spill] sm:$0xff] %v16438_v46  ;;  %v1886_v23 = vpop.f32.mrb[121].mxu0 }
 0x284   : > { %v16443_v52 = vpop.f32.mrb[122].mxu0 }
 0x285   : > { %18805 = vst [vmem:[#allocation27_spill] sm:$0xff] %v16443_v52  ;;  %v1889_v34 = vpop.f32.mrb[123].mxu0  ;;  %v14380_v52 = vld [vmem:[%s18757_s1 + $0x3b4] ss:$8 sps:$4 sm:$0xff]  }
 0x287   : > { %2099 = vmatmul.mubr.bf16.gmra.mrb[228].mxu0 %v14376_v18  ;;  %v14382_v18 = vld [vmem:[%s18757_s1 + $0x3b0] ss:$8 sps:$4 sm:$0xff]  }
 0x288   : > { %11975 = vmatprep.mubr.msk.bf16.mxu0 %vm1389_vm0, %v14377_v12 }
 0x28a   : > { %v16449_v3 = vpop.f32.mrb[124].mxu0 }
 0x28b   : > { %18806 = vst [vmem:[#allocation28_spill] sm:$0xff] %v16449_v3  ;;  %v1894_v33 = vpop.f32.mrb[125].mxu0 }
 0x28c   : > { %v16454_v23 = vpop.f32.mrb[126].mxu0 }
 0x28d   : > { %18807 = vst [vmem:[#allocation29_spill] sm:$0xff] %v16454_v23  ;;  %v1897_v46 = vpop.f32.mrb[127].mxu0  ;;  %v14383_v23 = vld [vmem:[%s18757_s1 + $0x3c4] ss:$8 sps:$4 sm:$0xff]  }
 0x28f   : > { %2107 = vmatmul.mubr.bf16.gmra.mrb[232].mxu0 %v14379_v63  ;;  %v14385_v63 = vld [vmem:[%s18757_s1 + $0x3c0] ss:$8 sps:$4 sm:$0xff]  }
 0x290   : > { %11976 = vmatprep.mubr.msk.bf16.mxu0 %vm1389_vm0, %v14380_v52 }
 0x292   : > { %v16460_v34 = vpop.f32.mrb[128].mxu0 }
 0x293   : > { %18808 = vst [vmem:[#allocation30_spill] sm:$0xff] %v16460_v34  ;;  %v1902_v12 = vpop.f32.mrb[129].mxu0 }
 0x294   : > { %v16465_v33 = vpop.f32.mrb[130].mxu0 }
 0x295   : > { %18809 = vst [vmem:[#allocation31_spill] sm:$0xff] %v16465_v33  ;;  %v1905_v3 = vpop.f32.mrb[131].mxu0  ;;  %v14386_v33 = vld [vmem:[%s18757_s1 + $0x3d4] ss:$8 sps:$4 sm:$0xff]  }
 0x297   : > { %2115 = vmatmul.mubr.bf16.gmra.mrb[236].mxu0 %v14382_v18  ;;  %v14388_v18 = vld [vmem:[%s18757_s1 + $0x3d0] ss:$8 sps:$4 sm:$0xff]  }
 0x298   : > { %11977 = vmatprep.mubr.msk.bf16.mxu0 %vm1389_vm0, %v14383_v23 }
 0x29a   : > { %v16471_v46 = vpop.f32.mrb[132].mxu0 }
 0x29b   : > { %18810 = vst [vmem:[#allocation32_spill] sm:$0xff] %v16471_v46  ;;  %v1910_v52 = vpop.f32.mrb[133].mxu0 }
 0x29c   : > { %v16476_v12 = vpop.f32.mrb[134].mxu0 }
 0x29d   : > { %18811 = vst [vmem:[#allocation33_spill] sm:$0xff] %v16476_v12  ;;  %v1913_v34 = vpop.f32.mrb[135].mxu0  ;;  %v14389_v12 = vld [vmem:[%s18757_s1 + $0x3e4] ss:$8 sps:$4 sm:$0xff]  }
 0x29f   : > { %2123 = vmatmul.mubr.bf16.gmra.mrb[240].mxu0 %v14385_v63  ;;  %v14391_v63 = vld [vmem:[%s18757_s1 + $0x3e0] ss:$8 sps:$4 sm:$0xff]  }
 0x2a0   : > { %11978 = vmatprep.mubr.msk.bf16.mxu0 %vm1389_vm0, %v14386_v33 }
 0x2a2   : > { %v16482_v3 = vpop.f32.mrb[136].mxu0 }
 0x2a3   : > { %18812 = vst [vmem:[#allocation34_spill] sm:$0xff] %v16482_v3  ;;  %v1918_v23 = vpop.f32.mrb[137].mxu0 }
 0x2a4   : > { %v16487_v52 = vpop.f32.mrb[138].mxu0 }
 0x2a5   : > { %18813 = vst [vmem:[#allocation35_spill] sm:$0xff] %v16487_v52  ;;  %v1921_v46 = vpop.f32.mrb[139].mxu0  ;;  %v14392_v52 = vld [vmem:[%s18757_s1 + $0x3f4] ss:$8 sps:$4 sm:$0xff]  }
 0x2a7   : > { %2131 = vmatmul.mubr.bf16.gmra.mrb[244].mxu0 %v14388_v18 }
 0x2a8   : > { %11979 = vmatprep.mubr.msk.bf16.mxu0 %vm1389_vm0, %v14389_v12 }
 0x2aa   : > { %v16493_v34 = vpop.f32.mrb[140].mxu0 }
 0x2ab   : > { %18814 = vst [vmem:[#allocation36_spill] sm:$0xff] %v16493_v34  ;;  %v1926_v33 = vpop.f32.mrb[141].mxu0 }
 0x2ac   : > { %v16498_v23 = vpop.f32.mrb[142].mxu0  ;;  %v14394_v33 = vld [vmem:[%s18757_s1 + $0x3f0] ss:$8 sps:$4 sm:$0xff]  }
 0x2ad   : > { %18815 = vst [vmem:[#allocation37_spill] sm:$0xff] %v16498_v23  ;;  %v1929_v3 = vpop.f32.mrb[143].mxu0  ;;  %v14421_v23 = vld [vmem:[%s18758_s2 + $0x4] ss:$20 sps:$4 sm:$0xff]  }
 0x2ae   : > { %v14397_v3 = vld [vmem:[%s18757_s1 + $0x404] ss:$8 sps:$4 sm:$0xff]   ;;  %3849 = vmatprep.mubr.bf16.mxu1 %v14421_v23  ;;  %v14400_v23 = vld [vmem:[%s18757_s1 + $0x414] ss:$8 sps:$4 sm:$0xff]  }
 0x2af   : > { %2139 = vmatmul.mubr.bf16.gmra.mrb[248].mxu0 %v14391_v63 }
 0x2b0   : > { %11980 = vmatprep.mubr.msk.bf16.mxu0 %vm1389_vm0, %v14392_v52 }
 0x2b2   : > { %v1932_v46 = vpop.f32.mrb[144].mxu0 }
 0x2b3   : > { %v2219_v12 = vmax.f32 %v16111_v30, %v1932_v46  ;;  %v1934_v18 = vpop.f32.mrb[145].mxu0 }
 0x2b4   : > { %v1935_v34 = vpop.f32.mrb[146].mxu0 }
 0x2b5   : > { %v2220_v63 = vmax.f32 %v16113_v32, %v1935_v34  ;;  %v1937_v52 = vpop.f32.mrb[147].mxu0  ;;  %v2291_v30 = vmax.f32 %v2219_v12, 0.0  ;;  %v18816_v34 = vmov 0  }
 0x2b7   : > { %2147 = vmatmul.mubr.bf16.gmra.mrb[252].mxu0 %v14394_v33  ;;  %v2292_v46 = vmax.f32 %v2220_v63, 0.0 }
 0x2b8   : > { %11981 = vmatprep.mubr.msk.bf16.mxu0 %vm1389_vm0, %v14397_v3 }
 0x2b9   : > { %v16516_v18 = vpack.c.bf16 %v2292_v46, %v2291_v30  ;;  %v14398_v30 = vld [vmem:[%s18757_s1 + $0x410] ss:$8 sps:$4 sm:$0xff]  }
 0x2ba   : > { %v1940_v24 = vpop.f32.mrb[148].mxu0 }
 0x2bb   : > { %v2221_v9 = vmax.f32 %v16122_v36, %v1940_v24  ;;  %v1942_v55 = vpop.f32.mrb[149].mxu0  ;;  %3818 = vmatpush1.bf16.msra.mxu1 %v16516_v18 }
 0x2bc   : > { %v1943_v32 = vpop.f32.mrb[150].mxu0  ;;  %3819 = vmatprep.subr.bf16.mxu1 %v18816_v34 }
 0x2bd   : > { %v2222_v12 = vmax.f32 %v16124_v38, %v1943_v32  ;;  %v1945_v33 = vpop.f32.mrb[151].mxu0  ;;  %v2293_v3 = vmax.f32 %v2221_v9, 0.0  ;;  %v14403_v38 = vld [vmem:[%s18757_s1 + $0x424] ss:$8 sps:$4 sm:$0xff]  }
 0x2bf   : > { %v2294_v63 = vmax.f32 %v2222_v12, 0.0  ;;  %2155 = vmatmul.mubr.bf16.gmra.mrb[0].mxu0 %v14395_v41 }
 0x2c0   : > { %11982 = vmatprep.mubr.msk.bf16.mxu0 %vm1389_vm0, %v14400_v23 }
 0x2c1   : > { %v16529_v36 = vpack.c.bf16 %v2294_v63, %v2293_v3  ;;  %v14401_v63 = vld [vmem:[%s18757_s1 + $0x420] ss:$8 sps:$4 sm:$0xff]  }
 0x2c2   : > { %v1948_v55 = vpop.f32.mrb[152].mxu0 }
 0x2c3   : > { %v2223_v24 = vmax.f32 %v16133_v42, %v1948_v55  ;;  %v1950_v52 = vpop.f32.mrb[153].mxu0  ;;  %3820 = vmatpush1.bf16.msra.mxu1 %v16529_v36 }
 0x2c4   : > { %v1951_v46 = vpop.f32.mrb[154].mxu0  ;;  %3821 = vmatprep.subr.bf16.mxu1 %v18816_v34 }
 0x2c5   : > { %v2224_v41 = vmax.f32 %v16135_v44, %v1951_v46  ;;  %v1953_v9 = vpop.f32.mrb[155].mxu0  ;;  %v2295_v32 = vmax.f32 %v2223_v24, 0.0  ;;  %v14406_v44 = vld [vmem:[%s18757_s1 + $0x434] ss:$8 sps:$4 sm:$0xff]  }
 0x2c7   : > { %v2296_v23 = vmax.f32 %v2224_v41, 0.0  ;;  %2163 = vmatmul.mubr.bf16.gmra.mrb[4].mxu0 %v14398_v30 }
 0x2c8   : > { %11983 = vmatprep.mubr.msk.bf16.mxu0 %vm1389_vm0, %v14403_v38 }
 0x2c9   : > { %v16542_v42 = vpack.c.bf16 %v2296_v23, %v2295_v32  ;;  %v14404_v32 = vld [vmem:[%s18757_s1 + $0x430] ss:$8 sps:$4 sm:$0xff]  }
 0x2ca   : > { %v1956_v12 = vpop.f32.mrb[156].mxu0 }
 0x2cb   : > { %v2225_v33 = vmax.f32 %v16144_v48, %v1956_v12  ;;  %v1958_v3 = vpop.f32.mrb[157].mxu0  ;;  %3822 = vmatpush1.bf16.msra.mxu1 %v16542_v42 }
 0x2cc   : > { %v1959_v55 = vpop.f32.mrb[158].mxu0  ;;  %3823 = vmatprep.subr.bf16.mxu1 %v18816_v34 }
 0x2cd   : > { %v2226_v24 = vmax.f32 %v16146_v50, %v1959_v55  ;;  %v1961_v52 = vpop.f32.mrb[159].mxu0  ;;  %v2297_v30 = vmax.f32 %v2225_v33, 0.0  ;;  %v14409_v50 = vld [vmem:[%s18757_s1 + $0x444] ss:$8 sps:$4 sm:$0xff]  }
 0x2ce   : > { %v14407_v52 = vld [vmem:[%s18757_s1 + $0x440] ss:$8 sps:$4 sm:$0xff]  }
 0x2cf   : > { %v2298_v46 = vmax.f32 %v2226_v24, 0.0  ;;  %2171 = vmatmul.mubr.bf16.gmra.mrb[8].mxu0 %v14401_v63 }
 0x2d0   : > { %11984 = vmatprep.mubr.msk.bf16.mxu0 %vm1389_vm0, %v14406_v44 }
 0x2d1   : > { %v16555_v48 = vpack.c.bf16 %v2298_v46, %v2297_v30 }
 0x2d2   : > { %v1964_v38 = vpop.f32.mrb[160].mxu0 }
 0x2d3   : > { %v2227_v41 = vmax.f32 %v16155_v54, %v1964_v38  ;;  %v1966_v9 = vpop.f32.mrb[161].mxu0  ;;  %3824 = vmatpush1.bf16.msra.mxu1 %v16555_v48 }
 0x2d4   : > { %v1967_v23 = vpop.f32.mrb[162].mxu0  ;;  %3825 = vmatprep.subr.bf16.mxu1 %v18816_v34 }
 0x2d5   : > { %v2228_v12 = vmax.f32 %v16157_v56, %v1967_v23  ;;  %v1969_v33 = vpop.f32.mrb[163].mxu0  ;;  %v2299_v3 = vmax.f32 %v2227_v41, 0.0  ;;  %v14412_v56 = vld [vmem:[%s18757_s1 + $0x454] ss:$8 sps:$4 sm:$0xff]  }
 0x2d7   : > { %v2300_v63 = vmax.f32 %v2228_v12, 0.0  ;;  %2179 = vmatmul.mubr.bf16.gmra.mrb[12].mxu0 %v14404_v32  ;;  %v14410_v12 = vld [vmem:[%s18757_s1 + $0x450] ss:$8 sps:$4 sm:$0xff]  }
 0x2d8   : > { %11985 = vmatprep.mubr.msk.bf16.mxu0 %vm1389_vm0, %v14409_v50 }
 0x2d9   : > { %v16568_v54 = vpack.c.bf16 %v2300_v63, %v2299_v3 }
 0x2da   : > { %v1972_v55 = vpop.f32.mrb[164].mxu0 }
 0x2db   : > { %v2229_v44 = vmax.f32 %v16166_v60, %v1972_v55  ;;  %v1974_v24 = vpop.f32.mrb[165].mxu0  ;;  %3826 = vmatpush1.bf16.msra.mxu1 %v16568_v54 }
 0x2dc   : > { %v1975_v30 = vpop.f32.mrb[166].mxu0  ;;  %3827 = vmatprep.subr.bf16.mxu1 %v18816_v34 }
 0x2dd   : > { %v2230_v46 = vmax.f32 %v16168_v62, %v1975_v30  ;;  %v1977_v38 = vpop.f32.mrb[167].mxu0  ;;  %v2301_v41 = vmax.f32 %v2229_v44, 0.0  ;;  %v14415_v62 = vld [vmem:[%s18757_s1 + $0x464] ss:$8 sps:$4 sm:$0xff]  }
 0x2df   : > { %v2302_v9 = vmax.f32 %v2230_v46, 0.0  ;;  %2187 = vmatmul.mubr.bf16.gmra.mrb[16].mxu0 %v14407_v52 }
 0x2e0   : > { %11986 = vmatprep.mubr.msk.bf16.mxu0 %vm1389_vm0, %v14412_v56  ;;  %v14413_v56 = vld [vmem:[%s18757_s1 + $0x460] ss:$8 sps:$4 sm:$0xff]  }
 0x2e1   : > { %v16581_v60 = vpack.c.bf16 %v2302_v9, %v2301_v41 }
 0x2e2   : > { %v1980_v32 = vpop.f32.mrb[168].mxu0 }
 0x2e3   : > { %v2231_v23 = vmax.f32 %v16177_v2, %v1980_v32  ;;  %v1982_v50 = vpop.f32.mrb[169].mxu0  ;;  %3828 = vmatpush1.bf16.msra.mxu1 %v16581_v60 }
 0x2e4   : > { %v1983_v33 = vpop.f32.mrb[170].mxu0  ;;  %3829 = vmatprep.subr.bf16.mxu1 %v18816_v34 }
 0x2e5   : > { %v2232_v3 = vmax.f32 %v16179_v4, %v1983_v33  ;;  %v1985_v63 = vpop.f32.mrb[171].mxu0  ;;  %v2303_v55 = vmax.f32 %v2231_v23, 0.0  ;;  %v14418_v4 = vld [vmem:[%s18757_s1 + $0x474] ss:$8 sps:$4 sm:$0xff]   ;;  %v14416_v33 = vld [vmem:[%s18757_s1 + $0x470] ss:$8 sps:$4 sm:$0xff]  }
 0x2e7   : > { %v2304_v44 = vmax.f32 %v2232_v3, 0.0  ;;  %2195 = vmatmul.mubr.bf16.gmra.mrb[20].mxu0 %v14410_v12 }
 0x2e8   : > { %11987 = vmatprep.mubr.msk.bf16.mxu0 %vm1389_vm0, %v14415_v62 }
 0x2e9   : > { %v16594_v2 = vpack.c.bf16 %v2304_v44, %v2303_v55 }
 0x2ea   : > { %v1988_v24 = vpop.f32.mrb[172].mxu0 }
 0x2eb   : > { %v2233_v52 = vmax.f32 %v16188_v8, %v1988_v24  ;;  %v1990_v30 = vpop.f32.mrb[173].mxu0  ;;  %3830 = vmatpush1.bf16.msra.mxu1 %v16594_v2 }
 0x2ec   : > { %v1991_v46 = vpop.f32.mrb[174].mxu0  ;;  %3831 = vmatprep.subr.bf16.mxu1 %v18816_v34 }
 0x2ed   : > { %v2234_v38 = vmax.f32 %v16190_v10, %v1991_v46  ;;  %v1993_v41 = vpop.f32.mrb[175].mxu0  ;;  %v2305_v9 = vmax.f32 %v2233_v52, 0.0 }
 0x2ef   : > { %v2306_v32 = vmax.f32 %v2234_v38, 0.0  ;;  %2203 = vmatmul.mubr.bf16.gmra.mrb[24].mxu0 %v14413_v56 }
 0x2f0   : > { %11988 = vmatprep.mubr.msk.bf16.mxu0 %vm1389_vm0, %v14418_v4 }
 0x2f1   : > { %v16607_v8 = vpack.c.bf16 %v2306_v32, %v2305_v9 }
 0x2f2   : > { %v1996_v23 = vpop.f32.mrb[176].mxu0 }
 0x2f3   : > { %v2235_v50 = vmax.f32 %v16199_v14, %v1996_v23  ;;  %v1998_v12 = vpop.f32.mrb[177].mxu0  ;;  %3832 = vmatpush1.bf16.msra.mxu1 %v16607_v8 }
 0x2f4   : > { %v1999_v62 = vpop.f32.mrb[178].mxu0  ;;  %3833 = vmatprep.subr.bf16.mxu1 %v18816_v34 }
 0x2f5   : > { %v2236_v10 = vmax.f32 %v16201_v16, %v1999_v62  ;;  %v2001_v3 = vpop.f32.mrb[179].mxu0  ;;  %v2307_v63 = vmax.f32 %v2235_v50, 0.0 }
 0x2f7   : > { %v2308_v55 = vmax.f32 %v2236_v10, 0.0  ;;  %2211 = vmatmul.mubr.bf16.gmra.mrb[28].mxu0 %v14416_v33 }
 0x2f9   : > { %v16616_v44 = vpack.c.bf16 %v2308_v55, %v2307_v63 }
 0x2fa   : > { %v2004_v24 = vpop.f32.mrb[180].mxu0 }
 0x2fb   : > { %v2237_v14 = vmax.f32 %v16210_v20, %v2004_v24  ;;  %v2006_v52 = vpop.f32.mrb[181].mxu0  ;;  %3834 = vmatpush1.bf16.msra.mxu1 %v16616_v44 }
 0x2fc   : > { %v2007_v30 = vpop.f32.mrb[182].mxu0  ;;  %3835 = vmatprep.subr.bf16.mxu1 %v18816_v34 }
 0x2fd   : > { %v2238_v56 = vmax.f32 %v16212_v22, %v2007_v30  ;;  %v2009_v46 = vpop.f32.mrb[183].mxu0  ;;  %v2309_v4 = vmax.f32 %v2237_v14, 0.0 }
 0x2ff   : > { %v2310_v16 = vmax.f32 %v2238_v56, 0.0 }
 0x301   : > { %v16622_v38 = vpack.c.bf16 %v2310_v16, %v2309_v4 }
 0x302   : > { %v2012_v41 = vpop.f32.mrb[184].mxu0 }
 0x303   : > { %v2239_v9 = vmax.f32 %v16221_v27, %v2012_v41  ;;  %v2014_v32 = vpop.f32.mrb[185].mxu0  ;;  %3836 = vmatpush1.bf16.msra.mxu1 %v16622_v38 }
 0x304   : > { %v2015_v20 = vpop.f32.mrb[186].mxu0  ;;  %3837 = vmatprep.subr.bf16.mxu1 %v18816_v34 }
 0x305   : > { %v2240_v23 = vmax.f32 %v16223_v29, %v2015_v20  ;;  %v2017_v50 = vpop.f32.mrb[187].mxu0  ;;  %v2311_v12 = vmax.f32 %v2239_v9, 0.0 }
 0x307   : > { %v2312_v33 = vmax.f32 %v2240_v23, 0.0 }
 0x309   : > { %v16628_v22 = vpack.c.bf16 %v2312_v33, %v2311_v12 }
 0x30a   : > { %v2020_v62 = vpop.f32.mrb[188].mxu0 }
 0x30b   : > { %v2241_v10 = vmax.f32 %v16232_v35, %v2020_v62  ;;  %v2022_v3 = vpop.f32.mrb[189].mxu0  ;;  %3838 = vmatpush1.bf16.msra.mxu1 %v16628_v22 }
 0x30c   : > { %v2023_v27 = vpop.f32.mrb[190].mxu0  ;;  %3839 = vmatprep.subr.bf16.mxu1 %v18816_v34 }
 0x30d   : > { %v2242_v63 = vmax.f32 %v16234_v39, %v2023_v27  ;;  %v2025_v55 = vpop.f32.mrb[191].mxu0  ;;  %v2313_v24 = vmax.f32 %v2241_v10, 0.0 }
 0x30f   : > { %v2314_v14 = vmax.f32 %v2242_v63, 0.0 }
 0x311   : > { %v16634_v29 = vpack.c.bf16 %v2314_v14, %v2313_v24 }
 0x312   : > { %v2028_v52 = vpop.f32.mrb[192].mxu0 }
 0x313   : > { %v2243_v30 = vmax.f32 %v16243_v45, %v2028_v52  ;;  %v2030_v56 = vpop.f32.mrb[193].mxu0  ;;  %3840 = vmatpush1.bf16.msra.mxu1 %v16634_v29 }
 0x314   : > { %v2031_v35 = vpop.f32.mrb[194].mxu0  ;;  %3841 = vmatprep.subr.bf16.mxu1 %v18816_v34 }
 0x315   : > { %v2244_v46 = vmax.f32 %v16245_v47, %v2031_v35  ;;  %v2033_v4 = vpop.f32.mrb[195].mxu0  ;;  %v2315_v16 = vmax.f32 %v2243_v30, 0.0 }
 0x317   : > { %v2316_v41 = vmax.f32 %v2244_v46, 0.0 }
 0x319   : > { %v16640_v39 = vpack.c.bf16 %v2316_v41, %v2315_v16  ;;  %v14419_v41 = vld [vmem:[%s18758_s2] ss:$20 sps:$4 sm:$0xff]  }
 0x31a   : > { %v2036_v9 = vpop.f32.mrb[196].mxu0 }
 0x31b   : > { %v2245_v32 = vmax.f32 %v16254_v53, %v2036_v9  ;;  %v2038_v20 = vpop.f32.mrb[197].mxu0  ;;  %3842 = vmatpush1.bf16.msra.mxu1 %v16640_v39 }
 0x31c   : > { %v2039_v45 = vpop.f32.mrb[198].mxu0  ;;  %3843 = vmatprep.subr.bf16.mxu1 %v18816_v34 }
 0x31d   : > { %v2246_v23 = vmax.f32 %v16256_v57, %v2039_v45  ;;  %v2041_v50 = vpop.f32.mrb[199].mxu0  ;;  %v2317_v12 = vmax.f32 %v2245_v32, 0.0 }
 0x31f   : > { %v2318_v33 = vmax.f32 %v2246_v23, 0.0 }
 0x321   : > { %v16646_v47 = vpack.c.bf16 %v2318_v33, %v2317_v12  ;;  %v14424_v33 = vld [vmem:[%s18758_s2 + $0x28] ss:$20 sps:$4 sm:$0xff]  }
 0x322   : > { %v2044_v62 = vpop.f32.mrb[200].mxu0 }
 0x323   : > { %v2046_v10 = vpop.f32.mrb[201].mxu0  ;;  %3844 = vmatpush1.bf16.msra.mxu1 %v16646_v47  ;;  %v2247_v3 = vmax.f32 %v16262_v61, %v2044_v62 }
 0x324   : > { %v2047_v53 = vpop.f32.mrb[202].mxu0  ;;  %3845 = vmatprep.subr.bf16.mxu1 %v18816_v34 }
 0x325   : > { %v2049_v27 = vpop.f32.mrb[203].mxu0  ;;  %v2248_v63 = vmax.f32 %v16267_v1, %v2047_v53  ;;  %v2319_v55 = vmax.f32 %v2247_v3, 0.0 }
 0x327   : > { %v2320_v24 = vmax.f32 %v2248_v63, 0.0 }
 0x329   : > { %v16652_v57 = vpack.c.bf16 %v2320_v24, %v2319_v55 }
 0x32a   : > { %v2052_v14 = vpop.f32.mrb[204].mxu0 }
 0x32b   : > { %v2054_v52 = vpop.f32.mrb[205].mxu0  ;;  %3846 = vmatpush1.bf16.msra.mxu1 %v16652_v57  ;;  %v2249_v30 = vmax.f32 %v16273_v6, %v2052_v14  ;;  %v14422_v6 = vld [vmem:[%s18758_s2 + $0x2c] ss:$20 sps:$4 sm:$0xff]   ;;  %v14427_v14 = vld [vmem:[%s18758_s2 + $0x50] ss:$20 sps:$4 sm:$0xff]  }
 0x32c   : > { %v2055_v56 = vpop.f32.mrb[206].mxu0  ;;  %3847 = vmatprep.subr.bf16.mxu1 %v18816_v34 }
 0x32d   : > { %v2057_v61 = vpop.f32.mrb[207].mxu0  ;;  %v2250_v35 = vmax.f32 %v16278_v11, %v2055_v56  ;;  %v2321_v46 = vmax.f32 %v2249_v30, 0.0 }
 0x32f   : > { %v2322_v4 = vmax.f32 %v2250_v35, 0.0 }
 0x331   : > { %v16658_v16 = vpack.c.bf16 %v2322_v4, %v2321_v46 }
 0x332   : > { %v2060_v1 = vpop.f32.mrb[208].mxu0 }
 0x333   : > { %v2251_v9 = vmax.f32 %v16284_v15, %v2060_v1  ;;  %v2062_v32 = vpop.f32.mrb[209].mxu0  ;;  %3848 = vmatpush1.bf16.msra.mxu1 %v16658_v16 }
 0x334   : > { %v2063_v20 = vpop.f32.mrb[210].mxu0  ;;  %4185 = vmatprep.subr.bf16.mxu1 %v18816_v34 }
 0x335   : > { %v2252_v11 = vmax.f32 %v16289_v19, %v2063_v20  ;;  %v2065_v45 = vpop.f32.mrb[211].mxu0  ;;  %v2323_v23 = vmax.f32 %v2251_v9, 0.0  ;;  %v14425_v19 = vld [vmem:[%s18758_s2 + $0x54] ss:$20 sps:$4 sm:$0xff]  }
 0x336   : > { %3850 = vmatmul.mubr.bf16.vlgmr.msra.gmra.mrb[0].mxu1 %v14419_v41  ;;  %v14430_v41 = vld [vmem:[%s18758_s2 + $0x78] ss:$20 sps:$4 sm:$0xff]  }
 0x337   : > { %v2324_v50 = vmax.f32 %v2252_v11, 0.0  ;;  %3857 = vmatprep.mubr.bf16.mxu1 %v14422_v6 }
 0x339   : > { %v16670_v12 = vpack.c.bf16 %v2324_v50, %v2323_v23 }
 0x33a   : > { %v2068_v15 = vpop.f32.mrb[212].mxu0 }
 0x33b   : > { %v2253_v62 = vmax.f32 %v16295_v25, %v2068_v15  ;;  %v2070_v10 = vpop.f32.mrb[213].mxu0  ;;  %4186 = vmatpush1.bf16.msra.mxu1 %v16670_v12  ;;  %v14433_v15 = vld [vmem:[%s18758_s2 + $0xa0] ss:$20 sps:$4 sm:$0xff]  }
 0x33c   : > { %v2071_v3 = vpop.f32.mrb[214].mxu0  ;;  %4187 = vmatprep.subr.bf16.mxu1 %v18816_v34 }
 0x33d   : > { %v2254_v53 = vmax.f32 %v16300_v31, %v2071_v3  ;;  %v2073_v27 = vpop.f32.mrb[215].mxu0  ;;  %v2325_v63 = vmax.f32 %v2253_v62, 0.0  ;;  %v14428_v31 = vld [vmem:[%s18758_s2 + $0x7c] ss:$20 sps:$4 sm:$0xff]  }
 0x33e   : > { %3858 = vmatmul.mubr.bf16.gmra.mrb[4].mxu1 %v14424_v33 }
 0x33f   : > { %v2326_v55 = vmax.f32 %v2254_v53, 0.0  ;;  %3865 = vmatprep.mubr.bf16.mxu1 %v14425_v19  ;;  %v14482_v53 = vld [vmem:[%s18758_s2 + $0x10] ss:$20 sps:$4 sm:$0xff]  }
 0x340   : > { %13086 = vmatprep.mubr.msk.bf16.mxu0 %vm3690_vm2, %v14482_v53 }
 0x341   : > { %v16682_v24 = vpack.c.bf16 %v2326_v55, %v2325_v63 }
 0x342   : > { %v2076_v25 = vpop.f32.mrb[216].mxu0 }
 0x343   : > { %v2255_v52 = vmax.f32 %v16306_v37, %v2076_v25  ;;  %v2078_v30 = vpop.f32.mrb[217].mxu0  ;;  %4188 = vmatpush1.bf16.msra.mxu1 %v16682_v24  ;;  %v14436_v25 = vld [vmem:[%s18758_s2 + $0xc8] ss:$20 sps:$4 sm:$0xff]  }
 0x344   : > { %v2079_v56 = vpop.f32.mrb[218].mxu0  ;;  %4189 = vmatprep.subr.bf16.mxu1 %v18816_v34 }
 0x345   : > { %v2256_v61 = vmax.f32 %v16311_v43, %v2079_v56  ;;  %v2081_v35 = vpop.f32.mrb[219].mxu0  ;;  %v2327_v46 = vmax.f32 %v2255_v52, 0.0  ;;  %v14431_v43 = vld [vmem:[%s18758_s2 + $0xa4] ss:$20 sps:$4 sm:$0xff]   ;;  %v14437_v52 = vld [vmem:[%s18758_s2 + $0xf4] ss:$20 sps:$4 sm:$0xff]  }
 0x346   : > { %3866 = vmatmul.mubr.bf16.gmra.mrb[8].mxu1 %v14427_v14 }
 0x347   : > { %v2328_v4 = vmax.f32 %v2256_v61, 0.0  ;;  %3873 = vmatprep.mubr.bf16.mxu1 %v14428_v31 }
 0x349   : > { %v16694_v1 = vpack.c.bf16 %v2328_v4, %v2327_v46  ;;  %v14439_v4 = vld [vmem:[%s18758_s2 + $0xf0] ss:$20 sps:$4 sm:$0xff]  }
 0x34a   : > { %v2084_v37 = vpop.f32.mrb[220].mxu0 }
 0x34b   : > { %v2257_v9 = vmax.f32 %v16317_v51, %v2084_v37  ;;  %v2086_v32 = vpop.f32.mrb[221].mxu0  ;;  %4190 = vmatpush1.bf16.msra.mxu1 %v16694_v1 }
 0x34c   : > { %v2087_v6 = vpop.f32.mrb[222].mxu0  ;;  %4191 = vmatprep.subr.bf16.mxu1 %v18816_v34 }
 0x34d   : > { %v2258_v20 = vmax.f32 %v16322_v58, %v2087_v6  ;;  %v2089_v11 = vpop.f32.mrb[223].mxu0  ;;  %v2329_v45 = vmax.f32 %v2257_v9, 0.0  ;;  %v14434_v58 = vld [vmem:[%s18758_s2 + $0xcc] ss:$20 sps:$4 sm:$0xff]  }
 0x34e   : > { %3874 = vmatmul.mubr.bf16.gmra.mrb[12].mxu1 %v14430_v41 }
 0x34f   : > { %v2330_v23 = vmax.f32 %v2258_v20, 0.0  ;;  %3881 = vmatprep.mubr.bf16.mxu1 %v14431_v43 }
 0x351   : > { %v16706_v50 = vpack.c.bf16 %v2330_v23, %v2329_v45  ;;  %v14442_v45 = vld [vmem:[%s18758_s2 + $0x118] ss:$20 sps:$4 sm:$0xff]  }
 0x352   : > { %v2092_v51 = vpop.f32.mrb[224].mxu0 }
 0x353   : > { %v2259_v33 = vmax.f32 %v16328_v0, %v2092_v51  ;;  %v2094_v62 = vpop.f32.mrb[225].mxu0  ;;  %4192 = vmatpush1.bf16.msra.mxu1 %v16706_v50 }
 0x354   : > { %v2095_v10 = vpop.f32.mrb[226].mxu0  ;;  %4193 = vmatprep.subr.bf16.mxu1 %v18816_v34 }
 0x355   : > { %v2260_v19 = vmax.f32 %v16333_v7, %v2095_v10  ;;  %v2097_v3 = vpop.f32.mrb[227].mxu0  ;;  %v2331_v0 = vmax.f32 %v2259_v33, 0.0 }
 0x356   : > { %3882 = vmatmul.mubr.bf16.gmra.mrb[16].mxu1 %v14433_v15  ;;  %v14445_v3 = vld [vmem:[%s18758_s2 + $0x140] ss:$20 sps:$4 sm:$0xff]  }
 0x357   : > { %v2332_v27 = vmax.f32 %v2260_v19, 0.0  ;;  %3889 = vmatprep.mubr.bf16.mxu1 %v14434_v58 }
 0x359   : > { %v16722_v63 = vpack.c.bf16 %v2332_v27, %v2331_v0 }
 0x35a   : > { %v2100_v55 = vpop.f32.mrb[228].mxu0 }
 0x35b   : > { %v2261_v7 = vmax.f32 %v16339_v13, %v2100_v55  ;;  %v2102_v14 = vpop.f32.mrb[229].mxu0  ;;  %4194 = vmatpush1.bf16.msra.mxu1 %v16722_v63 }
 0x35c   : > { %v2103_v30 = vpop.f32.mrb[230].mxu0  ;;  %4195 = vmatprep.subr.bf16.mxu1 %v18816_v34 }
 0x35d   : > { %v2262_v31 = vmax.f32 %v16344_v21, %v2103_v30  ;;  %v2105_v56 = vpop.f32.mrb[231].mxu0  ;;  %v2333_v61 = vmax.f32 %v2261_v7, 0.0  ;;  %v14440_v21 = vld [vmem:[%s18758_s2 + $0x11c] ss:$20 sps:$4 sm:$0xff]  }
 0x35e   : > { %3890 = vmatmul.mubr.bf16.gmra.mrb[20].mxu1 %v14436_v25  ;;  %v14448_v30 = vld [vmem:[%s18758_s2 + $0x168] ss:$20 sps:$4 sm:$0xff]  }
 0x35f   : > { %v2334_v35 = vmax.f32 %v2262_v31, 0.0  ;;  %3897 = vmatprep.mubr.bf16.mxu1 %v14437_v52 }
 0x361   : > { %v16734_v46 = vpack.c.bf16 %v2334_v35, %v2333_v61  ;;  %v18817_v35 = vld [vmem:[#allocation17_spill] sm:$0xff] }
 0x362   : > { %v2108_v13 = vpop.f32.mrb[232].mxu0 }
 0x363   : > { %v2263_v37 = vmax.f32 %v16350_v28, %v2108_v13  ;;  %v2110_v41 = vpop.f32.mrb[233].mxu0  ;;  %4196 = vmatpush1.bf16.msra.mxu1 %v16734_v46 }
 0x364   : > { %v2111_v9 = vpop.f32.mrb[234].mxu0  ;;  %4197 = vmatprep.subr.bf16.mxu1 %v18816_v34 }
 0x365   : > { %v2264_v32 = vmax.f32 %v16355_v40, %v2111_v9  ;;  %v2113_v43 = vpop.f32.mrb[235].mxu0  ;;  %v2335_v6 = vmax.f32 %v2263_v37, 0.0  ;;  %v14443_v40 = vld [vmem:[%s18758_s2 + $0x144] ss:$20 sps:$4 sm:$0xff]  }
 0x366   : > { %3898 = vmatmul.mubr.bf16.gmra.mrb[24].mxu1 %v14439_v4  ;;  %v14451_v9 = vld [vmem:[%s18758_s2 + $0x190] ss:$20 sps:$4 sm:$0xff]  }
 0x367   : > { %v2336_v20 = vmax.f32 %v2264_v32, 0.0  ;;  %3905 = vmatprep.mubr.bf16.mxu1 %v14440_v21  ;;  %v18818_v32 = vld [vmem:[#allocation18_spill] sm:$0xff] }
 0x369   : > { %v16746_v11 = vpack.c.bf16 %v2336_v20, %v2335_v6  ;;  %v14452_v20 = vld [vmem:[%s18758_s2 + $0x1bc] ss:$20 sps:$4 sm:$0xff]  }
 0x36a   : > { %v2116_v28 = vpop.f32.mrb[236].mxu0 }
 0x36b   : > { %v2265_v23 = vmax.f32 %v16361_v49, %v2116_v28  ;;  %v2118_v51 = vpop.f32.mrb[237].mxu0  ;;  %4198 = vmatpush1.bf16.msra.mxu1 %v16746_v11 }
 0x36c   : > { %v2119_v15 = vpop.f32.mrb[238].mxu0  ;;  %4199 = vmatprep.subr.bf16.mxu1 %v18816_v34 }
 0x36d   : > { %v2266_v33 = vmax.f32 %v16366_v59, %v2119_v15  ;;  %v2121_v62 = vpop.f32.mrb[239].mxu0  ;;  %v2337_v58 = vmax.f32 %v2265_v23, 0.0  ;;  %v14446_v59 = vld [vmem:[%s18758_s2 + $0x16c] ss:$20 sps:$4 sm:$0xff]  }
 0x36e   : > { %3906 = vmatmul.mubr.bf16.gmra.mrb[28].mxu1 %v14442_v45  ;;  %v18819_v45 = vld [vmem:[#allocation19_spill] sm:$0xff] }
 0x36f   : > { %v2338_v10 = vmax.f32 %v2266_v33, 0.0  ;;  %3913 = vmatprep.mubr.bf16.mxu1 %v14443_v40 }
 0x371   : > { %v16758_v19 = vpack.c.bf16 %v2338_v10, %v2337_v58  ;;  %v14454_v58 = vld [vmem:[%s18758_s2 + $0x1b8] ss:$20 sps:$4 sm:$0xff]  }
 0x372   : > { %v2124_v49 = vpop.f32.mrb[240].mxu0  ;;  %v18820_v10 = vld [vmem:[#allocation20_spill] sm:$0xff] }
 0x373   : > { %v2267_v53 = vmax.f32 %v16372_v5, %v2124_v49  ;;  %v2126_v0 = vpop.f32.mrb[241].mxu0  ;;  %4200 = vmatpush1.bf16.msra.mxu1 %v16758_v19 }
 0x374   : > { %v2127_v27 = vpop.f32.mrb[242].mxu0  ;;  %4201 = vmatprep.subr.bf16.mxu1 %v18816_v34 }
 0x375   : > { %v2268_v55 = vmax.f32 %v16377_v17, %v2127_v27  ;;  %v2129_v25 = vpop.f32.mrb[243].mxu0  ;;  %v2339_v7 = vmax.f32 %v2267_v53, 0.0  ;;  %v14449_v17 = vld [vmem:[%s18758_s2 + $0x194] ss:$20 sps:$4 sm:$0xff]   ;;  %v14455_v53 = vld [vmem:[%s18758_s2 + $0x1e4] ss:$20 sps:$4 sm:$0xff]  }
 0x376   : > { %3914 = vmatmul.mubr.bf16.gmra.mrb[32].mxu1 %v14445_v3 }
 0x377   : > { %v2340_v14 = vmax.f32 %v2268_v55, 0.0  ;;  %3921 = vmatprep.mubr.bf16.mxu1 %v14446_v59  ;;  %v18821_v59 = vld [vmem:[#allocation21_spill] sm:$0xff] }
 0x379   : > { %v16770_v52 = vpack.c.bf16 %v2340_v14, %v2339_v7 }
 0x37a   : > { %v2132_v5 = vpop.f32.mrb[244].mxu0 }
 0x37b   : > { %v2269_v31 = vmax.f32 %v16383_v26, %v2132_v5  ;;  %v2134_v56 = vpop.f32.mrb[245].mxu0  ;;  %4202 = vmatpush1.bf16.msra.mxu1 %v16770_v52 }
 0x37c   : > { %v2135_v61 = vpop.f32.mrb[246].mxu0  ;;  %4203 = vmatprep.subr.bf16.mxu1 %v18816_v34 }
 0x37d   : > { %v2270_v13 = vmax.f32 %v18817_v35, %v2135_v61  ;;  %v2137_v4 = vpop.f32.mrb[247].mxu0  ;;  %v2341_v37 = vmax.f32 %v2269_v31, 0.0  ;;  %v18822_v31 = vld [vmem:[#allocation22_spill] sm:$0xff]  ;;  %v14458_v61 = vld [vmem:[%s18758_s2 + $0x20c] ss:$20 sps:$4 sm:$0xff]  }
 0x37e   : > { %3922 = vmatmul.mubr.bf16.gmra.mrb[36].mxu1 %v14448_v30  ;;  %v14457_v30 = vld [vmem:[%s18758_s2 + $0x1e0] ss:$20 sps:$4 sm:$0xff]  }
 0x37f   : > { %v2342_v41 = vmax.f32 %v2270_v13, 0.0  ;;  %3929 = vmatprep.mubr.bf16.mxu1 %v14449_v17  ;;  %v18823_v13 = vld [vmem:[#allocation23_spill] sm:$0xff] }
 0x381   : > { %v16782_v21 = vpack.c.bf16 %v2342_v41, %v2341_v37 }
 0x382   : > { %v2140_v26 = vpop.f32.mrb[248].mxu0 }
 0x383   : > { %v2271_v43 = vmax.f32 %v18818_v32, %v2140_v26  ;;  %v2142_v6 = vpop.f32.mrb[249].mxu0  ;;  %4204 = vmatpush1.bf16.msra.mxu1 %v16782_v21 }
 0x384   : > { %v2143_v28 = vpop.f32.mrb[250].mxu0  ;;  %4205 = vmatprep.subr.bf16.mxu1 %v18816_v34  ;;  %v18824_v6 = vld [vmem:[#allocation24_spill] sm:$0xff] }
 0x385   : > { %v2272_v23 = vmax.f32 %v18819_v45, %v2143_v28  ;;  %v2145_v51 = vpop.f32.mrb[251].mxu0  ;;  %v2343_v40 = vmax.f32 %v2271_v43, 0.0  ;;  %v14460_v43 = vld [vmem:[%s18758_s2 + $0x208] ss:$20 sps:$4 sm:$0xff]  }
 0x386   : > { %3930 = vmatmul.mubr.bf16.gmra.mrb[40].mxu1 %v14451_v9  ;;  %v14461_v45 = vld [vmem:[%s18758_s2 + $0x234] ss:$20 sps:$4 sm:$0xff]  }
 0x387   : > { %v2344_v15 = vmax.f32 %v2272_v23, 0.0  ;;  %3937 = vmatprep.mubr.bf16.mxu1 %v14452_v20  ;;  %v18825_v51 = vld [vmem:[#allocation25_spill] sm:$0xff] }
 0x389   : > { %v16794_v33 = vpack.c.bf16 %v2344_v15, %v2343_v40 }
 0x38a   : > { %v2148_v62 = vpop.f32.mrb[252].mxu0 }
 0x38b   : > { %v2273_v49 = vmax.f32 %v18820_v10, %v2148_v62  ;;  %v2150_v3 = vpop.f32.mrb[253].mxu0  ;;  %4206 = vmatpush1.bf16.msra.mxu1 %v16794_v33 }
 0x38c   : > { %v2151_v0 = vpop.f32.mrb[254].mxu0  ;;  %4207 = vmatprep.subr.bf16.mxu1 %v18816_v34  ;;  %v14463_v3 = vld [vmem:[%s18758_s2 + $0x230] ss:$20 sps:$4 sm:$0xff]  }
 0x38d   : > { %v2274_v27 = vmax.f32 %v18821_v59, %v2151_v0  ;;  %v2153_v55 = vpop.f32.mrb[255].mxu0  ;;  %v2345_v25 = vmax.f32 %v2273_v49, 0.0 }
 0x38e   : > { %3938 = vmatmul.mubr.bf16.gmra.mrb[44].mxu1 %v14454_v58 }
 0x38f   : > { %v2346_v7 = vmax.f32 %v2274_v27, 0.0  ;;  %3945 = vmatprep.mubr.bf16.mxu1 %v14455_v53  ;;  %v18826_v53 = vld [vmem:[#allocation26_spill] sm:$0xff] }
 0x390   : > { %v14464_v27 = vld [vmem:[%s18758_s2 + $0x25c] ss:$20 sps:$4 sm:$0xff]  }
 0x391   : > { %v16806_v14 = vpack.c.bf16 %v2346_v7, %v2345_v25  ;;  %v18827_v25 = vld [vmem:[#allocation27_spill] sm:$0xff] }
 0x392   : > { %v2156_v5 = vpop.f32.mrb[0].mxu0 }
 0x393   : > { %v2275_v56 = vmax.f32 %v18822_v31, %v2156_v5  ;;  %v2158_v17 = vpop.f32.mrb[1].mxu0  ;;  %4208 = vmatpush1.bf16.msra.mxu1 %v16806_v14 }
 0x394   : > { %v2159_v35 = vpop.f32.mrb[2].mxu0  ;;  %4209 = vmatprep.subr.bf16.mxu1 %v18816_v34 }
 0x395   : > { %v2276_v4 = vmax.f32 %v18823_v13, %v2159_v35  ;;  %v2161_v37 = vpop.f32.mrb[3].mxu0  ;;  %v2347_v41 = vmax.f32 %v2275_v56, 0.0  ;;  %v18828_v35 = vld [vmem:[#allocation28_spill] sm:$0xff] }
 0x396   : > { %3946 = vmatmul.mubr.bf16.gmra.mrb[48].mxu1 %v14457_v30  ;;  %v14467_v37 = vld [vmem:[%s18758_s2 + $0x284] ss:$20 sps:$4 sm:$0xff]  }
 0x397   : > { %v2348_v26 = vmax.f32 %v2276_v4, 0.0  ;;  %3953 = vmatprep.mubr.bf16.mxu1 %v14458_v61  ;;  %v14466_v61 = vld [vmem:[%s18758_s2 + $0x258] ss:$20 sps:$4 sm:$0xff]  }
 0x399   : > { %v16818_v9 = vpack.c.bf16 %v2348_v26, %v2347_v41  ;;  %v18829_v26 = vld [vmem:[#allocation29_spill] sm:$0xff] }
 0x39a   : > { %v2164_v32 = vpop.f32.mrb[4].mxu0 }
 0x39b   : > { %v2277_v20 = vmax.f32 %v18824_v6, %v2164_v32  ;;  %v2166_v28 = vpop.f32.mrb[5].mxu0  ;;  %4210 = vmatpush1.bf16.msra.mxu1 %v16818_v9 }
 0x39c   : > { %v2167_v23 = vpop.f32.mrb[6].mxu0  ;;  %4211 = vmatprep.subr.bf16.mxu1 %v18816_v34 }
 0x39d   : > { %v2278_v40 = vmax.f32 %v18825_v51, %v2167_v23  ;;  %v2169_v15 = vpop.f32.mrb[7].mxu0  ;;  %v2349_v62 = vmax.f32 %v2277_v20, 0.0  ;;  %v14469_v23 = vld [vmem:[%s18758_s2 + $0x280] ss:$20 sps:$4 sm:$0xff]   ;;  %v18830_v51 = vld [vmem:[#allocation30_spill] sm:$0xff] }
 0x39e   : > { %3954 = vmatmul.mubr.bf16.gmra.mrb[52].mxu1 %v14460_v43 }
 0x39f   : > { %v2350_v58 = vmax.f32 %v2278_v40, 0.0  ;;  %3961 = vmatprep.mubr.bf16.mxu1 %v14461_v45 }
 0x3a1   : > { %v16830_v10 = vpack.c.bf16 %v2350_v58, %v2349_v62  ;;  %v14470_v62 = vld [vmem:[%s18758_s2 + $0x2ac] ss:$20 sps:$4 sm:$0xff]  }
 0x3a2   : > { %v2172_v49 = vpop.f32.mrb[8].mxu0 }
 0x3a3   : > { %v2279_v0 = vmax.f32 %v18826_v53, %v2172_v49  ;;  %v2174_v59 = vpop.f32.mrb[9].mxu0  ;;  %4212 = vmatpush1.bf16.msra.mxu1 %v16830_v10  ;;  %v18831_v49 = vld [vmem:[#allocation31_spill] sm:$0xff] }
 0x3a4   : > { %v2175_v55 = vpop.f32.mrb[10].mxu0  ;;  %4213 = vmatprep.subr.bf16.mxu1 %v18816_v34 }
 0x3a5   : > { %v2280_v7 = vmax.f32 %v18827_v25, %v2175_v55  ;;  %v2177_v5 = vpop.f32.mrb[11].mxu0  ;;  %v2351_v30 = vmax.f32 %v2279_v0, 0.0  ;;  %v14472_v25 = vld [vmem:[%s18758_s2 + $0x2a8] ss:$20 sps:$4 sm:$0xff]  }
 0x3a6   : > { %3962 = vmatmul.mubr.bf16.gmra.mrb[56].mxu1 %v14463_v3 }
 0x3a7   : > { %v2352_v31 = vmax.f32 %v2280_v7, 0.0  ;;  %3969 = vmatprep.mubr.bf16.mxu1 %v14464_v27  ;;  %v18832_v7 = vld [vmem:[#allocation32_spill] sm:$0xff] }
 0x3a9   : > { %v16842_v56 = vpack.c.bf16 %v2352_v31, %v2351_v30  ;;  %v14473_v31 = vld [vmem:[%s18758_s2 + $0x2d4] ss:$20 sps:$4 sm:$0xff]  }
 0x3aa   : > { %v2180_v17 = vpop.f32.mrb[12].mxu0 }
 0x3ab   : > { %v2281_v13 = vmax.f32 %v18828_v35, %v2180_v17  ;;  %v2182_v4 = vpop.f32.mrb[13].mxu0  ;;  %4214 = vmatpush1.bf16.msra.mxu1 %v16842_v56 }
 0x3ac   : > { %v2183_v41 = vpop.f32.mrb[14].mxu0  ;;  %4215 = vmatprep.subr.bf16.mxu1 %v18816_v34 }
 0x3ad   : > { %v2282_v32 = vmax.f32 %v18829_v26, %v2183_v41  ;;  %v2185_v43 = vpop.f32.mrb[15].mxu0  ;;  %v2353_v6 = vmax.f32 %v2281_v13, 0.0 }
 0x3ae   : > { %3970 = vmatmul.mubr.bf16.gmra.mrb[60].mxu1 %v14466_v61  ;;  %v18833_v61 = vld [vmem:[#allocation33_spill] sm:$0xff]  ;;  %v18834_v43 = vld [vmem:[#allocation34_spill] sm:$0xff] }
 0x3af   : > { %v2354_v20 = vmax.f32 %v2282_v32, 0.0  ;;  %3977 = vmatprep.mubr.bf16.mxu1 %v14467_v37  ;;  %v14475_v32 = vld [vmem:[%s18758_s2 + $0x2d0] ss:$20 sps:$4 sm:$0xff]  }
 0x3b1   : > { %v16854_v28 = vpack.c.bf16 %v2354_v20, %v2353_v6 }
 0x3b2   : > { %v2188_v45 = vpop.f32.mrb[16].mxu0 }
 0x3b3   : > { %v2283_v40 = vmax.f32 %v18830_v51, %v2188_v45  ;;  %v2190_v15 = vpop.f32.mrb[17].mxu0  ;;  %4216 = vmatpush1.bf16.msra.mxu1 %v16854_v28  ;;  %v14476_v45 = vld [vmem:[%s18758_s2 + $0x2fc] ss:$20 sps:$4 sm:$0xff]   ;;  %v18835_v51 = vld [vmem:[#allocation35_spill] sm:$0xff] }
 0x3b4   : > { %v2191_v58 = vpop.f32.mrb[18].mxu0  ;;  %6338 = vmatprep.subr.bf16.mxu1 %v18816_v34 }
 0x3b5   : > { %v2284_v3 = vmax.f32 %v18831_v49, %v2191_v58  ;;  %v2193_v53 = vpop.f32.mrb[19].mxu0  ;;  %v2355_v0 = vmax.f32 %v2283_v40, 0.0 }
 0x3b6   : > { %3978 = vmatmul.mubr.bf16.gmra.mrb[64].mxu1 %v14469_v23  ;;  %v14478_v53 = vld [vmem:[%s18758_s2 + $0x2f8] ss:$20 sps:$4 sm:$0xff]  }
 0x3b7   : > { %v2356_v59 = vmax.f32 %v2284_v3, 0.0  ;;  %3985 = vmatprep.mubr.bf16.mxu1 %v14470_v62 }
 0x3b9   : > { %v2395_v27 = vpack.c.bf16 %v2356_v59, %v2355_v0  ;;  %v18836_v0 = vld [vmem:[#allocation36_spill] sm:$0xff] }
 0x3ba   : > { %v2196_v55 = vpop.f32.mrb[20].mxu0 }
 0x3bb   : > { %v2285_v5 = vmax.f32 %v18832_v7, %v2196_v55  ;;  %v2198_v30 = vpop.f32.mrb[21].mxu0  ;;  %13078 = vmatprep.subr.bf16.mxu0 %v2395_v27 }
 0x3bc   : > { %v2199_v17 = vpop.f32.mrb[22].mxu0  ;;  %13079 = vmatpush3.bf16.msra.mxu0 %v2395_v27 }
 0x3bd   : > { %v2286_v35 = vmax.f32 %v18833_v61, %v2199_v17  ;;  %v2201_v13 = vpop.f32.mrb[23].mxu0  ;;  %v2357_v4 = vmax.f32 %v2285_v5, 0.0  ;;  %v18837_v5 = vld [vmem:[#allocation37_spill] sm:$0xff] }
 0x3be   : > { %3986 = vmatmul.mubr.bf16.gmra.mrb[68].mxu1 %v14472_v25  ;;  %v14479_v25 = vld [vmem:[%s18758_s2 + $0x324] ss:$20 sps:$4 sm:$0xff]   ;;  %v14481_v13 = vld [vmem:[%s18758_s2 + $0x320] ss:$20 sps:$4 sm:$0xff]  }
 0x3bf   : > { %v2358_v37 = vmax.f32 %v2286_v35, 0.0  ;;  %3993 = vmatprep.mubr.bf16.mxu1 %v14473_v31 }
 0x3c1   : > { %v2396_v41 = vpack.c.bf16 %v2358_v37, %v2357_v4  ;;  %v14483_v4 = vld [vmem:[%s18758_s2 + $0x38] ss:$20 sps:$4 sm:$0xff]  }
 0x3c2   : > { %v2204_v26 = vpop.f32.mrb[24].mxu0  ;;  %v14484_v37 = vld [vmem:[%s18758_s2 + $0x34c] ss:$20 sps:$4 sm:$0xff]  }
 0x3c3   : > { %v2287_v6 = vmax.f32 %v18834_v43, %v2204_v26  ;;  %v2206_v20 = vpop.f32.mrb[25].mxu0  ;;  %13080 = vmatprep.subr.bf16.mxu0 %v2396_v41  ;;  %v14486_v26 = vld [vmem:[%s18758_s2 + $0x348] ss:$20 sps:$4 sm:$0xff]   ;;  %v14489_v43 = vld [vmem:[%s18758_s2 + $0x370] ss:$20 sps:$4 sm:$0xff]  }
 0x3c4   : > { %v2207_v23 = vpop.f32.mrb[26].mxu0  ;;  %13081 = vmatpush3.bf16.msra.mxu0 %v2396_v41  ;;  %v14495_v20 = vld [vmem:[%s18758_s2 + $0x3c0] ss:$20 sps:$4 sm:$0xff]  }
 0x3c5   : > { %v2288_v40 = vmax.f32 %v18835_v51, %v2207_v23  ;;  %v2209_v15 = vpop.f32.mrb[27].mxu0  ;;  %v2359_v62 = vmax.f32 %v2287_v6, 0.0  ;;  %v14493_v6 = vld [vmem:[%s18758_s2 + $0x3c4] ss:$20 sps:$4 sm:$0xff]   ;;  %v14498_v23 = vld [vmem:[%s18758_s2 + $0x3e8] ss:$20 sps:$4 sm:$0xff]  }
 0x3c6   : > { %3994 = vmatmul.mubr.bf16.gmra.mrb[72].mxu1 %v14475_v32  ;;  %v14487_v32 = vld [vmem:[%s18758_s2 + $0x374] ss:$20 sps:$4 sm:$0xff]   ;;  %v14502_v15 = vld [vmem:[%s18758_s2 + $0x43c] ss:$20 sps:$4 sm:$0xff]  }
 0x3c7   : > { %v2360_v58 = vmax.f32 %v2288_v40, 0.0  ;;  %4001 = vmatprep.mubr.bf16.mxu1 %v14476_v45  ;;  %v14496_v45 = vld [vmem:[%s18758_s2 + $0x3ec] ss:$20 sps:$4 sm:$0xff]   ;;  %v14499_v51 = vld [vmem:[%s18758_s2 + $0x414] ss:$20 sps:$4 sm:$0xff]  }
 0x3c8   : > { %v14501_v40 = vld [vmem:[%s18758_s2 + $0x410] ss:$20 sps:$4 sm:$0xff]  }
 0x3c9   : > { %v2397_v49 = vpack.c.bf16 %v2360_v58, %v2359_v62  ;;  %v14504_v62 = vld [vmem:[%s18758_s2 + $0x438] ss:$20 sps:$4 sm:$0xff]  }
 0x3ca   : > { %v2212_v3 = vpop.f32.mrb[28].mxu0  ;;  %v14505_v58 = vld [vmem:[%s18758_s2 + $0x464] ss:$20 sps:$4 sm:$0xff]  }
 0x3cb   : > { %v2289_v59 = vmax.f32 %v18836_v0, %v2212_v3  ;;  %v2214_v55 = vpop.f32.mrb[29].mxu0  ;;  %13082 = vmatprep.subr.bf16.mxu0 %v2397_v49  ;;  %v14508_v3 = vld [vmem:[%s18758_s2 + $0x48c] ss:$20 sps:$4 sm:$0xff]   ;;  %v14555_v0 = vld [vmem:[%s18758_s2 + $0x88] ss:$20 sps:$4 sm:$0xff]  }
 0x3cc   : > { %v2215_v7 = vpop.f32.mrb[30].mxu0  ;;  %13083 = vmatpush3.bf16.msra.mxu0 %v2397_v49  ;;  %v14511_v55 = vld [vmem:[%s18758_s2 + $0x4b4] ss:$20 sps:$4 sm:$0xff]  }
 0x3cd   : > { %v2290_v30 = vmax.f32 %v18837_v5, %v2215_v7  ;;  %v2217_v31 = vpop.f32.mrb[31].mxu0  ;;  %v2361_v17 = vmax.f32 %v2289_v59, 0.0  ;;  %v14510_v59 = vld [vmem:[%s18758_s2 + $0x488] ss:$20 sps:$4 sm:$0xff]   ;;  %v14560_v5 = vld [vmem:[%s18758_s2 + $0xb0] ss:$20 sps:$4 sm:$0xff]  }
 0x3ce   : > { %4002 = vmatmul.mubr.bf16.gmra.mrb[76].mxu1 %v14478_v53  ;;  %v14552_v53 = vld [vmem:[%s18758_s2 + $0x60] ss:$20 sps:$4 sm:$0xff]   ;;  %v14514_v7 = vld [vmem:[%s18758_s2 + $0x4dc] ss:$20 sps:$4 sm:$0xff]   ;;  %v14516_v31 = vld [vmem:[%s18758_s2 + $0x4d8] ss:$20 sps:$4 sm:$0xff]  }
 0x3cf   : > { %v2362_v61 = vmax.f32 %v2290_v30, 0.0  ;;  %4009 = vmatprep.mubr.bf16.mxu1 %v14479_v25  ;;  %v14513_v25 = vld [vmem:[%s18758_s2 + $0x4b0] ss:$20 sps:$4 sm:$0xff]   ;;  %v14563_v30 = vld [vmem:[%s18758_s2 + $0xd8] ss:$20 sps:$4 sm:$0xff]  }
 0x3d1   : > { %v2398_v35 = vpack.c.bf16 %v2362_v61, %v2361_v17  ;;  %v14517_v17 = vld [vmem:[%s18758_s2 + $0x504] ss:$20 sps:$4 sm:$0xff]   ;;  %v14519_v61 = vld [vmem:[%s18758_s2 + $0x500] ss:$20 sps:$4 sm:$0xff]  }
 0x3d3   : > { %13084 = vmatprep.subr.bf16.mxu0 %v2398_v35 }
 0x3d4   : > { %13085 = vmatpush3.bf16.msra.mxu0 %v2398_v35 }
 0x3d5   : > { %13170 = vmatprep.subr.bf16.mxu0 %v2395_v27 }
 0x3d6   : > { %4010 = vmatmul.mubr.bf16.gmra.mrb[80].mxu1 %v14481_v13  ;;  %v14568_v13 = vld [vmem:[%s18758_s2 + $0x100] ss:$20 sps:$4 sm:$0xff]  }
 0x3d7   : > { %13087 = vmatmul.mubr.msk.bf16.vlgmr.msra.gmra.mrb[32].mxu0 %vm3690_vm2, %v14483_v4  ;;  %4017 = vmatprep.mubr.bf16.mxu1 %v14484_v37  ;;  %v14571_v4 = vld [vmem:[%s18758_s2 + $0x128] ss:$20 sps:$4 sm:$0xff]  }
 0x3d8   : > { %13171 = vmatpush3.bf16.msra.mxu0 %v2395_v27  ;;  %v14490_v27 = vld [vmem:[%s18758_s2 + $0x39c] ss:$20 sps:$4 sm:$0xff]   ;;  %13090 = vmatprep.mubr.msk.bf16.mxu0 %vm3690_vm2, %v14552_v53 }
 0x3d9   : > { %13172 = vmatprep.subr.bf16.mxu0 %v2396_v41  ;;  %v14522_v37 = vld [vmem:[%s18758_s2 + $0x528] ss:$20 sps:$4 sm:$0xff]  }
 0x3da   : > { %v14538_v53 = vld [vmem:[%s18758_s2 + $0x61c] ss:$20 sps:$4 sm:$0xff]  }
 0x3dc   : > { %13173 = vmatpush3.bf16.msra.mxu0 %v2396_v41  ;;  %v14492_v41 = vld [vmem:[%s18758_s2 + $0x398] ss:$20 sps:$4 sm:$0xff]  }
 0x3dd   : > { %13174 = vmatprep.subr.bf16.mxu0 %v2397_v49 }
 0x3de   : > { %4018 = vmatmul.mubr.bf16.gmra.mrb[84].mxu1 %v14486_v26  ;;  %v14523_v26 = vld [vmem:[%s18758_s2 + $0x554] ss:$20 sps:$4 sm:$0xff]  }
 0x3df   : > { %4025 = vmatprep.mubr.bf16.mxu1 %v14487_v32  ;;  %13091 = vmatmul.mubr.msk.bf16.gmra.mrb[36].mxu0 %vm3690_vm2, %v14555_v0  ;;  %v14525_v32 = vld [vmem:[%s18758_s2 + $0x550] ss:$20 sps:$4 sm:$0xff]   ;;  %v14540_v0 = vld [vmem:[%s18758_s2 + $0x618] ss:$20 sps:$4 sm:$0xff]  }
 0x3e0   : > { %13175 = vmatpush3.bf16.msra.mxu0 %v2397_v49  ;;  %v14507_v49 = vld [vmem:[%s18758_s2 + $0x460] ss:$20 sps:$4 sm:$0xff]   ;;  %13094 = vmatprep.mubr.msk.bf16.mxu0 %vm3690_vm2, %v14560_v5 }
 0x3e1   : > { %13176 = vmatprep.subr.bf16.mxu0 %v2398_v35  ;;  %v14543_v5 = vld [vmem:[%s18758_s2 + $0x640] ss:$20 sps:$4 sm:$0xff]  }
 0x3e4   : > { %13177 = vmatpush3.bf16.msra.mxu0 %v2398_v35  ;;  %v14520_v35 = vld [vmem:[%s18758_s2 + $0x52c] ss:$20 sps:$4 sm:$0xff]  }
 0x3e5   : > { %8896 = vmatprep.subr.bf16.mxu0 %v18816_v34 }
 0x3e6   : > { %4026 = vmatmul.mubr.bf16.gmra.mrb[88].mxu1 %v14489_v43  ;;  %v14526_v43 = vld [vmem:[%s18758_s2 + $0x57c] ss:$20 sps:$4 sm:$0xff]  }
 0x3e7   : > { %4033 = vmatprep.mubr.bf16.mxu1 %v14490_v27  ;;  %13095 = vmatmul.mubr.msk.bf16.gmra.mrb[40].mxu0 %vm3690_vm2, %v14563_v30  ;;  %v14576_v27 = vld [vmem:[%s18758_s2 + $0x150] ss:$20 sps:$4 sm:$0xff]  }
 0x3e8   : > { %13098 = vmatprep.mubr.msk.bf16.mxu0 %vm3690_vm2, %v14568_v13  ;;  %v14546_v13 = vld [vmem:[%s18758_s2 + $0x8] ss:$20 sps:$4 sm:$0xff]  }
 0x3ee   : > { %4034 = vmatmul.mubr.bf16.gmra.mrb[92].mxu1 %v14492_v41  ;;  %v14579_v41 = vld [vmem:[%s18758_s2 + $0x178] ss:$20 sps:$4 sm:$0xff]  }
 0x3ef   : > { %4041 = vmatprep.mubr.bf16.mxu1 %v14493_v6  ;;  %13099 = vmatmul.mubr.msk.bf16.gmra.mrb[44].mxu0 %vm3690_vm2, %v14571_v4  ;;  %v14528_v6 = vld [vmem:[%s18758_s2 + $0x578] ss:$20 sps:$4 sm:$0xff]   ;;  %v14549_v4 = vld [vmem:[%s18758_s2 + $0x34] ss:$20 sps:$4 sm:$0xff]  }
 0x3f0   : > { %13102 = vmatprep.mubr.msk.bf16.mxu0 %vm3690_vm2, %v14576_v27  ;;  %v14627_v27 = vld [vmem:[%s18758_s2 + $0x358] ss:$20 sps:$4 sm:$0xff]  }
 0x3f6   : > { %4042 = vmatmul.mubr.bf16.gmra.mrb[96].mxu1 %v14495_v20  ;;  %v14529_v20 = vld [vmem:[%s18758_s2 + $0x5a4] ss:$20 sps:$4 sm:$0xff]  }
 0x3f7   : > { %4049 = vmatprep.mubr.bf16.mxu1 %v14496_v45  ;;  %13103 = vmatmul.mubr.msk.bf16.gmra.mrb[48].mxu0 %vm3690_vm2, %v14579_v41  ;;  %v14584_v45 = vld [vmem:[%s18758_s2 + $0x1a0] ss:$20 sps:$4 sm:$0xff]   ;;  %v14567_v41 = vld [vmem:[%s18758_s2 + $0xd0] ss:$20 sps:$4 sm:$0xff]  }
 0x3f8   : > { %13106 = vmatprep.mubr.msk.bf16.mxu0 %vm3690_vm2, %v14584_v45  ;;  %v14643_v45 = vld [vmem:[%s18758_s2 + $0x3f8] ss:$20 sps:$4 sm:$0xff]  }
 0x3fe   : > { %4050 = vmatmul.mubr.bf16.gmra.mrb[100].mxu1 %v14498_v23  ;;  %v14587_v23 = vld [vmem:[%s18758_s2 + $0x1c8] ss:$20 sps:$4 sm:$0xff]  }
 0x3ff   : > { %4057 = vmatprep.mubr.bf16.mxu1 %v14499_v51  ;;  %13107 = vmatmul.mubr.msk.bf16.gmra.mrb[52].mxu0 %vm3690_vm2, %v14587_v23  ;;  %v14531_v51 = vld [vmem:[%s18758_s2 + $0x5a0] ss:$20 sps:$4 sm:$0xff]   ;;  %v14583_v23 = vld [vmem:[%s18758_s2 + $0x170] ss:$20 sps:$4 sm:$0xff]  }
 0x406   : > { %4058 = vmatmul.mubr.bf16.gmra.mrb[104].mxu1 %v14501_v40  ;;  %v14532_v40 = vld [vmem:[%s18758_s2 + $0x5cc] ss:$20 sps:$4 sm:$0xff]  }
 0x407   : > { %4065 = vmatprep.mubr.bf16.mxu1 %v14502_v15  ;;  %v14534_v15 = vld [vmem:[%s18758_s2 + $0x5c8] ss:$20 sps:$4 sm:$0xff]  }
 0x40e   : > { %4066 = vmatmul.mubr.bf16.gmra.mrb[108].mxu1 %v14504_v62  ;;  %v14535_v62 = vld [vmem:[%s18758_s2 + $0x5f4] ss:$20 sps:$4 sm:$0xff]  }
 0x40f   : > { %4073 = vmatprep.mubr.bf16.mxu1 %v14505_v58  ;;  %v14592_v58 = vld [vmem:[%s18758_s2 + $0x1f0] ss:$20 sps:$4 sm:$0xff]  }
 0x410   : > { %13110 = vmatprep.mubr.msk.bf16.mxu0 %vm3690_vm2, %v14592_v58 }
 0x416   : > { %4074 = vmatmul.mubr.bf16.gmra.mrb[112].mxu1 %v14507_v49  ;;  %v14595_v49 = vld [vmem:[%s18758_s2 + $0x218] ss:$20 sps:$4 sm:$0xff]  }
 0x417   : > { %4081 = vmatprep.mubr.bf16.mxu1 %v14508_v3  ;;  %13111 = vmatmul.mubr.msk.bf16.gmra.mrb[56].mxu0 %vm3690_vm2, %v14595_v49  ;;  %v14537_v3 = vld [vmem:[%s18758_s2 + $0x5f0] ss:$20 sps:$4 sm:$0xff]  }
 0x41e   : > { %4082 = vmatmul.mubr.bf16.gmra.mrb[116].mxu1 %v14510_v59  ;;  %v14541_v59 = vld [vmem:[%s18758_s2 + $0x644] ss:$20 sps:$4 sm:$0xff]  }
 0x41f   : > { %4089 = vmatprep.mubr.bf16.mxu1 %v14511_v55  ;;  %v14600_v55 = vld [vmem:[%s18758_s2 + $0x240] ss:$20 sps:$4 sm:$0xff]  }
 0x420   : > { %13114 = vmatprep.mubr.msk.bf16.mxu0 %vm3690_vm2, %v14600_v55  ;;  %v14596_v55 = vld [vmem:[%s18758_s2 + $0x1e8] ss:$20 sps:$4 sm:$0xff]  }
 0x426   : > { %4090 = vmatmul.mubr.bf16.gmra.mrb[120].mxu1 %v14513_v25  ;;  %v14603_v25 = vld [vmem:[%s18758_s2 + $0x268] ss:$20 sps:$4 sm:$0xff]  }
 0x427   : > { %4097 = vmatprep.mubr.bf16.mxu1 %v14514_v7  ;;  %v2645_v7 = vld [vmem:[%s18758_s2 + $0x668] sm:$0xff]  ;;  %13115 = vmatmul.mubr.msk.bf16.gmra.mrb[60].mxu0 %vm3690_vm2, %v14603_v25 }
 0x428   : > { %v12195_v30 = vcombine.high %v2645_v7, %v2645_v7  ;;  %v14597_v25 = vld [vmem:[%s18758_s2 + $0x214] ss:$20 sps:$4 sm:$0xff]  }
 0x42e   : > { %4098 = vmatmul.mubr.bf16.gmra.mrb[124].mxu1 %v14516_v31  ;;  %v12194_v31 = vcombine.low %v2645_v7, %v2645_v7  ;;  %v14656_v7 = vld [vmem:[%s18758_s2 + $0x470] ss:$20 sps:$4 sm:$0xff]  }
 0x42f   : > { %4105 = vmatprep.mubr.bf16.mxu1 %v14517_v17  ;;  %v14548_v17 = vld [vmem:[%s18758_s2 + $0xc] ss:$20 sps:$4 sm:$0xff]  }
 0x436   : > { %4106 = vmatmul.mubr.bf16.gmra.mrb[128].mxu1 %v14519_v61  ;;  %v14608_v61 = vld [vmem:[%s18758_s2 + $0x290] ss:$20 sps:$4 sm:$0xff]  }
 0x437   : > { %4113 = vmatprep.mubr.bf16.mxu1 %v14520_v35  ;;  %v14611_v35 = vld [vmem:[%s18758_s2 + $0x2b8] ss:$20 sps:$4 sm:$0xff]   ;;  %13118 = vmatprep.mubr.msk.bf16.mxu0 %vm3690_vm2, %v14608_v61  ;;  %v14601_v61 = vld [vmem:[%s18758_s2 + $0x23c] ss:$20 sps:$4 sm:$0xff]  }
 0x438   : > { %13119 = vmatmul.mubr.msk.bf16.gmra.mrb[64].mxu0 %vm3690_vm2, %v14611_v35 }
 0x43e   : > { %4114 = vmatmul.mubr.bf16.gmra.mrb[132].mxu1 %v14522_v37  ;;  %v14551_v37 = vld [vmem:[%s18758_s2 + $0x30] ss:$20 sps:$4 sm:$0xff]  }
 0x43f   : > { %4121 = vmatprep.mubr.bf16.mxu1 %v14523_v26  ;;  %v14553_v26 = vld [vmem:[%s18758_s2 + $0x5c] ss:$20 sps:$4 sm:$0xff]  }
 0x446   : > { %4122 = vmatmul.mubr.bf16.gmra.mrb[136].mxu1 %v14525_v32  ;;  %v14619_v32 = vld [vmem:[%s18758_s2 + $0x308] ss:$20 sps:$4 sm:$0xff]  }
 0x447   : > { %4129 = vmatprep.mubr.bf16.mxu1 %v14526_v43  ;;  %v14559_v43 = vld [vmem:[%s18758_s2 + $0x80] ss:$20 sps:$4 sm:$0xff]  }
 0x44e   : > { %4130 = vmatmul.mubr.bf16.gmra.mrb[140].mxu1 %v14528_v6  ;;  %v14635_v6 = vld [vmem:[%s18758_s2 + $0x3a8] ss:$20 sps:$4 sm:$0xff]  }
 0x44f   : > { %4137 = vmatprep.mubr.bf16.mxu1 %v14529_v20  ;;  %v14575_v20 = vld [vmem:[%s18758_s2 + $0x120] ss:$20 sps:$4 sm:$0xff]  }
 0x456   : > { %4138 = vmatmul.mubr.bf16.gmra.mrb[144].mxu1 %v14531_v51  ;;  %v14585_v51 = vld [vmem:[%s18758_s2 + $0x19c] ss:$20 sps:$4 sm:$0xff]  }
 0x457   : > { %4145 = vmatprep.mubr.bf16.mxu1 %v14532_v40  ;;  %v14589_v40 = vld [vmem:[%s18758_s2 + $0x1c4] ss:$20 sps:$4 sm:$0xff]  }
 0x45e   : > { %4146 = vmatmul.mubr.bf16.gmra.mrb[148].mxu1 %v14534_v15  ;;  %v14648_v15 = vld [vmem:[%s18758_s2 + $0x420] ss:$20 sps:$4 sm:$0xff]  }
 0x45f   : > { %4153 = vmatprep.mubr.bf16.mxu1 %v14535_v62  ;;  %v14651_v62 = vld [vmem:[%s18758_s2 + $0x448] ss:$20 sps:$4 sm:$0xff]  }
 0x466   : > { %4154 = vmatmul.mubr.bf16.gmra.mrb[152].mxu1 %v14537_v3  ;;  %v14591_v3 = vld [vmem:[%s18758_s2 + $0x1c0] ss:$20 sps:$4 sm:$0xff]  }
 0x467   : > { %4161 = vmatprep.mubr.bf16.mxu1 %v14538_v53 }
 0x46e   : > { %4162 = vmatmul.mubr.bf16.gmra.mrb[156].mxu1 %v14540_v0  ;;  %v14593_v0 = vld [vmem:[%s18758_s2 + $0x1ec] ss:$20 sps:$4 sm:$0xff]  }
 0x46f   : > { %4169 = vmatprep.mubr.bf16.mxu1 %v14541_v59 }
 0x476   : > { %4170 = vmatmul.mubr.bf16.gmra.mrb[160].mxu1 %v14543_v5  ;;  %v14659_v5 = vld [vmem:[%s18758_s2 + $0x498] ss:$20 sps:$4 sm:$0xff]  }
 0x477   : > { %4177 = vmatprep.mubr.bf16.mxu1 %v12195_v30 }
 0x47e   : > { %4178 = vmatmul.mubr.bf16.gmra.mrb[164].mxu1 %v12194_v31  ;;  %v14599_v31 = vld [vmem:[%s18758_s2 + $0x210] ss:$20 sps:$4 sm:$0xff]  }
 0x47f   : > { %4217 = vmatprep.mubr.bf16.mxu1 %v14548_v17 }
 0x486   : > { %4218 = vmatmul.mubr.bf16.vlgmr.msra.gmra.mrb[0].mxu1 %v14546_v13 }
 0x487   : > { %6339 = vmatpush1.bf16.msra.mxu1 %v16516_v18  ;;  %4225 = vmatprep.mubr.bf16.mxu1 %v14549_v4  ;;  %v14616_v18 = vld [vmem:[%s18758_s2 + $0x2e0] ss:$20 sps:$4 sm:$0xff]   ;;  %v14604_v4 = vld [vmem:[%s18758_s2 + $0x238] ss:$20 sps:$4 sm:$0xff]  }
 0x488   : > { %6340 = vmatprep.subr.bf16.mxu1 %v18816_v34  ;;  %13122 = vmatprep.mubr.msk.bf16.mxu0 %vm3690_vm2, %v14616_v18  ;;  %v14667_v18 = vld [vmem:[%s18758_s2 + $0x4e8] ss:$20 sps:$4 sm:$0xff]  }
 0x489   : > { %13123 = vmatmul.mubr.msk.bf16.gmra.mrb[68].mxu0 %vm3690_vm2, %v14619_v32 }
 0x48b   : > { %6341 = vmatpush1.bf16.msra.mxu1 %v16529_v36  ;;  %v14556_v36 = vld [vmem:[%s18758_s2 + $0x58] ss:$20 sps:$4 sm:$0xff]  }
 0x48c   : > { %6342 = vmatprep.subr.bf16.mxu1 %v18816_v34 }
 0x48e   : > { %4226 = vmatmul.mubr.bf16.gmra.mrb[4].mxu1 %v14551_v37  ;;  %v14605_v37 = vld [vmem:[%s18758_s2 + $0x264] ss:$20 sps:$4 sm:$0xff]  }
 0x48f   : > { %6343 = vmatpush1.bf16.msra.mxu1 %v16542_v42  ;;  %4233 = vmatprep.mubr.bf16.mxu1 %v14553_v26  ;;  %v14557_v42 = vld [vmem:[%s18758_s2 + $0x84] ss:$20 sps:$4 sm:$0xff]   ;;  %v14664_v26 = vld [vmem:[%s18758_s2 + $0x4c0] ss:$20 sps:$4 sm:$0xff]  }
 0x490   : > { %6344 = vmatprep.subr.bf16.mxu1 %v18816_v34 }
 0x493   : > { %6345 = vmatpush1.bf16.msra.mxu1 %v16555_v48  ;;  %v14561_v48 = vld [vmem:[%s18758_s2 + $0xac] ss:$20 sps:$4 sm:$0xff]  }
 0x494   : > { %6346 = vmatprep.subr.bf16.mxu1 %v18816_v34 }
 0x496   : > { %4234 = vmatmul.mubr.bf16.gmra.mrb[8].mxu1 %v14556_v36  ;;  %v14607_v36 = vld [vmem:[%s18758_s2 + $0x260] ss:$20 sps:$4 sm:$0xff]  }
 0x497   : > { %6347 = vmatpush1.bf16.msra.mxu1 %v16568_v54  ;;  %4241 = vmatprep.mubr.bf16.mxu1 %v14557_v42  ;;  %v14624_v54 = vld [vmem:[%s18758_s2 + $0x330] ss:$20 sps:$4 sm:$0xff]  }
 0x498   : > { %6348 = vmatprep.subr.bf16.mxu1 %v18816_v34  ;;  %13126 = vmatprep.mubr.msk.bf16.mxu0 %vm3690_vm2, %v14624_v54 }
 0x499   : > { %13127 = vmatmul.mubr.msk.bf16.gmra.mrb[72].mxu0 %vm3690_vm2, %v14627_v27  ;;  %v14612_v27 = vld [vmem:[%s18758_s2 + $0x288] ss:$20 sps:$4 sm:$0xff]  }
 0x49b   : > { %6349 = vmatpush1.bf16.msra.mxu1 %v16581_v60  ;;  %v14564_v60 = vld [vmem:[%s18758_s2 + $0xa8] ss:$20 sps:$4 sm:$0xff]  }
 0x49c   : > { %6350 = vmatprep.subr.bf16.mxu1 %v18816_v34 }
 0x49e   : > { %4242 = vmatmul.mubr.bf16.gmra.mrb[12].mxu1 %v14559_v43  ;;  %v14609_v43 = vld [vmem:[%s18758_s2 + $0x28c] ss:$20 sps:$4 sm:$0xff]  }
 0x49f   : > { %6351 = vmatpush1.bf16.msra.mxu1 %v16594_v2  ;;  %4249 = vmatprep.mubr.bf16.mxu1 %v14561_v48  ;;  %v14565_v2 = vld [vmem:[%s18758_s2 + $0xd4] ss:$20 sps:$4 sm:$0xff]  }
 0x4a0   : > { %6352 = vmatprep.subr.bf16.mxu1 %v18816_v34 }
 0x4a3   : > { %6353 = vmatpush1.bf16.msra.mxu1 %v16607_v8  ;;  %v14569_v8 = vld [vmem:[%s18758_s2 + $0xfc] ss:$20 sps:$4 sm:$0xff]  }
 0x4a4   : > { %6354 = vmatprep.subr.bf16.mxu1 %v18816_v34 }
 0x4a6   : > { %4250 = vmatmul.mubr.bf16.gmra.mrb[16].mxu1 %v14564_v60  ;;  %v14613_v60 = vld [vmem:[%s18758_s2 + $0x2b4] ss:$20 sps:$4 sm:$0xff]  }
 0x4a7   : > { %6355 = vmatpush1.bf16.msra.mxu1 %v16616_v44  ;;  %4257 = vmatprep.mubr.bf16.mxu1 %v14565_v2  ;;  %v14632_v44 = vld [vmem:[%s18758_s2 + $0x380] ss:$20 sps:$4 sm:$0xff]   ;;  %v14672_v2 = vld [vmem:[%s18758_s2 + $0x510] ss:$20 sps:$4 sm:$0xff]  }
 0x4a8   : > { %6356 = vmatprep.subr.bf16.mxu1 %v18816_v34  ;;  %13130 = vmatprep.mubr.msk.bf16.mxu0 %vm3690_vm2, %v14632_v44  ;;  %v14615_v44 = vld [vmem:[%s18758_s2 + $0x2b0] ss:$20 sps:$4 sm:$0xff]  }
 0x4a9   : > { %13131 = vmatmul.mubr.msk.bf16.gmra.mrb[76].mxu0 %vm3690_vm2, %v14635_v6 }
 0x4aa   : > { %v17226_v58 = vpop.f32.mrb[32].mxu0 }
 0x4ab   : > { %6357 = vmatpush1.bf16.msra.mxu1 %v16622_v38  ;;  %v14572_v38 = vld [vmem:[%s18758_s2 + $0xf8] ss:$20 sps:$4 sm:$0xff]   ;;  %v17228_v49 = vpop.f32.mrb[33].mxu0 }
 0x4ac   : > { %6358 = vmatprep.subr.bf16.mxu1 %v18816_v34  ;;  %v17233_v53 = vpop.f32.mrb[34].mxu0 }
 0x4ad   : > { %v17238_v59 = vpop.f32.mrb[35].mxu0 }
 0x4ae   : > { %4258 = vmatmul.mubr.bf16.gmra.mrb[20].mxu1 %v14567_v41  ;;  %v14675_v41 = vld [vmem:[%s18758_s2 + $0x538] ss:$20 sps:$4 sm:$0xff]  }
 0x4af   : > { %6359 = vmatpush1.bf16.msra.mxu1 %v16628_v22  ;;  %4265 = vmatprep.mubr.bf16.mxu1 %v14569_v8  ;;  %v14573_v22 = vld [vmem:[%s18758_s2 + $0x124] ss:$20 sps:$4 sm:$0xff]  }
 0x4b0   : > { %6360 = vmatprep.subr.bf16.mxu1 %v18816_v34 }
 0x4b2   : > { %v17254_v30 = vpop.f32.mrb[36].mxu0 }
 0x4b3   : > { %6361 = vmatpush1.bf16.msra.mxu1 %v16634_v29  ;;  %v14577_v29 = vld [vmem:[%s18758_s2 + $0x14c] ss:$20 sps:$4 sm:$0xff]   ;;  %v17259_v17 = vpop.f32.mrb[37].mxu0 }
 0x4b4   : > { %6362 = vmatprep.subr.bf16.mxu1 %v18816_v34  ;;  %v17264_v35 = vpop.f32.mrb[38].mxu0 }
 0x4b5   : > { %v17266_v13 = vpop.f32.mrb[39].mxu0 }
 0x4b6   : > { %4266 = vmatmul.mubr.bf16.gmra.mrb[24].mxu1 %v14572_v38  ;;  %v14617_v38 = vld [vmem:[%s18758_s2 + $0x2dc] ss:$20 sps:$4 sm:$0xff]  }
 0x4b7   : > { %6363 = vmatpush1.bf16.msra.mxu1 %v16640_v39  ;;  %4273 = vmatprep.mubr.bf16.mxu1 %v14573_v22  ;;  %v14640_v39 = vld [vmem:[%s18758_s2 + $0x3d0] ss:$20 sps:$4 sm:$0xff]  }
 0x4b8   : > { %6364 = vmatprep.subr.bf16.mxu1 %v18816_v34  ;;  %13134 = vmatprep.mubr.msk.bf16.mxu0 %vm3690_vm2, %v14640_v39  ;;  %v14621_v39 = vld [vmem:[%s18758_s2 + $0x304] ss:$20 sps:$4 sm:$0xff]  }
 0x4b9   : > { %13135 = vmatmul.mubr.msk.bf16.gmra.mrb[80].mxu0 %vm3690_vm2, %v14643_v45  ;;  %v14680_v45 = vld [vmem:[%s18758_s2 + $0x560] ss:$20 sps:$4 sm:$0xff]  }
 0x4ba   : > { %13138 = vmatprep.mubr.msk.bf16.mxu0 %vm3690_vm2, %v14648_v15  ;;  %v17282_v32 = vpop.f32.mrb[40].mxu0 }
 0x4bb   : > { %6365 = vmatpush1.bf16.msra.mxu1 %v16646_v47  ;;  %v14580_v47 = vld [vmem:[%s18758_s2 + $0x148] ss:$20 sps:$4 sm:$0xff]   ;;  %v17287_v42 = vpop.f32.mrb[41].mxu0 }
 0x4bc   : > { %6366 = vmatprep.subr.bf16.mxu1 %v18816_v34  ;;  %v17292_v48 = vpop.f32.mrb[42].mxu0 }
 0x4bd   : > { %v17294_v54 = vpop.f32.mrb[43].mxu0 }
 0x4be   : > { %4274 = vmatmul.mubr.bf16.gmra.mrb[28].mxu1 %v14575_v20 }
 0x4bf   : > { %6367 = vmatpush1.bf16.msra.mxu1 %v16652_v57  ;;  %4281 = vmatprep.mubr.bf16.mxu1 %v14577_v29  ;;  %v14581_v57 = vld [vmem:[%s18758_s2 + $0x174] ss:$20 sps:$4 sm:$0xff]   ;;  %v14620_v29 = vld [vmem:[%s18758_s2 + $0x2d8] ss:$20 sps:$4 sm:$0xff]  }
 0x4c0   : > { %6368 = vmatprep.subr.bf16.mxu1 %v18816_v34 }
 0x4c1   : > { %13139 = vmatmul.mubr.msk.bf16.gmra.mrb[84].mxu0 %vm3690_vm2, %v14651_v62  ;;  %v14628_v62 = vld [vmem:[%s18758_s2 + $0x328] ss:$20 sps:$4 sm:$0xff]  }
 0x4c2   : > { %13142 = vmatprep.mubr.msk.bf16.mxu0 %vm3690_vm2, %v14656_v7  ;;  %v17310_v8 = vpop.f32.mrb[44].mxu0 }
 0x4c3   : > { %6369 = vmatpush1.bf16.msra.mxu1 %v16658_v16  ;;  %v14588_v16 = vld [vmem:[%s18758_s2 + $0x198] ss:$20 sps:$4 sm:$0xff]   ;;  %v17315_v6 = vpop.f32.mrb[45].mxu0 }
 0x4c4   : > { %6706 = vmatprep.subr.bf16.mxu1 %v18816_v34  ;;  %v17320_v22 = vpop.f32.mrb[46].mxu0 }
 0x4c5   : > { %v17322_v20 = vpop.f32.mrb[47].mxu0 }
 0x4c6   : > { %4282 = vmatmul.mubr.bf16.gmra.mrb[32].mxu1 %v14580_v47  ;;  %v14683_v47 = vld [vmem:[%s18758_s2 + $0x588] ss:$20 sps:$4 sm:$0xff]  }
 0x4c7   : > { %4289 = vmatprep.mubr.bf16.mxu1 %v14581_v57 }
 0x4c9   : > { %13143 = vmatmul.mubr.msk.bf16.gmra.mrb[88].mxu0 %vm3690_vm2, %v14659_v5  ;;  %v14631_v5 = vld [vmem:[%s18758_s2 + $0x350] ss:$20 sps:$4 sm:$0xff]  }
 0x4ca   : > { %13146 = vmatprep.mubr.msk.bf16.mxu0 %vm3690_vm2, %v14664_v26  ;;  %v17338_v57 = vpop.f32.mrb[48].mxu0  ;;  %v14637_v26 = vld [vmem:[%s18758_s2 + $0x3a4] ss:$20 sps:$4 sm:$0xff]  }
 0x4ce   : > { %4290 = vmatmul.mubr.bf16.gmra.mrb[36].mxu1 %v14583_v23  ;;  %v14623_v23 = vld [vmem:[%s18758_s2 + $0x300] ss:$20 sps:$4 sm:$0xff]  }
 0x4cf   : > { %4297 = vmatprep.mubr.bf16.mxu1 %v14585_v51  ;;  %v17343_v51 = vpop.f32.mrb[49].mxu0 }
 0x4d1   : > { %13147 = vmatmul.mubr.msk.bf16.gmra.mrb[92].mxu0 %vm3690_vm2, %v14667_v18  ;;  %v14696_v18 = vld [vmem:[%s18758_s2 + $0x600] ss:$20 sps:$4 sm:$0xff]  }
 0x4d2   : > { %13150 = vmatprep.mubr.msk.bf16.mxu0 %vm3690_vm2, %v14672_v2 }
 0x4d6   : > { %4298 = vmatmul.mubr.bf16.gmra.mrb[40].mxu1 %v14588_v16  ;;  %v14625_v16 = vld [vmem:[%s18758_s2 + $0x32c] ss:$20 sps:$4 sm:$0xff]  }
 0x4d7   : > { %4305 = vmatprep.mubr.bf16.mxu1 %v14589_v40  ;;  %v17348_v40 = vpop.f32.mrb[50].mxu0 }
 0x4d8   : > { %v17350_v15 = vpop.f32.mrb[51].mxu0 }
 0x4d9   : > { %13151 = vmatmul.mubr.msk.bf16.gmra.mrb[96].mxu0 %vm3690_vm2, %v14675_v41  ;;  %v14641_v41 = vld [vmem:[%s18758_s2 + $0x3cc] ss:$20 sps:$4 sm:$0xff]  }
 0x4da   : > { %13154 = vmatprep.mubr.msk.bf16.mxu0 %vm3690_vm2, %v14680_v45  ;;  %v14707_v45 = vld [vmem:[%s18758_s2 + $0x678] ss:$0 sps:$4 sm:$0xff]  }
 0x4de   : > { %4306 = vmatmul.mubr.bf16.gmra.mrb[44].mxu1 %v14591_v3  ;;  %v14629_v3 = vld [vmem:[%s18758_s2 + $0x354] ss:$20 sps:$4 sm:$0xff]  }
 0x4df   : > { %4313 = vmatprep.mubr.bf16.mxu1 %v14593_v0  ;;  %v14688_v0 = vld [vmem:[%s18758_s2 + $0x5b0] ss:$20 sps:$4 sm:$0xff]  }
 0x4e1   : > { %13155 = vmatmul.mubr.msk.bf16.gmra.mrb[100].mxu0 %vm3690_vm2, %v14683_v47 }
 0x4e2   : > { %13158 = vmatprep.mubr.msk.bf16.mxu0 %vm3690_vm2, %v14688_v0 }
 0x4e6   : > { %4314 = vmatmul.mubr.bf16.gmra.mrb[48].mxu1 %v14596_v55  ;;  %v14691_v55 = vld [vmem:[%s18758_s2 + $0x5d8] ss:$20 sps:$4 sm:$0xff]  }
 0x4e7   : > { %4321 = vmatprep.mubr.bf16.mxu1 %v14597_v25  ;;  %v17366_v25 = vpop.f32.mrb[52].mxu0 }
 0x4e8   : > { %v17368_v7 = vpop.f32.mrb[53].mxu0 }
 0x4e9   : > { %13159 = vmatmul.mubr.msk.bf16.gmra.mrb[104].mxu0 %vm3690_vm2, %v14691_v55 }
 0x4ea   : > { %13162 = vmatprep.mubr.msk.bf16.mxu0 %vm3690_vm2, %v14696_v18 }
 0x4ee   : > { %4322 = vmatmul.mubr.bf16.gmra.mrb[52].mxu1 %v14599_v31  ;;  %v17373_v31 = vpop.f32.mrb[54].mxu0 }
 0x4ef   : > { %4329 = vmatprep.mubr.bf16.mxu1 %v14601_v61  ;;  %v14633_v61 = vld [vmem:[%s18758_s2 + $0x37c] ss:$20 sps:$4 sm:$0xff]  }
 0x4f6   : > { %4330 = vmatmul.mubr.bf16.gmra.mrb[56].mxu1 %v14604_v4  ;;  %v17378_v4 = vpop.f32.mrb[55].mxu0 }
 0x4f7   : > { %4337 = vmatprep.mubr.bf16.mxu1 %v14605_v37  ;;  %v14636_v37 = vld [vmem:[%s18758_s2 + $0x378] ss:$20 sps:$4 sm:$0xff]  }
 0x4fe   : > { %4338 = vmatmul.mubr.bf16.gmra.mrb[60].mxu1 %v14607_v36  ;;  %v14699_v36 = vld [vmem:[%s18758_s2 + $0x628] ss:$20 sps:$4 sm:$0xff]  }
 0x4ff   : > { %4345 = vmatprep.mubr.bf16.mxu1 %v14609_v43  ;;  %13163 = vmatmul.mubr.msk.bf16.gmra.mrb[108].mxu0 %vm3690_vm2, %v14699_v36  ;;  %v17394_v43 = vpop.f32.mrb[56].mxu0 }
 0x506   : > { %4346 = vmatmul.mubr.bf16.gmra.mrb[64].mxu1 %v14612_v27  ;;  %v17396_v27 = vpop.f32.mrb[57].mxu0 }
 0x507   : > { %4353 = vmatprep.mubr.bf16.mxu1 %v14613_v60  ;;  %v14639_v60 = vld [vmem:[%s18758_s2 + $0x3a0] ss:$20 sps:$4 sm:$0xff]   ;;  %v17401_v2 = vpop.f32.mrb[58].mxu0 }
 0x50e   : > { %4354 = vmatmul.mubr.bf16.gmra.mrb[68].mxu1 %v14615_v44  ;;  %v17406_v44 = vpop.f32.mrb[59].mxu0 }
 0x50f   : > { %4361 = vmatprep.mubr.bf16.mxu1 %v14617_v38  ;;  %v14644_v38 = vld [vmem:[%s18758_s2 + $0x3c8] ss:$20 sps:$4 sm:$0xff]   ;;  %v17422_v47 = vpop.f32.mrb[60].mxu0 }
 0x516   : > { %4362 = vmatmul.mubr.bf16.gmra.mrb[72].mxu1 %v14620_v29  ;;  %v14645_v29 = vld [vmem:[%s18758_s2 + $0x3f4] ss:$20 sps:$4 sm:$0xff]  }
 0x517   : > { %4369 = vmatprep.mubr.bf16.mxu1 %v14621_v39  ;;  %v14704_v39 = vld [vmem:[%s18758_s2 + $0x650] ss:$20 sps:$4 sm:$0xff]  }
 0x518   : > { %13166 = vmatprep.mubr.msk.bf16.mxu0 %vm3690_vm2, %v14704_v39 }
 0x519   : > { %13167 = vmatmul.mubr.msk.bf16.gmra.mrb[112].mxu0 %vm3690_vm2, %v14707_v45 }
 0x51e   : > { %4370 = vmatmul.mubr.bf16.gmra.mrb[76].mxu1 %v14623_v23  ;;  %v17424_v23 = vpop.f32.mrb[61].mxu0 }
 0x51f   : > { %4377 = vmatprep.mubr.bf16.mxu1 %v14625_v16  ;;  %v14647_v16 = vld [vmem:[%s18758_s2 + $0x3f0] ss:$20 sps:$4 sm:$0xff]  }
 0x526   : > { %4378 = vmatmul.mubr.bf16.gmra.mrb[80].mxu1 %v14628_v62  ;;  %v17429_v62 = vpop.f32.mrb[62].mxu0 }
 0x527   : > { %4385 = vmatprep.mubr.bf16.mxu1 %v14629_v3  ;;  %v14649_v3 = vld [vmem:[%s18758_s2 + $0x41c] ss:$20 sps:$4 sm:$0xff]   ;;  %v17434_v0 = vpop.f32.mrb[63].mxu0 }
 0x528   : > { %v17444_v36 = vpop.f32.mrb[64].mxu0 }
 0x52e   : > { %4386 = vmatmul.mubr.bf16.gmra.mrb[84].mxu1 %v14631_v5 }
 0x52f   : > { %4393 = vmatprep.mubr.bf16.mxu1 %v14633_v61  ;;  %v14652_v61 = vld [vmem:[%s18758_s2 + $0x418] ss:$20 sps:$4 sm:$0xff]  }
 0x536   : > { %4394 = vmatmul.mubr.bf16.gmra.mrb[88].mxu1 %v14636_v37 }
 0x537   : > { %4401 = vmatprep.mubr.bf16.mxu1 %v14637_v26  ;;  %v14653_v26 = vld [vmem:[%s18758_s2 + $0x444] ss:$20 sps:$4 sm:$0xff]  }
 0x53e   : > { %4402 = vmatmul.mubr.bf16.gmra.mrb[92].mxu1 %v14639_v60 }
 0x53f   : > { %4409 = vmatprep.mubr.bf16.mxu1 %v14641_v41  ;;  %v17446_v41 = vpop.f32.mrb[65].mxu0 }
 0x540   : > { %v17451_v39 = vpop.f32.mrb[66].mxu0 }
 0x546   : > { %4410 = vmatmul.mubr.bf16.gmra.mrb[96].mxu1 %v14644_v38 }
 0x547   : > { %4417 = vmatprep.mubr.bf16.mxu1 %v14645_v29  ;;  %v14655_v29 = vld [vmem:[%s18758_s2 + $0x440] ss:$20 sps:$4 sm:$0xff]  }
 0x54e   : > { %4418 = vmatmul.mubr.bf16.gmra.mrb[100].mxu1 %v14647_v16 }
 0x54f   : > { %4425 = vmatprep.mubr.bf16.mxu1 %v14649_v3  ;;  %v14657_v3 = vld [vmem:[%s18758_s2 + $0x46c] ss:$20 sps:$4 sm:$0xff]  }
 0x551   : > { %v17436_v55 = vpop.f32.mrb[164].mxu1 }
 0x552   : > { %18838 = vst [vmem:[#allocation17_spill] sm:$0xff] %v17436_v55  ;;  %v4181_v5 = vpop.f32.mrb[165].mxu1 }
 0x553   : > { %v4182_v37 = vpop.f32.mrb[166].mxu1  ;;  %v17459_v5 = vpop.f32.mrb[67].mxu0 }
 0x554   : > { %v4183_v18 = vpop.f32.mrb[167].mxu1 }
 0x556   : > { %4426 = vmatmul.mubr.bf16.gmra.mrb[104].mxu1 %v14652_v61 }
 0x557   : > { %4433 = vmatprep.mubr.bf16.mxu1 %v14653_v26 }
 0x559   : > { %v4219_v60 = vpop.f32.mrb[0].mxu1 }
 0x55a   : > { %v4221_v38 = vpop.f32.mrb[1].mxu1  ;;  %v17454_v45 = vadd.f32 %v17228_v49, %v4219_v60  ;;  %v14660_v49 = vld [vmem:[%s18758_s2 + $0x468] ss:$20 sps:$4 sm:$0xff]  }
 0x55b   : > { %v4222_v16 = vpop.f32.mrb[2].mxu1 }
 0x55c   : > { %18839 = vst [vmem:[#allocation18_spill] sm:$0xff] %v17454_v45  ;;  %v4224_v61 = vpop.f32.mrb[3].mxu1  ;;  %v17462_v37 = vadd.f32 %v17238_v59, %v4222_v16  ;;  %v14661_v45 = vld [vmem:[%s18758_s2 + $0x494] ss:$20 sps:$4 sm:$0xff]  }
 0x55e   : > { %18840 = vst [vmem:[#allocation19_spill] sm:$0xff] %v17462_v37  ;;  %4434 = vmatmul.mubr.bf16.gmra.mrb[108].mxu1 %v14655_v29  ;;  %v17476_v29 = vpop.f32.mrb[68].mxu0 }
 0x55f   : > { %4441 = vmatprep.mubr.bf16.mxu1 %v14657_v3  ;;  %v17478_v16 = vpop.f32.mrb[69].mxu0 }
 0x561   : > { %v4227_v26 = vpop.f32.mrb[4].mxu1 }
 0x562   : > { %v17465_v18 = vadd.f32 %v17226_v58, %v4227_v26  ;;  %v4229_v38 = vpop.f32.mrb[5].mxu1  ;;  %v14663_v26 = vld [vmem:[%s18758_s2 + $0x490] ss:$20 sps:$4 sm:$0xff]  }
 0x563   : > { %v4230_v60 = vpop.f32.mrb[6].mxu1  ;;  %v17483_v38 = vpop.f32.mrb[70].mxu0 }
 0x564   : > { %18841 = vst [vmem:[#allocation20_spill] sm:$0xff] %v17465_v18  ;;  %v17474_v61 = vadd.f32 %v17233_v53, %v4230_v60  ;;  %v4232_v59 = vpop.f32.mrb[7].mxu1 }
 0x566   : > { %18842 = vst [vmem:[#allocation21_spill] sm:$0xff] %v17474_v61  ;;  %4442 = vmatmul.mubr.bf16.gmra.mrb[112].mxu1 %v14660_v49  ;;  %v17491_v49 = vpop.f32.mrb[71].mxu0 }
 0x567   : > { %4449 = vmatprep.mubr.bf16.mxu1 %v14661_v45  ;;  %v14665_v45 = vld [vmem:[%s18758_s2 + $0x4bc] ss:$20 sps:$4 sm:$0xff]  }
 0x569   : > { %v4235_v58 = vpop.f32.mrb[8].mxu1 }
 0x56a   : > { %v4237_v3 = vpop.f32.mrb[9].mxu1  ;;  %v17486_v18 = vadd.f32 %v17259_v17, %v4235_v58  ;;  %v14668_v17 = vld [vmem:[%s18758_s2 + $0x4b8] ss:$20 sps:$4 sm:$0xff]  }
 0x56b   : > { %v4238_v53 = vpop.f32.mrb[10].mxu1 }
 0x56c   : > { %18843 = vst [vmem:[#allocation22_spill] sm:$0xff] %v17486_v18  ;;  %v4240_v60 = vpop.f32.mrb[11].mxu1  ;;  %v17494_v59 = vadd.f32 %v17266_v13, %v4238_v53  ;;  %v14669_v18 = vld [vmem:[%s18758_s2 + $0x4e4] ss:$20 sps:$4 sm:$0xff]  }
 0x56e   : > { %18844 = vst [vmem:[#allocation23_spill] sm:$0xff] %v17494_v59  ;;  %4450 = vmatmul.mubr.bf16.gmra.mrb[116].mxu1 %v14663_v26  ;;  %v17508_v26 = vpop.f32.mrb[72].mxu0  ;;  %v14677_v59 = vld [vmem:[%s18758_s2 + $0x534] ss:$20 sps:$4 sm:$0xff]  }
 0x56f   : > { %4457 = vmatprep.mubr.bf16.mxu1 %v14665_v45  ;;  %v17510_v53 = vpop.f32.mrb[73].mxu0  ;;  %v14671_v45 = vld [vmem:[%s18758_s2 + $0x4e0] ss:$20 sps:$4 sm:$0xff]  }
 0x571   : > { %v4243_v3 = vpop.f32.mrb[12].mxu1 }
 0x572   : > { %v17497_v61 = vadd.f32 %v17254_v30, %v4243_v3  ;;  %v4245_v37 = vpop.f32.mrb[13].mxu1  ;;  %v17515_v3 = vpop.f32.mrb[74].mxu0 }
 0x573   : > { %v4246_v58 = vpop.f32.mrb[14].mxu1 }
 0x574   : > { %18845 = vst [vmem:[#allocation24_spill] sm:$0xff] %v17497_v61  ;;  %v17506_v60 = vadd.f32 %v17264_v35, %v4246_v58  ;;  %v4248_v13 = vpop.f32.mrb[15].mxu1 }
 0x576   : > { %18846 = vst [vmem:[#allocation25_spill] sm:$0xff] %v17506_v60  ;;  %4458 = vmatmul.mubr.bf16.gmra.mrb[120].mxu1 %v14668_v17  ;;  %v17523_v17 = vpop.f32.mrb[75].mxu0 }
 0x577   : > { %4465 = vmatprep.mubr.bf16.mxu1 %v14669_v18  ;;  %v14673_v18 = vld [vmem:[%s18758_s2 + $0x50c] ss:$20 sps:$4 sm:$0xff]  }
 0x579   : > { %v4251_v30 = vpop.f32.mrb[16].mxu1 }
 0x57a   : > { %v4253_v37 = vpop.f32.mrb[17].mxu1  ;;  %v17518_v61 = vadd.f32 %v17287_v42, %v4251_v30  ;;  %v14676_v42 = vld [vmem:[%s18758_s2 + $0x508] ss:$20 sps:$4 sm:$0xff]  }
 0x57b   : > { %v4254_v35 = vpop.f32.mrb[18].mxu1 }
 0x57c   : > { %18847 = vst [vmem:[#allocation26_spill] sm:$0xff] %v17518_v61  ;;  %v4256_v58 = vpop.f32.mrb[19].mxu1  ;;  %v17526_v13 = vadd.f32 %v17294_v54, %v4254_v35 }
 0x57e   : > { %18848 = vst [vmem:[#allocation27_spill] sm:$0xff] %v17526_v13  ;;  %4466 = vmatmul.mubr.bf16.gmra.mrb[124].mxu1 %v14671_v45  ;;  %v17540_v45 = vpop.f32.mrb[76].mxu0  ;;  %v14685_v13 = vld [vmem:[%s18758_s2 + $0x584] ss:$20 sps:$4 sm:$0xff]  }
 0x57f   : > { %4473 = vmatprep.mubr.bf16.mxu1 %v14673_v18  ;;  %v17542_v35 = vpop.f32.mrb[77].mxu0 }
 0x581   : > { %v4259_v37 = vpop.f32.mrb[20].mxu1 }
 0x582   : > { %v4261_v60 = vpop.f32.mrb[21].mxu1  ;;  %v17532_v30 = vadd.f32 %v17282_v32, %v4259_v37  ;;  %v14679_v32 = vld [vmem:[%s18758_s2 + $0x530] ss:$20 sps:$4 sm:$0xff]   ;;  %v17547_v37 = vpop.f32.mrb[78].mxu0 }
 0x583   : > { %v4262_v61 = vpop.f32.mrb[22].mxu1 }
 0x584   : > { %18849 = vst [vmem:[#allocation28_spill] sm:$0xff] %v17532_v30  ;;  %v4264_v58 = vpop.f32.mrb[23].mxu1  ;;  %v17538_v54 = vadd.f32 %v17292_v48, %v4262_v61  ;;  %v14681_v48 = vld [vmem:[%s18758_s2 + $0x55c] ss:$20 sps:$4 sm:$0xff]   ;;  %v17555_v61 = vpop.f32.mrb[79].mxu0 }
 0x586   : > { %18850 = vst [vmem:[#allocation29_spill] sm:$0xff] %v17538_v54  ;;  %4474 = vmatmul.mubr.bf16.gmra.mrb[128].mxu1 %v14676_v42 }
 0x587   : > { %4481 = vmatprep.mubr.bf16.mxu1 %v14677_v59 }
 0x589   : > { %v4267_v60 = vpop.f32.mrb[24].mxu1 }
 0x58a   : > { %v4269_v18 = vpop.f32.mrb[25].mxu1  ;;  %v17550_v30 = vadd.f32 %v17315_v6, %v4267_v60  ;;  %v14684_v6 = vld [vmem:[%s18758_s2 + $0x558] ss:$20 sps:$4 sm:$0xff]  }
 0x58b   : > { %v4270_v58 = vpop.f32.mrb[26].mxu1 }
 0x58c   : > { %18851 = vst [vmem:[#allocation30_spill] sm:$0xff] %v17550_v30  ;;  %v4272_v59 = vpop.f32.mrb[27].mxu1  ;;  %v17558_v42 = vadd.f32 %v17322_v20, %v4270_v58 }
 0x58e   : > { %18852 = vst [vmem:[#allocation31_spill] sm:$0xff] %v17558_v42  ;;  %4482 = vmatmul.mubr.bf16.gmra.mrb[132].mxu1 %v14679_v32  ;;  %v17572_v32 = vpop.f32.mrb[80].mxu0  ;;  %v14693_v42 = vld [vmem:[%s18758_s2 + $0x5d4] ss:$20 sps:$4 sm:$0xff]  }
 0x58f   : > { %4489 = vmatprep.mubr.bf16.mxu1 %v14681_v48  ;;  %v17574_v58 = vpop.f32.mrb[81].mxu0 }
 0x591   : > { %v4275_v18 = vpop.f32.mrb[28].mxu1 }
 0x592   : > { %v4277_v54 = vpop.f32.mrb[29].mxu1  ;;  %v17564_v60 = vadd.f32 %v17310_v8, %v4275_v18  ;;  %v14687_v8 = vld [vmem:[%s18758_s2 + $0x580] ss:$20 sps:$4 sm:$0xff]   ;;  %v17579_v18 = vpop.f32.mrb[82].mxu0 }
 0x593   : > { %v4278_v30 = vpop.f32.mrb[30].mxu1 }
 0x594   : > { %18853 = vst [vmem:[#allocation32_spill] sm:$0xff] %v17564_v60  ;;  %v4280_v59 = vpop.f32.mrb[31].mxu1  ;;  %v17570_v20 = vadd.f32 %v17320_v22, %v4278_v30  ;;  %v14689_v22 = vld [vmem:[%s18758_s2 + $0x5ac] ss:$20 sps:$4 sm:$0xff]   ;;  %v17587_v30 = vpop.f32.mrb[83].mxu0 }
 0x596   : > { %18854 = vst [vmem:[#allocation33_spill] sm:$0xff] %v17570_v20  ;;  %4490 = vmatmul.mubr.bf16.gmra.mrb[136].mxu1 %v14684_v6 }
 0x597   : > { %4497 = vmatprep.mubr.bf16.mxu1 %v14685_v13 }
 0x599   : > { %v4283_v54 = vpop.f32.mrb[32].mxu1 }
 0x59a   : > { %v4285_v48 = vpop.f32.mrb[33].mxu1  ;;  %v17582_v60 = vadd.f32 %v17343_v51, %v4283_v54  ;;  %v14692_v51 = vld [vmem:[%s18758_s2 + $0x5a8] ss:$20 sps:$4 sm:$0xff]  }
 0x59b   : > { %v4286_v59 = vpop.f32.mrb[34].mxu1 }
 0x59c   : > { %18855 = vst [vmem:[#allocation34_spill] sm:$0xff] %v17582_v60  ;;  %v4288_v13 = vpop.f32.mrb[35].mxu1  ;;  %v17590_v6 = vadd.f32 %v17350_v15, %v4286_v59 }
 0x59e   : > { %18856 = vst [vmem:[#allocation35_spill] sm:$0xff] %v17590_v6  ;;  %4498 = vmatmul.mubr.bf16.gmra.mrb[140].mxu1 %v14687_v8 }
 0x59f   : > { %4505 = vmatprep.mubr.bf16.mxu1 %v14689_v22 }
 0x5a1   : > { %v4291_v48 = vpop.f32.mrb[36].mxu1 }
 0x5a2   : > { %v4293_v20 = vpop.f32.mrb[37].mxu1  ;;  %v17596_v54 = vadd.f32 %v17338_v57, %v4291_v48  ;;  %v14695_v57 = vld [vmem:[%s18758_s2 + $0x5d0] ss:$20 sps:$4 sm:$0xff]  }
 0x5a3   : > { %v4294_v60 = vpop.f32.mrb[38].mxu1  ;;  %v17604_v20 = vpop.f32.mrb[84].mxu0 }
 0x5a4   : > { %18857 = vst [vmem:[#allocation36_spill] sm:$0xff] %v17596_v54  ;;  %v4296_v13 = vpop.f32.mrb[39].mxu1  ;;  %v17602_v15 = vadd.f32 %v17348_v40, %v4294_v60  ;;  %v17609_v22 = vpop.f32.mrb[85].mxu0  ;;  %v14697_v40 = vld [vmem:[%s18758_s2 + $0x5fc] ss:$20 sps:$4 sm:$0xff]  }
 0x5a5   : > { %v17617_v60 = vpop.f32.mrb[86].mxu0 }
 0x5a6   : > { %18858 = vst [vmem:[#allocation37_spill] sm:$0xff] %v17602_v15  ;;  %4506 = vmatmul.mubr.bf16.gmra.mrb[144].mxu1 %v14692_v51  ;;  %v17619_v51 = vpop.f32.mrb[87].mxu0 }
 0x5a7   : > { %4513 = vmatprep.mubr.bf16.mxu1 %v14693_v42 }
 0x5a9   : > { %v4299_v8 = vpop.f32.mrb[40].mxu1 }
 0x5aa   : > { %v4301_v59 = vpop.f32.mrb[41].mxu1  ;;  %v17612_v48 = vadd.f32 %v17368_v7, %v4299_v8  ;;  %v14700_v7 = vld [vmem:[%s18758_s2 + $0x5f8] ss:$20 sps:$4 sm:$0xff]  }
 0x5ab   : > { %v4302_v54 = vpop.f32.mrb[42].mxu1 }
 0x5ac   : > { %18859 = vst [vmem:[#allocation38_spill] sm:$0xff] %v17612_v48  ;;  %v4304_v42 = vpop.f32.mrb[43].mxu1  ;;  %v17622_v13 = vadd.f32 %v17378_v4, %v4302_v54 }
 0x5ad   : > { %v14701_v42 = vld [vmem:[%s18758_s2 + $0x624] ss:$20 sps:$4 sm:$0xff]  }
 0x5ae   : > { %18860 = vst [vmem:[#allocation39_spill] sm:$0xff] %v17622_v13  ;;  %4514 = vmatmul.mubr.bf16.gmra.mrb[148].mxu1 %v14695_v57 }
 0x5af   : > { %4521 = vmatprep.mubr.bf16.mxu1 %v14697_v40 }
 0x5b1   : > { %v4307_v59 = vpop.f32.mrb[44].mxu1 }
 0x5b2   : > { %v4309_v15 = vpop.f32.mrb[45].mxu1  ;;  %v17628_v8 = vadd.f32 %v17366_v25, %v4307_v59  ;;  %v14703_v25 = vld [vmem:[%s18758_s2 + $0x620] ss:$20 sps:$4 sm:$0xff]  }
 0x5b3   : > { %v4310_v48 = vpop.f32.mrb[46].mxu1  ;;  %v17636_v15 = vpop.f32.mrb[88].mxu0 }
 0x5b4   : > { %18861 = vst [vmem:[#allocation40_spill] sm:$0xff] %v17628_v8  ;;  %v4312_v6 = vpop.f32.mrb[47].mxu1  ;;  %v17634_v4 = vadd.f32 %v17373_v31, %v4310_v48  ;;  %18863 = vst [vmem:[#allocation42_spill] sm:$0xff] %v17636_v15  ;;  %v17641_v40 = vpop.f32.mrb[89].mxu0  ;;  %v14705_v31 = vld [vmem:[%s18758_s2 + $0x64c] ss:$20 sps:$4 sm:$0xff]  }
 0x5b5   : > { %v17649_v6 = vpop.f32.mrb[90].mxu0 }
 0x5b6   : > { %18862 = vst [vmem:[#allocation41_spill] sm:$0xff] %v17634_v4  ;;  %4522 = vmatmul.mubr.bf16.gmra.mrb[152].mxu1 %v14700_v7  ;;  %18865 = vst [vmem:[#allocation44_spill] sm:$0xff] %v17649_v6  ;;  %v17651_v7 = vpop.f32.mrb[91].mxu0 }
 0x5b7   : > { %4529 = vmatprep.mubr.bf16.mxu1 %v14701_v42 }
 0x5b9   : > { %v4315_v54 = vpop.f32.mrb[48].mxu1 }
 0x5ba   : > { %v4317_v57 = vpop.f32.mrb[49].mxu1  ;;  %v17644_v59 = vadd.f32 %v17396_v27, %v4315_v54  ;;  %v2646_v27 = vld [vmem:[%s18758_s2 + $0x670] sm:$0xff] }
 0x5bb   : > { %v4318_v8 = vpop.f32.mrb[50].mxu1  ;;  %v12197_v13 = vcombine.high %v2646_v27, %v2646_v27 }
 0x5bc   : > { %18864 = vst [vmem:[#allocation43_spill] sm:$0xff] %v17644_v59  ;;  %v4320_v48 = vpop.f32.mrb[51].mxu1  ;;  %v17654_v42 = vadd.f32 %v17406_v44, %v4318_v8  ;;  %v14708_v59 = vld [vmem:[%s18758_s2 + $0x648] ss:$20 sps:$4 sm:$0xff]  }
 0x5be   : > { %18866 = vst [vmem:[#allocation45_spill] sm:$0xff] %v17654_v42  ;;  %4530 = vmatmul.mubr.bf16.gmra.mrb[156].mxu1 %v14703_v25  ;;  %v17668_v25 = vpop.f32.mrb[92].mxu0 }
 0x5bf   : > { %4537 = vmatprep.mubr.bf16.mxu1 %v14705_v31  ;;  %v17670_v42 = vpop.f32.mrb[93].mxu0 }
 0x5c1   : > { %v4323_v54 = vpop.f32.mrb[52].mxu1 }
 0x5c2   : > { %v4325_v57 = vpop.f32.mrb[53].mxu1  ;;  %v17663_v4 = vadd.f32 %v17394_v43, %v4323_v54  ;;  %v14713_v54 = vld [vmem:[#allocation3 + $0x4] ss:$20 sps:$4 sm:$0xff]  }
 0x5c3   : > { %v4326_v48 = vpop.f32.mrb[54].mxu1  ;;  %v12196_v57 = vcombine.low %v2646_v27, %v2646_v27  ;;  %v14711_v27 = vld [vmem:[#allocation3] ss:$20 sps:$4 sm:$0xff]  }
 0x5c4   : > { %18867 = vst [vmem:[#allocation46_spill] sm:$0xff] %v17663_v4  ;;  %v4328_v55 = vpop.f32.mrb[55].mxu1  ;;  %v17666_v44 = vadd.f32 %v17401_v2, %v4326_v48  ;;  %v17675_v4 = vpop.f32.mrb[94].mxu0 }
 0x5c5   : > { %v17677_v15 = vpop.f32.mrb[95].mxu0 }
 0x5c6   : > { %4538 = vmatmul.mubr.bf16.gmra.mrb[160].mxu1 %v14708_v59 }
 0x5c7   : > { %4545 = vmatprep.mubr.bf16.mxu1 %v12197_v13 }
 0x5c9   : > { %v4331_v8 = vpop.f32.mrb[56].mxu1 }
 0x5ca   : > { %v4333_v31 = vpop.f32.mrb[57].mxu1  ;;  %v17673_v6 = vadd.f32 %v17424_v23, %v4331_v8  ;;  %v14714_v8 = vld [vmem:[#allocation3 + $0x2c] ss:$20 sps:$4 sm:$0xff]  }
 0x5cb   : > { %v4334_v43 = vpop.f32.mrb[58].mxu1 }
 0x5cc   : > { %18868 = vst [vmem:[#allocation47_spill] sm:$0xff] %v17673_v6  ;;  %v4336_v55 = vpop.f32.mrb[59].mxu1  ;;  %v17680_v2 = vadd.f32 %v17434_v0, %v4334_v43 }
 0x5ce   : > { %4546 = vmatmul.mubr.bf16.gmra.mrb[168].mxu1 %v12196_v57  ;;  %v17690_v57 = vpop.f32.mrb[96].mxu0 }
 0x5cf   : > { %6370 = vmatprep.mubr.bf16.mxu1 %v14713_v54  ;;  %v14716_v54 = vld [vmem:[#allocation3 + $0x28] ss:$20 sps:$4 sm:$0xff]   ;;  %v17692_v55 = vpop.f32.mrb[97].mxu0 }
 0x5d1   : > { %v4339_v13 = vpop.f32.mrb[60].mxu1 }
 0x5d2   : > { %v4341_v59 = vpop.f32.mrb[61].mxu1  ;;  %v17683_v48 = vadd.f32 %v17422_v47, %v4339_v13  ;;  %v14717_v13 = vld [vmem:[#allocation3 + $0x54] ss:$20 sps:$4 sm:$0xff]  }
 0x5d3   : > { %v4342_v23 = vpop.f32.mrb[62].mxu1  ;;  %v17698_v59 = vpop.f32.mrb[98].mxu0 }
 0x5d4   : > { %v4344_v31 = vpop.f32.mrb[63].mxu1  ;;  %v17686_v6 = vadd.f32 %v17429_v62, %v4342_v23 }
 0x5d6   : > { %6371 = vmatmul.mubr.bf16.vlgmr.msra.gmra.mrb[172].mxu1 %v14711_v27  ;;  %v17701_v27 = vpop.f32.mrb[99].mxu0 }
 0x5d7   : > { %6707 = vmatpush1.bf16.msra.mxu1 %v16670_v12  ;;  %6378 = vmatprep.mubr.bf16.mxu1 %v14714_v8  ;;  %v14719_v8 = vld [vmem:[#allocation3 + $0x50] ss:$20 sps:$4 sm:$0xff]  }
 0x5d8   : > { %6708 = vmatprep.subr.bf16.mxu1 %v18816_v34 }
 0x5d9   : > { %v4347_v0 = vpop.f32.mrb[64].mxu1 }
 0x5da   : > { %v4349_v43 = vpop.f32.mrb[65].mxu1  ;;  %v17695_v47 = vadd.f32 %v17446_v41, %v4347_v0 }
 0x5db   : > { %6709 = vmatpush1.bf16.msra.mxu1 %v16682_v24  ;;  %v4350_v62 = vpop.f32.mrb[66].mxu1  ;;  %v14720_v43 = vld [vmem:[#allocation3 + $0x7c] ss:$20 sps:$4 sm:$0xff]  }
 0x5dc   : > { %v4352_v12 = vpop.f32.mrb[67].mxu1  ;;  %6710 = vmatprep.subr.bf16.mxu1 %v18816_v34  ;;  %v17704_v23 = vadd.f32 %v17459_v5, %v4350_v62  ;;  %v14722_v62 = vld [vmem:[#allocation3 + $0x78] ss:$20 sps:$4 sm:$0xff]  }
 0x5de   : > { %6379 = vmatmul.mubr.bf16.gmra.mrb[176].mxu1 %v14716_v54  ;;  %v17718_v54 = vpop.f32.mrb[100].mxu0 }
 0x5df   : > { %6711 = vmatpush1.bf16.msra.mxu1 %v16694_v1  ;;  %6386 = vmatprep.mubr.bf16.mxu1 %v14717_v13 }
 0x5e0   : > { %6712 = vmatprep.subr.bf16.mxu1 %v18816_v34 }
 0x5e1   : > { %v4355_v41 = vpop.f32.mrb[68].mxu1 }
 0x5e2   : > { %v4357_v24 = vpop.f32.mrb[69].mxu1  ;;  %v17709_v31 = vadd.f32 %v17444_v36, %v4355_v41  ;;  %v14723_v41 = vld [vmem:[#allocation3 + $0xa4] ss:$20 sps:$4 sm:$0xff]  }
 0x5e3   : > { %6713 = vmatpush1.bf16.msra.mxu1 %v16706_v50  ;;  %v4358_v0 = vpop.f32.mrb[70].mxu1  ;;  %v17720_v50 = vpop.f32.mrb[101].mxu0 }
 0x5e4   : > { %v4360_v12 = vpop.f32.mrb[71].mxu1  ;;  %6714 = vmatprep.subr.bf16.mxu1 %v18816_v34  ;;  %v17714_v5 = vadd.f32 %v17451_v39, %v4358_v0  ;;  %v17726_v24 = vpop.f32.mrb[102].mxu0 }
 0x5e5   : > { %v14725_v12 = vld [vmem:[#allocation3 + $0xa0] ss:$20 sps:$4 sm:$0xff]  }
 0x5e6   : > { %6387 = vmatmul.mubr.bf16.gmra.mrb[180].mxu1 %v14719_v8  ;;  %v17729_v8 = vpop.f32.mrb[103].mxu0 }
 0x5e7   : > { %6715 = vmatpush1.bf16.msra.mxu1 %v16722_v63  ;;  %6394 = vmatprep.mubr.bf16.mxu1 %v14720_v43 }
 0x5e8   : > { %6716 = vmatprep.subr.bf16.mxu1 %v18816_v34 }
 0x5e9   : > { %v4363_v1 = vpop.f32.mrb[72].mxu1 }
 0x5ea   : > { %v4365_v36 = vpop.f32.mrb[73].mxu1  ;;  %v17723_v13 = vadd.f32 %v17478_v16, %v4363_v1 }
 0x5eb   : > { %6717 = vmatpush1.bf16.msra.mxu1 %v16734_v46  ;;  %v4366_v39 = vpop.f32.mrb[74].mxu1  ;;  %v14726_v36 = vld [vmem:[#allocation3 + $0xcc] ss:$20 sps:$4 sm:$0xff]  }
 0x5ec   : > { %v4368_v63 = vpop.f32.mrb[75].mxu1  ;;  %6718 = vmatprep.subr.bf16.mxu1 %v18816_v34  ;;  %v17732_v0 = vadd.f32 %v17491_v49, %v4366_v39  ;;  %v14728_v39 = vld [vmem:[#allocation3 + $0xc8] ss:$20 sps:$4 sm:$0xff]  }
 0x5ee   : > { %18869 = vst [vmem:[#allocation48_spill] sm:$0xff] %v17732_v0  ;;  %6395 = vmatmul.mubr.bf16.gmra.mrb[184].mxu1 %v14722_v62 }
 0x5ef   : > { %6719 = vmatpush1.bf16.msra.mxu1 %v16746_v11  ;;  %6402 = vmatprep.mubr.bf16.mxu1 %v14723_v41 }
 0x5f0   : > { %6720 = vmatprep.subr.bf16.mxu1 %v18816_v34 }
 0x5f1   : > { %v4371_v16 = vpop.f32.mrb[76].mxu1 }
 0x5f2   : > { %v17737_v46 = vadd.f32 %v17476_v29, %v4371_v16  ;;  %v4373_v43 = vpop.f32.mrb[77].mxu1  ;;  %v17746_v29 = vpop.f32.mrb[104].mxu0  ;;  %v14729_v16 = vld [vmem:[#allocation3 + $0xf4] ss:$20 sps:$4 sm:$0xff]  }
 0x5f3   : > { %6721 = vmatpush1.bf16.msra.mxu1 %v16758_v19  ;;  %v4374_v1 = vpop.f32.mrb[78].mxu1  ;;  %v17748_v19 = vpop.f32.mrb[105].mxu0 }
 0x5f4   : > { %18870 = vst [vmem:[#allocation49_spill] sm:$0xff] %v17737_v46  ;;  %v17741_v63 = vadd.f32 %v17483_v38, %v4374_v1  ;;  %v4376_v49 = vpop.f32.mrb[79].mxu1  ;;  %6722 = vmatprep.subr.bf16.mxu1 %v18816_v34  ;;  %v17754_v43 = vpop.f32.mrb[106].mxu0  ;;  %v14949_v46 = vld [vmem:[#allocation3 + $0x468] ss:$20 sps:$4 sm:$0xff]  }
 0x5f6   : > { %18871 = vst [vmem:[#allocation50_spill] sm:$0xff] %v17741_v63  ;;  %6403 = vmatmul.mubr.bf16.gmra.mrb[188].mxu1 %v14725_v12  ;;  %v17757_v12 = vpop.f32.mrb[107].mxu0 }
 0x5f7   : > { %6723 = vmatpush1.bf16.msra.mxu1 %v16770_v52  ;;  %6410 = vmatprep.mubr.bf16.mxu1 %v14726_v36  ;;  %v14731_v36 = vld [vmem:[#allocation3 + $0xf0] ss:$20 sps:$4 sm:$0xff]  }
 0x5f8   : > { %6724 = vmatprep.subr.bf16.mxu1 %v18816_v34 }
 0x5f9   : > { %v4379_v11 = vpop.f32.mrb[80].mxu1 }
 0x5fa   : > { %v4381_v62 = vpop.f32.mrb[81].mxu1  ;;  %v17751_v41 = vadd.f32 %v17510_v53, %v4379_v11 }
 0x5fb   : > { %6725 = vmatpush1.bf16.msra.mxu1 %v16782_v21  ;;  %v4382_v38 = vpop.f32.mrb[82].mxu1  ;;  %v14732_v62 = vld [vmem:[#allocation3 + $0x11c] ss:$20 sps:$4 sm:$0xff]  }
 0x5fc   : > { %18872 = vst [vmem:[#allocation51_spill] sm:$0xff] %v17751_v41  ;;  %v4384_v52 = vpop.f32.mrb[83].mxu1  ;;  %6726 = vmatprep.subr.bf16.mxu1 %v18816_v34  ;;  %v17760_v1 = vadd.f32 %v17523_v17, %v4382_v38  ;;  %v14734_v38 = vld [vmem:[#allocation3 + $0x118] ss:$20 sps:$4 sm:$0xff]  }
 0x5fe   : > { %18873 = vst [vmem:[#allocation52_spill] sm:$0xff] %v17760_v1  ;;  %6411 = vmatmul.mubr.bf16.gmra.mrb[192].mxu1 %v14728_v39  ;;  %v17774_v39 = vpop.f32.mrb[108].mxu0 }
 0x5ff   : > { %6727 = vmatpush1.bf16.msra.mxu1 %v16794_v33  ;;  %6418 = vmatprep.mubr.bf16.mxu1 %v14729_v16  ;;  %v17779_v16 = vpop.f32.mrb[109].mxu0 }
 0x600   : > { %6728 = vmatprep.subr.bf16.mxu1 %v18816_v34 }
 0x601   : > { %v4387_v53 = vpop.f32.mrb[84].mxu1 }
 0x602   : > { %v4389_v21 = vpop.f32.mrb[85].mxu1  ;;  %v17765_v49 = vadd.f32 %v17508_v26, %v4387_v53  ;;  %v14735_v53 = vld [vmem:[#allocation3 + $0x144] ss:$20 sps:$4 sm:$0xff]  }
 0x603   : > { %6729 = vmatpush1.bf16.msra.mxu1 %v16806_v14  ;;  %v4390_v11 = vpop.f32.mrb[86].mxu1  ;;  %v17782_v21 = vpop.f32.mrb[110].mxu0 }
 0x604   : > { %18874 = vst [vmem:[#allocation53_spill] sm:$0xff] %v17765_v49  ;;  %v4392_v52 = vpop.f32.mrb[87].mxu1  ;;  %6730 = vmatprep.subr.bf16.mxu1 %v18816_v34  ;;  %v17770_v17 = vadd.f32 %v17515_v3, %v4390_v11  ;;  %v17788_v11 = vpop.f32.mrb[111].mxu0 }
 0x606   : > { %18875 = vst [vmem:[#allocation54_spill] sm:$0xff] %v17770_v17  ;;  %6419 = vmatmul.mubr.bf16.gmra.mrb[196].mxu1 %v14731_v36  ;;  %v18920_v17 = vld [vmem:[#allocation19_spill] sm:$0xff] }
 0x607   : > { %6731 = vmatpush1.bf16.msra.mxu1 %v16818_v9  ;;  %6426 = vmatprep.mubr.bf16.mxu1 %v14732_v62  ;;  %v14737_v62 = vld [vmem:[#allocation3 + $0x140] ss:$20 sps:$4 sm:$0xff]  }
 0x608   : > { %6732 = vmatprep.subr.bf16.mxu1 %v18816_v34 }
 0x609   : > { %v4395_v33 = vpop.f32.mrb[88].mxu1 }
 0x60a   : > { %v17777_v26 = vadd.f32 %v17542_v35, %v4395_v33  ;;  %v4397_v14 = vpop.f32.mrb[89].mxu1  ;;  %v14738_v33 = vld [vmem:[#allocation3 + $0x16c] ss:$20 sps:$4 sm:$0xff]  }
 0x60b   : > { %6733 = vmatpush1.bf16.msra.mxu1 %v16830_v10  ;;  %v4398_v3 = vpop.f32.mrb[90].mxu1 }
 0x60c   : > { %18876 = vst [vmem:[#allocation55_spill] sm:$0xff] %v17777_v26  ;;  %v17785_v9 = vadd.f32 %v17555_v61, %v4398_v3  ;;  %v4400_v36 = vpop.f32.mrb[91].mxu1  ;;  %6734 = vmatprep.subr.bf16.mxu1 %v18816_v34 }
 0x60d   : > { %v14740_v36 = vld [vmem:[#allocation3 + $0x168] ss:$20 sps:$4 sm:$0xff]  }
 0x60e   : > { %18877 = vst [vmem:[#allocation56_spill] sm:$0xff] %v17785_v9  ;;  %6427 = vmatmul.mubr.bf16.gmra.mrb[200].mxu1 %v14734_v38  ;;  %v17800_v38 = vpop.f32.mrb[112].mxu0 }
 0x60f   : > { %6735 = vmatpush1.bf16.msra.mxu1 %v16842_v56  ;;  %6434 = vmatprep.mubr.bf16.mxu1 %v14735_v53 }
 0x610   : > { %6736 = vmatprep.subr.bf16.mxu1 %v18816_v34 }
 0x611   : > { %v4403_v35 = vpop.f32.mrb[92].mxu1 }
 0x612   : > { %v4405_v10 = vpop.f32.mrb[93].mxu1  ;;  %v17793_v52 = vadd.f32 %v17540_v45, %v4403_v35  ;;  %v17805_v35 = vpop.f32.mrb[113].mxu0 }
 0x613   : > { %6737 = vmatpush1.bf16.msra.mxu1 %v16854_v28  ;;  %v4406_v61 = vpop.f32.mrb[94].mxu1  ;;  %v14741_v10 = vld [vmem:[#allocation3 + $0x194] ss:$20 sps:$4 sm:$0xff]  }
 0x614   : > { %18878 = vst [vmem:[#allocation57_spill] sm:$0xff] %v17793_v52  ;;  %v4408_v14 = vpop.f32.mrb[95].mxu1  ;;  %v17797_v3 = vadd.f32 %v17547_v37, %v4406_v61  ;;  %10453 = vmatprep.subr.bf16.mxu1 %v18816_v34  ;;  %v14743_v52 = vld [vmem:[#allocation3 + $0x190] ss:$20 sps:$4 sm:$0xff]  }
 0x615   : > { %v13169_v14 = vpop.f32.mrb[114].mxu0 }
 0x616   : > { %18879 = vst [vmem:[#allocation58_spill] sm:$0xff] %v17797_v3  ;;  %6435 = vmatmul.mubr.bf16.gmra.mrb[204].mxu1 %v14737_v62  ;;  %v17810_v3 = vpop.f32.mrb[115].mxu0 }
 0x617   : > { %6442 = vmatprep.mubr.bf16.mxu1 %v14738_v33 }
 0x619   : > { %v4411_v56 = vpop.f32.mrb[96].mxu1 }
 0x61a   : > { %v17803_v53 = vadd.f32 %v17574_v58, %v4411_v56  ;;  %v4413_v45 = vpop.f32.mrb[97].mxu1 }
 0x61b   : > { %v4414_v28 = vpop.f32.mrb[98].mxu1  ;;  %v14744_v45 = vld [vmem:[#allocation3 + $0x1bc] ss:$20 sps:$4 sm:$0xff]  }
 0x61c   : > { %18880 = vst [vmem:[#allocation59_spill] sm:$0xff] %v17803_v53  ;;  %v17808_v37 = vadd.f32 %v17587_v30, %v4414_v28  ;;  %v4416_v61 = vpop.f32.mrb[99].mxu1 }
 0x61d   : > { %v14747_v61 = vld [vmem:[#allocation3 + $0x1e4] ss:$20 sps:$4 sm:$0xff]  }
 0x61e   : > { %18881 = vst [vmem:[#allocation60_spill] sm:$0xff] %v17808_v37  ;;  %6443 = vmatmul.mubr.bf16.gmra.mrb[208].mxu1 %v14740_v36 }
 0x61f   : > { %6450 = vmatprep.mubr.bf16.mxu1 %v14741_v10  ;;  %v14746_v10 = vld [vmem:[#allocation3 + $0x1b8] ss:$20 sps:$4 sm:$0xff]  }
 0x621   : > { %v4419_v62 = vpop.f32.mrb[100].mxu1 }
 0x622   : > { %v4421_v33 = vpop.f32.mrb[101].mxu1  ;;  %v17813_v58 = vadd.f32 %v17572_v32, %v4419_v62 }
 0x623   : > { %v4422_v56 = vpop.f32.mrb[102].mxu1 }
 0x624   : > { %18882 = vst [vmem:[#allocation61_spill] sm:$0xff] %v17813_v58  ;;  %v4424_v53 = vpop.f32.mrb[103].mxu1  ;;  %v17816_v9 = vadd.f32 %v17579_v18, %v4422_v56  ;;  %v14749_v18 = vld [vmem:[#allocation3 + $0x1e0] ss:$20 sps:$4 sm:$0xff]  }
 0x625   : > { %v14945_v58 = vld [vmem:[#allocation3 + $0x440] ss:$20 sps:$4 sm:$0xff]  }
 0x626   : > { %18883 = vst [vmem:[#allocation62_spill] sm:$0xff] %v17816_v9  ;;  %6451 = vmatmul.mubr.bf16.gmra.mrb[212].mxu1 %v14743_v52 }
 0x627   : > { %6458 = vmatprep.mubr.bf16.mxu1 %v14744_v45  ;;  %v14750_v45 = vld [vmem:[#allocation3 + $0x20c] ss:$20 sps:$4 sm:$0xff]  }
 0x629   : > { %v4427_v30 = vpop.f32.mrb[104].mxu1 }
 0x62a   : > { %v17819_v28 = vadd.f32 %v17609_v22, %v4427_v30  ;;  %v4429_v36 = vpop.f32.mrb[105].mxu1 }
 0x62b   : > { %v4430_v14 = vpop.f32.mrb[106].mxu1 }
 0x62c   : > { %18884 = vst [vmem:[#allocation63_spill] sm:$0xff] %v17819_v28  ;;  %v17822_v33 = vadd.f32 %v17619_v51, %v4430_v14  ;;  %v4432_v32 = vpop.f32.mrb[107].mxu1  ;;  %v14752_v14 = vld [vmem:[#allocation3 + $0x208] ss:$20 sps:$4 sm:$0xff]  }
 0x62d   : > { %v14753_v32 = vld [vmem:[#allocation3 + $0x234] ss:$20 sps:$4 sm:$0xff]  }
 0x62e   : > { %18885 = vst [vmem:[#allocation64_spill] sm:$0xff] %v17822_v33  ;;  %6459 = vmatmul.mubr.bf16.gmra.mrb[216].mxu1 %v14746_v10 }
 0x62f   : > { %6466 = vmatprep.mubr.bf16.mxu1 %v14747_v61 }
 0x631   : > { %v4435_v53 = vpop.f32.mrb[108].mxu1 }
 0x632   : > { %v4437_v62 = vpop.f32.mrb[109].mxu1  ;;  %v17825_v52 = vadd.f32 %v17604_v20, %v4435_v53 }
 0x633   : > { %v4438_v56 = vpop.f32.mrb[110].mxu1 }
 0x634   : > { %18886 = vst [vmem:[#allocation65_spill] sm:$0xff] %v17825_v52  ;;  %v4440_v22 = vpop.f32.mrb[111].mxu1  ;;  %v17828_v30 = vadd.f32 %v17617_v60, %v4438_v56  ;;  %v14755_v60 = vld [vmem:[#allocation3 + $0x230] ss:$20 sps:$4 sm:$0xff]  }
 0x635   : > { %v18890_v56 = vld [vmem:[#allocation42_spill] sm:$0xff] }
 0x636   : > { %18887 = vst [vmem:[#allocation66_spill] sm:$0xff] %v17828_v30  ;;  %6467 = vmatmul.mubr.bf16.gmra.mrb[220].mxu1 %v14749_v18  ;;  %v14756_v30 = vld [vmem:[#allocation3 + $0x25c] ss:$20 sps:$4 sm:$0xff]   ;;  %v14947_v52 = vld [vmem:[#allocation3 + $0x444] ss:$20 sps:$4 sm:$0xff]  }
 0x637   : > { %6474 = vmatprep.mubr.bf16.mxu1 %v14750_v45 }
 0x639   : > { %v4443_v36 = vpop.f32.mrb[112].mxu1 }
 0x63a   : > { %v17831_v51 = vadd.f32 %v17641_v40, %v4443_v36  ;;  %v4445_v10 = vpop.f32.mrb[113].mxu1  ;;  %v18892_v36 = vld [vmem:[#allocation44_spill] sm:$0xff] }
 0x63b   : > { %v4446_v61 = vpop.f32.mrb[114].mxu1 }
 0x63c   : > { %18888 = vst [vmem:[#allocation67_spill] sm:$0xff] %v17831_v51  ;;  %v17834_v62 = vadd.f32 %v17651_v7, %v4446_v61  ;;  %v4448_v20 = vpop.f32.mrb[115].mxu1  ;;  %v14758_v61 = vld [vmem:[#allocation3 + $0x258] ss:$20 sps:$4 sm:$0xff]  }
 0x63d   : > { %v14759_v20 = vld [vmem:[#allocation3 + $0x284] ss:$20 sps:$4 sm:$0xff]  }
 0x63e   : > { %18889 = vst [vmem:[#allocation68_spill] sm:$0xff] %v17834_v62  ;;  %6475 = vmatmul.mubr.bf16.gmra.mrb[224].mxu1 %v14752_v14 }
 0x63f   : > { %6482 = vmatprep.mubr.bf16.mxu1 %v14753_v32 }
 0x641   : > { %v4451_v53 = vpop.f32.mrb[116].mxu1 }
 0x642   : > { %v4453_v22 = vpop.f32.mrb[117].mxu1  ;;  %v17837_v18 = vadd.f32 %v18890_v56, %v4451_v53 }
 0x643   : > { %v4454_v45 = vpop.f32.mrb[118].mxu1 }
 0x644   : > { %18891 = vst [vmem:[#allocation42_spill] sm:$0xff] %v17837_v18  ;;  %v4456_v40 = vpop.f32.mrb[119].mxu1  ;;  %v17840_v10 = vadd.f32 %v18892_v36, %v4454_v45  ;;  %v14761_v45 = vld [vmem:[#allocation3 + $0x280] ss:$20 sps:$4 sm:$0xff]  }
 0x645   : > { %v14762_v36 = vld [vmem:[#allocation3 + $0x2ac] ss:$20 sps:$4 sm:$0xff]  }
 0x646   : > { %18893 = vst [vmem:[#allocation44_spill] sm:$0xff] %v17840_v10  ;;  %6483 = vmatmul.mubr.bf16.gmra.mrb[228].mxu1 %v14755_v60  ;;  %v14943_v10 = vld [vmem:[#allocation3 + $0x41c] ss:$20 sps:$4 sm:$0xff]  }
 0x647   : > { %6490 = vmatprep.mubr.bf16.mxu1 %v14756_v30 }
 0x649   : > { %v4459_v51 = vpop.f32.mrb[120].mxu1 }
 0x64a   : > { %v17843_v7 = vadd.f32 %v17670_v42, %v4459_v51  ;;  %v4461_v14 = vpop.f32.mrb[121].mxu1 }
 0x64b   : > { %v4462_v32 = vpop.f32.mrb[122].mxu1 }
 0x64c   : > { %18894 = vst [vmem:[#allocation69_spill] sm:$0xff] %v17843_v7  ;;  %v17846_v22 = vadd.f32 %v17677_v15, %v4462_v32  ;;  %v4464_v53 = vpop.f32.mrb[123].mxu1  ;;  %v14764_v32 = vld [vmem:[#allocation3 + $0x2a8] ss:$20 sps:$4 sm:$0xff]   ;;  %v14996_v7 = vld [vmem:[#allocation3 + $0x650] ss:$20 sps:$4 sm:$0xff]  }
 0x64d   : > { %v14765_v53 = vld [vmem:[#allocation3 + $0x2d4] ss:$20 sps:$4 sm:$0xff]  }
 0x64e   : > { %18895 = vst [vmem:[#allocation70_spill] sm:$0xff] %v17846_v22  ;;  %6491 = vmatmul.mubr.bf16.gmra.mrb[232].mxu1 %v14758_v61  ;;  %v14939_v22 = vld [vmem:[#allocation3 + $0x3f4] ss:$20 sps:$4 sm:$0xff]  }
 0x64f   : > { %6498 = vmatprep.mubr.bf16.mxu1 %v14759_v20 }
 0x651   : > { %v4467_v56 = vpop.f32.mrb[124].mxu1 }
 0x652   : > { %v4469_v40 = vpop.f32.mrb[125].mxu1  ;;  %v17849_v60 = vadd.f32 %v17668_v25, %v4467_v56 }
 0x653   : > { %v4470_v30 = vpop.f32.mrb[126].mxu1 }
 0x654   : > { %18896 = vst [vmem:[#allocation71_spill] sm:$0xff] %v17849_v60  ;;  %v4472_v42 = vpop.f32.mrb[127].mxu1  ;;  %v17852_v51 = vadd.f32 %v17675_v4, %v4470_v30  ;;  %v14767_v4 = vld [vmem:[#allocation3 + $0x2d0] ss:$20 sps:$4 sm:$0xff]  }
 0x656   : > { %18897 = vst [vmem:[#allocation72_spill] sm:$0xff] %v17852_v51  ;;  %6499 = vmatmul.mubr.bf16.gmra.mrb[236].mxu1 %v14761_v45  ;;  %v14935_v51 = vld [vmem:[#allocation3 + $0x3cc] ss:$20 sps:$4 sm:$0xff]  }
 0x657   : > { %6506 = vmatprep.mubr.bf16.mxu1 %v14762_v36  ;;  %v14768_v36 = vld [vmem:[#allocation3 + $0x2fc] ss:$20 sps:$4 sm:$0xff]  }
 0x659   : > { %v4475_v14 = vpop.f32.mrb[128].mxu1 }
 0x65a   : > { %v17855_v15 = vadd.f32 %v17692_v55, %v4475_v14  ;;  %v4477_v61 = vpop.f32.mrb[129].mxu1 }
 0x65b   : > { %v4478_v20 = vpop.f32.mrb[130].mxu1 }
 0x65c   : > { %18898 = vst [vmem:[#allocation73_spill] sm:$0xff] %v17855_v15  ;;  %v17858_v40 = vadd.f32 %v17701_v27, %v4478_v20  ;;  %v4480_v25 = vpop.f32.mrb[131].mxu1  ;;  %v14770_v20 = vld [vmem:[#allocation3 + $0x2f8] ss:$20 sps:$4 sm:$0xff]   ;;  %v14988_v15 = vld [vmem:[#allocation3 + $0x600] ss:$20 sps:$4 sm:$0xff]  }
 0x65d   : > { %v14771_v25 = vld [vmem:[#allocation3 + $0x324] ss:$20 sps:$4 sm:$0xff]  }
 0x65e   : > { %18899 = vst [vmem:[#allocation74_spill] sm:$0xff] %v17858_v40  ;;  %6507 = vmatmul.mubr.bf16.gmra.mrb[240].mxu1 %v14764_v32  ;;  %v14931_v40 = vld [vmem:[#allocation3 + $0x3a4] ss:$20 sps:$4 sm:$0xff]  }
 0x65f   : > { %6514 = vmatprep.mubr.bf16.mxu1 %v14765_v53 }
 0x661   : > { %v4483_v56 = vpop.f32.mrb[132].mxu1 }
 0x662   : > { %v4485_v42 = vpop.f32.mrb[133].mxu1  ;;  %v17861_v45 = vadd.f32 %v17690_v57, %v4483_v56 }
 0x663   : > { %v4486_v30 = vpop.f32.mrb[134].mxu1 }
 0x664   : > { %18900 = vst [vmem:[#allocation75_spill] sm:$0xff] %v17861_v45  ;;  %v4488_v55 = vpop.f32.mrb[135].mxu1  ;;  %v17864_v14 = vadd.f32 %v17698_v59, %v4486_v30  ;;  %v14773_v59 = vld [vmem:[#allocation3 + $0x320] ss:$20 sps:$4 sm:$0xff]  }
 0x666   : > { %18901 = vst [vmem:[#allocation76_spill] sm:$0xff] %v17864_v14  ;;  %6515 = vmatmul.mubr.bf16.gmra.mrb[244].mxu1 %v14767_v4  ;;  %v14927_v14 = vld [vmem:[#allocation3 + $0x37c] ss:$20 sps:$4 sm:$0xff]  }
 0x667   : > { %6522 = vmatprep.mubr.bf16.mxu1 %v14768_v36  ;;  %v14776_v36 = vld [vmem:[#allocation3 + $0x34c] ss:$20 sps:$4 sm:$0xff]  }
 0x669   : > { %v4491_v61 = vpop.f32.mrb[136].mxu1 }
 0x66a   : > { %v17867_v27 = vadd.f32 %v17720_v50, %v4491_v61  ;;  %v4493_v32 = vpop.f32.mrb[137].mxu1 }
 0x66b   : > { %v4494_v53 = vpop.f32.mrb[138].mxu1 }
 0x66c   : > { %18902 = vst [vmem:[#allocation77_spill] sm:$0xff] %v17867_v27  ;;  %v17870_v42 = vadd.f32 %v17729_v8, %v4494_v53  ;;  %v4496_v57 = vpop.f32.mrb[139].mxu1  ;;  %v14774_v53 = vld [vmem:[#allocation3 + $0x348] ss:$20 sps:$4 sm:$0xff]   ;;  %v14980_v27 = vld [vmem:[#allocation3 + $0x5b0] ss:$20 sps:$4 sm:$0xff]  }
 0x66d   : > { %v14779_v57 = vld [vmem:[#allocation3 + $0x374] ss:$20 sps:$4 sm:$0xff]  }
 0x66e   : > { %18903 = vst [vmem:[#allocation78_spill] sm:$0xff] %v17870_v42  ;;  %6523 = vmatmul.mubr.bf16.gmra.mrb[248].mxu1 %v14770_v20  ;;  %v14923_v42 = vld [vmem:[#allocation3 + $0x354] ss:$20 sps:$4 sm:$0xff]  }
 0x66f   : > { %6530 = vmatprep.mubr.bf16.mxu1 %v14771_v25 }
 0x671   : > { %v4499_v56 = vpop.f32.mrb[140].mxu1 }
 0x672   : > { %v4501_v55 = vpop.f32.mrb[141].mxu1  ;;  %v17873_v4 = vadd.f32 %v17718_v54, %v4499_v56 }
 0x673   : > { %v4502_v30 = vpop.f32.mrb[142].mxu1 }
 0x674   : > { %18904 = vst [vmem:[#allocation79_spill] sm:$0xff] %v17873_v4  ;;  %v4504_v50 = vpop.f32.mrb[143].mxu1  ;;  %v17876_v61 = vadd.f32 %v17726_v24, %v4502_v30  ;;  %v14777_v24 = vld [vmem:[#allocation3 + $0x370] ss:$20 sps:$4 sm:$0xff]  }
 0x676   : > { %18905 = vst [vmem:[#allocation80_spill] sm:$0xff] %v17876_v61  ;;  %6531 = vmatmul.mubr.bf16.gmra.mrb[252].mxu1 %v14773_v59  ;;  %v14917_v61 = vld [vmem:[#allocation3 + $0x32c] ss:$20 sps:$4 sm:$0xff]  }
 0x677   : > { %6538 = vmatprep.mubr.bf16.mxu1 %v14776_v36  ;;  %v14782_v36 = vld [vmem:[#allocation3 + $0x39c] ss:$20 sps:$4 sm:$0xff]  }
 0x679   : > { %v4507_v32 = vpop.f32.mrb[144].mxu1 }
 0x67a   : > { %v17879_v8 = vadd.f32 %v17748_v19, %v4507_v32  ;;  %v4509_v20 = vpop.f32.mrb[145].mxu1 }
 0x67b   : > { %v4510_v25 = vpop.f32.mrb[146].mxu1 }
 0x67c   : > { %18906 = vst [vmem:[#allocation81_spill] sm:$0xff] %v17879_v8  ;;  %v17882_v55 = vadd.f32 %v17757_v12, %v4510_v25  ;;  %v4512_v54 = vpop.f32.mrb[147].mxu1  ;;  %v14780_v25 = vld [vmem:[#allocation3 + $0x398] ss:$20 sps:$4 sm:$0xff]   ;;  %v14972_v8 = vld [vmem:[#allocation3 + $0x560] ss:$20 sps:$4 sm:$0xff]  }
 0x67d   : > { %v14785_v54 = vld [vmem:[#allocation3 + $0x3c4] ss:$20 sps:$4 sm:$0xff]  }
 0x67e   : > { %18907 = vst [vmem:[#allocation82_spill] sm:$0xff] %v17882_v55  ;;  %6539 = vmatmul.mubr.bf16.gmra.mrb[164].mxu1 %v14774_v53  ;;  %v14913_v55 = vld [vmem:[#allocation3 + $0x304] ss:$20 sps:$4 sm:$0xff]  }
 0x67f   : > { %6546 = vmatprep.mubr.bf16.mxu1 %v14779_v57 }
 0x681   : > { %v4515_v56 = vpop.f32.mrb[148].mxu1 }
 0x682   : > { %v4517_v50 = vpop.f32.mrb[149].mxu1  ;;  %v17885_v59 = vadd.f32 %v17746_v29, %v4515_v56 }
 0x683   : > { %v4518_v30 = vpop.f32.mrb[150].mxu1 }
 0x684   : > { %18908 = vst [vmem:[#allocation83_spill] sm:$0xff] %v17885_v59  ;;  %v4520_v19 = vpop.f32.mrb[151].mxu1  ;;  %v17888_v32 = vadd.f32 %v17754_v43, %v4518_v30  ;;  %v14783_v30 = vld [vmem:[#allocation3 + $0x3c0] ss:$20 sps:$4 sm:$0xff]  }
 0x685   : > { %v14788_v19 = vld [vmem:[#allocation3 + $0x3ec] ss:$20 sps:$4 sm:$0xff]  }
 0x686   : > { %18909 = vst [vmem:[#allocation84_spill] sm:$0xff] %v17888_v32  ;;  %6547 = vmatmul.mubr.bf16.gmra.mrb[0].mxu1 %v14777_v24  ;;  %v14909_v32 = vld [vmem:[#allocation3 + $0x2dc] ss:$20 sps:$4 sm:$0xff]  }
 0x687   : > { %6554 = vmatprep.mubr.bf16.mxu1 %v14782_v36 }
 0x689   : > { %v4523_v20 = vpop.f32.mrb[152].mxu1 }
 0x68a   : > { %v17891_v12 = vadd.f32 %v17779_v16, %v4523_v20  ;;  %v4525_v53 = vpop.f32.mrb[153].mxu1 }
 0x68b   : > { %v4526_v57 = vpop.f32.mrb[154].mxu1 }
 0x68c   : > { %18910 = vst [vmem:[#allocation85_spill] sm:$0xff] %v17891_v12  ;;  %v17894_v50 = vadd.f32 %v17788_v11, %v4526_v57  ;;  %v4528_v29 = vpop.f32.mrb[155].mxu1  ;;  %v14786_v57 = vld [vmem:[#allocation3 + $0x3e8] ss:$20 sps:$4 sm:$0xff]   ;;  %v14964_v12 = vld [vmem:[#allocation3 + $0x510] ss:$20 sps:$4 sm:$0xff]  }
 0x68d   : > { %v14791_v29 = vld [vmem:[#allocation3 + $0x414] ss:$20 sps:$4 sm:$0xff]  }
 0x68e   : > { %18911 = vst [vmem:[#allocation86_spill] sm:$0xff] %v17894_v50  ;;  %6555 = vmatmul.mubr.bf16.gmra.mrb[4].mxu1 %v14780_v25  ;;  %v14905_v50 = vld [vmem:[#allocation3 + $0x2b4] ss:$20 sps:$4 sm:$0xff]  }
 0x68f   : > { %6562 = vmatprep.mubr.bf16.mxu1 %v14785_v54 }
 0x691   : > { %v4531_v56 = vpop.f32.mrb[156].mxu1 }
 0x692   : > { %v17897_v43 = vadd.f32 %v17774_v39, %v4531_v56  ;;  %v4533_v24 = vpop.f32.mrb[157].mxu1 }
 0x693   : > { %v4534_v36 = vpop.f32.mrb[158].mxu1  ;;  %v14836_v24 = vld [vmem:[#allocation3 + $0x10] ss:$20 sps:$4 sm:$0xff]  }
 0x694   : > { %18912 = vst [vmem:[#allocation87_spill] sm:$0xff] %v17897_v43  ;;  %v17900_v16 = vadd.f32 %v17782_v21, %v4534_v36  ;;  %v4536_v20 = vpop.f32.mrb[159].mxu1  ;;  %v14840_v21 = vld [vmem:[#allocation3 + $0x38] ss:$20 sps:$4 sm:$0xff]   ;;  %13178 = vmatprep.mubr.msk.bf16.mxu0 %vm3690_vm2, %v14836_v24  ;;  %v14795_v24 = vld [vmem:[#allocation3 + $0x460] ss:$20 sps:$4 sm:$0xff]  }
 0x695   : > { %13179 = vmatmul.mubr.msk.bf16.vlgmr.msra.gmra.mrb[116].mxu0 %vm3690_vm2, %v14840_v21  ;;  %v18916_v36 = vld [vmem:[#allocation17_spill] sm:$0xff]  ;;  %v14789_v20 = vld [vmem:[#allocation3 + $0x410] ss:$20 sps:$4 sm:$0xff]   ;;  %v14800_v21 = vld [vmem:[#allocation3 + $0x48c] ss:$20 sps:$4 sm:$0xff]  }
 0x696   : > { %18913 = vst [vmem:[#allocation88_spill] sm:$0xff] %v17900_v16  ;;  %6563 = vmatmul.mubr.bf16.gmra.mrb[8].mxu1 %v14783_v30  ;;  %v14901_v16 = vld [vmem:[#allocation3 + $0x28c] ss:$20 sps:$4 sm:$0xff]  }
 0x697   : > { %6570 = vmatprep.mubr.bf16.mxu1 %v14788_v19 }
 0x699   : > { %v4539_v53 = vpop.f32.mrb[160].mxu1 }
 0x69a   : > { %v17903_v11 = vadd.f32 %v17805_v35, %v4539_v53  ;;  %v4541_v25 = vpop.f32.mrb[161].mxu1 }
 0x69b   : > { %v4542_v54 = vpop.f32.mrb[162].mxu1  ;;  %v14794_v25 = vld [vmem:[#allocation3 + $0x43c] ss:$20 sps:$4 sm:$0xff]  }
 0x69c   : > { %18914 = vst [vmem:[#allocation89_spill] sm:$0xff] %v17903_v11  ;;  %v17906_v39 = vadd.f32 %v17810_v3, %v4542_v54  ;;  %v4544_v56 = vpop.f32.mrb[163].mxu1  ;;  %v14797_v54 = vld [vmem:[#allocation3 + $0x464] ss:$20 sps:$4 sm:$0xff]  }
 0x69d   : > { %v14847_v56 = vld [vmem:[#allocation3 + $0x88] ss:$20 sps:$4 sm:$0xff]  }
 0x69e   : > { %18915 = vst [vmem:[#allocation90_spill] sm:$0xff] %v17906_v39  ;;  %6571 = vmatmul.mubr.bf16.gmra.mrb[12].mxu1 %v14786_v57  ;;  %v14792_v57 = vld [vmem:[#allocation3 + $0x438] ss:$20 sps:$4 sm:$0xff]   ;;  %v14956_v39 = vld [vmem:[#allocation3 + $0x4c0] ss:$20 sps:$4 sm:$0xff]  }
 0x69f   : > { %6578 = vmatprep.mubr.bf16.mxu1 %v14791_v29  ;;  %v14844_v29 = vld [vmem:[#allocation3 + $0x60] ss:$20 sps:$4 sm:$0xff]  }
 0x6a0   : > { %13182 = vmatprep.mubr.msk.bf16.mxu0 %vm3690_vm2, %v14844_v29  ;;  %v14812_v29 = vld [vmem:[#allocation3 + $0x52c] ss:$20 sps:$4 sm:$0xff]  }
 0x6a1   : > { %v4547_v30 = vpop.f32.mrb[168].mxu1  ;;  %13183 = vmatmul.mubr.msk.bf16.gmra.mrb[120].mxu0 %vm3690_vm2, %v14847_v56  ;;  %v14810_v56 = vld [vmem:[#allocation3 + $0x528] ss:$20 sps:$4 sm:$0xff]  }
 0x6a2   : > { %v4548_v35 = vadd.f32 %v4547_v30, %v18916_v36  ;;  %v4549_v19 = vpop.f32.mrb[169].mxu1  ;;  %v14798_v30 = vld [vmem:[#allocation3 + $0x488] ss:$20 sps:$4 sm:$0xff]   ;;  %v14852_v36 = vld [vmem:[#allocation3 + $0xb0] ss:$20 sps:$4 sm:$0xff]  }
 0x6a3   : > { %v4550_v53 = vpop.f32.mrb[170].mxu1  ;;  %13186 = vmatprep.mubr.msk.bf16.mxu0 %vm3690_vm2, %v14852_v36  ;;  %v14801_v19 = vld [vmem:[#allocation3 + $0x4b0] ss:$20 sps:$4 sm:$0xff]  }
 0x6a4   : > { %v17912_v11 = vadd.f32 %v17800_v38, %v4548_v35  ;;  %v4551_v3 = vpop.f32.mrb[171].mxu1  ;;  %v14803_v38 = vld [vmem:[#allocation3 + $0x4b4] ss:$20 sps:$4 sm:$0xff]   ;;  %v14855_v35 = vld [vmem:[#allocation3 + $0xd8] ss:$20 sps:$4 sm:$0xff]  }
 0x6a5   : > { %v14804_v53 = vld [vmem:[#allocation3 + $0x4d8] ss:$20 sps:$4 sm:$0xff]   ;;  %v14860_v3 = vld [vmem:[#allocation3 + $0x100] ss:$20 sps:$4 sm:$0xff]   ;;  %v14818_v36 = vld [vmem:[#allocation3 + $0x57c] ss:$20 sps:$4 sm:$0xff]  }
 0x6a6   : > { %18917 = vst [vmem:[#allocation17_spill] sm:$0xff] %v17912_v11  ;;  %6579 = vmatmul.mubr.bf16.gmra.mrb[16].mxu1 %v14789_v20  ;;  %v14806_v20 = vld [vmem:[#allocation3 + $0x4dc] ss:$20 sps:$4 sm:$0xff]   ;;  %v14897_v11 = vld [vmem:[#allocation3 + $0x264] ss:$20 sps:$4 sm:$0xff]  }
 0x6a7   : > { %6586 = vmatprep.mubr.bf16.mxu1 %v14794_v25  ;;  %v14809_v25 = vld [vmem:[#allocation3 + $0x504] ss:$20 sps:$4 sm:$0xff]  }
 0x6a9   : > { %13187 = vmatmul.mubr.msk.bf16.gmra.mrb[124].mxu0 %vm3690_vm2, %v14855_v35  ;;  %v14816_v35 = vld [vmem:[#allocation3 + $0x578] ss:$20 sps:$4 sm:$0xff]  }
 0x6aa   : > { %13190 = vmatprep.mubr.msk.bf16.mxu0 %vm3690_vm2, %v14860_v3  ;;  %v14824_v3 = vld [vmem:[#allocation3 + $0x5cc] ss:$20 sps:$4 sm:$0xff]  }
 0x6ae   : > { %6587 = vmatmul.mubr.bf16.gmra.mrb[20].mxu1 %v14792_v57  ;;  %v14863_v57 = vld [vmem:[#allocation3 + $0x128] ss:$20 sps:$4 sm:$0xff]  }
 0x6af   : > { %6594 = vmatprep.mubr.bf16.mxu1 %v14797_v54  ;;  %v14807_v54 = vld [vmem:[#allocation3 + $0x500] ss:$20 sps:$4 sm:$0xff]  }
 0x6b1   : > { %13191 = vmatmul.mubr.msk.bf16.gmra.mrb[128].mxu0 %vm3690_vm2, %v14863_v57  ;;  %v14822_v57 = vld [vmem:[#allocation3 + $0x5c8] ss:$20 sps:$4 sm:$0xff]  }
 0x6b6   : > { %6595 = vmatmul.mubr.bf16.gmra.mrb[24].mxu1 %v14795_v24  ;;  %v14815_v24 = vld [vmem:[#allocation3 + $0x554] ss:$20 sps:$4 sm:$0xff]  }
 0x6b7   : > { %6602 = vmatprep.mubr.bf16.mxu1 %v14800_v21  ;;  %v14868_v21 = vld [vmem:[#allocation3 + $0x150] ss:$20 sps:$4 sm:$0xff]  }
 0x6b8   : > { %13194 = vmatprep.mubr.msk.bf16.mxu0 %vm3690_vm2, %v14868_v21  ;;  %v14830_v21 = vld [vmem:[#allocation3 + $0x61c] ss:$20 sps:$4 sm:$0xff]  }
 0x6be   : > { %6603 = vmatmul.mubr.bf16.gmra.mrb[28].mxu1 %v14798_v30  ;;  %v14871_v30 = vld [vmem:[#allocation3 + $0x178] ss:$20 sps:$4 sm:$0xff]  }
 0x6bf   : > { %6610 = vmatprep.mubr.bf16.mxu1 %v14803_v38  ;;  %13195 = vmatmul.mubr.msk.bf16.gmra.mrb[132].mxu0 %vm3690_vm2, %v14871_v30  ;;  %v14813_v38 = vld [vmem:[#allocation3 + $0x550] ss:$20 sps:$4 sm:$0xff]   ;;  %v14828_v30 = vld [vmem:[#allocation3 + $0x618] ss:$20 sps:$4 sm:$0xff]  }
 0x6c6   : > { %6611 = vmatmul.mubr.bf16.gmra.mrb[32].mxu1 %v14801_v19  ;;  %v14821_v19 = vld [vmem:[#allocation3 + $0x5a4] ss:$20 sps:$4 sm:$0xff]  }
 0x6c7   : > { %6618 = vmatprep.mubr.bf16.mxu1 %v14806_v20  ;;  %v14876_v20 = vld [vmem:[#allocation3 + $0x1a0] ss:$20 sps:$4 sm:$0xff]  }
 0x6c8   : > { %13198 = vmatprep.mubr.msk.bf16.mxu0 %vm3690_vm2, %v14876_v20  ;;  %v14831_v20 = vld [vmem:[#allocation3 + $0x640] ss:$20 sps:$4 sm:$0xff]  }
 0x6ce   : > { %6619 = vmatmul.mubr.bf16.gmra.mrb[36].mxu1 %v14804_v53  ;;  %v14879_v53 = vld [vmem:[#allocation3 + $0x1c8] ss:$20 sps:$4 sm:$0xff]  }
 0x6cf   : > { %6626 = vmatprep.mubr.bf16.mxu1 %v14809_v25  ;;  %13199 = vmatmul.mubr.msk.bf16.gmra.mrb[136].mxu0 %vm3690_vm2, %v14879_v53  ;;  %v14819_v25 = vld [vmem:[#allocation3 + $0x5a0] ss:$20 sps:$4 sm:$0xff]  }
 0x6d6   : > { %6627 = vmatmul.mubr.bf16.gmra.mrb[40].mxu1 %v14807_v54  ;;  %v14827_v54 = vld [vmem:[#allocation3 + $0x5f4] ss:$20 sps:$4 sm:$0xff]  }
 0x6d7   : > { %6634 = vmatprep.mubr.bf16.mxu1 %v14812_v29  ;;  %v14884_v29 = vld [vmem:[#allocation3 + $0x1f0] ss:$20 sps:$4 sm:$0xff]  }
 0x6d8   : > { %13202 = vmatprep.mubr.msk.bf16.mxu0 %vm3690_vm2, %v14884_v29  ;;  %v14837_v29 = vld [vmem:[#allocation3 + $0x8] ss:$20 sps:$4 sm:$0xff]  }
 0x6de   : > { %6635 = vmatmul.mubr.bf16.gmra.mrb[44].mxu1 %v14810_v56  ;;  %v14887_v56 = vld [vmem:[#allocation3 + $0x218] ss:$20 sps:$4 sm:$0xff]  }
 0x6df   : > { %6642 = vmatprep.mubr.bf16.mxu1 %v14815_v24  ;;  %13203 = vmatmul.mubr.msk.bf16.gmra.mrb[140].mxu0 %vm3690_vm2, %v14887_v56  ;;  %v14825_v24 = vld [vmem:[#allocation3 + $0x5f0] ss:$20 sps:$4 sm:$0xff]   ;;  %v14841_v56 = vld [vmem:[#allocation3 + $0x34] ss:$20 sps:$4 sm:$0xff]  }
 0x6e6   : > { %6643 = vmatmul.mubr.bf16.gmra.mrb[48].mxu1 %v14813_v38  ;;  %v14833_v38 = vld [vmem:[#allocation3 + $0x644] ss:$20 sps:$4 sm:$0xff]  }
 0x6e7   : > { %6650 = vmatprep.mubr.bf16.mxu1 %v14818_v36  ;;  %v14892_v36 = vld [vmem:[#allocation3 + $0x240] ss:$20 sps:$4 sm:$0xff]  }
 0x6e8   : > { %13206 = vmatprep.mubr.msk.bf16.mxu0 %vm3690_vm2, %v14892_v36  ;;  %v14848_v36 = vld [vmem:[#allocation3 + $0x58] ss:$20 sps:$4 sm:$0xff]  }
 0x6ee   : > { %6651 = vmatmul.mubr.bf16.gmra.mrb[52].mxu1 %v14816_v35  ;;  %v14895_v35 = vld [vmem:[#allocation3 + $0x268] ss:$20 sps:$4 sm:$0xff]  }
 0x6ef   : > { %6658 = vmatprep.mubr.bf16.mxu1 %v14821_v19  ;;  %v5167_v19 = vld [vmem:[#allocation3 + $0x668] sm:$0xff]  ;;  %13207 = vmatmul.mubr.msk.bf16.gmra.mrb[144].mxu0 %vm3690_vm2, %v14895_v35  ;;  %v14849_v35 = vld [vmem:[#allocation3 + $0x84] ss:$20 sps:$4 sm:$0xff]  }
 0x6f0   : > { %v12447_v53 = vcombine.high %v5167_v19, %v5167_v19 }
 0x6f6   : > { %6659 = vmatmul.mubr.bf16.gmra.mrb[56].mxu1 %v14819_v25  ;;  %v12446_v25 = vcombine.low %v5167_v19, %v5167_v19  ;;  %v14851_v19 = vld [vmem:[#allocation3 + $0x80] ss:$20 sps:$4 sm:$0xff]  }
 0x6f7   : > { %6666 = vmatprep.mubr.bf16.mxu1 %v14824_v3  ;;  %v14839_v3 = vld [vmem:[#allocation3 + $0xc] ss:$20 sps:$4 sm:$0xff]  }
 0x6fe   : > { %6667 = vmatmul.mubr.bf16.gmra.mrb[60].mxu1 %v14822_v57  ;;  %v14900_v57 = vld [vmem:[#allocation3 + $0x290] ss:$20 sps:$4 sm:$0xff]  }
 0x6ff   : > { %6674 = vmatprep.mubr.bf16.mxu1 %v14827_v54  ;;  %v14903_v54 = vld [vmem:[#allocation3 + $0x2b8] ss:$20 sps:$4 sm:$0xff]   ;;  %13210 = vmatprep.mubr.msk.bf16.mxu0 %vm3690_vm2, %v14900_v57  ;;  %v14857_v57 = vld [vmem:[#allocation3 + $0xd4] ss:$20 sps:$4 sm:$0xff]  }
 0x700   : > { %13211 = vmatmul.mubr.msk.bf16.gmra.mrb[148].mxu0 %vm3690_vm2, %v14903_v54  ;;  %v14859_v54 = vld [vmem:[#allocation3 + $0xd0] ss:$20 sps:$4 sm:$0xff]  }
 0x706   : > { %6675 = vmatmul.mubr.bf16.gmra.mrb[64].mxu1 %v14825_v24  ;;  %v14843_v24 = vld [vmem:[#allocation3 + $0x30] ss:$20 sps:$4 sm:$0xff]  }
 0x707   : > { %6682 = vmatprep.mubr.bf16.mxu1 %v14830_v21  ;;  %v14845_v21 = vld [vmem:[#allocation3 + $0x5c] ss:$20 sps:$4 sm:$0xff]  }
 0x70e   : > { %6683 = vmatmul.mubr.bf16.gmra.mrb[68].mxu1 %v14828_v30  ;;  %v14908_v30 = vld [vmem:[#allocation3 + $0x2e0] ss:$20 sps:$4 sm:$0xff]  }
 0x70f   : > { %6690 = vmatprep.mubr.bf16.mxu1 %v14833_v38  ;;  %v14911_v38 = vld [vmem:[#allocation3 + $0x308] ss:$20 sps:$4 sm:$0xff]   ;;  %13214 = vmatprep.mubr.msk.bf16.mxu0 %vm3690_vm2, %v14908_v30  ;;  %v14865_v30 = vld [vmem:[#allocation3 + $0x124] ss:$20 sps:$4 sm:$0xff]  }
 0x710   : > { %13215 = vmatmul.mubr.msk.bf16.gmra.mrb[152].mxu0 %vm3690_vm2, %v14911_v38  ;;  %v14867_v38 = vld [vmem:[#allocation3 + $0x120] ss:$20 sps:$4 sm:$0xff]  }
 0x716   : > { %6691 = vmatmul.mubr.bf16.gmra.mrb[72].mxu1 %v14831_v20  ;;  %v14853_v20 = vld [vmem:[#allocation3 + $0xac] ss:$20 sps:$4 sm:$0xff]  }
 0x717   : > { %6698 = vmatprep.mubr.bf16.mxu1 %v12447_v53  ;;  %v14916_v53 = vld [vmem:[#allocation3 + $0x330] ss:$20 sps:$4 sm:$0xff]  }
 0x718   : > { %13218 = vmatprep.mubr.msk.bf16.mxu0 %vm3690_vm2, %v14916_v53  ;;  %v14873_v53 = vld [vmem:[#allocation3 + $0x174] ss:$20 sps:$4 sm:$0xff]  }
 0x71e   : > { %6699 = vmatmul.mubr.bf16.gmra.mrb[76].mxu1 %v12446_v25  ;;  %v14919_v25 = vld [vmem:[#allocation3 + $0x358] ss:$20 sps:$4 sm:$0xff]  }
 0x71f   : > { %6738 = vmatprep.mubr.bf16.mxu1 %v14839_v3  ;;  %13219 = vmatmul.mubr.msk.bf16.gmra.mrb[156].mxu0 %vm3690_vm2, %v14919_v25  ;;  %v14856_v3 = vld [vmem:[#allocation3 + $0xa8] ss:$20 sps:$4 sm:$0xff]   ;;  %v14875_v25 = vld [vmem:[#allocation3 + $0x170] ss:$20 sps:$4 sm:$0xff]  }
 0x726   : > { %6739 = vmatmul.mubr.bf16.vlgmr.msra.gmra.mrb[172].mxu1 %v14837_v29  ;;  %v14861_v29 = vld [vmem:[#allocation3 + $0xfc] ss:$20 sps:$4 sm:$0xff]  }
 0x727   : > { %6746 = vmatprep.mubr.bf16.mxu1 %v14841_v56  ;;  %v14924_v56 = vld [vmem:[#allocation3 + $0x380] ss:$20 sps:$4 sm:$0xff]  }
 0x728   : > { %13222 = vmatprep.mubr.msk.bf16.mxu0 %vm3690_vm2, %v14924_v56  ;;  %v14944_v56 = vld [vmem:[#allocation3 + $0x448] ss:$20 sps:$4 sm:$0xff]  }
 0x72e   : > { %6747 = vmatmul.mubr.bf16.gmra.mrb[176].mxu1 %v14843_v24  ;;  %v14928_v24 = vld [vmem:[#allocation3 + $0x3a8] ss:$20 sps:$4 sm:$0xff]  }
 0x72f   : > { %6754 = vmatprep.mubr.bf16.mxu1 %v14845_v21  ;;  %13223 = vmatmul.mubr.msk.bf16.gmra.mrb[160].mxu0 %vm3690_vm2, %v14928_v24  ;;  %v14864_v21 = vld [vmem:[#allocation3 + $0xf8] ss:$20 sps:$4 sm:$0xff]  }
 0x736   : > { %6755 = vmatmul.mubr.bf16.gmra.mrb[180].mxu1 %v14848_v36  ;;  %v14869_v36 = vld [vmem:[#allocation3 + $0x14c] ss:$20 sps:$4 sm:$0xff]  }
 0x737   : > { %6762 = vmatprep.mubr.bf16.mxu1 %v14849_v35  ;;  %v14932_v35 = vld [vmem:[#allocation3 + $0x3d0] ss:$20 sps:$4 sm:$0xff]  }
 0x738   : > { %13226 = vmatprep.mubr.msk.bf16.mxu0 %vm3690_vm2, %v14932_v35 }
 0x73e   : > { %6763 = vmatmul.mubr.bf16.gmra.mrb[184].mxu1 %v14851_v19  ;;  %v14936_v19 = vld [vmem:[#allocation3 + $0x3f8] ss:$20 sps:$4 sm:$0xff]  }
 0x73f   : > { %6770 = vmatprep.mubr.bf16.mxu1 %v14853_v20  ;;  %13227 = vmatmul.mubr.msk.bf16.gmra.mrb[164].mxu0 %vm3690_vm2, %v14936_v19  ;;  %v14872_v20 = vld [vmem:[#allocation3 + $0x148] ss:$20 sps:$4 sm:$0xff]  }
 0x740   : > { %v14888_v19 = vld [vmem:[#allocation3 + $0x1e8] ss:$20 sps:$4 sm:$0xff]  }
 0x746   : > { %6771 = vmatmul.mubr.bf16.gmra.mrb[188].mxu1 %v14856_v3  ;;  %v14877_v3 = vld [vmem:[#allocation3 + $0x19c] ss:$20 sps:$4 sm:$0xff]  }
 0x747   : > { %6778 = vmatprep.mubr.bf16.mxu1 %v14857_v57  ;;  %v14880_v57 = vld [vmem:[#allocation3 + $0x198] ss:$20 sps:$4 sm:$0xff]  }
 0x74e   : > { %6779 = vmatmul.mubr.bf16.gmra.mrb[192].mxu1 %v14859_v54  ;;  %v14881_v54 = vld [vmem:[#allocation3 + $0x1c4] ss:$20 sps:$4 sm:$0xff]  }
 0x74f   : > { %6786 = vmatprep.mubr.bf16.mxu1 %v14861_v29  ;;  %v14940_v29 = vld [vmem:[#allocation3 + $0x420] ss:$20 sps:$4 sm:$0xff]  }
 0x750   : > { %13230 = vmatprep.mubr.msk.bf16.mxu0 %vm3690_vm2, %v14940_v29  ;;  %v14893_v29 = vld [vmem:[#allocation3 + $0x23c] ss:$20 sps:$4 sm:$0xff]  }
 0x751   : > { %13231 = vmatmul.mubr.msk.bf16.gmra.mrb[168].mxu0 %vm3690_vm2, %v14944_v56 }
 0x756   : > { %6787 = vmatmul.mubr.bf16.gmra.mrb[196].mxu1 %v14864_v21 }
 0x757   : > { %6794 = vmatprep.mubr.bf16.mxu1 %v14865_v30  ;;  %v14883_v30 = vld [vmem:[#allocation3 + $0x1c0] ss:$20 sps:$4 sm:$0xff]  }
 0x75e   : > { %6795 = vmatmul.mubr.bf16.gmra.mrb[200].mxu1 %v14867_v38  ;;  %v14885_v38 = vld [vmem:[#allocation3 + $0x1ec] ss:$20 sps:$4 sm:$0xff]  }
 0x75f   : > { %6802 = vmatprep.mubr.bf16.mxu1 %v14869_v36 }
 0x766   : > { %6803 = vmatmul.mubr.bf16.gmra.mrb[204].mxu1 %v14872_v20  ;;  %v14889_v20 = vld [vmem:[#allocation3 + $0x214] ss:$20 sps:$4 sm:$0xff]  }
 0x767   : > { %6810 = vmatprep.mubr.bf16.mxu1 %v14873_v53  ;;  %v14948_v53 = vld [vmem:[#allocation3 + $0x470] ss:$20 sps:$4 sm:$0xff]  }
 0x768   : > { %v17940_v24 = vpop.f32.mrb[116].mxu0  ;;  %13234 = vmatprep.mubr.msk.bf16.mxu0 %vm3690_vm2, %v14948_v53  ;;  %v14960_v53 = vld [vmem:[#allocation3 + $0x4e8] ss:$20 sps:$4 sm:$0xff]  }
 0x769   : > { %v17942_v21 = vpop.f32.mrb[117].mxu0 }
 0x76a   : > { %v17944_v36 = vpop.f32.mrb[118].mxu0 }
 0x76b   : > { %v17946_v35 = vpop.f32.mrb[119].mxu0 }
 0x76e   : > { %6811 = vmatmul.mubr.bf16.gmra.mrb[208].mxu1 %v14875_v25  ;;  %v14952_v25 = vld [vmem:[#allocation3 + $0x498] ss:$20 sps:$4 sm:$0xff]  }
 0x76f   : > { %6818 = vmatprep.mubr.bf16.mxu1 %v14877_v3  ;;  %13235 = vmatmul.mubr.msk.bf16.gmra.mrb[172].mxu0 %vm3690_vm2, %v14952_v25  ;;  %v14899_v25 = vld [vmem:[#allocation3 + $0x260] ss:$20 sps:$4 sm:$0xff]  }
 0x770   : > { %13238 = vmatprep.mubr.msk.bf16.mxu0 %vm3690_vm2, %v14956_v39  ;;  %v14968_v39 = vld [vmem:[#allocation3 + $0x538] ss:$20 sps:$4 sm:$0xff]  }
 0x774   : > { %v17950_v3 = vpop.f32.mrb[120].mxu0 }
 0x776   : > { %6819 = vmatmul.mubr.bf16.gmra.mrb[212].mxu1 %v14880_v57  ;;  %v17952_v57 = vpop.f32.mrb[121].mxu0 }
 0x777   : > { %6826 = vmatprep.mubr.bf16.mxu1 %v14881_v54  ;;  %v14891_v54 = vld [vmem:[#allocation3 + $0x210] ss:$20 sps:$4 sm:$0xff]   ;;  %v17954_v56 = vpop.f32.mrb[122].mxu0  ;;  %13239 = vmatmul.mubr.msk.bf16.gmra.mrb[176].mxu0 %vm3690_vm2, %v14960_v53 }
 0x778   : > { %13242 = vmatprep.mubr.msk.bf16.mxu0 %vm3690_vm2, %v14964_v12  ;;  %v14976_v12 = vld [vmem:[#allocation3 + $0x588] ss:$20 sps:$4 sm:$0xff]  }
 0x77e   : > { %6827 = vmatmul.mubr.bf16.gmra.mrb[216].mxu1 %v14883_v30  ;;  %v17956_v30 = vpop.f32.mrb[123].mxu0 }
 0x77f   : > { %6834 = vmatprep.mubr.bf16.mxu1 %v14885_v38  ;;  %v14896_v38 = vld [vmem:[#allocation3 + $0x238] ss:$20 sps:$4 sm:$0xff]   ;;  %13243 = vmatmul.mubr.msk.bf16.gmra.mrb[180].mxu0 %vm3690_vm2, %v14968_v39 }
 0x780   : > { %13246 = vmatprep.mubr.msk.bf16.mxu0 %vm3690_vm2, %v14972_v8  ;;  %v14984_v8 = vld [vmem:[#allocation3 + $0x5d8] ss:$20 sps:$4 sm:$0xff]  }
 0x786   : > { %6835 = vmatmul.mubr.bf16.gmra.mrb[220].mxu1 %v14888_v19  ;;  %v17960_v19 = vpop.f32.mrb[124].mxu0 }
 0x787   : > { %6842 = vmatprep.mubr.bf16.mxu1 %v14889_v20  ;;  %v17962_v20 = vpop.f32.mrb[125].mxu0  ;;  %13247 = vmatmul.mubr.msk.bf16.gmra.mrb[184].mxu0 %vm3690_vm2, %v14976_v12 }
 0x788   : > { %v17964_v43 = vpop.f32.mrb[126].mxu0  ;;  %13250 = vmatprep.mubr.msk.bf16.mxu0 %vm3690_vm2, %v14980_v27  ;;  %v14992_v27 = vld [vmem:[#allocation3 + $0x628] ss:$20 sps:$4 sm:$0xff]  }
 0x78e   : > { %6843 = vmatmul.mubr.bf16.gmra.mrb[224].mxu1 %v14891_v54  ;;  %v17966_v54 = vpop.f32.mrb[127].mxu0 }
 0x78f   : > { %6850 = vmatprep.mubr.bf16.mxu1 %v14893_v29  ;;  %v14904_v29 = vld [vmem:[#allocation3 + $0x288] ss:$20 sps:$4 sm:$0xff]   ;;  %13251 = vmatmul.mubr.msk.bf16.gmra.mrb[188].mxu0 %vm3690_vm2, %v14984_v8 }
 0x790   : > { %13254 = vmatprep.mubr.msk.bf16.mxu0 %vm3690_vm2, %v14988_v15  ;;  %v15000_v15 = vld [vmem:[#allocation3 + $0x678] ss:$0 sps:$4 sm:$0xff]  }
 0x796   : > { %6851 = vmatmul.mubr.bf16.gmra.mrb[228].mxu1 %v14896_v38  ;;  %v14907_v38 = vld [vmem:[#allocation3 + $0x2b0] ss:$20 sps:$4 sm:$0xff]  }
 0x797   : > { %6858 = vmatprep.mubr.bf16.mxu1 %v14897_v11  ;;  %v17970_v11 = vpop.f32.mrb[128].mxu0  ;;  %13255 = vmatmul.mubr.msk.bf16.gmra.mrb[192].mxu0 %vm3690_vm2, %v14992_v27 }
 0x798   : > { %v17972_v53 = vpop.f32.mrb[129].mxu0  ;;  %13258 = vmatprep.mubr.msk.bf16.mxu0 %vm3690_vm2, %v14996_v7  ;;  %v14941_v7 = vld [vmem:[#allocation3 + $0x418] ss:$20 sps:$4 sm:$0xff]  }
 0x799   : > { %v17974_v59 = vpop.f32.mrb[130].mxu0 }
 0x79e   : > { %6859 = vmatmul.mubr.bf16.gmra.mrb[232].mxu1 %v14899_v25  ;;  %v17976_v25 = vpop.f32.mrb[131].mxu0 }
 0x79f   : > { %6866 = vmatprep.mubr.bf16.mxu1 %v14901_v16  ;;  %v14912_v16 = vld [vmem:[#allocation3 + $0x2d8] ss:$20 sps:$4 sm:$0xff]   ;;  %13259 = vmatmul.mubr.msk.bf16.gmra.mrb[196].mxu0 %vm3690_vm2, %v15000_v15 }
 0x7a6   : > { %6867 = vmatmul.mubr.bf16.gmra.mrb[236].mxu1 %v14904_v29  ;;  %v14915_v29 = vld [vmem:[#allocation3 + $0x300] ss:$20 sps:$4 sm:$0xff]  }
 0x7a7   : > { %6874 = vmatprep.mubr.bf16.mxu1 %v14905_v50  ;;  %v17980_v50 = vpop.f32.mrb[132].mxu0 }
 0x7a8   : > { %v17982_v39 = vpop.f32.mrb[133].mxu0 }
 0x7a9   : > { %v17984_v4 = vpop.f32.mrb[134].mxu0 }
 0x7ae   : > { %6875 = vmatmul.mubr.bf16.gmra.mrb[240].mxu1 %v14907_v38  ;;  %v17986_v38 = vpop.f32.mrb[135].mxu0 }
 0x7af   : > { %6882 = vmatprep.mubr.bf16.mxu1 %v14909_v32  ;;  %v14920_v32 = vld [vmem:[#allocation3 + $0x328] ss:$20 sps:$4 sm:$0xff]  }
 0x7b6   : > { %6883 = vmatmul.mubr.bf16.gmra.mrb[244].mxu1 %v14912_v16  ;;  %v14921_v16 = vld [vmem:[#allocation3 + $0x350] ss:$20 sps:$4 sm:$0xff]  }
 0x7b7   : > { %6890 = vmatprep.mubr.bf16.mxu1 %v14913_v55  ;;  %v17990_v55 = vpop.f32.mrb[136].mxu0 }
 0x7b8   : > { %v17992_v12 = vpop.f32.mrb[137].mxu0 }
 0x7b9   : > { %v17994_v45 = vpop.f32.mrb[138].mxu0 }
 0x7be   : > { %6891 = vmatmul.mubr.bf16.gmra.mrb[248].mxu1 %v14915_v29  ;;  %v17996_v29 = vpop.f32.mrb[139].mxu0 }
 0x7bf   : > { %6898 = vmatprep.mubr.bf16.mxu1 %v14917_v61  ;;  %v14925_v61 = vld [vmem:[#allocation3 + $0x378] ss:$20 sps:$4 sm:$0xff]  }
 0x7c6   : > { %6899 = vmatmul.mubr.bf16.gmra.mrb[252].mxu1 %v14920_v32  ;;  %v14929_v32 = vld [vmem:[#allocation3 + $0x3a0] ss:$20 sps:$4 sm:$0xff]  }
 0x7c7   : > { %6906 = vmatprep.mubr.bf16.mxu1 %v14923_v42  ;;  %v18000_v42 = vpop.f32.mrb[140].mxu0 }
 0x7c8   : > { %v18002_v8 = vpop.f32.mrb[141].mxu0 }
 0x7c9   : > { %v18004_v60 = vpop.f32.mrb[142].mxu0 }
 0x7ce   : > { %6907 = vmatmul.mubr.bf16.gmra.mrb[164].mxu1 %v14921_v16  ;;  %v18006_v16 = vpop.f32.mrb[143].mxu0 }
 0x7cf   : > { %6914 = vmatprep.mubr.bf16.mxu1 %v14927_v14  ;;  %v14933_v14 = vld [vmem:[#allocation3 + $0x3c8] ss:$20 sps:$4 sm:$0xff]  }
 0x7d6   : > { %6915 = vmatmul.mubr.bf16.gmra.mrb[0].mxu1 %v14925_v61  ;;  %v14937_v61 = vld [vmem:[#allocation3 + $0x3f0] ss:$20 sps:$4 sm:$0xff]  }
 0x7d7   : > { %6922 = vmatprep.mubr.bf16.mxu1 %v14931_v40  ;;  %v18010_v40 = vpop.f32.mrb[144].mxu0 }
 0x7d8   : > { %v18012_v27 = vpop.f32.mrb[145].mxu0 }
 0x7d9   : > { %v18014_v18 = vpop.f32.mrb[146].mxu0 }
 0x7de   : > { %6923 = vmatmul.mubr.bf16.gmra.mrb[4].mxu1 %v14929_v32  ;;  %v18016_v32 = vpop.f32.mrb[147].mxu0 }
 0x7df   : > { %6930 = vmatprep.mubr.bf16.mxu1 %v14935_v51  ;;  %v18020_v33 = vpop.f32.mrb[148].mxu0 }
 0x7e0   : > { %v18023_v37 = vpop.f32.mrb[149].mxu0 }
 0x7e1   : > { %v18025_v26 = vpop.f32.mrb[150].mxu0 }
 0x7e6   : > { %6931 = vmatmul.mubr.bf16.gmra.mrb[8].mxu1 %v14933_v14 }
 0x7e7   : > { %6938 = vmatprep.mubr.bf16.mxu1 %v14939_v22 }
 0x7ee   : > { %6939 = vmatmul.mubr.bf16.gmra.mrb[12].mxu1 %v14937_v61 }
 0x7ef   : > { %6946 = vmatprep.mubr.bf16.mxu1 %v14943_v10  ;;  %v14951_v10 = vld [vmem:[#allocation3 + $0x46c] ss:$20 sps:$4 sm:$0xff]  }
 0x7f1   : > { %v18018_v51 = vpop.f32.mrb[76].mxu1 }
 0x7f2   : > { %18918 = vst [vmem:[#allocation91_spill] sm:$0xff] %v18018_v51  ;;  %v6702_v62 = vpop.f32.mrb[77].mxu1 }
 0x7f3   : > { %v6703_v14 = vpop.f32.mrb[78].mxu1  ;;  %v18919_v62 = vld [vmem:[#allocation18_spill] sm:$0xff] }
 0x7f4   : > { %v6704_v15 = vpop.f32.mrb[79].mxu1 }
 0x7f6   : > { %6947 = vmatmul.mubr.bf16.gmra.mrb[16].mxu1 %v14941_v7  ;;  %v18029_v7 = vpop.f32.mrb[151].mxu0 }
 0x7f7   : > { %6954 = vmatprep.mubr.bf16.mxu1 %v14947_v52  ;;  %v15005_v52 = vld [vmem:[#allocation6 + $0x4] ss:$24 sps:$4 sm:$0xff]  }
 0x7f8   : > { %8928 = vmatprep.mubr.bf16.mxu0 %v15005_v52 }
 0x7f9   : > { %v6740_v22 = vpop.f32.mrb[172].mxu1 }
 0x7fa   : > { %v7109_v28 = vadd.f32 %v17942_v21, %v6740_v22  ;;  %v6742_v9 = vpop.f32.mrb[173].mxu1 }
 0x7fb   : > { %v6743_v61 = vpop.f32.mrb[174].mxu1 }
 0x7fc   : > { %v7442_v51 = vmax.f32 %v18919_v62, %v7109_v28  ;;  %v7112_v14 = vadd.f32 %v17946_v35, %v6743_v61  ;;  %v6745_v15 = vpop.f32.mrb[175].mxu1  ;;  %v14955_v62 = vld [vmem:[#allocation3 + $0x494] ss:$20 sps:$4 sm:$0xff]  }
 0x7fd   : > { %v18921_v35 = vld [vmem:[#allocation20_spill] sm:$0xff] }
 0x7fe   : > { %v7443_v49 = vmax.f32 %v18920_v17, %v7112_v14  ;;  %6955 = vmatmul.mubr.bf16.gmra.mrb[20].mxu1 %v14945_v58  ;;  %v7525_v9 = vmax.f32 %v7442_v51, 0.0  ;;  %v18922_v17 = vld [vmem:[#allocation21_spill] sm:$0xff] }
 0x7ff   : > { %6962 = vmatprep.mubr.bf16.mxu1 %v14951_v10 }
 0x800   : > { %v7526_v21 = vmax.f32 %v7443_v49, 0.0 }
 0x801   : > { %v6748_v22 = vpop.f32.mrb[176].mxu1 }
 0x802   : > { %v7117_v1 = vadd.f32 %v17940_v24, %v6748_v22  ;;  %v6750_v41 = vpop.f32.mrb[177].mxu1  ;;  %v7608_v63 = vpack.c.bf16 %v7526_v21, %v7525_v9  ;;  %v18923_v21 = vld [vmem:[#allocation22_spill] sm:$0xff] }
 0x803   : > { %v6751_v28 = vpop.f32.mrb[178].mxu1  ;;  %v18037_v41 = vpop.f32.mrb[152].mxu0 }
 0x804   : > { %v7444_v61 = vmax.f32 %v18921_v35, %v7117_v1  ;;  %v7120_v15 = vadd.f32 %v17944_v36, %v6751_v28  ;;  %v6753_v0 = vpop.f32.mrb[179].mxu1  ;;  %8897 = vmatpush1.bf16.msra.mxu0 %v7608_v63  ;;  %v14953_v1 = vld [vmem:[#allocation3 + $0x490] ss:$20 sps:$4 sm:$0xff]   ;;  %v18040_v9 = vpop.f32.mrb[153].mxu0 }
 0x805   : > { %8898 = vmatprep.subr.bf16.mxu0 %v18816_v34  ;;  %v14959_v63 = vld [vmem:[#allocation3 + $0x4bc] ss:$20 sps:$4 sm:$0xff]   ;;  %v18042_v36 = vpop.f32.mrb[154].mxu0 }
 0x806   : > { %v7445_v58 = vmax.f32 %v18922_v17, %v7120_v15  ;;  %6963 = vmatmul.mubr.bf16.gmra.mrb[24].mxu1 %v14949_v46  ;;  %v7527_v49 = vmax.f32 %v7444_v61, 0.0 }
 0x807   : > { %6970 = vmatprep.mubr.bf16.mxu1 %v14955_v62  ;;  %v18046_v62 = vpop.f32.mrb[155].mxu0 }
 0x808   : > { %v7528_v51 = vmax.f32 %v7445_v58, 0.0 }
 0x809   : > { %v6756_v24 = vpop.f32.mrb[180].mxu1 }
 0x80a   : > { %v7125_v10 = vadd.f32 %v17952_v57, %v6756_v24  ;;  %v6758_v14 = vpop.f32.mrb[181].mxu1  ;;  %v7609_v52 = vpack.c.bf16 %v7528_v51, %v7527_v49  ;;  %v18924_v57 = vld [vmem:[#allocation23_spill] sm:$0xff] }
 0x80b   : > { %v6759_v0 = vpop.f32.mrb[182].mxu1  ;;  %v14957_v24 = vld [vmem:[#allocation3 + $0x4b8] ss:$20 sps:$4 sm:$0xff]   ;;  %v18925_v14 = vld [vmem:[#allocation24_spill] sm:$0xff] }
 0x80c   : > { %v7446_v22 = vmax.f32 %v18923_v21, %v7125_v10  ;;  %v7128_v46 = vadd.f32 %v17956_v30, %v6759_v0  ;;  %v6761_v28 = vpop.f32.mrb[183].mxu1  ;;  %8899 = vmatpush1.bf16.msra.mxu0 %v7609_v52  ;;  %v14963_v30 = vld [vmem:[#allocation3 + $0x4e4] ss:$20 sps:$4 sm:$0xff]  }
 0x80d   : > { %8900 = vmatprep.subr.bf16.mxu0 %v18816_v34  ;;  %v18055_v28 = vpop.f32.mrb[156].mxu0 }
 0x80e   : > { %v7447_v35 = vmax.f32 %v18924_v57, %v7128_v46  ;;  %6971 = vmatmul.mubr.bf16.gmra.mrb[28].mxu1 %v14953_v1  ;;  %v7529_v61 = vmax.f32 %v7446_v22, 0.0  ;;  %v18926_v1 = vld [vmem:[#allocation25_spill] sm:$0xff] }
 0x80f   : > { %6978 = vmatprep.mubr.bf16.mxu1 %v14959_v63 }
 0x810   : > { %v7530_v15 = vmax.f32 %v7447_v35, 0.0 }
 0x811   : > { %v6764_v17 = vpop.f32.mrb[184].mxu1 }
 0x812   : > { %v7133_v58 = vadd.f32 %v17950_v3, %v6764_v17  ;;  %v6766_v49 = vpop.f32.mrb[185].mxu1  ;;  %v7610_v51 = vpack.c.bf16 %v7530_v15, %v7529_v61  ;;  %v14961_v15 = vld [vmem:[#allocation3 + $0x4e0] ss:$20 sps:$4 sm:$0xff]   ;;  %v18058_v17 = vpop.f32.mrb[157].mxu0 }
 0x813   : > { %v6767_v10 = vpop.f32.mrb[186].mxu1  ;;  %v18060_v49 = vpop.f32.mrb[158].mxu0 }
 0x814   : > { %v7448_v52 = vmax.f32 %v18925_v14, %v7133_v58  ;;  %v7136_v0 = vadd.f32 %v17954_v56, %v6767_v10  ;;  %v6769_v21 = vpop.f32.mrb[187].mxu1  ;;  %8901 = vmatpush1.bf16.msra.mxu0 %v7610_v51  ;;  %v14967_v58 = vld [vmem:[#allocation3 + $0x50c] ss:$20 sps:$4 sm:$0xff]   ;;  %v18064_v14 = vpop.f32.mrb[159].mxu0 }
 0x815   : > { %8902 = vmatprep.subr.bf16.mxu0 %v18816_v34  ;;  %v18927_v51 = vld [vmem:[#allocation26_spill] sm:$0xff] }
 0x816   : > { %v7449_v63 = vmax.f32 %v18926_v1, %v7136_v0  ;;  %6979 = vmatmul.mubr.bf16.gmra.mrb[32].mxu1 %v14957_v24  ;;  %v7531_v22 = vmax.f32 %v7448_v52, 0.0 }
 0x817   : > { %6986 = vmatprep.mubr.bf16.mxu1 %v14963_v30 }
 0x818   : > { %v7532_v46 = vmax.f32 %v7449_v63, 0.0 }
 0x819   : > { %v6772_v3 = vpop.f32.mrb[188].mxu1 }
 0x81a   : > { %v7141_v57 = vadd.f32 %v17962_v20, %v6772_v3  ;;  %v6774_v35 = vpop.f32.mrb[189].mxu1  ;;  %v7611_v61 = vpack.c.bf16 %v7532_v46, %v7531_v22  ;;  %v18928_v20 = vld [vmem:[#allocation27_spill] sm:$0xff] }
 0x81b   : > { %v6775_v56 = vpop.f32.mrb[190].mxu1  ;;  %v14965_v3 = vld [vmem:[#allocation3 + $0x508] ss:$20 sps:$4 sm:$0xff]   ;;  %v18929_v35 = vld [vmem:[#allocation28_spill] sm:$0xff] }
 0x81c   : > { %v7450_v10 = vmax.f32 %v18927_v51, %v7141_v57  ;;  %v7144_v24 = vadd.f32 %v17966_v54, %v6775_v56  ;;  %v6777_v30 = vpop.f32.mrb[191].mxu1  ;;  %8903 = vmatpush1.bf16.msra.mxu0 %v7611_v61  ;;  %v14971_v54 = vld [vmem:[#allocation3 + $0x534] ss:$20 sps:$4 sm:$0xff]  }
 0x81d   : > { %8904 = vmatprep.subr.bf16.mxu0 %v18816_v34  ;;  %v18073_v30 = vpop.f32.mrb[160].mxu0 }
 0x81e   : > { %v7451_v52 = vmax.f32 %v18928_v20, %v7144_v24  ;;  %6987 = vmatmul.mubr.bf16.gmra.mrb[36].mxu1 %v14961_v15  ;;  %v7533_v0 = vmax.f32 %v7450_v10, 0.0  ;;  %v18930_v15 = vld [vmem:[#allocation29_spill] sm:$0xff] }
 0x81f   : > { %6994 = vmatprep.mubr.bf16.mxu1 %v14967_v58 }
 0x820   : > { %v7534_v21 = vmax.f32 %v7451_v52, 0.0 }
 0x821   : > { %v6780_v1 = vpop.f32.mrb[192].mxu1 }
 0x822   : > { %v7149_v63 = vadd.f32 %v17960_v19, %v6780_v1  ;;  %v6782_v22 = vpop.f32.mrb[193].mxu1  ;;  %v7612_v46 = vpack.c.bf16 %v7534_v21, %v7533_v0  ;;  %v14969_v21 = vld [vmem:[#allocation3 + $0x530] ss:$20 sps:$4 sm:$0xff]   ;;  %v18076_v1 = vpop.f32.mrb[161].mxu0 }
 0x823   : > { %v6783_v57 = vpop.f32.mrb[194].mxu1  ;;  %v18078_v22 = vpop.f32.mrb[162].mxu0 }
 0x824   : > { %v7452_v61 = vmax.f32 %v18929_v35, %v7149_v63  ;;  %v7152_v56 = vadd.f32 %v17964_v43, %v6783_v57  ;;  %v6785_v51 = vpop.f32.mrb[195].mxu1  ;;  %8905 = vmatpush1.bf16.msra.mxu0 %v7612_v46  ;;  %v14975_v63 = vld [vmem:[#allocation3 + $0x55c] ss:$20 sps:$4 sm:$0xff]   ;;  %v18931_v46 = vld [vmem:[#allocation30_spill] sm:$0xff]  ;;  %v18082_v35 = vpop.f32.mrb[163].mxu0 }
 0x825   : > { %8906 = vmatprep.subr.bf16.mxu0 %v18816_v34 }
 0x826   : > { %v7453_v58 = vmax.f32 %v18930_v15, %v7152_v56  ;;  %6995 = vmatmul.mubr.bf16.gmra.mrb[40].mxu1 %v14965_v3  ;;  %v7535_v10 = vmax.f32 %v7452_v61, 0.0  ;;  %v18932_v61 = vld [vmem:[#allocation31_spill] sm:$0xff] }
 0x827   : > { %7002 = vmatprep.mubr.bf16.mxu1 %v14971_v54 }
 0x828   : > { %v7536_v24 = vmax.f32 %v7453_v58, 0.0 }
 0x829   : > { %v6788_v19 = vpop.f32.mrb[196].mxu1 }
 0x82a   : > { %v7613_v20 = vpack.c.bf16 %v7536_v24, %v7535_v10  ;;  %v7157_v52 = vadd.f32 %v17972_v53, %v6788_v19  ;;  %v6790_v0 = vpop.f32.mrb[197].mxu1  ;;  %v14973_v19 = vld [vmem:[#allocation3 + $0x558] ss:$20 sps:$4 sm:$0xff]  }
 0x82b   : > { %v6791_v43 = vpop.f32.mrb[198].mxu1  ;;  %v18933_v0 = vld [vmem:[#allocation32_spill] sm:$0xff] }
 0x82c   : > { %v7454_v57 = vmax.f32 %v18931_v46, %v7157_v52  ;;  %v7160_v3 = vadd.f32 %v17976_v25, %v6791_v43  ;;  %v6793_v54 = vpop.f32.mrb[199].mxu1  ;;  %8907 = vmatpush1.bf16.msra.mxu0 %v7613_v20  ;;  %v14979_v25 = vld [vmem:[#allocation3 + $0x584] ss:$20 sps:$4 sm:$0xff]  }
 0x82d   : > { %8908 = vmatprep.subr.bf16.mxu0 %v18816_v34  ;;  %v18091_v54 = vpop.f32.mrb[164].mxu0 }
 0x82e   : > { %v7455_v53 = vmax.f32 %v18932_v61, %v7160_v3  ;;  %7003 = vmatmul.mubr.bf16.gmra.mrb[44].mxu1 %v14969_v21  ;;  %v7537_v56 = vmax.f32 %v7454_v57, 0.0  ;;  %v18934_v21 = vld [vmem:[#allocation33_spill] sm:$0xff] }
 0x82f   : > { %7010 = vmatprep.mubr.bf16.mxu1 %v14975_v63 }
 0x830   : > { %v7538_v51 = vmax.f32 %v7455_v53, 0.0 }
 0x831   : > { %v6796_v15 = vpop.f32.mrb[200].mxu1 }
 0x832   : > { %v7165_v58 = vadd.f32 %v17970_v11, %v6796_v15  ;;  %v6798_v10 = vpop.f32.mrb[201].mxu1  ;;  %v7614_v24 = vpack.c.bf16 %v7538_v51, %v7537_v56  ;;  %v14977_v51 = vld [vmem:[#allocation3 + $0x580] ss:$20 sps:$4 sm:$0xff]   ;;  %v18094_v15 = vpop.f32.mrb[165].mxu0 }
 0x833   : > { %v6799_v52 = vpop.f32.mrb[202].mxu1  ;;  %v18096_v10 = vpop.f32.mrb[166].mxu0 }
 0x834   : > { %v7456_v20 = vmax.f32 %v18933_v0, %v7165_v58  ;;  %v7168_v43 = vadd.f32 %v17974_v59, %v6799_v52  ;;  %v6801_v46 = vpop.f32.mrb[203].mxu1  ;;  %8909 = vmatpush1.bf16.msra.mxu0 %v7614_v24  ;;  %v14983_v58 = vld [vmem:[#allocation3 + $0x5ac] ss:$20 sps:$4 sm:$0xff]   ;;  %v18100_v0 = vpop.f32.mrb[167].mxu0 }
 0x835   : > { %8910 = vmatprep.subr.bf16.mxu0 %v18816_v34  ;;  %v18935_v24 = vld [vmem:[#allocation34_spill] sm:$0xff] }
 0x836   : > { %v7457_v63 = vmax.f32 %v18934_v21, %v7168_v43  ;;  %7011 = vmatmul.mubr.bf16.gmra.mrb[48].mxu1 %v14973_v19  ;;  %v7539_v57 = vmax.f32 %v7456_v20, 0.0  ;;  %v18936_v20 = vld [vmem:[#allocation35_spill] sm:$0xff] }
 0x837   : > { %7018 = vmatprep.mubr.bf16.mxu1 %v14979_v25 }
 0x838   : > { %v7540_v3 = vmax.f32 %v7457_v63, 0.0 }
 0x839   : > { %v6804_v11 = vpop.f32.mrb[204].mxu1 }
 0x83a   : > { %v7615_v61 = vpack.c.bf16 %v7540_v3, %v7539_v57  ;;  %v7173_v53 = vadd.f32 %v17982_v39, %v6804_v11  ;;  %v6806_v56 = vpop.f32.mrb[205].mxu1  ;;  %v14981_v11 = vld [vmem:[#allocation3 + $0x5a8] ss:$20 sps:$4 sm:$0xff]  }
 0x83b   : > { %v6807_v59 = vpop.f32.mrb[206].mxu1  ;;  %v18937_v56 = vld [vmem:[#allocation36_spill] sm:$0xff] }
 0x83c   : > { %v7458_v52 = vmax.f32 %v18935_v24, %v7173_v53  ;;  %v7176_v19 = vadd.f32 %v17986_v38, %v6807_v59  ;;  %v6809_v25 = vpop.f32.mrb[207].mxu1  ;;  %8911 = vmatpush1.bf16.msra.mxu0 %v7615_v61  ;;  %v14987_v38 = vld [vmem:[#allocation3 + $0x5d4] ss:$20 sps:$4 sm:$0xff]  }
 0x83d   : > { %8912 = vmatprep.subr.bf16.mxu0 %v18816_v34  ;;  %v18109_v25 = vpop.f32.mrb[168].mxu0 }
 0x83e   : > { %v7459_v39 = vmax.f32 %v18936_v20, %v7176_v19  ;;  %7019 = vmatmul.mubr.bf16.gmra.mrb[52].mxu1 %v14977_v51  ;;  %v7541_v43 = vmax.f32 %v7458_v52, 0.0  ;;  %v18938_v51 = vld [vmem:[#allocation37_spill] sm:$0xff] }
 0x83f   : > { %7026 = vmatprep.mubr.bf16.mxu1 %v14983_v58 }
 0x840   : > { %v7542_v46 = vmax.f32 %v7459_v39, 0.0 }
 0x841   : > { %v6812_v21 = vpop.f32.mrb[208].mxu1 }
 0x842   : > { %v7181_v63 = vadd.f32 %v17980_v50, %v6812_v21  ;;  %v6814_v57 = vpop.f32.mrb[209].mxu1  ;;  %v7616_v3 = vpack.c.bf16 %v7542_v46, %v7541_v43  ;;  %v14985_v46 = vld [vmem:[#allocation3 + $0x5d0] ss:$20 sps:$4 sm:$0xff]   ;;  %v18112_v21 = vpop.f32.mrb[169].mxu0 }
 0x843   : > { %v6815_v53 = vpop.f32.mrb[210].mxu1  ;;  %v18114_v57 = vpop.f32.mrb[170].mxu0 }
 0x844   : > { %v7460_v61 = vmax.f32 %v18937_v56, %v7181_v63  ;;  %v7184_v59 = vadd.f32 %v17984_v4, %v6815_v53  ;;  %v6817_v24 = vpop.f32.mrb[211].mxu1  ;;  %8913 = vmatpush1.bf16.msra.mxu0 %v7616_v3  ;;  %v14991_v63 = vld [vmem:[#allocation3 + $0x5fc] ss:$20 sps:$4 sm:$0xff]   ;;  %v18939_v3 = vld [vmem:[#allocation38_spill] sm:$0xff]  ;;  %v18118_v56 = vpop.f32.mrb[171].mxu0 }
 0x845   : > { %8914 = vmatprep.subr.bf16.mxu0 %v18816_v34 }
 0x846   : > { %v7461_v58 = vmax.f32 %v18938_v51, %v7184_v59  ;;  %7027 = vmatmul.mubr.bf16.gmra.mrb[56].mxu1 %v14981_v11  ;;  %v7543_v52 = vmax.f32 %v7460_v61, 0.0  ;;  %v18940_v61 = vld [vmem:[#allocation39_spill] sm:$0xff] }
 0x847   : > { %7034 = vmatprep.mubr.bf16.mxu1 %v14987_v38 }
 0x848   : > { %v7544_v19 = vmax.f32 %v7461_v58, 0.0 }
 0x849   : > { %v6820_v50 = vpop.f32.mrb[212].mxu1 }
 0x84a   : > { %v7617_v20 = vpack.c.bf16 %v7544_v19, %v7543_v52  ;;  %v7189_v39 = vadd.f32 %v17992_v12, %v6820_v50  ;;  %v6822_v43 = vpop.f32.mrb[213].mxu1  ;;  %v14989_v50 = vld [vmem:[#allocation3 + $0x5f8] ss:$20 sps:$4 sm:$0xff]  }
 0x84b   : > { %v6823_v4 = vpop.f32.mrb[214].mxu1  ;;  %v18941_v43 = vld [vmem:[#allocation40_spill] sm:$0xff] }
 0x84c   : > { %v7462_v53 = vmax.f32 %v18939_v3, %v7189_v39  ;;  %v7192_v11 = vadd.f32 %v17996_v29, %v6823_v4  ;;  %v6825_v38 = vpop.f32.mrb[215].mxu1  ;;  %8915 = vmatpush1.bf16.msra.mxu0 %v7617_v20  ;;  %v14995_v29 = vld [vmem:[#allocation3 + $0x624] ss:$20 sps:$4 sm:$0xff]  }
 0x84d   : > { %8916 = vmatprep.subr.bf16.mxu0 %v18816_v34 }
 0x84e   : > { %v7463_v12 = vmax.f32 %v18940_v61, %v7192_v11  ;;  %7035 = vmatmul.mubr.bf16.gmra.mrb[60].mxu1 %v14985_v46  ;;  %v7545_v59 = vmax.f32 %v7462_v53, 0.0  ;;  %v18942_v46 = vld [vmem:[#allocation41_spill] sm:$0xff] }
 0x84f   : > { %7042 = vmatprep.mubr.bf16.mxu1 %v14991_v63 }
 0x850   : > { %v7546_v24 = vmax.f32 %v7463_v12, 0.0 }
 0x851   : > { %v6828_v51 = vpop.f32.mrb[216].mxu1 }
 0x852   : > { %v7618_v58 = vpack.c.bf16 %v7546_v24, %v7545_v59  ;;  %v7197_v52 = vadd.f32 %v17990_v55, %v6828_v51  ;;  %v6830_v19 = vpop.f32.mrb[217].mxu1  ;;  %v18127_v55 = vpop.f32.mrb[172].mxu0  ;;  %v14993_v24 = vld [vmem:[#allocation3 + $0x620] ss:$20 sps:$4 sm:$0xff]  }
 0x853   : > { %v6831_v39 = vpop.f32.mrb[218].mxu1  ;;  %v18130_v51 = vpop.f32.mrb[173].mxu0  ;;  %v18943_v19 = vld [vmem:[#allocation43_spill] sm:$0xff] }
 0x854   : > { %v7464_v20 = vmax.f32 %v18941_v43, %v7197_v52  ;;  %v7200_v4 = vadd.f32 %v17994_v45, %v6831_v39  ;;  %v6833_v3 = vpop.f32.mrb[219].mxu1  ;;  %8917 = vmatpush1.bf16.msra.mxu0 %v7618_v58  ;;  %v14999_v58 = vld [vmem:[#allocation3 + $0x64c] ss:$20 sps:$4 sm:$0xff]   ;;  %v18132_v52 = vpop.f32.mrb[174].mxu0 }
 0x855   : > { %8918 = vmatprep.subr.bf16.mxu0 %v18816_v34  ;;  %v18136_v43 = vpop.f32.mrb[175].mxu0 }
 0x856   : > { %v7465_v63 = vmax.f32 %v18942_v46, %v7200_v4  ;;  %7043 = vmatmul.mubr.bf16.gmra.mrb[64].mxu1 %v14989_v50  ;;  %v7547_v53 = vmax.f32 %v7464_v20, 0.0  ;;  %v18944_v20 = vld [vmem:[#allocation45_spill] sm:$0xff]  ;;  %v5168_v46 = vld [vmem:[#allocation3 + $0x670] sm:$0xff] }
 0x857   : > { %7050 = vmatprep.mubr.bf16.mxu1 %v14995_v29 }
 0x858   : > { %v7548_v11 = vmax.f32 %v7465_v63, 0.0 }
 0x859   : > { %v6836_v38 = vpop.f32.mrb[220].mxu1 }
 0x85a   : > { %v7619_v61 = vpack.c.bf16 %v7548_v11, %v7547_v53  ;;  %v7205_v12 = vadd.f32 %v18002_v8, %v6836_v38  ;;  %v6838_v59 = vpop.f32.mrb[221].mxu1 }
 0x85b   : > { %v6839_v45 = vpop.f32.mrb[222].mxu1  ;;  %v12449_v59 = vcombine.high %v5168_v46, %v5168_v46 }
 0x85c   : > { %v7466_v39 = vmax.f32 %v18943_v19, %v7205_v12  ;;  %v7208_v50 = vadd.f32 %v18006_v16, %v6839_v45  ;;  %v6841_v29 = vpop.f32.mrb[223].mxu1  ;;  %8919 = vmatpush1.bf16.msra.mxu0 %v7619_v61  ;;  %v14997_v12 = vld [vmem:[#allocation3 + $0x648] ss:$20 sps:$4 sm:$0xff]   ;;  %v18945_v61 = vld [vmem:[#allocation46_spill] sm:$0xff] }
 0x85d   : > { %8920 = vmatprep.subr.bf16.mxu0 %v18816_v34 }
 0x85e   : > { %v7467_v8 = vmax.f32 %v18944_v20, %v7208_v50  ;;  %7051 = vmatmul.mubr.bf16.gmra.mrb[68].mxu1 %v14993_v24  ;;  %v7549_v4 = vmax.f32 %v7466_v39, 0.0 }
 0x85f   : > { %7058 = vmatprep.mubr.bf16.mxu1 %v14999_v58 }
 0x860   : > { %v7550_v3 = vmax.f32 %v7467_v8, 0.0 }
 0x861   : > { %v6844_v63 = vpop.f32.mrb[224].mxu1 }
 0x862   : > { %v7620_v53 = vpack.c.bf16 %v7550_v3, %v7549_v4  ;;  %v7213_v11 = vadd.f32 %v18000_v42, %v6844_v63  ;;  %v6846_v38 = vpop.f32.mrb[225].mxu1  ;;  %v18145_v42 = vpop.f32.mrb[176].mxu0  ;;  %v12448_v3 = vcombine.low %v5168_v46, %v5168_v46 }
 0x863   : > { %v6847_v16 = vpop.f32.mrb[226].mxu1  ;;  %v18148_v63 = vpop.f32.mrb[177].mxu0 }
 0x864   : > { %v7468_v45 = vmax.f32 %v18945_v61, %v7213_v11  ;;  %v7216_v19 = vadd.f32 %v18004_v60, %v6847_v16  ;;  %v6849_v29 = vpop.f32.mrb[227].mxu1  ;;  %8921 = vmatpush1.bf16.msra.mxu0 %v7620_v53  ;;  %v18150_v53 = vpop.f32.mrb[178].mxu0  ;;  %v18946_v11 = vld [vmem:[#allocation47_spill] sm:$0xff] }
 0x865   : > { %8922 = vmatprep.subr.bf16.mxu0 %v18816_v34  ;;  %v18154_v16 = vpop.f32.mrb[179].mxu0 }
 0x866   : > { %v7469_v24 = vmax.f32 %v17666_v44, %v7216_v19  ;;  %7059 = vmatmul.mubr.bf16.gmra.mrb[72].mxu1 %v14997_v12  ;;  %v7551_v58 = vmax.f32 %v7468_v45, 0.0 }
 0x867   : > { %7066 = vmatprep.mubr.bf16.mxu1 %v12449_v59 }
 0x868   : > { %v7552_v39 = vmax.f32 %v7469_v24, 0.0 }
 0x869   : > { %v6852_v50 = vpop.f32.mrb[228].mxu1 }
 0x86a   : > { %v7621_v20 = vpack.c.bf16 %v7552_v39, %v7551_v58  ;;  %v7221_v8 = vadd.f32 %v18012_v27, %v6852_v50  ;;  %v6854_v4 = vpop.f32.mrb[229].mxu1 }
 0x86b   : > { %v6855_v60 = vpop.f32.mrb[230].mxu1  ;;  %v18163_v4 = vpop.f32.mrb[180].mxu0 }
 0x86c   : > { %v7470_v38 = vmax.f32 %v18946_v11, %v7221_v8  ;;  %v7224_v44 = vadd.f32 %v18016_v32, %v6855_v60  ;;  %v6857_v12 = vpop.f32.mrb[231].mxu1  ;;  %8923 = vmatpush1.bf16.msra.mxu0 %v7621_v20  ;;  %v18166_v11 = vpop.f32.mrb[181].mxu0 }
 0x86d   : > { %8924 = vmatprep.subr.bf16.mxu0 %v18816_v34 }
 0x86e   : > { %v7471_v59 = vmax.f32 %v17680_v2, %v7224_v44  ;;  %7067 = vmatmul.mubr.bf16.gmra.mrb[80].mxu1 %v12448_v3  ;;  %v7553_v27 = vmax.f32 %v7470_v38, 0.0  ;;  %v15003_v38 = vld [vmem:[#allocation6] ss:$24 sps:$4 sm:$0xff]  }
 0x870   : > { %v7554_v46 = vmax.f32 %v7471_v59, 0.0  ;;  %v15008_v59 = vld [vmem:[#allocation6 + $0x34] ss:$24 sps:$4 sm:$0xff]  }
 0x871   : > { %v6860_v61 = vpop.f32.mrb[232].mxu1 }
 0x872   : > { %v7622_v45 = vpack.c.bf16 %v7554_v46, %v7553_v27  ;;  %v7229_v19 = vadd.f32 %v18010_v40, %v6860_v61  ;;  %v6862_v29 = vpop.f32.mrb[233].mxu1 }
 0x873   : > { %v6863_v24 = vpop.f32.mrb[234].mxu1 }
 0x874   : > { %v7472_v58 = vmax.f32 %v17683_v48, %v7229_v19  ;;  %v7232_v32 = vadd.f32 %v18014_v18, %v6863_v24  ;;  %v6865_v39 = vpop.f32.mrb[235].mxu1  ;;  %8925 = vmatpush1.bf16.msra.mxu0 %v7622_v45  ;;  %v18168_v18 = vpop.f32.mrb[182].mxu0 }
 0x875   : > { %8926 = vmatprep.subr.bf16.mxu0 %v18816_v34  ;;  %v18172_v27 = vpop.f32.mrb[183].mxu0 }
 0x876   : > { %v7473_v50 = vmax.f32 %v17686_v6, %v7232_v32  ;;  %v7555_v2 = vmax.f32 %v7472_v58, 0.0 }
 0x878   : > { %v7556_v20 = vmax.f32 %v7473_v50, 0.0  ;;  %v15011_v50 = vld [vmem:[#allocation6 + $0x64] ss:$24 sps:$4 sm:$0xff]  }
 0x879   : > { %v6868_v8 = vpop.f32.mrb[236].mxu1 }
 0x87a   : > { %v7623_v3 = vpack.c.bf16 %v7556_v20, %v7555_v2  ;;  %v7237_v40 = vadd.f32 %v18023_v37, %v6868_v8  ;;  %v6870_v60 = vpop.f32.mrb[237].mxu1 }
 0x87b   : > { %v6871_v48 = vpop.f32.mrb[238].mxu1 }
 0x87c   : > { %v7474_v44 = vmax.f32 %v17695_v47, %v7237_v40  ;;  %v7240_v12 = vadd.f32 %v18029_v7, %v6871_v48  ;;  %v6873_v6 = vpop.f32.mrb[239].mxu1  ;;  %8927 = vmatpush1.bf16.msra.mxu0 %v7623_v3  ;;  %v15006_v7 = vld [vmem:[#allocation6 + $0x30] ss:$24 sps:$4 sm:$0xff]   ;;  %v15009_v48 = vld [vmem:[#allocation6 + $0x60] ss:$24 sps:$4 sm:$0xff]  }
 0x87d   : > { %9192 = vmatprep.subr.bf16.mxu0 %v18816_v34  ;;  %v15014_v6 = vld [vmem:[#allocation6 + $0x94] ss:$24 sps:$4 sm:$0xff]  }
 0x87e   : > { %v7475_v37 = vmax.f32 %v17704_v23, %v7240_v12  ;;  %v7557_v46 = vmax.f32 %v7474_v44, 0.0 }
 0x87f   : > { %8929 = vmatmul.mubr.bf16.vlgmr.msra.gmra.mrb[200].mxu0 %v15003_v38 }
 0x880   : > { %v7558_v61 = vmax.f32 %v7475_v37, 0.0  ;;  %8936 = vmatprep.mubr.bf16.mxu0 %v15008_v59  ;;  %v18947_v37 = vld [vmem:[#allocation48_spill] sm:$0xff] }
 0x881   : > { %v6876_v45 = vpop.f32.mrb[240].mxu1 }
 0x882   : > { %v7624_v19 = vpack.c.bf16 %v7558_v61, %v7557_v46  ;;  %v7245_v29 = vadd.f32 %v18020_v33, %v6876_v45  ;;  %v6878_v47 = vpop.f32.mrb[241].mxu1  ;;  %v18181_v33 = vpop.f32.mrb[184].mxu0 }
 0x883   : > { %v6879_v24 = vpop.f32.mrb[242].mxu1  ;;  %v18184_v60 = vpop.f32.mrb[185].mxu0 }
 0x884   : > { %v7476_v58 = vmax.f32 %v17709_v31, %v7245_v29  ;;  %v7248_v32 = vadd.f32 %v18025_v26, %v6879_v24  ;;  %v6881_v39 = vpop.f32.mrb[243].mxu1  ;;  %9193 = vmatpush1.bf16.msra.mxu0 %v7624_v19  ;;  %v18186_v38 = vpop.f32.mrb[186].mxu0  ;;  %v18948_v24 = vld [vmem:[#allocation49_spill] sm:$0xff] }
 0x885   : > { %9194 = vmatprep.subr.bf16.mxu0 %v18816_v34  ;;  %v18190_v59 = vpop.f32.mrb[187].mxu0  ;;  %v15017_v39 = vld [vmem:[#allocation6 + $0xc4] ss:$24 sps:$4 sm:$0xff]  }
 0x886   : > { %v7477_v23 = vmax.f32 %v17714_v5, %v7248_v32  ;;  %v7559_v2 = vmax.f32 %v7476_v58, 0.0 }
 0x887   : > { %8937 = vmatmul.mubr.bf16.gmra.mrb[204].mxu0 %v15006_v7 }
 0x888   : > { %v7560_v20 = vmax.f32 %v7477_v23, 0.0  ;;  %8944 = vmatprep.mubr.bf16.mxu0 %v15011_v50  ;;  %v18949_v50 = vld [vmem:[#allocation50_spill] sm:$0xff] }
 0x889   : > { %v6884_v8 = vpop.f32.mrb[244].mxu1 }
 0x88a   : > { %v7625_v3 = vpack.c.bf16 %v7560_v20, %v7559_v2  ;;  %v7253_v40 = vadd.f32 %v18040_v9, %v6884_v8  ;;  %v6886_v31 = vpop.f32.mrb[245].mxu1 }
 0x88b   : > { %v6887_v26 = vpop.f32.mrb[246].mxu1 }
 0x88c   : > { %v7478_v44 = vmax.f32 %v17723_v13, %v7253_v40  ;;  %v7256_v5 = vadd.f32 %v18046_v62, %v6887_v26  ;;  %v6889_v12 = vpop.f32.mrb[247].mxu1  ;;  %9195 = vmatpush1.bf16.msra.mxu0 %v7625_v3  ;;  %v15012_v62 = vld [vmem:[#allocation6 + $0x90] ss:$24 sps:$4 sm:$0xff]  }
 0x88d   : > { %9196 = vmatprep.subr.bf16.mxu0 %v18816_v34 }
 0x88e   : > { %v7479_v9 = vmax.f32 %v18947_v37, %v7256_v5  ;;  %v7561_v46 = vmax.f32 %v7478_v44, 0.0  ;;  %v18950_v5 = vld [vmem:[#allocation51_spill] sm:$0xff] }
 0x88f   : > { %8945 = vmatmul.mubr.bf16.gmra.mrb[208].mxu0 %v15009_v48  ;;  %v15015_v48 = vld [vmem:[#allocation6 + $0xc0] ss:$24 sps:$4 sm:$0xff]  }
 0x890   : > { %v7562_v61 = vmax.f32 %v7479_v9, 0.0  ;;  %8952 = vmatprep.mubr.bf16.mxu0 %v15014_v6  ;;  %v15020_v9 = vld [vmem:[#allocation6 + $0xf4] ss:$24 sps:$4 sm:$0xff]  }
 0x891   : > { %v6892_v45 = vpop.f32.mrb[248].mxu1 }
 0x892   : > { %v7626_v19 = vpack.c.bf16 %v7562_v61, %v7561_v46  ;;  %v7261_v29 = vadd.f32 %v18037_v41, %v6892_v45  ;;  %v6894_v13 = vpop.f32.mrb[249].mxu1  ;;  %v18199_v41 = vpop.f32.mrb[188].mxu0  ;;  %v18951_v61 = vld [vmem:[#allocation52_spill] sm:$0xff] }
 0x893   : > { %v6895_v47 = vpop.f32.mrb[250].mxu1  ;;  %v18202_v26 = vpop.f32.mrb[189].mxu0 }
 0x894   : > { %v7480_v7 = vmax.f32 %v18948_v24, %v7261_v29  ;;  %v7264_v58 = vadd.f32 %v18042_v36, %v6895_v47  ;;  %v6897_v32 = vpop.f32.mrb[251].mxu1  ;;  %9197 = vmatpush1.bf16.msra.mxu0 %v7626_v19  ;;  %v18204_v44 = vpop.f32.mrb[190].mxu0 }
 0x895   : > { %9198 = vmatprep.subr.bf16.mxu0 %v18816_v34  ;;  %v18208_v46 = vpop.f32.mrb[191].mxu0 }
 0x896   : > { %v7481_v23 = vmax.f32 %v18949_v50, %v7264_v58  ;;  %v7563_v2 = vmax.f32 %v7480_v7, 0.0  ;;  %v18952_v7 = vld [vmem:[#allocation53_spill] sm:$0xff] }
 0x897   : > { %8953 = vmatmul.mubr.bf16.gmra.mrb[212].mxu0 %v15012_v62  ;;  %v15023_v50 = vld [vmem:[#allocation6 + $0x124] ss:$24 sps:$4 sm:$0xff]  }
 0x898   : > { %v7564_v20 = vmax.f32 %v7481_v23, 0.0  ;;  %8960 = vmatprep.mubr.bf16.mxu0 %v15017_v39  ;;  %v18953_v23 = vld [vmem:[#allocation54_spill] sm:$0xff] }
 0x899   : > { %v6900_v8 = vpop.f32.mrb[252].mxu1 }
 0x89a   : > { %v7627_v3 = vpack.c.bf16 %v7564_v20, %v7563_v2  ;;  %v7269_v40 = vadd.f32 %v18058_v17, %v6900_v8  ;;  %v6902_v31 = vpop.f32.mrb[253].mxu1 }
 0x89b   : > { %v6903_v36 = vpop.f32.mrb[254].mxu1 }
 0x89c   : > { %v7482_v12 = vmax.f32 %v18950_v5, %v7269_v40  ;;  %v7272_v6 = vadd.f32 %v18064_v14, %v6903_v36  ;;  %v6905_v37 = vpop.f32.mrb[255].mxu1  ;;  %9199 = vmatpush1.bf16.msra.mxu0 %v7627_v3  ;;  %v15018_v14 = vld [vmem:[#allocation6 + $0xf0] ss:$24 sps:$4 sm:$0xff]   ;;  %v15021_v5 = vld [vmem:[#allocation6 + $0x120] ss:$24 sps:$4 sm:$0xff]  }
 0x89d   : > { %9200 = vmatprep.subr.bf16.mxu0 %v18816_v34 }
 0x89e   : > { %v7483_v17 = vmax.f32 %v18951_v61, %v7272_v6  ;;  %v7565_v45 = vmax.f32 %v7482_v12, 0.0  ;;  %v18954_v6 = vld [vmem:[#allocation55_spill] sm:$0xff] }
 0x89f   : > { %8961 = vmatmul.mubr.bf16.gmra.mrb[216].mxu0 %v15015_v48 }
 0x8a0   : > { %v7566_v19 = vmax.f32 %v7483_v17, 0.0  ;;  %8968 = vmatprep.mubr.bf16.mxu0 %v15020_v9  ;;  %v15026_v17 = vld [vmem:[#allocation6 + $0x154] ss:$24 sps:$4 sm:$0xff]  }
 0x8a1   : > { %v6908_v29 = vpop.f32.mrb[164].mxu1 }
 0x8a2   : > { %v7628_v13 = vpack.c.bf16 %v7566_v19, %v7565_v45  ;;  %v7277_v47 = vadd.f32 %v18055_v28, %v6908_v29  ;;  %v6910_v62 = vpop.f32.mrb[165].mxu1  ;;  %v18217_v28 = vpop.f32.mrb[192].mxu0  ;;  %v18955_v19 = vld [vmem:[#allocation56_spill] sm:$0xff] }
 0x8a3   : > { %v6911_v24 = vpop.f32.mrb[166].mxu1  ;;  %v18220_v48 = vpop.f32.mrb[193].mxu0 }
 0x8a4   : > { %v7484_v58 = vmax.f32 %v18952_v7, %v7277_v47  ;;  %v7280_v32 = vadd.f32 %v18060_v49, %v6911_v24  ;;  %v6913_v39 = vpop.f32.mrb[167].mxu1  ;;  %9201 = vmatpush1.bf16.msra.mxu0 %v7628_v13  ;;  %v18222_v12 = vpop.f32.mrb[194].mxu0 }
 0x8a5   : > { %9202 = vmatprep.subr.bf16.mxu0 %v18816_v34  ;;  %v18226_v45 = vpop.f32.mrb[195].mxu0 }
 0x8a6   : > { %v7485_v2 = vmax.f32 %v18953_v23, %v7280_v32  ;;  %v7567_v20 = vmax.f32 %v7484_v58, 0.0  ;;  %v18956_v58 = vld [vmem:[#allocation57_spill] sm:$0xff] }
 0x8a7   : > { %8969 = vmatmul.mubr.bf16.gmra.mrb[220].mxu0 %v15018_v14  ;;  %v15029_v23 = vld [vmem:[#allocation6 + $0x184] ss:$24 sps:$4 sm:$0xff]  }
 0x8a8   : > { %v7568_v8 = vmax.f32 %v7485_v2, 0.0  ;;  %8976 = vmatprep.mubr.bf16.mxu0 %v15023_v50  ;;  %v18957_v2 = vld [vmem:[#allocation58_spill] sm:$0xff] }
 0x8a9   : > { %v6916_v3 = vpop.f32.mrb[0].mxu1 }
 0x8aa   : > { %v7629_v40 = vpack.c.bf16 %v7568_v8, %v7567_v20  ;;  %v7285_v31 = vadd.f32 %v18076_v1, %v6916_v3  ;;  %v6918_v36 = vpop.f32.mrb[1].mxu1 }
 0x8ab   : > { %v6919_v49 = vpop.f32.mrb[2].mxu1 }
 0x8ac   : > { %v7486_v37 = vmax.f32 %v18954_v6, %v7285_v31  ;;  %v7288_v9 = vadd.f32 %v18082_v35, %v6919_v49  ;;  %v6921_v61 = vpop.f32.mrb[3].mxu1  ;;  %9203 = vmatpush1.bf16.msra.mxu0 %v7629_v40  ;;  %v15024_v35 = vld [vmem:[#allocation6 + $0x150] ss:$24 sps:$4 sm:$0xff]   ;;  %v15027_v6 = vld [vmem:[#allocation6 + $0x180] ss:$24 sps:$4 sm:$0xff]  }
 0x8ad   : > { %9204 = vmatprep.subr.bf16.mxu0 %v18816_v34 }
 0x8ae   : > { %v7487_v1 = vmax.f32 %v18955_v19, %v7288_v9  ;;  %v7569_v29 = vmax.f32 %v7486_v37, 0.0  ;;  %v18958_v9 = vld [vmem:[#allocation59_spill] sm:$0xff] }
 0x8af   : > { %8977 = vmatmul.mubr.bf16.gmra.mrb[224].mxu0 %v15021_v5 }
 0x8b0   : > { %v7570_v13 = vmax.f32 %v7487_v1, 0.0  ;;  %8984 = vmatprep.mubr.bf16.mxu0 %v15026_v17  ;;  %v15032_v1 = vld [vmem:[#allocation6 + $0x1b4] ss:$24 sps:$4 sm:$0xff]  }
 0x8b1   : > { %v6924_v47 = vpop.f32.mrb[4].mxu1 }
 0x8b2   : > { %v7630_v62 = vpack.c.bf16 %v7570_v13, %v7569_v29  ;;  %v7293_v24 = vadd.f32 %v18073_v30, %v6924_v47  ;;  %v6926_v14 = vpop.f32.mrb[5].mxu1  ;;  %v18235_v30 = vpop.f32.mrb[196].mxu0  ;;  %v18959_v13 = vld [vmem:[#allocation60_spill] sm:$0xff] }
 0x8b3   : > { %v6927_v7 = vpop.f32.mrb[6].mxu1  ;;  %v18238_v5 = vpop.f32.mrb[197].mxu0 }
 0x8b4   : > { %v7488_v32 = vmax.f32 %v18956_v58, %v7293_v24  ;;  %v7296_v39 = vadd.f32 %v18078_v22, %v6927_v7  ;;  %v6929_v50 = vpop.f32.mrb[7].mxu1  ;;  %9205 = vmatpush1.bf16.msra.mxu0 %v7630_v62  ;;  %v13261_v37 = vpop.f32.mrb[198].mxu0 }
 0x8b5   : > { %9206 = vmatprep.subr.bf16.mxu0 %v18816_v34  ;;  %v18242_v29 = vpop.f32.mrb[199].mxu0  ;;  %v18962_v37 = vld [vmem:[#allocation63_spill] sm:$0xff] }
 0x8b6   : > { %v7489_v20 = vmax.f32 %v18957_v2, %v7296_v39  ;;  %v7571_v8 = vmax.f32 %v7488_v32, 0.0  ;;  %v18960_v32 = vld [vmem:[#allocation61_spill] sm:$0xff] }
 0x8b7   : > { %8985 = vmatmul.mubr.bf16.gmra.mrb[228].mxu0 %v15024_v35  ;;  %v15035_v2 = vld [vmem:[#allocation6 + $0x1e4] ss:$24 sps:$4 sm:$0xff]  }
 0x8b8   : > { %v7572_v3 = vmax.f32 %v7489_v20, 0.0  ;;  %8992 = vmatprep.mubr.bf16.mxu0 %v15029_v23  ;;  %v18961_v20 = vld [vmem:[#allocation62_spill] sm:$0xff] }
 0x8b9   : > { %v6932_v40 = vpop.f32.mrb[8].mxu1 }
 0x8ba   : > { %v7631_v31 = vpack.c.bf16 %v7572_v3, %v7571_v8  ;;  %v7301_v36 = vadd.f32 %v18094_v15, %v6932_v40  ;;  %v6934_v49 = vpop.f32.mrb[9].mxu1 }
 0x8bb   : > { %v6935_v22 = vpop.f32.mrb[10].mxu1 }
 0x8bc   : > { %v7490_v61 = vmax.f32 %v18958_v9, %v7301_v36  ;;  %v7304_v17 = vadd.f32 %v18100_v0, %v6935_v22  ;;  %v6937_v19 = vpop.f32.mrb[11].mxu1  ;;  %9207 = vmatpush1.bf16.msra.mxu0 %v7631_v31  ;;  %v15030_v0 = vld [vmem:[#allocation6 + $0x1b0] ss:$24 sps:$4 sm:$0xff]  }
 0x8bd   : > { %9208 = vmatprep.subr.bf16.mxu0 %v18816_v34  ;;  %v18963_v19 = vld [vmem:[#allocation64_spill] sm:$0xff] }
 0x8be   : > { %v7491_v47 = vmax.f32 %v18959_v13, %v7304_v17  ;;  %v7573_v15 = vmax.f32 %v7490_v61, 0.0  ;;  %v15038_v17 = vld [vmem:[#allocation6 + $0x214] ss:$24 sps:$4 sm:$0xff]  }
 0x8bf   : > { %8993 = vmatmul.mubr.bf16.gmra.mrb[232].mxu0 %v15027_v6  ;;  %v15033_v6 = vld [vmem:[#allocation6 + $0x1e0] ss:$24 sps:$4 sm:$0xff]  }
 0x8c0   : > { %v7574_v62 = vmax.f32 %v7491_v47, 0.0  ;;  %9000 = vmatprep.mubr.bf16.mxu0 %v15032_v1 }
 0x8c1   : > { %v6940_v24 = vpop.f32.mrb[12].mxu1 }
 0x8c2   : > { %v7632_v14 = vpack.c.bf16 %v7574_v62, %v7573_v15  ;;  %v7309_v7 = vadd.f32 %v18091_v54, %v6940_v24  ;;  %v6942_v35 = vpop.f32.mrb[13].mxu1 }
 0x8c3   : > { %v6943_v58 = vpop.f32.mrb[14].mxu1  ;;  %v18964_v35 = vld [vmem:[#allocation65_spill] sm:$0xff] }
 0x8c4   : > { %v7492_v39 = vmax.f32 %v18960_v32, %v7309_v7  ;;  %v7312_v50 = vadd.f32 %v18096_v10, %v6943_v58  ;;  %v6945_v23 = vpop.f32.mrb[15].mxu1  ;;  %9209 = vmatpush1.bf16.msra.mxu0 %v7632_v14  ;;  %v15036_v7 = vld [vmem:[#allocation6 + $0x210] ss:$24 sps:$4 sm:$0xff]   ;;  %v15041_v32 = vld [vmem:[#allocation6 + $0x244] ss:$24 sps:$4 sm:$0xff]  }
 0x8c5   : > { %9210 = vmatprep.subr.bf16.mxu0 %v18816_v34 }
 0x8c6   : > { %v7493_v8 = vmax.f32 %v18961_v20, %v7312_v50  ;;  %v7575_v3 = vmax.f32 %v7492_v39, 0.0  ;;  %v18965_v39 = vld [vmem:[#allocation66_spill] sm:$0xff] }
 0x8c7   : > { %9001 = vmatmul.mubr.bf16.gmra.mrb[236].mxu0 %v15030_v0 }
 0x8c8   : > { %v7576_v40 = vmax.f32 %v7493_v8, 0.0  ;;  %9008 = vmatprep.mubr.bf16.mxu0 %v15035_v2 }
 0x8c9   : > { %v6948_v31 = vpop.f32.mrb[16].mxu1 }
 0x8ca   : > { %v7633_v54 = vpack.c.bf16 %v7576_v40, %v7575_v3  ;;  %v7317_v36 = vadd.f32 %v18112_v21, %v6948_v31  ;;  %v6950_v49 = vpop.f32.mrb[17].mxu1  ;;  %v15039_v31 = vld [vmem:[#allocation6 + $0x240] ss:$24 sps:$4 sm:$0xff]  }
 0x8cb   : > { %v6951_v22 = vpop.f32.mrb[18].mxu1 }
 0x8cc   : > { %v7494_v10 = vmax.f32 %v18962_v37, %v7317_v36  ;;  %v7320_v9 = vadd.f32 %v18118_v56, %v6951_v22  ;;  %v6953_v61 = vpop.f32.mrb[19].mxu1  ;;  %9211 = vmatpush1.bf16.msra.mxu0 %v7633_v54  ;;  %v18966_v54 = vld [vmem:[#allocation67_spill] sm:$0xff] }
 0x8cd   : > { %9212 = vmatprep.subr.bf16.mxu0 %v18816_v34  ;;  %v15044_v22 = vld [vmem:[#allocation6 + $0x274] ss:$24 sps:$4 sm:$0xff]  }
 0x8ce   : > { %v7495_v1 = vmax.f32 %v18963_v19, %v7320_v9  ;;  %v7577_v13 = vmax.f32 %v7494_v10, 0.0 }
 0x8cf   : > { %9009 = vmatmul.mubr.bf16.gmra.mrb[240].mxu0 %v15033_v6  ;;  %v18967_v6 = vld [vmem:[#allocation68_spill] sm:$0xff] }
 0x8d0   : > { %v7578_v47 = vmax.f32 %v7495_v1, 0.0  ;;  %9016 = vmatprep.mubr.bf16.mxu0 %v15038_v17 }
 0x8d1   : > { %v6956_v15 = vpop.f32.mrb[20].mxu1 }
 0x8d2   : > { %v7634_v21 = vpack.c.bf16 %v7578_v47, %v7577_v13  ;;  %v7325_v62 = vadd.f32 %v18109_v25, %v6956_v15  ;;  %v6958_v24 = vpop.f32.mrb[21].mxu1  ;;  %v15042_v13 = vld [vmem:[#allocation6 + $0x270] ss:$24 sps:$4 sm:$0xff]  }
 0x8d3   : > { %v6959_v14 = vpop.f32.mrb[22].mxu1  ;;  %v18968_v47 = vld [vmem:[#allocation42_spill] sm:$0xff]  ;;  %v18969_v24 = vld [vmem:[#allocation44_spill] sm:$0xff] }
 0x8d4   : > { %v7496_v56 = vmax.f32 %v18964_v35, %v7325_v62  ;;  %v7328_v58 = vadd.f32 %v18114_v57, %v6959_v14  ;;  %v6961_v0 = vpop.f32.mrb[23].mxu1  ;;  %9213 = vmatpush1.bf16.msra.mxu0 %v7634_v21  ;;  %v15047_v62 = vld [vmem:[#allocation6 + $0x2a4] ss:$24 sps:$4 sm:$0xff]  }
 0x8d5   : > { %9214 = vmatprep.subr.bf16.mxu0 %v18816_v34 }
 0x8d6   : > { %v7497_v50 = vmax.f32 %v18965_v39, %v7328_v58  ;;  %v7579_v23 = vmax.f32 %v7496_v56, 0.0  ;;  %v15045_v39 = vld [vmem:[#allocation6 + $0x2a0] ss:$24 sps:$4 sm:$0xff]  }
 0x8d7   : > { %9017 = vmatmul.mubr.bf16.gmra.mrb[244].mxu0 %v15036_v7 }
 0x8d8   : > { %v7580_v2 = vmax.f32 %v7497_v50, 0.0  ;;  %9024 = vmatprep.mubr.bf16.mxu0 %v15041_v32  ;;  %v18970_v50 = vld [vmem:[#allocation69_spill] sm:$0xff] }
 0x8d9   : > { %v6964_v20 = vpop.f32.mrb[24].mxu1 }
 0x8da   : > { %v7635_v25 = vpack.c.bf16 %v7580_v2, %v7579_v23  ;;  %v7333_v8 = vadd.f32 %v18130_v51, %v6964_v20  ;;  %v6966_v3 = vpop.f32.mrb[25].mxu1  ;;  %v15050_v20 = vld [vmem:[#allocation6 + $0x2d4] ss:$24 sps:$4 sm:$0xff]  }
 0x8db   : > { %v6967_v40 = vpop.f32.mrb[26].mxu1 }
 0x8dc   : > { %v7498_v57 = vmax.f32 %v18966_v54, %v7333_v8  ;;  %v7336_v36 = vadd.f32 %v18136_v43, %v6967_v40  ;;  %v6969_v49 = vpop.f32.mrb[27].mxu1  ;;  %9215 = vmatpush1.bf16.msra.mxu0 %v7635_v25  ;;  %v18971_v25 = vld [vmem:[#allocation70_spill] sm:$0xff] }
 0x8dd   : > { %9216 = vmatprep.subr.bf16.mxu0 %v18816_v34  ;;  %v15048_v49 = vld [vmem:[#allocation6 + $0x2d0] ss:$24 sps:$4 sm:$0xff]  }
 0x8de   : > { %v7499_v37 = vmax.f32 %v18967_v6, %v7336_v36  ;;  %v7581_v10 = vmax.f32 %v7498_v57, 0.0 }
 0x8df   : > { %9025 = vmatmul.mubr.bf16.gmra.mrb[248].mxu0 %v15039_v31 }
 0x8e0   : > { %v7582_v9 = vmax.f32 %v7499_v37, 0.0  ;;  %9032 = vmatprep.mubr.bf16.mxu0 %v15044_v22  ;;  %v18972_v22 = vld [vmem:[#allocation71_spill] sm:$0xff] }
 0x8e1   : > { %v6972_v61 = vpop.f32.mrb[28].mxu1 }
 0x8e2   : > { %v7636_v51 = vpack.c.bf16 %v7582_v9, %v7581_v10  ;;  %v7341_v17 = vadd.f32 %v18127_v55, %v6972_v61  ;;  %v6974_v19 = vpop.f32.mrb[29].mxu1  ;;  %v15053_v10 = vld [vmem:[#allocation6 + $0x304] ss:$24 sps:$4 sm:$0xff]   ;;  %v18973_v9 = vld [vmem:[#allocation72_spill] sm:$0xff] }
 0x8e3   : > { %v6975_v1 = vpop.f32.mrb[30].mxu1 }
 0x8e4   : > { %v7500_v43 = vmax.f32 %v18968_v47, %v7341_v17  ;;  %v7344_v15 = vadd.f32 %v18132_v52, %v6975_v1  ;;  %v6977_v21 = vpop.f32.mrb[31].mxu1  ;;  %9217 = vmatpush1.bf16.msra.mxu0 %v7636_v51 }
 0x8e5   : > { %9218 = vmatprep.subr.bf16.mxu0 %v18816_v34 }
 0x8e6   : > { %v7501_v14 = vmax.f32 %v18969_v24, %v7344_v15  ;;  %v7583_v7 = vmax.f32 %v7500_v43, 0.0  ;;  %v15051_v43 = vld [vmem:[#allocation6 + $0x300] ss:$24 sps:$4 sm:$0xff]   ;;  %v15056_v24 = vld [vmem:[#allocation6 + $0x334] ss:$24 sps:$4 sm:$0xff]  }
 0x8e7   : > { %9033 = vmatmul.mubr.bf16.gmra.mrb[252].mxu0 %v15042_v13  ;;  %v18974_v15 = vld [vmem:[#allocation73_spill] sm:$0xff] }
 0x8e8   : > { %v7584_v35 = vmax.f32 %v7501_v14, 0.0  ;;  %9040 = vmatprep.mubr.bf16.mxu0 %v15047_v62  ;;  %v18975_v14 = vld [vmem:[#allocation74_spill] sm:$0xff] }
 0x8e9   : > { %v6980_v56 = vpop.f32.mrb[32].mxu1 }
 0x8ea   : > { %v7637_v55 = vpack.c.bf16 %v7584_v35, %v7583_v7  ;;  %v7349_v58 = vadd.f32 %v18148_v63, %v6980_v56  ;;  %v6982_v0 = vpop.f32.mrb[33].mxu1 }
 0x8eb   : > { %v6983_v32 = vpop.f32.mrb[34].mxu1 }
 0x8ec   : > { %v7502_v52 = vmax.f32 %v18970_v50, %v7349_v58  ;;  %v7352_v23 = vadd.f32 %v18154_v16, %v6983_v32  ;;  %v6985_v2 = vpop.f32.mrb[35].mxu1  ;;  %9219 = vmatpush1.bf16.msra.mxu0 %v7637_v55  ;;  %v15054_v32 = vld [vmem:[#allocation6 + $0x330] ss:$24 sps:$4 sm:$0xff]  }
 0x8ed   : > { %9220 = vmatprep.subr.bf16.mxu0 %v18816_v34  ;;  %v15059_v2 = vld [vmem:[#allocation6 + $0x364] ss:$24 sps:$4 sm:$0xff]  }
 0x8ee   : > { %v7503_v8 = vmax.f32 %v18971_v25, %v7352_v23  ;;  %v7585_v3 = vmax.f32 %v7502_v52, 0.0 }
 0x8ef   : > { %9041 = vmatmul.mubr.bf16.gmra.mrb[0].mxu0 %v15045_v39  ;;  %v18976_v39 = vld [vmem:[#allocation75_spill] sm:$0xff] }
 0x8f0   : > { %v7586_v40 = vmax.f32 %v7503_v8, 0.0  ;;  %9048 = vmatprep.mubr.bf16.mxu0 %v15050_v20  ;;  %v18977_v20 = vld [vmem:[#allocation76_spill] sm:$0xff] }
 0x8f1   : > { %v6988_v31 = vpop.f32.mrb[36].mxu1 }
 0x8f2   : > { %v7638_v63 = vpack.c.bf16 %v7586_v40, %v7585_v3  ;;  %v7357_v54 = vadd.f32 %v18145_v42, %v6988_v31  ;;  %v6990_v57 = vpop.f32.mrb[37].mxu1 }
 0x8f3   : > { %v6991_v36 = vpop.f32.mrb[38].mxu1  ;;  %v15057_v57 = vld [vmem:[#allocation6 + $0x360] ss:$24 sps:$4 sm:$0xff]  }
 0x8f4   : > { %v7504_v16 = vmax.f32 %v18972_v22, %v7357_v54  ;;  %v7360_v6 = vadd.f32 %v18150_v53, %v6991_v36  ;;  %v6993_v37 = vpop.f32.mrb[39].mxu1  ;;  %9221 = vmatpush1.bf16.msra.mxu0 %v7638_v63 }
 0x8f5   : > { %9222 = vmatprep.subr.bf16.mxu0 %v18816_v34 }
 0x8f6   : > { %v7505_v61 = vmax.f32 %v18973_v9, %v7360_v6  ;;  %v7587_v51 = vmax.f32 %v7504_v16, 0.0  ;;  %v15062_v16 = vld [vmem:[#allocation6 + $0x394] ss:$24 sps:$4 sm:$0xff]   ;;  %v18979_v6 = vld [vmem:[#allocation78_spill] sm:$0xff] }
 0x8f7   : > { %9049 = vmatmul.mubr.bf16.gmra.mrb[4].mxu0 %v15048_v49 }
 0x8f8   : > { %v7588_v17 = vmax.f32 %v7505_v61, 0.0  ;;  %9056 = vmatprep.mubr.bf16.mxu0 %v15053_v10 }
 0x8f9   : > { %v6996_v19 = vpop.f32.mrb[40].mxu1 }
 0x8fa   : > { %v7639_v42 = vpack.c.bf16 %v7588_v17, %v7587_v51  ;;  %v7365_v1 = vadd.f32 %v18166_v11, %v6996_v19  ;;  %v6998_v13 = vpop.f32.mrb[41].mxu1 }
 0x8fb   : > { %v6999_v47 = vpop.f32.mrb[42].mxu1 }
 0x8fc   : > { %v7506_v53 = vmax.f32 %v18974_v15, %v7365_v1  ;;  %v7368_v21 = vadd.f32 %v18172_v27, %v6999_v47  ;;  %v7001_v62 = vpop.f32.mrb[43].mxu1  ;;  %9223 = vmatpush1.bf16.msra.mxu0 %v7639_v42  ;;  %v15060_v42 = vld [vmem:[#allocation6 + $0x390] ss:$24 sps:$4 sm:$0xff]   ;;  %v18981_v15 = vld [vmem:[#allocation80_spill] sm:$0xff] }
 0x8fd   : > { %9488 = vmatprep.subr.bf16.mxu0 %v18816_v34 }
 0x8fe   : > { %v7507_v7 = vmax.f32 %v18975_v14, %v7368_v21  ;;  %v18286_v35 = vmax.f32 %v7506_v53, 0.0 }
 0x8ff   : > { %9057 = vmatmul.mubr.bf16.gmra.mrb[8].mxu0 %v15051_v43  ;;  %v15065_v43 = vld [vmem:[#allocation6 + $0x3c4] ss:$24 sps:$4 sm:$0xff]  }
 0x900   : > { %v18288_v56 = vmax.f32 %v7507_v7, 0.0  ;;  %9064 = vmatprep.mubr.bf16.mxu0 %v15056_v24 }
 0x901   : > { %v7004_v11 = vpop.f32.mrb[44].mxu1 }
 0x902   : > { %v7640_v55 = vpack.c.bf16 %v18288_v56, %v18286_v35  ;;  %v7373_v58 = vadd.f32 %v18163_v4, %v7004_v11  ;;  %v7006_v27 = vpop.f32.mrb[45].mxu1  ;;  %v15107_v35 = vld [vmem:[#allocation6 + $0x68] ss:$24 sps:$4 sm:$0xff]   ;;  %v15112_v56 = vld [vmem:[#allocation6 + $0x9c] ss:$24 sps:$4 sm:$0xff]  }
 0x903   : > { %v7007_v0 = vpop.f32.mrb[46].mxu1 }
 0x904   : > { %v7508_v50 = vmax.f32 %v18976_v39, %v7373_v58  ;;  %v7376_v52 = vadd.f32 %v18168_v18, %v7007_v0  ;;  %v7009_v23 = vpop.f32.mrb[47].mxu1  ;;  %v18978_v18 = vld [vmem:[#allocation77_spill] sm:$0xff]  ;;  %v15068_v39 = vld [vmem:[#allocation6 + $0x3f4] ss:$24 sps:$4 sm:$0xff]  }
 0x905   : > { %v15063_v58 = vld [vmem:[#allocation6 + $0x3c0] ss:$24 sps:$4 sm:$0xff]  }
 0x906   : > { %v7509_v25 = vmax.f32 %v18977_v20, %v7376_v52  ;;  %v18296_v8 = vmax.f32 %v7508_v50, 0.0  ;;  %v18983_v50 = vld [vmem:[#allocation82_spill] sm:$0xff] }
 0x907   : > { %9065 = vmatmul.mubr.bf16.gmra.mrb[12].mxu0 %v15054_v32 }
 0x908   : > { %v18298_v3 = vmax.f32 %v7509_v25, 0.0  ;;  %9072 = vmatprep.mubr.bf16.mxu0 %v15059_v2 }
 0x909   : > { %v7012_v40 = vpop.f32.mrb[48].mxu1 }
 0x90a   : > { %v7641_v4 = vpack.c.bf16 %v18298_v3, %v18296_v8  ;;  %v7381_v31 = vadd.f32 %v18184_v60, %v7012_v40  ;;  %v7014_v63 = vpop.f32.mrb[49].mxu1  ;;  %v15115_v8 = vld [vmem:[#allocation6 + $0xcc] ss:$24 sps:$4 sm:$0xff]  }
 0x90b   : > { %v7015_v54 = vpop.f32.mrb[50].mxu1  ;;  %v15066_v63 = vld [vmem:[#allocation6 + $0x3f0] ss:$24 sps:$4 sm:$0xff]  }
 0x90c   : > { %v7510_v36 = vmax.f32 %v18978_v18, %v7381_v31  ;;  %v7384_v49 = vadd.f32 %v18190_v59, %v7015_v54  ;;  %v7017_v22 = vpop.f32.mrb[51].mxu1  ;;  %v18980_v59 = vld [vmem:[#allocation79_spill] sm:$0xff] }
 0x90e   : > { %v7511_v37 = vmax.f32 %v18979_v6, %v7384_v49  ;;  %v18306_v10 = vmax.f32 %v7510_v36, 0.0  ;;  %v15071_v36 = vld [vmem:[#allocation6 + $0x424] ss:$24 sps:$4 sm:$0xff]   ;;  %v18985_v49 = vld [vmem:[#allocation84_spill] sm:$0xff] }
 0x90f   : > { %9073 = vmatmul.mubr.bf16.gmra.mrb[16].mxu0 %v15057_v57 }
 0x910   : > { %v18308_v9 = vmax.f32 %v7511_v37, 0.0  ;;  %9080 = vmatprep.mubr.bf16.mxu0 %v15062_v16 }
 0x911   : > { %v7020_v61 = vpop.f32.mrb[52].mxu1 }
 0x912   : > { %v7642_v60 = vpack.c.bf16 %v18308_v9, %v18306_v10  ;;  %v7389_v51 = vadd.f32 %v18181_v33, %v7020_v61  ;;  %v7022_v17 = vpop.f32.mrb[53].mxu1  ;;  %v15118_v10 = vld [vmem:[#allocation6 + $0xfc] ss:$24 sps:$4 sm:$0xff]  }
 0x913   : > { %v7023_v19 = vpop.f32.mrb[54].mxu1 }
 0x914   : > { %v7512_v1 = vmax.f32 %v18980_v59, %v7389_v51  ;;  %v7392_v13 = vadd.f32 %v18186_v38, %v7023_v19  ;;  %v7025_v47 = vpop.f32.mrb[55].mxu1  ;;  %v18982_v38 = vld [vmem:[#allocation81_spill] sm:$0xff] }
 0x915   : > { %v15069_v19 = vld [vmem:[#allocation6 + $0x420] ss:$24 sps:$4 sm:$0xff]   ;;  %v18987_v47 = vld [vmem:[#allocation86_spill] sm:$0xff] }
 0x916   : > { %v7513_v53 = vmax.f32 %v18981_v15, %v7392_v13  ;;  %v18316_v21 = vmax.f32 %v7512_v1, 0.0  ;;  %v15074_v13 = vld [vmem:[#allocation6 + $0x454] ss:$24 sps:$4 sm:$0xff]  }
 0x917   : > { %9081 = vmatmul.mubr.bf16.gmra.mrb[20].mxu0 %v15060_v42 }
 0x918   : > { %v18318_v62 = vmax.f32 %v7513_v53, 0.0  ;;  %9088 = vmatprep.mubr.bf16.mxu0 %v15065_v43 }
 0x919   : > { %v7028_v24 = vpop.f32.mrb[56].mxu1 }
 0x91a   : > { %v7643_v33 = vpack.c.bf16 %v18318_v62, %v18316_v21  ;;  %v7397_v14 = vadd.f32 %v18202_v26, %v7028_v24  ;;  %v7030_v7 = vpop.f32.mrb[57].mxu1  ;;  %v15116_v21 = vld [vmem:[#allocation6 + $0xf8] ss:$24 sps:$4 sm:$0xff]   ;;  %v15121_v62 = vld [vmem:[#allocation6 + $0x12c] ss:$24 sps:$4 sm:$0xff]  }
 0x91b   : > { %v7031_v11 = vpop.f32.mrb[58].mxu1 }
 0x91c   : > { %v7514_v27 = vmax.f32 %v18982_v38, %v7397_v14  ;;  %v7400_v0 = vadd.f32 %v18208_v46, %v7031_v11  ;;  %v7033_v32 = vpop.f32.mrb[59].mxu1  ;;  %v18984_v46 = vld [vmem:[#allocation83_spill] sm:$0xff] }
 0x91d   : > { %v15077_v32 = vld [vmem:[#allocation6 + $0x484] ss:$24 sps:$4 sm:$0xff]  }
 0x91e   : > { %v7515_v52 = vmax.f32 %v18983_v50, %v7400_v0  ;;  %v18326_v23 = vmax.f32 %v7514_v27, 0.0 }
 0x91f   : > { %9089 = vmatmul.mubr.bf16.gmra.mrb[24].mxu0 %v15063_v58  ;;  %v15072_v58 = vld [vmem:[#allocation6 + $0x450] ss:$24 sps:$4 sm:$0xff]  }
 0x920   : > { %v18328_v2 = vmax.f32 %v7515_v52, 0.0  ;;  %9096 = vmatprep.mubr.bf16.mxu0 %v15068_v39  ;;  %v18989_v39 = vld [vmem:[#allocation88_spill] sm:$0xff] }
 0x921   : > { %v7036_v20 = vpop.f32.mrb[60].mxu1 }
 0x922   : > { %v7644_v26 = vpack.c.bf16 %v18328_v2, %v18326_v23  ;;  %v7405_v25 = vadd.f32 %v18199_v41, %v7036_v20  ;;  %v7038_v40 = vpop.f32.mrb[61].mxu1  ;;  %v15124_v23 = vld [vmem:[#allocation6 + $0x15c] ss:$24 sps:$4 sm:$0xff]   ;;  %v15122_v2 = vld [vmem:[#allocation6 + $0x158] ss:$24 sps:$4 sm:$0xff]  }
 0x923   : > { %v7039_v31 = vpop.f32.mrb[62].mxu1 }
 0x924   : > { %v7516_v54 = vmax.f32 %v18984_v46, %v7405_v25  ;;  %v7408_v57 = vadd.f32 %v18204_v44, %v7039_v31  ;;  %v7041_v18 = vpop.f32.mrb[63].mxu1  ;;  %v18986_v44 = vld [vmem:[#allocation85_spill] sm:$0xff] }
 0x925   : > { %v15075_v46 = vld [vmem:[#allocation6 + $0x480] ss:$24 sps:$4 sm:$0xff]  }
 0x926   : > { %v7517_v22 = vmax.f32 %v18985_v49, %v7408_v57  ;;  %v18336_v16 = vmax.f32 %v7516_v54, 0.0  ;;  %v18991_v49 = vld [vmem:[#allocation90_spill] sm:$0xff] }
 0x927   : > { %9097 = vmatmul.mubr.bf16.gmra.mrb[28].mxu0 %v15066_v63 }
 0x928   : > { %v18338_v6 = vmax.f32 %v7517_v22, 0.0  ;;  %9104 = vmatprep.mubr.bf16.mxu0 %v15071_v36  ;;  %v15080_v36 = vld [vmem:[#allocation6 + $0x4b4] ss:$24 sps:$4 sm:$0xff]  }
 0x929   : > { %v7044_v37 = vpop.f32.mrb[64].mxu1 }
 0x92a   : > { %v7645_v41 = vpack.c.bf16 %v18338_v6, %v18336_v16  ;;  %v7413_v61 = vadd.f32 %v18220_v48, %v7044_v37  ;;  %v7046_v51 = vpop.f32.mrb[65].mxu1  ;;  %v15125_v16 = vld [vmem:[#allocation6 + $0x188] ss:$24 sps:$4 sm:$0xff]   ;;  %v15130_v6 = vld [vmem:[#allocation6 + $0x1bc] ss:$24 sps:$4 sm:$0xff]  }
 0x92b   : > { %v7047_v17 = vpop.f32.mrb[66].mxu1 }
 0x92c   : > { %v7518_v42 = vmax.f32 %v18986_v44, %v7413_v61  ;;  %v7416_v59 = vadd.f32 %v18226_v45, %v7047_v17  ;;  %v7049_v1 = vpop.f32.mrb[67].mxu1  ;;  %v18988_v45 = vld [vmem:[#allocation87_spill] sm:$0xff] }
 0x92d   : > { %v18992_v17 = vld [vmem:[#allocation91_spill] sm:$0xff]  ;;  %v15083_v1 = vld [vmem:[#allocation6 + $0x4e4] ss:$24 sps:$4 sm:$0xff]  }
 0x92e   : > { %v7519_v43 = vmax.f32 %v18987_v47, %v7416_v59  ;;  %v18346_v15 = vmax.f32 %v7518_v42, 0.0  ;;  %v15078_v42 = vld [vmem:[#allocation6 + $0x4b0] ss:$24 sps:$4 sm:$0xff]   ;;  %v18993_v47 = vld [vmem:[#allocation17_spill] sm:$0xff] }
 0x92f   : > { %9105 = vmatmul.mubr.bf16.gmra.mrb[32].mxu0 %v15069_v19 }
 0x930   : > { %v18348_v53 = vmax.f32 %v7519_v43, 0.0  ;;  %9112 = vmatprep.mubr.bf16.mxu0 %v15074_v13 }
 0x931   : > { %v7052_v24 = vpop.f32.mrb[68].mxu1 }
 0x932   : > { %v7646_v48 = vpack.c.bf16 %v18348_v53, %v18346_v15  ;;  %v7421_v14 = vadd.f32 %v18217_v28, %v7052_v24  ;;  %v7054_v7 = vpop.f32.mrb[69].mxu1  ;;  %v15081_v24 = vld [vmem:[#allocation6 + $0x4e0] ss:$24 sps:$4 sm:$0xff]   ;;  %v15133_v15 = vld [vmem:[#allocation6 + $0x1ec] ss:$24 sps:$4 sm:$0xff]  }
 0x933   : > { %v7055_v11 = vpop.f32.mrb[70].mxu1  ;;  %v15084_v7 = vld [vmem:[#allocation6 + $0x510] ss:$24 sps:$4 sm:$0xff]  }
 0x934   : > { %v7520_v38 = vmax.f32 %v18988_v45, %v7421_v14  ;;  %v7424_v27 = vadd.f32 %v18222_v12, %v7055_v11  ;;  %v7057_v0 = vpop.f32.mrb[71].mxu1  ;;  %v18990_v12 = vld [vmem:[#allocation89_spill] sm:$0xff]  ;;  %v15086_v14 = vld [vmem:[#allocation6 + $0x514] ss:$24 sps:$4 sm:$0xff]  }
 0x935   : > { %v15089_v11 = vld [vmem:[#allocation6 + $0x544] ss:$24 sps:$4 sm:$0xff]   ;;  %v15092_v45 = vld [vmem:[#allocation6 + $0x574] ss:$24 sps:$4 sm:$0xff]   ;;  %v15131_v53 = vld [vmem:[#allocation6 + $0x1e8] ss:$24 sps:$4 sm:$0xff]  }
 0x936   : > { %v7521_v50 = vmax.f32 %v18989_v39, %v7424_v27  ;;  %v18356_v52 = vmax.f32 %v7520_v38, 0.0  ;;  %v15095_v38 = vld [vmem:[#allocation6 + $0x5a4] ss:$24 sps:$4 sm:$0xff]   ;;  %v15093_v27 = vld [vmem:[#allocation6 + $0x5a0] ss:$24 sps:$4 sm:$0xff]  }
 0x937   : > { %9113 = vmatmul.mubr.bf16.gmra.mrb[36].mxu0 %v15072_v58  ;;  %v15087_v58 = vld [vmem:[#allocation6 + $0x540] ss:$24 sps:$4 sm:$0xff]   ;;  %v15098_v0 = vld [vmem:[#allocation6 + $0x5d4] ss:$24 sps:$4 sm:$0xff]   ;;  %v15096_v39 = vld [vmem:[#allocation6 + $0x5d0] ss:$24 sps:$4 sm:$0xff]  }
 0x938   : > { %v18358_v20 = vmax.f32 %v7521_v50, 0.0  ;;  %9120 = vmatprep.mubr.bf16.mxu0 %v15077_v32  ;;  %v7842_v32 = vld [vmem:[#allocation6 + $0x600] sm:$0xff] }
 0x939   : > { %v7060_v25 = vpop.f32.mrb[72].mxu1  ;;  %v12686_v50 = vcombine.high %v7842_v32, %v7842_v32 }
 0x93a   : > { %v7647_v28 = vpack.c.bf16 %v18358_v20, %v18356_v52  ;;  %v7429_v40 = vadd.f32 %v18238_v5, %v7060_v25  ;;  %v7062_v31 = vpop.f32.mrb[73].mxu1  ;;  %v12685_v25 = vcombine.low %v7842_v32, %v7842_v32  ;;  %v15134_v52 = vld [vmem:[#allocation6 + $0x218] ss:$24 sps:$4 sm:$0xff]   ;;  %v15139_v20 = vld [vmem:[#allocation6 + $0x24c] ss:$24 sps:$4 sm:$0xff]  }
 0x93b   : > { %v7063_v63 = vpop.f32.mrb[74].mxu1  ;;  %v15101_v31 = vld [vmem:[#allocation6 + $0x8] ss:$24 sps:$4 sm:$0xff]   ;;  %v15187_v32 = vld [vmem:[#allocation6 + $0x54c] ss:$24 sps:$4 sm:$0xff]  }
 0x93c   : > { %v7522_v54 = vmax.f32 %v18990_v12, %v7429_v40  ;;  %v7432_v57 = vadd.f32 %v18242_v29, %v7063_v63  ;;  %v7065_v18 = vpop.f32.mrb[75].mxu1  ;;  %v15103_v40 = vld [vmem:[#allocation6 + $0xc] ss:$24 sps:$4 sm:$0xff]   ;;  %v15106_v63 = vld [vmem:[#allocation6 + $0x3c] ss:$24 sps:$4 sm:$0xff]  }
 0x93d   : > { %v15109_v12 = vld [vmem:[#allocation6 + $0x6c] ss:$24 sps:$4 sm:$0xff]  }
 0x93e   : > { %v7523_v22 = vmax.f32 %v18991_v49, %v7432_v57  ;;  %v18366_v37 = vmax.f32 %v7522_v54, 0.0  ;;  %v15142_v54 = vld [vmem:[#allocation6 + $0x27c] ss:$24 sps:$4 sm:$0xff]   ;;  %v15140_v57 = vld [vmem:[#allocation6 + $0x278] ss:$24 sps:$4 sm:$0xff]  }
 0x93f   : > { %9121 = vmatmul.mubr.bf16.gmra.mrb[40].mxu0 %v15075_v46  ;;  %v15104_v46 = vld [vmem:[#allocation6 + $0x38] ss:$24 sps:$4 sm:$0xff]   ;;  %v15145_v18 = vld [vmem:[#allocation6 + $0x2ac] ss:$24 sps:$4 sm:$0xff]   ;;  %v15148_v49 = vld [vmem:[#allocation6 + $0x2dc] ss:$24 sps:$4 sm:$0xff]  }
 0x940   : > { %v18368_v61 = vmax.f32 %v7523_v22, 0.0  ;;  %9128 = vmatprep.mubr.bf16.mxu0 %v15080_v36  ;;  %v15143_v36 = vld [vmem:[#allocation6 + $0x2a8] ss:$24 sps:$4 sm:$0xff]   ;;  %v15146_v22 = vld [vmem:[#allocation6 + $0x2d8] ss:$24 sps:$4 sm:$0xff]  }
 0x941   : > { %v7068_v51 = vpop.f32.mrb[80].mxu1 }
 0x942   : > { %v7648_v5 = vpack.c.bf16 %v18368_v61, %v18366_v37  ;;  %v7069_v19 = vadd.f32 %v7068_v51, %v18992_v17  ;;  %v7070_v44 = vpop.f32.mrb[81].mxu1  ;;  %v15151_v37 = vld [vmem:[#allocation6 + $0x30c] ss:$24 sps:$4 sm:$0xff]   ;;  %v15149_v61 = vld [vmem:[#allocation6 + $0x308] ss:$24 sps:$4 sm:$0xff]  }
 0x943   : > { %v7071_v59 = vpop.f32.mrb[82].mxu1  ;;  %v15154_v51 = vld [vmem:[#allocation6 + $0x33c] ss:$24 sps:$4 sm:$0xff]   ;;  %v15157_v17 = vld [vmem:[#allocation6 + $0x36c] ss:$24 sps:$4 sm:$0xff]  }
 0x944   : > { %v18374_v29 = vadd.f32 %v18235_v30, %v7069_v19  ;;  %v7072_v13 = vpop.f32.mrb[83].mxu1  ;;  %v15090_v30 = vld [vmem:[#allocation6 + $0x570] ss:$24 sps:$4 sm:$0xff]   ;;  %v15160_v44 = vld [vmem:[#allocation6 + $0x39c] ss:$24 sps:$4 sm:$0xff]  }
 0x945   : > { %v15155_v19 = vld [vmem:[#allocation6 + $0x368] ss:$24 sps:$4 sm:$0xff]   ;;  %v15163_v59 = vld [vmem:[#allocation6 + $0x3cc] ss:$24 sps:$4 sm:$0xff]   ;;  %v15164_v13 = vld [vmem:[#allocation6 + $0x3f8] ss:$24 sps:$4 sm:$0xff]  }
 0x946   : > { %v7524_v43 = vmax.f32 %v18993_v47, %v18374_v29  ;;  %v15161_v29 = vld [vmem:[#allocation6 + $0x3c8] ss:$24 sps:$4 sm:$0xff]   ;;  %v15169_v47 = vld [vmem:[#allocation6 + $0x42c] ss:$24 sps:$4 sm:$0xff]  }
 0x947   : > { %9129 = vmatmul.mubr.bf16.gmra.mrb[44].mxu0 %v15078_v42  ;;  %v15158_v42 = vld [vmem:[#allocation6 + $0x398] ss:$24 sps:$4 sm:$0xff]  }
 0x948   : > { %9136 = vmatprep.mubr.bf16.mxu0 %v15083_v1  ;;  %v7607_v3 = vmax.f32 %v7524_v43, 0.0  ;;  %v15166_v1 = vld [vmem:[#allocation6 + $0x3fc] ss:$24 sps:$4 sm:$0xff]   ;;  %v15167_v43 = vld [vmem:[#allocation6 + $0x428] ss:$24 sps:$4 sm:$0xff]  }
 0x94a   : > { %v7649_v9 = vpack.c.bf16 %v7607_v3, %v7607_v3  ;;  %v15204_v3 = vld [vmem:[#allocation6 + $0x44] ss:$24 sps:$4 sm:$0xff]  }
 0x94f   : > { %9137 = vmatmul.mubr.bf16.gmra.mrb[48].mxu0 %v15081_v24  ;;  %v15172_v24 = vld [vmem:[#allocation6 + $0x45c] ss:$24 sps:$4 sm:$0xff]  }
 0x950   : > { %9144 = vmatprep.mubr.bf16.mxu0 %v15086_v14  ;;  %v15170_v14 = vld [vmem:[#allocation6 + $0x458] ss:$24 sps:$4 sm:$0xff]  }
 0x957   : > { %9145 = vmatmul.mubr.bf16.gmra.mrb[52].mxu0 %v15084_v7  ;;  %v15175_v7 = vld [vmem:[#allocation6 + $0x48c] ss:$24 sps:$4 sm:$0xff]  }
 0x958   : > { %9152 = vmatprep.mubr.bf16.mxu0 %v15089_v11  ;;  %v15173_v11 = vld [vmem:[#allocation6 + $0x488] ss:$24 sps:$4 sm:$0xff]  }
 0x95f   : > { %9153 = vmatmul.mubr.bf16.gmra.mrb[56].mxu0 %v15087_v58  ;;  %v15178_v58 = vld [vmem:[#allocation6 + $0x4bc] ss:$24 sps:$4 sm:$0xff]  }
 0x960   : > { %9160 = vmatprep.mubr.bf16.mxu0 %v15092_v45  ;;  %v15176_v45 = vld [vmem:[#allocation6 + $0x4b8] ss:$24 sps:$4 sm:$0xff]  }
 0x967   : > { %9161 = vmatmul.mubr.bf16.gmra.mrb[60].mxu0 %v15090_v30  ;;  %v15181_v30 = vld [vmem:[#allocation6 + $0x4ec] ss:$24 sps:$4 sm:$0xff]  }
 0x968   : > { %9168 = vmatprep.mubr.bf16.mxu0 %v15095_v38  ;;  %v15179_v38 = vld [vmem:[#allocation6 + $0x4e8] ss:$24 sps:$4 sm:$0xff]  }
 0x96f   : > { %9169 = vmatmul.mubr.bf16.gmra.mrb[64].mxu0 %v15093_v27  ;;  %v15184_v27 = vld [vmem:[#allocation6 + $0x51c] ss:$24 sps:$4 sm:$0xff]  }
 0x970   : > { %9176 = vmatprep.mubr.bf16.mxu0 %v15098_v0  ;;  %v15182_v0 = vld [vmem:[#allocation6 + $0x518] ss:$24 sps:$4 sm:$0xff]  }
 0x977   : > { %9177 = vmatmul.mubr.bf16.gmra.mrb[68].mxu0 %v15096_v39  ;;  %v15185_v39 = vld [vmem:[#allocation6 + $0x548] ss:$24 sps:$4 sm:$0xff]  }
 0x978   : > { %9184 = vmatprep.mubr.bf16.mxu0 %v12686_v50  ;;  %v15190_v50 = vld [vmem:[#allocation6 + $0x57c] ss:$24 sps:$4 sm:$0xff]  }
 0x97f   : > { %9185 = vmatmul.mubr.bf16.gmra.mrb[72].mxu0 %v12685_v25  ;;  %v15188_v25 = vld [vmem:[#allocation6 + $0x578] ss:$24 sps:$4 sm:$0xff]  }
 0x980   : > { %9224 = vmatprep.mubr.bf16.mxu0 %v15103_v40  ;;  %v15193_v40 = vld [vmem:[#allocation6 + $0x5ac] ss:$24 sps:$4 sm:$0xff]  }
 0x987   : > { %9225 = vmatmul.mubr.bf16.vlgmr.msra.gmra.mrb[200].mxu0 %v15101_v31  ;;  %v15191_v31 = vld [vmem:[#allocation6 + $0x5a8] ss:$24 sps:$4 sm:$0xff]  }
 0x988   : > { %9489 = vmatpush1.bf16.msra.mxu0 %v7640_v55  ;;  %9232 = vmatprep.mubr.bf16.mxu0 %v15106_v63  ;;  %v15110_v55 = vld [vmem:[#allocation6 + $0x98] ss:$24 sps:$4 sm:$0xff]   ;;  %v15196_v63 = vld [vmem:[#allocation6 + $0x5dc] ss:$24 sps:$4 sm:$0xff]  }
 0x989   : > { %9490 = vmatprep.subr.bf16.mxu0 %v18816_v34 }
 0x98c   : > { %9491 = vmatpush1.bf16.msra.mxu0 %v7641_v4  ;;  %v15113_v4 = vld [vmem:[#allocation6 + $0xc8] ss:$24 sps:$4 sm:$0xff]  }
 0x98d   : > { %9492 = vmatprep.subr.bf16.mxu0 %v18816_v34 }
 0x98f   : > { %9233 = vmatmul.mubr.bf16.gmra.mrb[204].mxu0 %v15104_v46  ;;  %v7843_v46 = vld [vmem:[#allocation6 + $0x608] sm:$0xff] }
 0x990   : > { %9493 = vmatpush1.bf16.msra.mxu0 %v7642_v60  ;;  %9240 = vmatprep.mubr.bf16.mxu0 %v15109_v12  ;;  %v8894_v60 = vsel %vm1606_vm1, %v7649_v9, 0  ;;  %v15194_v12 = vld [vmem:[#allocation6 + $0x5d8] ss:$24 sps:$4 sm:$0xff]  }
 0x991   : > { %9494 = vmatprep.subr.bf16.mxu0 %v18816_v34  ;;  %v15205_v9 = vld [vmem:[#allocation6 + $0x70] ss:$24 sps:$4 sm:$0xff]  }
 0x994   : > { %9495 = vmatpush1.bf16.msra.mxu0 %v7643_v33  ;;  %v15119_v33 = vld [vmem:[#allocation6 + $0x128] ss:$24 sps:$4 sm:$0xff]  }
 0x995   : > { %9496 = vmatprep.subr.bf16.mxu0 %v18816_v34 }
 0x997   : > { %9241 = vmatmul.mubr.bf16.gmra.mrb[208].mxu0 %v15107_v35  ;;  %v12688_v35 = vcombine.high %v7843_v46, %v7843_v46 }
 0x998   : > { %9497 = vmatpush1.bf16.msra.mxu0 %v7644_v26  ;;  %9248 = vmatprep.mubr.bf16.mxu0 %v15112_v56  ;;  %v15127_v26 = vld [vmem:[#allocation6 + $0x18c] ss:$24 sps:$4 sm:$0xff]   ;;  %v12687_v56 = vcombine.low %v7843_v46, %v7843_v46 }
 0x999   : > { %9498 = vmatprep.subr.bf16.mxu0 %v18816_v34 }
 0x99c   : > { %9499 = vmatpush1.bf16.msra.mxu0 %v7645_v41  ;;  %v15128_v41 = vld [vmem:[#allocation6 + $0x1b8] ss:$24 sps:$4 sm:$0xff]  }
 0x99d   : > { %9500 = vmatprep.subr.bf16.mxu0 %v18816_v34 }
 0x99f   : > { %9249 = vmatmul.mubr.bf16.gmra.mrb[212].mxu0 %v15110_v55  ;;  %v15201_v55 = vld [vmem:[#allocation6 + $0x14] ss:$24 sps:$4 sm:$0xff]  }
 0x9a0   : > { %9501 = vmatpush1.bf16.msra.mxu0 %v7646_v48  ;;  %9256 = vmatprep.mubr.bf16.mxu0 %v15115_v8  ;;  %v15136_v48 = vld [vmem:[#allocation6 + $0x21c] ss:$24 sps:$4 sm:$0xff]   ;;  %v15199_v8 = vld [vmem:[#allocation6 + $0x10] ss:$24 sps:$4 sm:$0xff]  }
 0x9a1   : > { %9502 = vmatprep.subr.bf16.mxu0 %v18816_v34 }
 0x9a4   : > { %9503 = vmatpush1.bf16.msra.mxu0 %v7647_v28  ;;  %v15137_v28 = vld [vmem:[#allocation6 + $0x248] ss:$24 sps:$4 sm:$0xff]  }
 0x9a5   : > { %9504 = vmatprep.subr.bf16.mxu0 %v18816_v34 }
 0x9a7   : > { %9257 = vmatmul.mubr.bf16.gmra.mrb[216].mxu0 %v15113_v4  ;;  %v15202_v4 = vld [vmem:[#allocation6 + $0x40] ss:$24 sps:$4 sm:$0xff]  }
 0x9a8   : > { %9505 = vmatpush1.bf16.msra.mxu0 %v7648_v5  ;;  %9264 = vmatprep.mubr.bf16.mxu0 %v15118_v10  ;;  %v15152_v5 = vld [vmem:[#allocation6 + $0x338] ss:$24 sps:$4 sm:$0xff]   ;;  %v15207_v10 = vld [vmem:[#allocation6 + $0x74] ss:$24 sps:$4 sm:$0xff]  }
 0x9a9   : > { %9506 = vmatprep.subr.bf16.mxu0 %v18816_v34 }
 0x9ac   : > { %9507 = vmatpush1.bf16.msra.mxu0 %v8894_v60  ;;  %v15210_v60 = vld [vmem:[#allocation6 + $0xa4] ss:$24 sps:$4 sm:$0xff]  }
 0x9af   : > { %9265 = vmatmul.mubr.bf16.gmra.mrb[220].mxu0 %v15116_v21  ;;  %v15208_v21 = vld [vmem:[#allocation6 + $0xa0] ss:$24 sps:$4 sm:$0xff]  }
 0x9b0   : > { %9272 = vmatprep.mubr.bf16.mxu0 %v15121_v62  ;;  %v15213_v62 = vld [vmem:[#allocation6 + $0xd4] ss:$24 sps:$4 sm:$0xff]  }
 0x9b7   : > { %9273 = vmatmul.mubr.bf16.gmra.mrb[224].mxu0 %v15119_v33  ;;  %v15211_v33 = vld [vmem:[#allocation6 + $0xd0] ss:$24 sps:$4 sm:$0xff]  }
 0x9b8   : > { %9280 = vmatprep.mubr.bf16.mxu0 %v15124_v23  ;;  %v15216_v23 = vld [vmem:[#allocation6 + $0x104] ss:$24 sps:$4 sm:$0xff]  }
 0x9bf   : > { %9281 = vmatmul.mubr.bf16.gmra.mrb[228].mxu0 %v15122_v2  ;;  %v15214_v2 = vld [vmem:[#allocation6 + $0x100] ss:$24 sps:$4 sm:$0xff]  }
 0x9c0   : > { %9288 = vmatprep.mubr.bf16.mxu0 %v15127_v26  ;;  %v15219_v26 = vld [vmem:[#allocation6 + $0x134] ss:$24 sps:$4 sm:$0xff]  }
 0x9c7   : > { %9289 = vmatmul.mubr.bf16.gmra.mrb[232].mxu0 %v15125_v16  ;;  %v15217_v16 = vld [vmem:[#allocation6 + $0x130] ss:$24 sps:$4 sm:$0xff]  }
 0x9c8   : > { %9296 = vmatprep.mubr.bf16.mxu0 %v15130_v6  ;;  %v15222_v6 = vld [vmem:[#allocation6 + $0x164] ss:$24 sps:$4 sm:$0xff]  }
 0x9cf   : > { %9297 = vmatmul.mubr.bf16.gmra.mrb[236].mxu0 %v15128_v41  ;;  %v15220_v41 = vld [vmem:[#allocation6 + $0x160] ss:$24 sps:$4 sm:$0xff]  }
 0x9d0   : > { %9304 = vmatprep.mubr.bf16.mxu0 %v15133_v15  ;;  %v15225_v15 = vld [vmem:[#allocation6 + $0x194] ss:$24 sps:$4 sm:$0xff]  }
 0x9d7   : > { %9305 = vmatmul.mubr.bf16.gmra.mrb[240].mxu0 %v15131_v53  ;;  %v15223_v53 = vld [vmem:[#allocation6 + $0x190] ss:$24 sps:$4 sm:$0xff]  }
 0x9d8   : > { %9312 = vmatprep.mubr.bf16.mxu0 %v15136_v48  ;;  %v15228_v48 = vld [vmem:[#allocation6 + $0x1c4] ss:$24 sps:$4 sm:$0xff]  }
 0x9df   : > { %9313 = vmatmul.mubr.bf16.gmra.mrb[244].mxu0 %v15134_v52  ;;  %v15226_v52 = vld [vmem:[#allocation6 + $0x1c0] ss:$24 sps:$4 sm:$0xff]  }
 0x9e0   : > { %9320 = vmatprep.mubr.bf16.mxu0 %v15139_v20  ;;  %v15231_v20 = vld [vmem:[#allocation6 + $0x1f4] ss:$24 sps:$4 sm:$0xff]  }
 0x9e7   : > { %9321 = vmatmul.mubr.bf16.gmra.mrb[248].mxu0 %v15137_v28  ;;  %v15229_v28 = vld [vmem:[#allocation6 + $0x1f0] ss:$24 sps:$4 sm:$0xff]  }
 0x9e8   : > { %9328 = vmatprep.mubr.bf16.mxu0 %v15142_v54  ;;  %v15234_v54 = vld [vmem:[#allocation6 + $0x224] ss:$24 sps:$4 sm:$0xff]  }
 0x9ef   : > { %9329 = vmatmul.mubr.bf16.gmra.mrb[252].mxu0 %v15140_v57  ;;  %v15232_v57 = vld [vmem:[#allocation6 + $0x220] ss:$24 sps:$4 sm:$0xff]  }
 0x9f0   : > { %9336 = vmatprep.mubr.bf16.mxu0 %v15145_v18  ;;  %v15237_v18 = vld [vmem:[#allocation6 + $0x254] ss:$24 sps:$4 sm:$0xff]  }
 0x9f7   : > { %9337 = vmatmul.mubr.bf16.gmra.mrb[0].mxu0 %v15143_v36  ;;  %v15235_v36 = vld [vmem:[#allocation6 + $0x250] ss:$24 sps:$4 sm:$0xff]  }
 0x9f8   : > { %9344 = vmatprep.mubr.bf16.mxu0 %v15148_v49  ;;  %v15240_v49 = vld [vmem:[#allocation6 + $0x284] ss:$24 sps:$4 sm:$0xff]  }
 0x9ff   : > { %9345 = vmatmul.mubr.bf16.gmra.mrb[4].mxu0 %v15146_v22  ;;  %v15238_v22 = vld [vmem:[#allocation6 + $0x280] ss:$24 sps:$4 sm:$0xff]  }
 0xa00   : > { %9352 = vmatprep.mubr.bf16.mxu0 %v15151_v37  ;;  %v15243_v37 = vld [vmem:[#allocation6 + $0x2b4] ss:$24 sps:$4 sm:$0xff]  }
 0xa07   : > { %9353 = vmatmul.mubr.bf16.gmra.mrb[8].mxu0 %v15149_v61  ;;  %v15241_v61 = vld [vmem:[#allocation6 + $0x2b0] ss:$24 sps:$4 sm:$0xff]  }
 0xa08   : > { %9360 = vmatprep.mubr.bf16.mxu0 %v15154_v51  ;;  %v15246_v51 = vld [vmem:[#allocation6 + $0x2e4] ss:$24 sps:$4 sm:$0xff]  }
 0xa0f   : > { %9361 = vmatmul.mubr.bf16.gmra.mrb[12].mxu0 %v15152_v5  ;;  %v15244_v5 = vld [vmem:[#allocation6 + $0x2e0] ss:$24 sps:$4 sm:$0xff]  }
 0xa10   : > { %9368 = vmatprep.mubr.bf16.mxu0 %v15157_v17  ;;  %v15249_v17 = vld [vmem:[#allocation6 + $0x314] ss:$24 sps:$4 sm:$0xff]  }
 0xa17   : > { %9369 = vmatmul.mubr.bf16.gmra.mrb[16].mxu0 %v15155_v19  ;;  %v15247_v19 = vld [vmem:[#allocation6 + $0x310] ss:$24 sps:$4 sm:$0xff]  }
 0xa18   : > { %9376 = vmatprep.mubr.bf16.mxu0 %v15160_v44  ;;  %v15252_v44 = vld [vmem:[#allocation6 + $0x344] ss:$24 sps:$4 sm:$0xff]  }
 0xa1f   : > { %9377 = vmatmul.mubr.bf16.gmra.mrb[20].mxu0 %v15158_v42  ;;  %v15250_v42 = vld [vmem:[#allocation6 + $0x340] ss:$24 sps:$4 sm:$0xff]  }
 0xa20   : > { %9384 = vmatprep.mubr.bf16.mxu0 %v15163_v59  ;;  %v15255_v59 = vld [vmem:[#allocation6 + $0x374] ss:$24 sps:$4 sm:$0xff]  }
 0xa27   : > { %9385 = vmatmul.mubr.bf16.gmra.mrb[24].mxu0 %v15161_v29  ;;  %v15253_v29 = vld [vmem:[#allocation6 + $0x370] ss:$24 sps:$4 sm:$0xff]  }
 0xa28   : > { %9392 = vmatprep.mubr.bf16.mxu0 %v15166_v1  ;;  %v15258_v1 = vld [vmem:[#allocation6 + $0x3a4] ss:$24 sps:$4 sm:$0xff]  }
 0xa2f   : > { %9393 = vmatmul.mubr.bf16.gmra.mrb[28].mxu0 %v15164_v13  ;;  %v15256_v13 = vld [vmem:[#allocation6 + $0x3a0] ss:$24 sps:$4 sm:$0xff]  }
 0xa30   : > { %9400 = vmatprep.mubr.bf16.mxu0 %v15169_v47  ;;  %v15261_v47 = vld [vmem:[#allocation6 + $0x3d4] ss:$24 sps:$4 sm:$0xff]  }
 0xa37   : > { %9401 = vmatmul.mubr.bf16.gmra.mrb[32].mxu0 %v15167_v43  ;;  %v15259_v43 = vld [vmem:[#allocation6 + $0x3d0] ss:$24 sps:$4 sm:$0xff]  }
 0xa38   : > { %9408 = vmatprep.mubr.bf16.mxu0 %v15172_v24  ;;  %v15264_v24 = vld [vmem:[#allocation6 + $0x404] ss:$24 sps:$4 sm:$0xff]  }
 0xa3f   : > { %9409 = vmatmul.mubr.bf16.gmra.mrb[36].mxu0 %v15170_v14  ;;  %v15262_v14 = vld [vmem:[#allocation6 + $0x400] ss:$24 sps:$4 sm:$0xff]  }
 0xa40   : > { %9416 = vmatprep.mubr.bf16.mxu0 %v15175_v7  ;;  %v15267_v7 = vld [vmem:[#allocation6 + $0x434] ss:$24 sps:$4 sm:$0xff]  }
 0xa47   : > { %9417 = vmatmul.mubr.bf16.gmra.mrb[40].mxu0 %v15173_v11  ;;  %v15265_v11 = vld [vmem:[#allocation6 + $0x430] ss:$24 sps:$4 sm:$0xff]  }
 0xa48   : > { %9424 = vmatprep.mubr.bf16.mxu0 %v15178_v58  ;;  %v15270_v58 = vld [vmem:[#allocation6 + $0x464] ss:$24 sps:$4 sm:$0xff]  }
 0xa4f   : > { %9425 = vmatmul.mubr.bf16.gmra.mrb[44].mxu0 %v15176_v45  ;;  %v15268_v45 = vld [vmem:[#allocation6 + $0x460] ss:$24 sps:$4 sm:$0xff]  }
 0xa50   : > { %9432 = vmatprep.mubr.bf16.mxu0 %v15181_v30  ;;  %v15273_v30 = vld [vmem:[#allocation6 + $0x494] ss:$24 sps:$4 sm:$0xff]  }
 0xa57   : > { %9433 = vmatmul.mubr.bf16.gmra.mrb[48].mxu0 %v15179_v38  ;;  %v15271_v38 = vld [vmem:[#allocation6 + $0x490] ss:$24 sps:$4 sm:$0xff]  }
 0xa58   : > { %9440 = vmatprep.mubr.bf16.mxu0 %v15184_v27  ;;  %v15276_v27 = vld [vmem:[#allocation6 + $0x4c4] ss:$24 sps:$4 sm:$0xff]  }
 0xa5f   : > { %9441 = vmatmul.mubr.bf16.gmra.mrb[52].mxu0 %v15182_v0  ;;  %v15274_v0 = vld [vmem:[#allocation6 + $0x4c0] ss:$24 sps:$4 sm:$0xff]  }
 0xa60   : > { %9448 = vmatprep.mubr.bf16.mxu0 %v15187_v32  ;;  %v15279_v32 = vld [vmem:[#allocation6 + $0x4f4] ss:$24 sps:$4 sm:$0xff]  }
 0xa67   : > { %9449 = vmatmul.mubr.bf16.gmra.mrb[56].mxu0 %v15185_v39  ;;  %v15277_v39 = vld [vmem:[#allocation6 + $0x4f0] ss:$24 sps:$4 sm:$0xff]  }
 0xa68   : > { %9456 = vmatprep.mubr.bf16.mxu0 %v15190_v50  ;;  %v15282_v50 = vld [vmem:[#allocation6 + $0x524] ss:$24 sps:$4 sm:$0xff]  }
 0xa6f   : > { %9457 = vmatmul.mubr.bf16.gmra.mrb[60].mxu0 %v15188_v25 }
 0xa70   : > { %9464 = vmatprep.mubr.bf16.mxu0 %v15193_v40  ;;  %v15299_v40 = vld [vmem:[#allocation8 + $0x4] ss:$20 sps:$4 sm:$0xff]  }
 0xa71   : > { %10485 = vmatprep.mubr.bf16.mxu1 %v15299_v40 }
 0xa77   : > { %9465 = vmatmul.mubr.bf16.gmra.mrb[64].mxu0 %v15191_v31 }
 0xa78   : > { %9472 = vmatprep.mubr.bf16.mxu0 %v15196_v63  ;;  %v15280_v63 = vld [vmem:[#allocation6 + $0x520] ss:$24 sps:$4 sm:$0xff]  }
 0xa7f   : > { %9473 = vmatmul.mubr.bf16.gmra.mrb[68].mxu0 %v15194_v12  ;;  %v15285_v12 = vld [vmem:[#allocation6 + $0x554] ss:$24 sps:$4 sm:$0xff]  }
 0xa80   : > { %9480 = vmatprep.mubr.bf16.mxu0 %v12688_v35 }
 0xa87   : > { %9481 = vmatmul.mubr.bf16.gmra.mrb[72].mxu0 %v12687_v56 }
 0xa88   : > { %12691 = vmatprep.mubr.msk.bf16.mxu0 %vm8793_vm3, %v15201_v55 }
 0xa8f   : > { %9521 = vmatmul.mubr.bf16.vlgmr.msra.gmra.mrb[200].mxu0 %v15199_v8 }
 0xa90   : > { %12692 = vmatprep.mubr.msk.bf16.mxu0 %vm8793_vm3, %v15204_v3 }
 0xa97   : > { %9529 = vmatmul.mubr.bf16.gmra.mrb[204].mxu0 %v15202_v4 }
 0xa98   : > { %12693 = vmatprep.mubr.msk.bf16.mxu0 %vm8793_vm3, %v15207_v10  ;;  %v15283_v10 = vld [vmem:[#allocation6 + $0x550] ss:$24 sps:$4 sm:$0xff]  }
 0xa9f   : > { %9537 = vmatmul.mubr.bf16.gmra.mrb[208].mxu0 %v15205_v9 }
 0xaa0   : > { %12694 = vmatprep.mubr.msk.bf16.mxu0 %vm8793_vm3, %v15210_v60  ;;  %v15288_v60 = vld [vmem:[#allocation6 + $0x584] ss:$24 sps:$4 sm:$0xff]  }
 0xaa7   : > { %9545 = vmatmul.mubr.bf16.gmra.mrb[212].mxu0 %v15208_v21 }
 0xaa8   : > { %12695 = vmatprep.mubr.msk.bf16.mxu0 %vm8793_vm3, %v15213_v62 }
 0xaaf   : > { %9553 = vmatmul.mubr.bf16.gmra.mrb[216].mxu0 %v15211_v33 }
 0xab0   : > { %12696 = vmatprep.mubr.msk.bf16.mxu0 %vm8793_vm3, %v15216_v23 }
 0xab7   : > { %9561 = vmatmul.mubr.bf16.gmra.mrb[220].mxu0 %v15214_v2 }
 0xab8   : > { %12697 = vmatprep.mubr.msk.bf16.mxu0 %vm8793_vm3, %v15219_v26 }
 0xabf   : > { %9569 = vmatmul.mubr.bf16.gmra.mrb[224].mxu0 %v15217_v16  ;;  %v15286_v16 = vld [vmem:[#allocation6 + $0x580] ss:$24 sps:$4 sm:$0xff]  }
 0xac0   : > { %12698 = vmatprep.mubr.msk.bf16.mxu0 %vm8793_vm3, %v15222_v6 }
 0xac7   : > { %9577 = vmatmul.mubr.bf16.gmra.mrb[228].mxu0 %v15220_v41  ;;  %v15291_v41 = vld [vmem:[#allocation6 + $0x5b4] ss:$24 sps:$4 sm:$0xff]  }
 0xac8   : > { %12699 = vmatprep.mubr.msk.bf16.mxu0 %vm8793_vm3, %v15225_v15 }
 0xacf   : > { %9585 = vmatmul.mubr.bf16.gmra.mrb[232].mxu0 %v15223_v53 }
 0xad0   : > { %12700 = vmatprep.mubr.msk.bf16.mxu0 %vm8793_vm3, %v15228_v48 }
 0xad7   : > { %9593 = vmatmul.mubr.bf16.gmra.mrb[236].mxu0 %v15226_v52 }
 0xad8   : > { %12701 = vmatprep.mubr.msk.bf16.mxu0 %vm8793_vm3, %v15231_v20 }
 0xadf   : > { %9601 = vmatmul.mubr.bf16.gmra.mrb[240].mxu0 %v15229_v28 }
 0xae0   : > { %12702 = vmatprep.mubr.msk.bf16.mxu0 %vm8793_vm3, %v15234_v54  ;;  %v15289_v54 = vld [vmem:[#allocation6 + $0x5b0] ss:$24 sps:$4 sm:$0xff]  }
 0xae7   : > { %9609 = vmatmul.mubr.bf16.gmra.mrb[244].mxu0 %v15232_v57 }
 0xae8   : > { %12703 = vmatprep.mubr.msk.bf16.mxu0 %vm8793_vm3, %v15237_v18  ;;  %v15294_v18 = vld [vmem:[#allocation6 + $0x5e4] ss:$24 sps:$4 sm:$0xff]  }
 0xaef   : > { %9617 = vmatmul.mubr.bf16.gmra.mrb[248].mxu0 %v15235_v36 }
 0xaf0   : > { %12704 = vmatprep.mubr.msk.bf16.mxu0 %vm8793_vm3, %v15240_v49 }
 0xaf7   : > { %9625 = vmatmul.mubr.bf16.gmra.mrb[252].mxu0 %v15238_v22 }
 0xaf8   : > { %12705 = vmatprep.mubr.msk.bf16.mxu0 %vm8793_vm3, %v15243_v37 }
 0xaff   : > { %9633 = vmatmul.mubr.bf16.gmra.mrb[0].mxu0 %v15241_v61  ;;  %v7844_v61 = vld [vmem:[#allocation6 + $0x610] sm:$0xff] }
 0xb00   : > { %12706 = vmatprep.mubr.msk.bf16.mxu0 %vm8793_vm3, %v15246_v51 }
 0xb07   : > { %9641 = vmatmul.mubr.bf16.gmra.mrb[4].mxu0 %v15244_v5 }
 0xb08   : > { %12707 = vmatprep.mubr.msk.bf16.mxu0 %vm8793_vm3, %v15249_v17  ;;  %v15292_v17 = vld [vmem:[#allocation6 + $0x5e0] ss:$24 sps:$4 sm:$0xff]  }
 0xb0f   : > { %9649 = vmatmul.mubr.bf16.gmra.mrb[8].mxu0 %v15247_v19 }
 0xb10   : > { %12708 = vmatprep.mubr.msk.bf16.mxu0 %vm8793_vm3, %v15252_v44  ;;  %v12690_v44 = vcombine.high %v7844_v61, %v7844_v61 }
 0xb17   : > { %9657 = vmatmul.mubr.bf16.gmra.mrb[12].mxu0 %v15250_v42 }
 0xb18   : > { %12709 = vmatprep.mubr.msk.bf16.mxu0 %vm8793_vm3, %v15255_v59 }
 0xb1f   : > { %9665 = vmatmul.mubr.bf16.gmra.mrb[16].mxu0 %v15253_v29 }
 0xb20   : > { %12710 = vmatprep.mubr.msk.bf16.mxu0 %vm8793_vm3, %v15258_v1 }
 0xb27   : > { %9673 = vmatmul.mubr.bf16.gmra.mrb[20].mxu0 %v15256_v13 }
 0xb28   : > { %12711 = vmatprep.mubr.msk.bf16.mxu0 %vm8793_vm3, %v15261_v47 }
 0xb2f   : > { %9681 = vmatmul.mubr.bf16.gmra.mrb[24].mxu0 %v15259_v43  ;;  %v12689_v43 = vcombine.low %v7844_v61, %v7844_v61 }
 0xb30   : > { %12712 = vmatprep.mubr.msk.bf16.mxu0 %vm8793_vm3, %v15264_v24 }
 0xb37   : > { %9689 = vmatmul.mubr.bf16.gmra.mrb[28].mxu0 %v15262_v14 }
 0xb38   : > { %12713 = vmatprep.mubr.msk.bf16.mxu0 %vm8793_vm3, %v15267_v7 }
 0xb3f   : > { %9697 = vmatmul.mubr.bf16.gmra.mrb[32].mxu0 %v15265_v11 }
 0xb40   : > { %12714 = vmatprep.mubr.msk.bf16.mxu0 %vm8793_vm3, %v15270_v58 }
 0xb47   : > { %9705 = vmatmul.mubr.bf16.gmra.mrb[36].mxu0 %v15268_v45 }
 0xb48   : > { %12715 = vmatprep.mubr.msk.bf16.mxu0 %vm8793_vm3, %v15273_v30 }
 0xb4f   : > { %9713 = vmatmul.mubr.bf16.gmra.mrb[40].mxu0 %v15271_v38 }
 0xb50   : > { %12716 = vmatprep.mubr.msk.bf16.mxu0 %vm8793_vm3, %v15276_v27 }
 0xb57   : > { %9721 = vmatmul.mubr.bf16.gmra.mrb[44].mxu0 %v15274_v0 }
 0xb58   : > { %12717 = vmatprep.mubr.msk.bf16.mxu0 %vm8793_vm3, %v15279_v32 }
 0xb5f   : > { %9729 = vmatmul.mubr.bf16.gmra.mrb[48].mxu0 %v15277_v39 }
 0xb60   : > { %12718 = vmatprep.mubr.msk.bf16.mxu0 %vm8793_vm3, %v15282_v50 }
 0xb62   : > { %v9522_v25 = vpop.f32.mrb[200].mxu0 }
 0xb63   : > { %v9524_v31 = vpop.f32.mrb[201].mxu0  ;;  %v9784_v35 = vmax.f32 %v9522_v25, 0.0 }
 0xb64   : > { %v9525_v46 = vpop.f32.mrb[202].mxu0 }
 0xb65   : > { %v9785_v56 = vmax.f32 %v9525_v46, 0.0  ;;  %v9527_v55 = vpop.f32.mrb[203].mxu0 }
 0xb67   : > { %v9849_v8 = vpack.c.bf16 %v9785_v56, %v9784_v35  ;;  %9737 = vmatmul.mubr.bf16.gmra.mrb[52].mxu0 %v15280_v63 }
 0xb68   : > { %12719 = vmatprep.mubr.msk.bf16.mxu0 %vm8793_vm3, %v15285_v12 }
 0xb69   : > { %10454 = vmatpush1.bf16.msra.mxu1 %v9849_v8 }
 0xb6a   : > { %v9530_v3 = vpop.f32.mrb[204].mxu0  ;;  %10455 = vmatprep.subr.bf16.mxu1 %v18816_v34 }
 0xb6b   : > { %v9532_v4 = vpop.f32.mrb[205].mxu0  ;;  %v9786_v21 = vmax.f32 %v9530_v3, 0.0 }
 0xb6c   : > { %v9533_v9 = vpop.f32.mrb[206].mxu0 }
 0xb6d   : > { %v9787_v62 = vmax.f32 %v9533_v9, 0.0  ;;  %v9535_v33 = vpop.f32.mrb[207].mxu0 }
 0xb6f   : > { %v9850_v23 = vpack.c.bf16 %v9787_v62, %v9786_v21  ;;  %9745 = vmatmul.mubr.bf16.gmra.mrb[56].mxu0 %v15283_v10 }
 0xb70   : > { %12720 = vmatprep.mubr.msk.bf16.mxu0 %vm8793_vm3, %v15288_v60 }
 0xb71   : > { %10456 = vmatpush1.bf16.msra.mxu1 %v9850_v23 }
 0xb72   : > { %v9538_v2 = vpop.f32.mrb[208].mxu0  ;;  %10457 = vmatprep.subr.bf16.mxu1 %v18816_v34 }
 0xb73   : > { %v9540_v26 = vpop.f32.mrb[209].mxu0  ;;  %v9788_v15 = vmax.f32 %v9538_v2, 0.0 }
 0xb74   : > { %v9541_v6 = vpop.f32.mrb[210].mxu0 }
 0xb75   : > { %v9789_v53 = vmax.f32 %v9541_v6, 0.0  ;;  %v9543_v48 = vpop.f32.mrb[211].mxu0 }
 0xb77   : > { %v9851_v52 = vpack.c.bf16 %v9789_v53, %v9788_v15  ;;  %9753 = vmatmul.mubr.bf16.gmra.mrb[60].mxu0 %v15286_v16 }
 0xb78   : > { %12721 = vmatprep.mubr.msk.bf16.mxu0 %vm8793_vm3, %v15291_v41 }
 0xb79   : > { %10458 = vmatpush1.bf16.msra.mxu1 %v9851_v52 }
 0xb7a   : > { %v9546_v20 = vpop.f32.mrb[212].mxu0  ;;  %10459 = vmatprep.subr.bf16.mxu1 %v18816_v34 }
 0xb7b   : > { %v9548_v28 = vpop.f32.mrb[213].mxu0  ;;  %v9790_v36 = vmax.f32 %v9546_v20, 0.0 }
 0xb7c   : > { %v9549_v57 = vpop.f32.mrb[214].mxu0 }
 0xb7d   : > { %v9791_v49 = vmax.f32 %v9549_v57, 0.0  ;;  %v9551_v22 = vpop.f32.mrb[215].mxu0 }
 0xb7f   : > { %v9852_v37 = vpack.c.bf16 %v9791_v49, %v9790_v36  ;;  %9761 = vmatmul.mubr.bf16.gmra.mrb[64].mxu0 %v15289_v54 }
 0xb80   : > { %12722 = vmatprep.mubr.msk.bf16.mxu0 %vm8793_vm3, %v15294_v18 }
 0xb81   : > { %10460 = vmatpush1.bf16.msra.mxu1 %v9852_v37 }
 0xb82   : > { %v9554_v51 = vpop.f32.mrb[216].mxu0  ;;  %10461 = vmatprep.subr.bf16.mxu1 %v18816_v34 }
 0xb83   : > { %v9556_v5 = vpop.f32.mrb[217].mxu0  ;;  %v9792_v42 = vmax.f32 %v9554_v51, 0.0 }
 0xb84   : > { %v9557_v19 = vpop.f32.mrb[218].mxu0 }
 0xb85   : > { %v9793_v59 = vmax.f32 %v9557_v19, 0.0  ;;  %v9559_v29 = vpop.f32.mrb[219].mxu0 }
 0xb87   : > { %v9853_v1 = vpack.c.bf16 %v9793_v59, %v9792_v42  ;;  %9769 = vmatmul.mubr.bf16.gmra.mrb[68].mxu0 %v15292_v17 }
 0xb88   : > { %12723 = vmatprep.mubr.msk.bf16.mxu0 %vm8793_vm3, %v12690_v44 }
 0xb89   : > { %10462 = vmatpush1.bf16.msra.mxu1 %v9853_v1 }
 0xb8a   : > { %v9562_v13 = vpop.f32.mrb[220].mxu0  ;;  %10463 = vmatprep.subr.bf16.mxu1 %v18816_v34 }
 0xb8b   : > { %v9564_v47 = vpop.f32.mrb[221].mxu0  ;;  %v9794_v14 = vmax.f32 %v9562_v13, 0.0 }
 0xb8c   : > { %v9565_v24 = vpop.f32.mrb[222].mxu0 }
 0xb8d   : > { %v9795_v7 = vmax.f32 %v9565_v24, 0.0  ;;  %v9567_v11 = vpop.f32.mrb[223].mxu0 }
 0xb8f   : > { %v9854_v58 = vpack.c.bf16 %v9795_v7, %v9794_v14  ;;  %9777 = vmatmul.mubr.bf16.gmra.mrb[72].mxu0 %v12689_v43 }
 0xb91   : > { %10464 = vmatpush1.bf16.msra.mxu1 %v9854_v58 }
 0xb92   : > { %v9570_v45 = vpop.f32.mrb[224].mxu0  ;;  %10465 = vmatprep.subr.bf16.mxu1 %v18816_v34 }
 0xb93   : > { %v9572_v30 = vpop.f32.mrb[225].mxu0  ;;  %v9796_v27 = vmax.f32 %v9570_v45, 0.0 }
 0xb94   : > { %v9573_v38 = vpop.f32.mrb[226].mxu0 }
 0xb95   : > { %v9797_v0 = vmax.f32 %v9573_v38, 0.0  ;;  %v9575_v32 = vpop.f32.mrb[227].mxu0 }
 0xb97   : > { %v9855_v39 = vpack.c.bf16 %v9797_v0, %v9796_v27 }
 0xb99   : > { %10466 = vmatpush1.bf16.msra.mxu1 %v9855_v39 }
 0xb9a   : > { %v9578_v50 = vpop.f32.mrb[228].mxu0  ;;  %10467 = vmatprep.subr.bf16.mxu1 %v18816_v34 }
 0xb9b   : > { %v9580_v25 = vpop.f32.mrb[229].mxu0  ;;  %v9798_v31 = vmax.f32 %v9578_v50, 0.0  ;;  %v15297_v50 = vld [vmem:[#allocation8] ss:$20 sps:$4 sm:$0xff]  }
 0xb9c   : > { %v9581_v40 = vpop.f32.mrb[230].mxu0  ;;  %v15302_v25 = vld [vmem:[#allocation8 + $0x2c] ss:$20 sps:$4 sm:$0xff]  }
 0xb9d   : > { %v9799_v63 = vmax.f32 %v9581_v40, 0.0  ;;  %v9583_v46 = vpop.f32.mrb[231].mxu0 }
 0xb9f   : > { %v9856_v12 = vpack.c.bf16 %v9799_v63, %v9798_v31 }
 0xba1   : > { %10468 = vmatpush1.bf16.msra.mxu1 %v9856_v12 }
 0xba2   : > { %v9586_v35 = vpop.f32.mrb[232].mxu0  ;;  %10469 = vmatprep.subr.bf16.mxu1 %v18816_v34 }
 0xba3   : > { %v9588_v56 = vpop.f32.mrb[233].mxu0  ;;  %v9800_v8 = vmax.f32 %v9586_v35, 0.0 }
 0xba4   : > { %v9589_v55 = vpop.f32.mrb[234].mxu0 }
 0xba5   : > { %v9801_v3 = vmax.f32 %v9589_v55, 0.0  ;;  %v9591_v4 = vpop.f32.mrb[235].mxu0  ;;  %v15300_v55 = vld [vmem:[#allocation8 + $0x28] ss:$20 sps:$4 sm:$0xff]  }
 0xba7   : > { %v9857_v10 = vpack.c.bf16 %v9801_v3, %v9800_v8  ;;  %v15305_v8 = vld [vmem:[#allocation8 + $0x54] ss:$20 sps:$4 sm:$0xff]  }
 0xba9   : > { %10470 = vmatpush1.bf16.msra.mxu1 %v9857_v10 }
 0xbaa   : > { %v9594_v9 = vpop.f32.mrb[236].mxu0  ;;  %10471 = vmatprep.subr.bf16.mxu1 %v18816_v34 }
 0xbab   : > { %v9596_v60 = vpop.f32.mrb[237].mxu0  ;;  %v9802_v62 = vmax.f32 %v9594_v9, 0.0 }
 0xbac   : > { %v9597_v21 = vpop.f32.mrb[238].mxu0 }
 0xbad   : > { %v9803_v33 = vmax.f32 %v9597_v21, 0.0  ;;  %v9599_v23 = vpop.f32.mrb[239].mxu0 }
 0xbae   : > { %v15308_v23 = vld [vmem:[#allocation8 + $0x7c] ss:$20 sps:$4 sm:$0xff]  }
 0xbaf   : > { %v9858_v2 = vpack.c.bf16 %v9803_v33, %v9802_v62  ;;  %v15303_v33 = vld [vmem:[#allocation8 + $0x50] ss:$20 sps:$4 sm:$0xff]  }
 0xbb1   : > { %10472 = vmatpush1.bf16.msra.mxu1 %v9858_v2 }
 0xbb2   : > { %v9602_v26 = vpop.f32.mrb[240].mxu0  ;;  %10473 = vmatprep.subr.bf16.mxu1 %v18816_v34 }
 0xbb3   : > { %v9604_v16 = vpop.f32.mrb[241].mxu0  ;;  %v9804_v41 = vmax.f32 %v9602_v26, 0.0 }
 0xbb4   : > { %v9605_v6 = vpop.f32.mrb[242].mxu0 }
 0xbb5   : > { %v9805_v15 = vmax.f32 %v9605_v6, 0.0  ;;  %v9607_v53 = vpop.f32.mrb[243].mxu0 }
 0xbb7   : > { %v9859_v48 = vpack.c.bf16 %v9805_v15, %v9804_v41 }
 0xbb9   : > { %10474 = vmatpush1.bf16.msra.mxu1 %v9859_v48  ;;  %v15306_v48 = vld [vmem:[#allocation8 + $0x78] ss:$20 sps:$4 sm:$0xff]  }
 0xbba   : > { %v9610_v52 = vpop.f32.mrb[244].mxu0  ;;  %10475 = vmatprep.subr.bf16.mxu1 %v18816_v34 }
 0xbbb   : > { %v9612_v20 = vpop.f32.mrb[245].mxu0  ;;  %v9806_v54 = vmax.f32 %v9610_v52, 0.0  ;;  %v15311_v52 = vld [vmem:[#allocation8 + $0xa4] ss:$20 sps:$4 sm:$0xff]  }
 0xbbc   : > { %v9613_v28 = vpop.f32.mrb[246].mxu0 }
 0xbbd   : > { %v9807_v57 = vmax.f32 %v9613_v28, 0.0  ;;  %v9615_v18 = vpop.f32.mrb[247].mxu0 }
 0xbbf   : > { %v9860_v36 = vpack.c.bf16 %v9807_v57, %v9806_v54 }
 0xbc1   : > { %10476 = vmatpush1.bf16.msra.mxu1 %v9860_v36 }
 0xbc2   : > { %v9618_v49 = vpop.f32.mrb[248].mxu0  ;;  %10477 = vmatprep.subr.bf16.mxu1 %v18816_v34 }
 0xbc3   : > { %v9620_v22 = vpop.f32.mrb[249].mxu0  ;;  %v9808_v61 = vmax.f32 %v9618_v49, 0.0 }
 0xbc4   : > { %v9621_v37 = vpop.f32.mrb[250].mxu0  ;;  %v15309_v22 = vld [vmem:[#allocation8 + $0xa0] ss:$20 sps:$4 sm:$0xff]  }
 0xbc5   : > { %v9809_v51 = vmax.f32 %v9621_v37, 0.0  ;;  %v9623_v5 = vpop.f32.mrb[251].mxu0  ;;  %v15314_v37 = vld [vmem:[#allocation8 + $0xcc] ss:$20 sps:$4 sm:$0xff]  }
 0xbc7   : > { %v9861_v17 = vpack.c.bf16 %v9809_v51, %v9808_v61 }
 0xbc9   : > { %10478 = vmatpush1.bf16.msra.mxu1 %v9861_v17 }
 0xbca   : > { %v9626_v19 = vpop.f32.mrb[252].mxu0  ;;  %10479 = vmatprep.subr.bf16.mxu1 %v18816_v34 }
 0xbcb   : > { %v9628_v44 = vpop.f32.mrb[253].mxu0  ;;  %v9810_v59 = vmax.f32 %v9626_v19, 0.0 }
 0xbcc   : > { %v9629_v42 = vpop.f32.mrb[254].mxu0 }
 0xbcd   : > { %v9811_v29 = vmax.f32 %v9629_v42, 0.0  ;;  %v9631_v1 = vpop.f32.mrb[255].mxu0 }
 0xbcf   : > { %v9862_v13 = vpack.c.bf16 %v9811_v29, %v9810_v59  ;;  %v15312_v59 = vld [vmem:[#allocation8 + $0xc8] ss:$20 sps:$4 sm:$0xff]  }
 0xbd0   : > { %v15317_v29 = vld [vmem:[#allocation8 + $0xf4] ss:$20 sps:$4 sm:$0xff]  }
 0xbd1   : > { %10480 = vmatpush1.bf16.msra.mxu1 %v9862_v13 }
 0xbd2   : > { %v9634_v47 = vpop.f32.mrb[0].mxu0  ;;  %10481 = vmatprep.subr.bf16.mxu1 %v18816_v34 }
 0xbd3   : > { %v9636_v43 = vpop.f32.mrb[1].mxu0  ;;  %v9812_v14 = vmax.f32 %v9634_v47, 0.0 }
 0xbd4   : > { %v9637_v24 = vpop.f32.mrb[2].mxu0 }
 0xbd5   : > { %v9813_v7 = vmax.f32 %v9637_v24, 0.0  ;;  %v9639_v11 = vpop.f32.mrb[3].mxu0 }
 0xbd6   : > { %v15315_v11 = vld [vmem:[#allocation8 + $0xf0] ss:$20 sps:$4 sm:$0xff]  }
 0xbd7   : > { %v9863_v58 = vpack.c.bf16 %v9813_v7, %v9812_v14 }
 0xbd9   : > { %10482 = vmatpush1.bf16.msra.mxu1 %v9863_v58  ;;  %v15320_v58 = vld [vmem:[#allocation8 + $0x11c] ss:$20 sps:$4 sm:$0xff]  }
 0xbda   : > { %v9642_v45 = vpop.f32.mrb[4].mxu0  ;;  %10483 = vmatprep.subr.bf16.mxu1 %v18816_v34 }
 0xbdb   : > { %v9644_v30 = vpop.f32.mrb[5].mxu0  ;;  %v9814_v27 = vmax.f32 %v9642_v45, 0.0 }
 0xbdc   : > { %v9645_v38 = vpop.f32.mrb[6].mxu0 }
 0xbdd   : > { %v9815_v0 = vmax.f32 %v9645_v38, 0.0  ;;  %v9647_v32 = vpop.f32.mrb[7].mxu0 }
 0xbdf   : > { %v9864_v39 = vpack.c.bf16 %v9815_v0, %v9814_v27 }
 0xbe1   : > { %10484 = vmatpush1.bf16.msra.mxu1 %v9864_v39 }
 0xbe2   : > { %v9650_v40 = vpop.f32.mrb[8].mxu0  ;;  %10621 = vmatprep.subr.bf16.mxu1 %v18816_v34 }
 0xbe3   : > { %v9652_v31 = vpop.f32.mrb[9].mxu0  ;;  %v9816_v46 = vmax.f32 %v9650_v40, 0.0 }
 0xbe4   : > { %v9653_v63 = vpop.f32.mrb[10].mxu0  ;;  %10486 = vmatmul.mubr.bf16.vlgmr.msra.gmra.mrb[84].mxu1 %v15297_v50  ;;  %v15318_v50 = vld [vmem:[#allocation8 + $0x118] ss:$20 sps:$4 sm:$0xff]  }
 0xbe5   : > { %v9817_v12 = vmax.f32 %v9653_v63, 0.0  ;;  %v9655_v35 = vpop.f32.mrb[11].mxu0  ;;  %10493 = vmatprep.mubr.bf16.mxu1 %v15302_v25  ;;  %v15323_v25 = vld [vmem:[#allocation8 + $0x144] ss:$20 sps:$4 sm:$0xff]  }
 0xbe7   : > { %v9865_v56 = vpack.c.bf16 %v9817_v12, %v9816_v46 }
 0xbe9   : > { %10622 = vmatpush1.bf16.msra.mxu1 %v9865_v56 }
 0xbea   : > { %v9658_v3 = vpop.f32.mrb[12].mxu0  ;;  %10623 = vmatprep.subr.bf16.mxu1 %v18816_v34 }
 0xbeb   : > { %v9660_v4 = vpop.f32.mrb[13].mxu0  ;;  %v9818_v9 = vmax.f32 %v9658_v3, 0.0 }
 0xbec   : > { %v9661_v10 = vpop.f32.mrb[14].mxu0  ;;  %10494 = vmatmul.mubr.bf16.gmra.mrb[88].mxu1 %v15300_v55  ;;  %v15321_v55 = vld [vmem:[#allocation8 + $0x140] ss:$20 sps:$4 sm:$0xff]  }
 0xbed   : > { %v9819_v60 = vmax.f32 %v9661_v10, 0.0  ;;  %v9663_v21 = vpop.f32.mrb[15].mxu0  ;;  %10501 = vmatprep.mubr.bf16.mxu1 %v15305_v8  ;;  %v15326_v8 = vld [vmem:[#allocation8 + $0x16c] ss:$20 sps:$4 sm:$0xff]  }
 0xbef   : > { %v9866_v62 = vpack.c.bf16 %v9819_v60, %v9818_v9 }
 0xbf1   : > { %10624 = vmatpush1.bf16.msra.mxu1 %v9866_v62 }
 0xbf2   : > { %v9666_v2 = vpop.f32.mrb[16].mxu0  ;;  %10625 = vmatprep.subr.bf16.mxu1 %v18816_v34 }
 0xbf3   : > { %v9668_v26 = vpop.f32.mrb[17].mxu0  ;;  %v9820_v6 = vmax.f32 %v9666_v2, 0.0 }
 0xbf4   : > { %v9669_v16 = vpop.f32.mrb[18].mxu0  ;;  %10502 = vmatmul.mubr.bf16.gmra.mrb[92].mxu1 %v15303_v33  ;;  %v15324_v33 = vld [vmem:[#allocation8 + $0x168] ss:$20 sps:$4 sm:$0xff]  }
 0xbf5   : > { %v9821_v41 = vmax.f32 %v9669_v16, 0.0  ;;  %v9671_v15 = vpop.f32.mrb[19].mxu0  ;;  %10509 = vmatprep.mubr.bf16.mxu1 %v15308_v23  ;;  %v15329_v23 = vld [vmem:[#allocation8 + $0x194] ss:$20 sps:$4 sm:$0xff]  }
 0xbf7   : > { %v9867_v53 = vpack.c.bf16 %v9821_v41, %v9820_v6 }
 0xbf9   : > { %10626 = vmatpush1.bf16.msra.mxu1 %v9867_v53 }
 0xbfa   : > { %v9674_v20 = vpop.f32.mrb[20].mxu0  ;;  %10627 = vmatprep.subr.bf16.mxu1 %v18816_v34 }
 0xbfb   : > { %v9676_v28 = vpop.f32.mrb[21].mxu0  ;;  %v9822_v57 = vmax.f32 %v9674_v20, 0.0 }
 0xbfc   : > { %v9677_v54 = vpop.f32.mrb[22].mxu0  ;;  %10510 = vmatmul.mubr.bf16.gmra.mrb[96].mxu1 %v15306_v48  ;;  %v15327_v48 = vld [vmem:[#allocation8 + $0x190] ss:$20 sps:$4 sm:$0xff]  }
 0xbfd   : > { %v9823_v18 = vmax.f32 %v9677_v54, 0.0  ;;  %v9679_v36 = vpop.f32.mrb[23].mxu0  ;;  %10517 = vmatprep.mubr.bf16.mxu1 %v15311_v52  ;;  %v15332_v52 = vld [vmem:[#allocation8 + $0x1bc] ss:$20 sps:$4 sm:$0xff]  }
 0xbff   : > { %v9868_v49 = vpack.c.bf16 %v9823_v18, %v9822_v57 }
 0xc01   : > { %10628 = vmatpush1.bf16.msra.mxu1 %v9868_v49 }
 0xc02   : > { %v9682_v61 = vpop.f32.mrb[24].mxu0  ;;  %10629 = vmatprep.subr.bf16.mxu1 %v18816_v34 }
 0xc03   : > { %v9684_v51 = vpop.f32.mrb[25].mxu0  ;;  %v9824_v17 = vmax.f32 %v9682_v61, 0.0 }
 0xc04   : > { %v9685_v5 = vpop.f32.mrb[26].mxu0  ;;  %10518 = vmatmul.mubr.bf16.gmra.mrb[100].mxu1 %v15309_v22  ;;  %v15330_v22 = vld [vmem:[#allocation8 + $0x1b8] ss:$20 sps:$4 sm:$0xff]  }
 0xc05   : > { %v9825_v19 = vmax.f32 %v9685_v5, 0.0  ;;  %v9687_v44 = vpop.f32.mrb[27].mxu0  ;;  %10525 = vmatprep.mubr.bf16.mxu1 %v15314_v37  ;;  %v15335_v37 = vld [vmem:[#allocation8 + $0x1e4] ss:$20 sps:$4 sm:$0xff]  }
 0xc07   : > { %v9869_v42 = vpack.c.bf16 %v9825_v19, %v9824_v17 }
 0xc09   : > { %10630 = vmatpush1.bf16.msra.mxu1 %v9869_v42 }
 0xc0a   : > { %v9690_v1 = vpop.f32.mrb[28].mxu0  ;;  %10631 = vmatprep.subr.bf16.mxu1 %v18816_v34 }
 0xc0b   : > { %v9692_v13 = vpop.f32.mrb[29].mxu0  ;;  %v9826_v43 = vmax.f32 %v9690_v1, 0.0 }
 0xc0c   : > { %v9693_v47 = vpop.f32.mrb[30].mxu0  ;;  %10526 = vmatmul.mubr.bf16.gmra.mrb[104].mxu1 %v15312_v59  ;;  %v15333_v59 = vld [vmem:[#allocation8 + $0x1e0] ss:$20 sps:$4 sm:$0xff]  }
 0xc0d   : > { %v9827_v24 = vmax.f32 %v9693_v47, 0.0  ;;  %v9695_v14 = vpop.f32.mrb[31].mxu0  ;;  %10533 = vmatprep.mubr.bf16.mxu1 %v15317_v29  ;;  %v15338_v29 = vld [vmem:[#allocation8 + $0x20c] ss:$20 sps:$4 sm:$0xff]  }
 0xc0f   : > { %v9870_v7 = vpack.c.bf16 %v9827_v24, %v9826_v43 }
 0xc11   : > { %10632 = vmatpush1.bf16.msra.mxu1 %v9870_v7 }
 0xc12   : > { %v9698_v45 = vpop.f32.mrb[32].mxu0  ;;  %10633 = vmatprep.subr.bf16.mxu1 %v18816_v34 }
 0xc13   : > { %v9700_v30 = vpop.f32.mrb[33].mxu0  ;;  %v9828_v27 = vmax.f32 %v9698_v45, 0.0 }
 0xc14   : > { %v9701_v38 = vpop.f32.mrb[34].mxu0  ;;  %10534 = vmatmul.mubr.bf16.gmra.mrb[108].mxu1 %v15315_v11  ;;  %v15336_v11 = vld [vmem:[#allocation8 + $0x208] ss:$20 sps:$4 sm:$0xff]  }
 0xc15   : > { %v9829_v0 = vmax.f32 %v9701_v38, 0.0  ;;  %v9703_v32 = vpop.f32.mrb[35].mxu0  ;;  %10541 = vmatprep.mubr.bf16.mxu1 %v15320_v58  ;;  %v15341_v58 = vld [vmem:[#allocation8 + $0x234] ss:$20 sps:$4 sm:$0xff]  }
 0xc17   : > { %v9871_v39 = vpack.c.bf16 %v9829_v0, %v9828_v27 }
 0xc19   : > { %10634 = vmatpush1.bf16.msra.mxu1 %v9871_v39 }
 0xc1a   : > { %v9706_v40 = vpop.f32.mrb[36].mxu0  ;;  %10635 = vmatprep.subr.bf16.mxu1 %v18816_v34 }
 0xc1b   : > { %v9708_v31 = vpop.f32.mrb[37].mxu0  ;;  %v9830_v46 = vmax.f32 %v9706_v40, 0.0 }
 0xc1c   : > { %v9709_v63 = vpop.f32.mrb[38].mxu0  ;;  %10542 = vmatmul.mubr.bf16.gmra.mrb[112].mxu1 %v15318_v50  ;;  %v15339_v50 = vld [vmem:[#allocation8 + $0x230] ss:$20 sps:$4 sm:$0xff]  }
 0xc1d   : > { %v9831_v12 = vmax.f32 %v9709_v63, 0.0  ;;  %v9711_v35 = vpop.f32.mrb[39].mxu0  ;;  %10549 = vmatprep.mubr.bf16.mxu1 %v15323_v25  ;;  %v15344_v25 = vld [vmem:[#allocation8 + $0x25c] ss:$20 sps:$4 sm:$0xff]  }
 0xc1f   : > { %v9872_v56 = vpack.c.bf16 %v9831_v12, %v9830_v46 }
 0xc21   : > { %10636 = vmatpush1.bf16.msra.mxu1 %v9872_v56  ;;  %v9978_v56 = vld [vmem:[#allocation8 + $0x280] sm:$0xff] }
 0xc22   : > { %v9714_v3 = vpop.f32.mrb[40].mxu0  ;;  %10637 = vmatprep.subr.bf16.mxu1 %v18816_v34 }
 0xc23   : > { %v9716_v4 = vpop.f32.mrb[41].mxu0  ;;  %v9832_v9 = vmax.f32 %v9714_v3, 0.0  ;;  %v12805_v3 = vcombine.high %v9978_v56, %v9978_v56 }
 0xc24   : > { %v9717_v10 = vpop.f32.mrb[42].mxu0  ;;  %10550 = vmatmul.mubr.bf16.gmra.mrb[116].mxu1 %v15321_v55 }
 0xc25   : > { %v9833_v60 = vmax.f32 %v9717_v10, 0.0  ;;  %v9719_v21 = vpop.f32.mrb[43].mxu0  ;;  %10557 = vmatprep.mubr.bf16.mxu1 %v15326_v8  ;;  %v15342_v8 = vld [vmem:[#allocation8 + $0x258] ss:$20 sps:$4 sm:$0xff]  }
 0xc27   : > { %v9873_v62 = vpack.c.bf16 %v9833_v60, %v9832_v9 }
 0xc29   : > { %10638 = vmatpush1.bf16.msra.mxu1 %v9873_v62 }
 0xc2a   : > { %v9722_v2 = vpop.f32.mrb[44].mxu0  ;;  %10639 = vmatprep.subr.bf16.mxu1 %v18816_v34 }
 0xc2b   : > { %v9724_v26 = vpop.f32.mrb[45].mxu0  ;;  %v9834_v6 = vmax.f32 %v9722_v2, 0.0  ;;  %v15349_v2 = vld [vmem:[#allocation8 + $0xc] ss:$20 sps:$4 sm:$0xff]  }
 0xc2c   : > { %v9725_v16 = vpop.f32.mrb[46].mxu0  ;;  %10558 = vmatmul.mubr.bf16.gmra.mrb[120].mxu1 %v15324_v33 }
 0xc2d   : > { %v9835_v41 = vmax.f32 %v9725_v16, 0.0  ;;  %v9727_v15 = vpop.f32.mrb[47].mxu0  ;;  %10565 = vmatprep.mubr.bf16.mxu1 %v15329_v23  ;;  %v12804_v23 = vcombine.low %v9978_v56, %v9978_v56  ;;  %v15627_v16 = vmov 0.0   ;;  %v15405_v56 = vld [vmem:[#allocation8 + $0x150] ss:$20 sps:$4 sm:$0xff]  }
 0xc2f   : > { %v9874_v53 = vpack.c.bf16 %v9835_v41, %v9834_v6 }
 0xc31   : > { %10640 = vmatpush1.bf16.msra.mxu1 %v9874_v53 }
 0xc32   : > { %v9730_v20 = vpop.f32.mrb[48].mxu0  ;;  %10641 = vmatprep.subr.bf16.mxu1 %v18816_v34 }
 0xc33   : > { %v9732_v28 = vpop.f32.mrb[49].mxu0  ;;  %v9836_v57 = vmax.f32 %v9730_v20, 0.0  ;;  %v15352_v20 = vld [vmem:[#allocation8 + $0x34] ss:$20 sps:$4 sm:$0xff]  }
 0xc34   : > { %v9733_v54 = vpop.f32.mrb[50].mxu0  ;;  %10566 = vmatmul.mubr.bf16.gmra.mrb[124].mxu1 %v15327_v48 }
 0xc35   : > { %v9837_v18 = vmax.f32 %v9733_v54, 0.0  ;;  %v9735_v36 = vpop.f32.mrb[51].mxu0  ;;  %10573 = vmatprep.mubr.bf16.mxu1 %v15332_v52  ;;  %v15347_v52 = vld [vmem:[#allocation8 + $0x8] ss:$20 sps:$4 sm:$0xff]   ;;  %v15350_v54 = vld [vmem:[#allocation8 + $0x30] ss:$20 sps:$4 sm:$0xff]  }
 0xc36   : > { %v15358_v36 = vld [vmem:[#allocation8 + $0x84] ss:$20 sps:$4 sm:$0xff]  }
 0xc37   : > { %v9875_v49 = vpack.c.bf16 %v9837_v18, %v9836_v57  ;;  %v15355_v57 = vld [vmem:[#allocation8 + $0x5c] ss:$20 sps:$4 sm:$0xff]   ;;  %v15353_v18 = vld [vmem:[#allocation8 + $0x58] ss:$20 sps:$4 sm:$0xff]  }
 0xc39   : > { %10642 = vmatpush1.bf16.msra.mxu1 %v9875_v49  ;;  %v15356_v49 = vld [vmem:[#allocation8 + $0x80] ss:$20 sps:$4 sm:$0xff]  }
 0xc3a   : > { %v9738_v61 = vpop.f32.mrb[52].mxu0  ;;  %10643 = vmatprep.subr.bf16.mxu1 %v18816_v34 }
 0xc3b   : > { %v9740_v51 = vpop.f32.mrb[53].mxu0  ;;  %v9838_v17 = vmax.f32 %v9738_v61, 0.0  ;;  %v15364_v61 = vld [vmem:[#allocation8 + $0xd4] ss:$20 sps:$4 sm:$0xff]  }
 0xc3c   : > { %v9741_v5 = vpop.f32.mrb[54].mxu0  ;;  %10574 = vmatmul.mubr.bf16.gmra.mrb[128].mxu1 %v15330_v22  ;;  %v15361_v22 = vld [vmem:[#allocation8 + $0xac] ss:$20 sps:$4 sm:$0xff]   ;;  %v15362_v51 = vld [vmem:[#allocation8 + $0xd0] ss:$20 sps:$4 sm:$0xff]  }
 0xc3d   : > { %v9839_v19 = vmax.f32 %v9741_v5, 0.0  ;;  %v9743_v44 = vpop.f32.mrb[55].mxu0  ;;  %10581 = vmatprep.mubr.bf16.mxu1 %v15335_v37  ;;  %v15359_v37 = vld [vmem:[#allocation8 + $0xa8] ss:$20 sps:$4 sm:$0xff]  }
 0xc3e   : > { %v15367_v5 = vld [vmem:[#allocation8 + $0xfc] ss:$20 sps:$4 sm:$0xff]   ;;  %v15368_v44 = vld [vmem:[#allocation8 + $0x120] ss:$20 sps:$4 sm:$0xff]  }
 0xc3f   : > { %v9876_v42 = vpack.c.bf16 %v9839_v19, %v9838_v17  ;;  %v15365_v17 = vld [vmem:[#allocation8 + $0xf8] ss:$20 sps:$4 sm:$0xff]  }
 0xc40   : > { %v15370_v19 = vld [vmem:[#allocation8 + $0x124] ss:$20 sps:$4 sm:$0xff]  }
 0xc41   : > { %10644 = vmatpush1.bf16.msra.mxu1 %v9876_v42  ;;  %v15373_v42 = vld [vmem:[#allocation8 + $0x14c] ss:$20 sps:$4 sm:$0xff]  }
 0xc42   : > { %v9746_v1 = vpop.f32.mrb[56].mxu0  ;;  %10645 = vmatprep.subr.bf16.mxu1 %v18816_v34 }
 0xc43   : > { %v9748_v13 = vpop.f32.mrb[57].mxu0  ;;  %v9840_v43 = vmax.f32 %v9746_v1, 0.0  ;;  %v15374_v1 = vld [vmem:[#allocation8 + $0x170] ss:$20 sps:$4 sm:$0xff]  }
 0xc44   : > { %v9749_v47 = vpop.f32.mrb[58].mxu0  ;;  %10582 = vmatmul.mubr.bf16.gmra.mrb[132].mxu1 %v15333_v59  ;;  %v15371_v59 = vld [vmem:[#allocation8 + $0x148] ss:$20 sps:$4 sm:$0xff]  }
 0xc45   : > { %v9841_v24 = vmax.f32 %v9749_v47, 0.0  ;;  %v9751_v14 = vpop.f32.mrb[59].mxu0  ;;  %10589 = vmatprep.mubr.bf16.mxu1 %v15338_v29  ;;  %v15376_v29 = vld [vmem:[#allocation8 + $0x174] ss:$20 sps:$4 sm:$0xff]   ;;  %v15379_v13 = vld [vmem:[#allocation8 + $0x19c] ss:$20 sps:$4 sm:$0xff]  }
 0xc46   : > { %v15377_v47 = vld [vmem:[#allocation8 + $0x198] ss:$20 sps:$4 sm:$0xff]  }
 0xc47   : > { %v9877_v7 = vpack.c.bf16 %v9841_v24, %v9840_v43  ;;  %v15382_v43 = vld [vmem:[#allocation8 + $0x1c4] ss:$20 sps:$4 sm:$0xff]   ;;  %v15380_v24 = vld [vmem:[#allocation8 + $0x1c0] ss:$20 sps:$4 sm:$0xff]  }
 0xc48   : > { %v15385_v14 = vld [vmem:[#allocation8 + $0x1ec] ss:$20 sps:$4 sm:$0xff]  }
 0xc49   : > { %10646 = vmatpush1.bf16.msra.mxu1 %v9877_v7  ;;  %v15383_v7 = vld [vmem:[#allocation8 + $0x1e8] ss:$20 sps:$4 sm:$0xff]  }
 0xc4a   : > { %v9754_v45 = vpop.f32.mrb[60].mxu0  ;;  %10647 = vmatprep.subr.bf16.mxu1 %v18816_v34 }
 0xc4b   : > { %v9756_v30 = vpop.f32.mrb[61].mxu0  ;;  %v9842_v27 = vmax.f32 %v9754_v45, 0.0  ;;  %v15391_v45 = vld [vmem:[#allocation8 + $0x23c] ss:$20 sps:$4 sm:$0xff]  }
 0xc4c   : > { %v9757_v38 = vpop.f32.mrb[62].mxu0  ;;  %10590 = vmatmul.mubr.bf16.gmra.mrb[136].mxu1 %v15336_v11  ;;  %v15388_v11 = vld [vmem:[#allocation8 + $0x214] ss:$20 sps:$4 sm:$0xff]   ;;  %v15389_v30 = vld [vmem:[#allocation8 + $0x238] ss:$20 sps:$4 sm:$0xff]  }
 0xc4d   : > { %v9843_v0 = vmax.f32 %v9757_v38, 0.0  ;;  %v9759_v32 = vpop.f32.mrb[63].mxu0  ;;  %10597 = vmatprep.mubr.bf16.mxu1 %v15341_v58  ;;  %v15386_v58 = vld [vmem:[#allocation8 + $0x210] ss:$20 sps:$4 sm:$0xff]  }
 0xc4e   : > { %v15394_v38 = vld [vmem:[#allocation8 + $0x264] ss:$20 sps:$4 sm:$0xff]  }
 0xc4f   : > { %v9878_v39 = vpack.c.bf16 %v9843_v0, %v9842_v27  ;;  %v9979_v27 = vld [vmem:[#allocation8 + $0x288] sm:$0xff]  ;;  %v15392_v0 = vld [vmem:[#allocation8 + $0x260] ss:$20 sps:$4 sm:$0xff]  }
 0xc50   : > { %v12807_v32 = vcombine.high %v9979_v27, %v9979_v27 }
 0xc51   : > { %10648 = vmatpush1.bf16.msra.mxu1 %v9878_v39  ;;  %v12806_v39 = vcombine.low %v9979_v27, %v9979_v27 }
 0xc52   : > { %v9762_v40 = vpop.f32.mrb[64].mxu0  ;;  %10649 = vmatprep.subr.bf16.mxu1 %v18816_v34 }
 0xc53   : > { %v9764_v31 = vpop.f32.mrb[65].mxu0  ;;  %v9844_v46 = vmax.f32 %v9762_v40, 0.0  ;;  %v15399_v40 = vld [vmem:[#allocation8 + $0x60] ss:$20 sps:$4 sm:$0xff]  }
 0xc54   : > { %v9765_v63 = vpop.f32.mrb[66].mxu0  ;;  %10598 = vmatmul.mubr.bf16.gmra.mrb[140].mxu1 %v15339_v50  ;;  %v15397_v50 = vld [vmem:[#allocation8 + $0x10] ss:$20 sps:$4 sm:$0xff]   ;;  %v15400_v31 = vld [vmem:[#allocation8 + $0x88] ss:$20 sps:$4 sm:$0xff]  }
 0xc55   : > { %v9845_v12 = vmax.f32 %v9765_v63, 0.0  ;;  %v9767_v35 = vpop.f32.mrb[67].mxu0  ;;  %10605 = vmatprep.mubr.bf16.mxu1 %v15344_v25  ;;  %v15398_v25 = vld [vmem:[#allocation8 + $0x38] ss:$20 sps:$4 sm:$0xff]   ;;  %v15401_v63 = vld [vmem:[#allocation8 + $0xb0] ss:$20 sps:$4 sm:$0xff]  }
 0xc56   : > { %v15404_v35 = vld [vmem:[#allocation8 + $0x128] ss:$20 sps:$4 sm:$0xff]  }
 0xc57   : > { %v9879_v55 = vpack.c.bf16 %v9845_v12, %v9844_v46  ;;  %v15402_v46 = vld [vmem:[#allocation8 + $0xd8] ss:$20 sps:$4 sm:$0xff]   ;;  %v15403_v12 = vld [vmem:[#allocation8 + $0x100] ss:$20 sps:$4 sm:$0xff]  }
 0xc59   : > { %10650 = vmatpush1.bf16.msra.mxu1 %v9879_v55  ;;  %v15406_v55 = vld [vmem:[#allocation8 + $0x178] ss:$20 sps:$4 sm:$0xff]  }
 0xc5a   : > { %v9770_v4 = vpop.f32.mrb[68].mxu0  ;;  %10651 = vmatprep.subr.bf16.mxu1 %v18816_v34 }
 0xc5b   : > { %v9772_v10 = vpop.f32.mrb[69].mxu0  ;;  %v9846_v60 = vmax.f32 %v9770_v4, 0.0  ;;  %v15409_v4 = vld [vmem:[#allocation8 + $0x1f0] ss:$20 sps:$4 sm:$0xff]  }
 0xc5c   : > { %v9773_v9 = vpop.f32.mrb[70].mxu0  ;;  %10606 = vmatmul.mubr.bf16.gmra.mrb[144].mxu1 %v15342_v8  ;;  %v15407_v8 = vld [vmem:[#allocation8 + $0x1a0] ss:$20 sps:$4 sm:$0xff]   ;;  %v15410_v10 = vld [vmem:[#allocation8 + $0x218] ss:$20 sps:$4 sm:$0xff]  }
 0xc5d   : > { %v9847_v21 = vmax.f32 %v9773_v9, 0.0  ;;  %v9775_v62 = vpop.f32.mrb[71].mxu0  ;;  %10613 = vmatprep.mubr.bf16.mxu1 %v12805_v3  ;;  %v15408_v3 = vld [vmem:[#allocation8 + $0x1c8] ss:$20 sps:$4 sm:$0xff]   ;;  %v15411_v9 = vld [vmem:[#allocation8 + $0x240] ss:$20 sps:$4 sm:$0xff]  }
 0xc5f   : > { %v9880_v33 = vpack.c.bf16 %v9847_v21, %v9846_v60  ;;  %v15412_v60 = vld [vmem:[#allocation8 + $0x268] ss:$20 sps:$4 sm:$0xff]   ;;  %v15413_v21 = vld [vmem:[#allocation8 + $0x290] ss:$0 sps:$4 sm:$0xff]  }
 0xc61   : > { %10652 = vmatpush1.bf16.msra.mxu1 %v9880_v33 }
 0xc62   : > { %v9778_v26 = vpop.f32.mrb[72].mxu0  ;;  %13262 = vmatprep.subr.bf16.mxu1 %v15627_v16 }
 0xc63   : > { %v9780_v6 = vpop.f32.mrb[73].mxu0  ;;  %v9848_v41 = vmax.f32 %v9778_v26, 0.0 }
 0xc64   : > { %v9781_v15 = vpop.f32.mrb[74].mxu0  ;;  %10614 = vmatmul.mubr.bf16.gmra.mrb[148].mxu1 %v12804_v23  ;;  %v15416_v23 = vld [vmem:[%s18762_s6 + $0x4] ss:$12 sps:$4 sm:$0xff]  }
 0xc65   : > { %v9782_v53 = vpop.f32.mrb[75].mxu0  ;;  %10653 = vmatprep.mubr.bf16.mxu1 %v15349_v2  ;;  %v9881_v48 = vpack.c.bf16 %v9848_v41, %v9848_v41  ;;  %11233 = vmatprep.mubr.bf16.mxu0 %v15416_v23 }
 0xc67   : > { %v10451_v28 = vsel %vm1606_vm1, %v9881_v48, 0 }
 0xc6c   : > { %10654 = vmatmul.mubr.bf16.vlgmr.msra.gmra.mrb[84].mxu1 %v15347_v52 }
 0xc6d   : > { %13263 = vmatpush3.bf16.msra.mxu1 %v10451_v28  ;;  %10661 = vmatprep.mubr.bf16.mxu1 %v15352_v20 }
 0xc6e   : > { %13332 = vmatprep.subr.bf16.mxu1 %v15627_v16 }
 0xc74   : > { %10662 = vmatmul.mubr.bf16.gmra.mrb[88].mxu1 %v15350_v54 }
 0xc75   : > { %10669 = vmatprep.mubr.bf16.mxu1 %v15355_v57 }
 0xc7c   : > { %10670 = vmatmul.mubr.bf16.gmra.mrb[92].mxu1 %v15353_v18 }
 0xc7d   : > { %10677 = vmatprep.mubr.bf16.mxu1 %v15358_v36 }
 0xc84   : > { %10678 = vmatmul.mubr.bf16.gmra.mrb[96].mxu1 %v15356_v49 }
 0xc85   : > { %10685 = vmatprep.mubr.bf16.mxu1 %v15361_v22 }
 0xc8c   : > { %10686 = vmatmul.mubr.bf16.gmra.mrb[100].mxu1 %v15359_v37 }
 0xc8d   : > { %10693 = vmatprep.mubr.bf16.mxu1 %v15364_v61 }
 0xc94   : > { %10694 = vmatmul.mubr.bf16.gmra.mrb[104].mxu1 %v15362_v51 }
 0xc95   : > { %10701 = vmatprep.mubr.bf16.mxu1 %v15367_v5 }
 0xc9c   : > { %10702 = vmatmul.mubr.bf16.gmra.mrb[108].mxu1 %v15365_v17 }
 0xc9d   : > { %10709 = vmatprep.mubr.bf16.mxu1 %v15370_v19 }
 0xca4   : > { %10710 = vmatmul.mubr.bf16.gmra.mrb[112].mxu1 %v15368_v44 }
 0xca5   : > { %10717 = vmatprep.mubr.bf16.mxu1 %v15373_v42 }
 0xcac   : > { %10718 = vmatmul.mubr.bf16.gmra.mrb[116].mxu1 %v15371_v59 }
 0xcad   : > { %10725 = vmatprep.mubr.bf16.mxu1 %v15376_v29 }
 0xcb4   : > { %10726 = vmatmul.mubr.bf16.gmra.mrb[120].mxu1 %v15374_v1 }
 0xcb5   : > { %10733 = vmatprep.mubr.bf16.mxu1 %v15379_v13 }
 0xcbc   : > { %10734 = vmatmul.mubr.bf16.gmra.mrb[124].mxu1 %v15377_v47 }
 0xcbd   : > { %10741 = vmatprep.mubr.bf16.mxu1 %v15382_v43 }
 0xcc4   : > { %10742 = vmatmul.mubr.bf16.gmra.mrb[128].mxu1 %v15380_v24 }
 0xcc5   : > { %10749 = vmatprep.mubr.bf16.mxu1 %v15385_v14 }
 0xccc   : > { %10750 = vmatmul.mubr.bf16.gmra.mrb[132].mxu1 %v15383_v7 }
 0xccd   : > { %10757 = vmatprep.mubr.bf16.mxu1 %v15388_v11 }
 0xcd4   : > { %10758 = vmatmul.mubr.bf16.gmra.mrb[136].mxu1 %v15386_v58 }
 0xcd5   : > { %10765 = vmatprep.mubr.bf16.mxu1 %v15391_v45 }
 0xcdc   : > { %10766 = vmatmul.mubr.bf16.gmra.mrb[140].mxu1 %v15389_v30 }
 0xcdd   : > { %10773 = vmatprep.mubr.bf16.mxu1 %v15394_v38 }
 0xce4   : > { %10774 = vmatmul.mubr.bf16.gmra.mrb[144].mxu1 %v15392_v0 }
 0xce5   : > { %10781 = vmatprep.mubr.bf16.mxu1 %v12807_v32 }
 0xcec   : > { %10782 = vmatmul.mubr.bf16.gmra.mrb[148].mxu1 %v12806_v39 }
 0xced   : > { %13264 = vmatprep.mubr.msk.bf16.mxu1 %vm15628_vm4, %v15627_v16 }
 0xcf4   : > { %13265 = vmatmul.mubr.msk.bf16.vlgmr.msra.gmra.mrb[84].mxu1 %vm10398_vm5, %v15397_v50 }
 0xcf5   : > { %13268 = vmatprep.mubr.msk.bf16.mxu1 %vm15628_vm4, %v15627_v16 }
 0xcfc   : > { %13269 = vmatmul.mubr.msk.bf16.gmra.mrb[88].mxu1 %vm10398_vm5, %v15398_v25 }
 0xcfd   : > { %13272 = vmatprep.mubr.msk.bf16.mxu1 %vm15628_vm4, %v15627_v16 }
 0xd04   : > { %13273 = vmatmul.mubr.msk.bf16.gmra.mrb[92].mxu1 %vm10398_vm5, %v15399_v40 }
 0xd05   : > { %13276 = vmatprep.mubr.msk.bf16.mxu1 %vm15628_vm4, %v15627_v16 }
 0xd0c   : > { %13277 = vmatmul.mubr.msk.bf16.gmra.mrb[96].mxu1 %vm10398_vm5, %v15400_v31 }
 0xd0d   : > { %13280 = vmatprep.mubr.msk.bf16.mxu1 %vm15628_vm4, %v15627_v16 }
 0xd14   : > { %13281 = vmatmul.mubr.msk.bf16.gmra.mrb[100].mxu1 %vm10398_vm5, %v15401_v63 }
 0xd15   : > { %13284 = vmatprep.mubr.msk.bf16.mxu1 %vm15628_vm4, %v15627_v16 }
 0xd1c   : > { %13285 = vmatmul.mubr.msk.bf16.gmra.mrb[104].mxu1 %vm10398_vm5, %v15402_v46 }
 0xd1d   : > { %13288 = vmatprep.mubr.msk.bf16.mxu1 %vm15628_vm4, %v15627_v16 }
 0xd24   : > { %13289 = vmatmul.mubr.msk.bf16.gmra.mrb[108].mxu1 %vm10398_vm5, %v15403_v12 }
 0xd25   : > { %13292 = vmatprep.mubr.msk.bf16.mxu1 %vm15628_vm4, %v15627_v16 }
 0xd2c   : > { %13293 = vmatmul.mubr.msk.bf16.gmra.mrb[112].mxu1 %vm10398_vm5, %v15404_v35 }
 0xd2d   : > { %13296 = vmatprep.mubr.msk.bf16.mxu1 %vm15628_vm4, %v15627_v16 }
 0xd34   : > { %13297 = vmatmul.mubr.msk.bf16.gmra.mrb[116].mxu1 %vm10398_vm5, %v15405_v56 }
 0xd35   : > { %13300 = vmatprep.mubr.msk.bf16.mxu1 %vm15628_vm4, %v15627_v16 }
 0xd3c   : > { %13301 = vmatmul.mubr.msk.bf16.gmra.mrb[120].mxu1 %vm10398_vm5, %v15406_v55 }
 0xd3d   : > { %13304 = vmatprep.mubr.msk.bf16.mxu1 %vm15628_vm4, %v15627_v16 }
 0xd44   : > { %13305 = vmatmul.mubr.msk.bf16.gmra.mrb[124].mxu1 %vm10398_vm5, %v15407_v8 }
 0xd45   : > { %13308 = vmatprep.mubr.msk.bf16.mxu1 %vm15628_vm4, %v15627_v16 }
 0xd4c   : > { %13309 = vmatmul.mubr.msk.bf16.gmra.mrb[128].mxu1 %vm10398_vm5, %v15408_v3 }
 0xd4d   : > { %13312 = vmatprep.mubr.msk.bf16.mxu1 %vm15628_vm4, %v15627_v16 }
 0xd54   : > { %13313 = vmatmul.mubr.msk.bf16.gmra.mrb[132].mxu1 %vm10398_vm5, %v15409_v4 }
 0xd55   : > { %13316 = vmatprep.mubr.msk.bf16.mxu1 %vm15628_vm4, %v15627_v16 }
 0xd5c   : > { %13317 = vmatmul.mubr.msk.bf16.gmra.mrb[136].mxu1 %vm10398_vm5, %v15410_v10 }
 0xd5d   : > { %13320 = vmatprep.mubr.msk.bf16.mxu1 %vm15628_vm4, %v15627_v16 }
 0xd64   : > { %13321 = vmatmul.mubr.msk.bf16.gmra.mrb[140].mxu1 %vm10398_vm5, %v15411_v9 }
 0xd65   : > { %13324 = vmatprep.mubr.msk.bf16.mxu1 %vm15628_vm4, %v15627_v16 }
 0xd6c   : > { %13325 = vmatmul.mubr.msk.bf16.gmra.mrb[144].mxu1 %vm10398_vm5, %v15412_v60 }
 0xd6d   : > { %13328 = vmatprep.mubr.msk.bf16.mxu1 %vm15628_vm4, %v15627_v16 }
 0xd74   : > { %13329 = vmatmul.mubr.msk.bf16.gmra.mrb[148].mxu1 %vm10398_vm5, %v15413_v21 }
 0xd75   : > { %13334 = vmatprep.mubr.msk.bf16.mxu1 %vm15628_vm4, %v15627_v16 }
 0xdc7   : > { %v10823_v62 = vpop.f32.mrb[84].mxu1 }
 0xdc8   : > { %v13266_v33 = vpop.f32.mrb[85].mxu1  ;;  %v10957_v26 = vmax.f32 %v10823_v62, 0.0 }
 0xdc9   : > { %v10826_v2 = vpop.f32.mrb[86].mxu1 }
 0xdca   : > { %v10958_v6 = vmax.f32 %v10826_v2, 0.0  ;;  %v13267_v41 = vpop.f32.mrb[87].mxu1 }
 0xdcc   : > { %v10990_v15 = vpack.c.bf16 %v10958_v6, %v10957_v26 }
 0xdcf   : > { %v10831_v53 = vpop.f32.mrb[88].mxu1 }
 0xdd0   : > { %v13270_v48 = vpop.f32.mrb[89].mxu1  ;;  %v10959_v20 = vmax.f32 %v10831_v53, 0.0 }
 0xdd1   : > { %v10834_v52 = vpop.f32.mrb[90].mxu1 }
 0xdd2   : > { %v10960_v28 = vmax.f32 %v10834_v52, 0.0  ;;  %v13271_v54 = vpop.f32.mrb[91].mxu1 }
 0xdd4   : > { %v10991_v57 = vpack.c.bf16 %v10960_v28, %v10959_v20 }
 0xdd7   : > { %v10839_v18 = vpop.f32.mrb[92].mxu1 }
 0xdd8   : > { %v13274_v36 = vpop.f32.mrb[93].mxu1  ;;  %v10961_v22 = vmax.f32 %v10839_v18, 0.0 }
 0xdd9   : > { %v10842_v49 = vpop.f32.mrb[94].mxu1 }
 0xdda   : > { %v10962_v37 = vmax.f32 %v10842_v49, 0.0  ;;  %v13275_v61 = vpop.f32.mrb[95].mxu1 }
 0xddc   : > { %v10992_v51 = vpack.c.bf16 %v10962_v37, %v10961_v22 }
 0xddf   : > { %v10847_v5 = vpop.f32.mrb[96].mxu1 }
 0xde0   : > { %v13278_v17 = vpop.f32.mrb[97].mxu1  ;;  %v10963_v44 = vmax.f32 %v10847_v5, 0.0 }
 0xde1   : > { %v10850_v19 = vpop.f32.mrb[98].mxu1 }
 0xde2   : > { %v10964_v42 = vmax.f32 %v10850_v19, 0.0  ;;  %v13279_v59 = vpop.f32.mrb[99].mxu1 }
 0xde4   : > { %v18538_v29 = vpack.c.bf16 %v10964_v42, %v10963_v44 }
 0xde7   : > { %v10855_v1 = vpop.f32.mrb[100].mxu1 }
 0xde8   : > { %v13282_v13 = vpop.f32.mrb[101].mxu1  ;;  %v10965_v43 = vmax.f32 %v10855_v1, 0.0 }
 0xde9   : > { %v10858_v47 = vpop.f32.mrb[102].mxu1 }
 0xdea   : > { %v10966_v24 = vmax.f32 %v10858_v47, 0.0  ;;  %v13283_v14 = vpop.f32.mrb[103].mxu1 }
 0xdec   : > { %v18540_v7 = vpack.c.bf16 %v10966_v24, %v10965_v43 }
 0xdef   : > { %v10863_v11 = vpop.f32.mrb[104].mxu1 }
 0xdf0   : > { %v13286_v58 = vpop.f32.mrb[105].mxu1  ;;  %v10967_v30 = vmax.f32 %v10863_v11, 0.0 }
 0xdf1   : > { %v10866_v45 = vpop.f32.mrb[106].mxu1 }
 0xdf2   : > { %v10968_v38 = vmax.f32 %v10866_v45, 0.0  ;;  %v13287_v27 = vpop.f32.mrb[107].mxu1 }
 0xdf4   : > { %v18542_v0 = vpack.c.bf16 %v10968_v38, %v10967_v30 }
 0xdf7   : > { %v10871_v32 = vpop.f32.mrb[108].mxu1 }
 0xdf8   : > { %v13290_v39 = vpop.f32.mrb[109].mxu1  ;;  %v10969_v25 = vmax.f32 %v10871_v32, 0.0 }
 0xdf9   : > { %v10874_v50 = vpop.f32.mrb[110].mxu1 }
 0xdfa   : > { %v10970_v40 = vmax.f32 %v10874_v50, 0.0  ;;  %v13291_v31 = vpop.f32.mrb[111].mxu1 }
 0xdfc   : > { %v18544_v63 = vpack.c.bf16 %v10970_v40, %v10969_v25 }
 0xdff   : > { %v10879_v46 = vpop.f32.mrb[112].mxu1 }
 0xe00   : > { %v13294_v12 = vpop.f32.mrb[113].mxu1  ;;  %v10971_v56 = vmax.f32 %v10879_v46, 0.0 }
 0xe01   : > { %v10882_v35 = vpop.f32.mrb[114].mxu1 }
 0xe02   : > { %v10972_v55 = vmax.f32 %v10882_v35, 0.0  ;;  %v13295_v8 = vpop.f32.mrb[115].mxu1 }
 0xe04   : > { %v18546_v3 = vpack.c.bf16 %v10972_v55, %v10971_v56  ;;  %v15420_v55 = vld [vmem:[%s18762_s6 + $0x1c] ss:$12 sps:$4 sm:$0xff]  }
 0xe07   : > { %v10887_v4 = vpop.f32.mrb[116].mxu1 }
 0xe08   : > { %v13298_v10 = vpop.f32.mrb[117].mxu1  ;;  %v10973_v60 = vmax.f32 %v10887_v4, 0.0 }
 0xe09   : > { %v10890_v9 = vpop.f32.mrb[118].mxu1 }
 0xe0a   : > { %v10974_v21 = vmax.f32 %v10890_v9, 0.0  ;;  %v13299_v62 = vpop.f32.mrb[119].mxu1 }
 0xe0b   : > { %v15424_v62 = vld [vmem:[%s18762_s6 + $0x34] ss:$12 sps:$4 sm:$0xff]  }
 0xe0c   : > { %v10998_v33 = vpack.c.bf16 %v10974_v21, %v10973_v60  ;;  %v15417_v21 = vld [vmem:[%s18762_s6 + $0x8] ss:$12 sps:$4 sm:$0xff]  }
 0xe0e   : > { %12992 = vmatprep.subr.bf16.mxu0 %v10998_v33  ;;  %v15421_v33 = vld [vmem:[%s18762_s6 + $0x20] ss:$12 sps:$4 sm:$0xff]  }
 0xe0f   : > { %v10895_v23 = vpop.f32.mrb[120].mxu1  ;;  %12993 = vmatpush3.bf16.msra.mxu0 %v10990_v15 }
 0xe10   : > { %v13302_v2 = vpop.f32.mrb[121].mxu1  ;;  %v10975_v6 = vmax.f32 %v10895_v23, 0.0  ;;  %v15422_v23 = vld [vmem:[%s18762_s6 + $0x30] ss:$12 sps:$4 sm:$0xff]  }
 0xe11   : > { %v10898_v26 = vpop.f32.mrb[122].mxu1  ;;  %v15428_v2 = vld [vmem:[%s18762_s6 + $0x4c] ss:$12 sps:$4 sm:$0xff]  }
 0xe12   : > { %v10976_v41 = vmax.f32 %v10898_v26, 0.0  ;;  %v13303_v53 = vpop.f32.mrb[123].mxu1  ;;  %v15425_v26 = vld [vmem:[%s18762_s6 + $0x38] ss:$12 sps:$4 sm:$0xff]  }
 0xe13   : > { %v15429_v53 = vld [vmem:[%s18762_s6 + $0x50] ss:$12 sps:$4 sm:$0xff]  }
 0xe14   : > { %v10999_v48 = vpack.c.bf16 %v10976_v41, %v10975_v6  ;;  %v15426_v6 = vld [vmem:[%s18762_s6 + $0x48] ss:$12 sps:$4 sm:$0xff]   ;;  %v15432_v41 = vld [vmem:[%s18762_s6 + $0x64] ss:$12 sps:$4 sm:$0xff]  }
 0xe16   : > { %12994 = vmatprep.subr.bf16.mxu0 %v10999_v48  ;;  %v15430_v48 = vld [vmem:[%s18762_s6 + $0x60] ss:$12 sps:$4 sm:$0xff]  }
 0xe17   : > { %v10903_v52 = vpop.f32.mrb[124].mxu1  ;;  %12995 = vmatpush3.bf16.msra.mxu0 %v10991_v57 }
 0xe18   : > { %v13306_v20 = vpop.f32.mrb[125].mxu1  ;;  %v10977_v54 = vmax.f32 %v10903_v52, 0.0  ;;  %v15436_v52 = vld [vmem:[%s18762_s6 + $0x7c] ss:$12 sps:$4 sm:$0xff]  }
 0xe19   : > { %v10906_v28 = vpop.f32.mrb[126].mxu1  ;;  %v15433_v20 = vld [vmem:[%s18762_s6 + $0x68] ss:$12 sps:$4 sm:$0xff]  }
 0xe1a   : > { %v10978_v18 = vmax.f32 %v10906_v28, 0.0  ;;  %v13307_v36 = vpop.f32.mrb[127].mxu1  ;;  %v15434_v28 = vld [vmem:[%s18762_s6 + $0x78] ss:$12 sps:$4 sm:$0xff]  }
 0xe1b   : > { %v15438_v36 = vld [vmem:[%s18762_s6 + $0x90] ss:$12 sps:$4 sm:$0xff]  }
 0xe1c   : > { %v11000_v49 = vpack.c.bf16 %v10978_v18, %v10977_v54  ;;  %v15440_v54 = vld [vmem:[%s18762_s6 + $0x94] ss:$12 sps:$4 sm:$0xff]  }
 0xe1d   : > { %v15437_v18 = vld [vmem:[%s18762_s6 + $0x80] ss:$12 sps:$4 sm:$0xff]  }
 0xe1e   : > { %12996 = vmatprep.subr.bf16.mxu0 %v11000_v49  ;;  %v15444_v49 = vld [vmem:[%s18762_s6 + $0xac] ss:$12 sps:$4 sm:$0xff]  }
 0xe1f   : > { %v10911_v22 = vpop.f32.mrb[128].mxu1  ;;  %12997 = vmatpush3.bf16.msra.mxu0 %v10992_v51 }
 0xe20   : > { %v13310_v37 = vpop.f32.mrb[129].mxu1  ;;  %v10979_v61 = vmax.f32 %v10911_v22, 0.0  ;;  %v15441_v22 = vld [vmem:[%s18762_s6 + $0x98] ss:$12 sps:$4 sm:$0xff]  }
 0xe21   : > { %v10914_v15 = vpop.f32.mrb[130].mxu1  ;;  %v11039_v37 = vld [vmem:[%s18762_s6 + $0xc0] sm:$0xff] }
 0xe22   : > { %v10980_v5 = vmax.f32 %v10914_v15, 0.0  ;;  %v13311_v17 = vpop.f32.mrb[131].mxu1  ;;  %v15442_v15 = vld [vmem:[%s18762_s6 + $0xa8] ss:$12 sps:$4 sm:$0xff]  }
 0xe23   : > { %v12850_v17 = vcombine.low %v11039_v37, %v11039_v37 }
 0xe24   : > { %v11001_v19 = vpack.c.bf16 %v10980_v5, %v10979_v61  ;;  %v12851_v61 = vcombine.high %v11039_v37, %v11039_v37  ;;  %v15445_v5 = vld [vmem:[%s18762_s6 + $0xb0] ss:$12 sps:$4 sm:$0xff]  }
 0xe26   : > { %12998 = vmatprep.subr.bf16.mxu0 %v11001_v19  ;;  %v15448_v19 = vld [vmem:[%s18762_s6 + $0xc8] ss:$0 sps:$4 sm:$0xff]  }
 0xe27   : > { %v10919_v44 = vpop.f32.mrb[132].mxu1  ;;  %12999 = vmatpush3.bf16.msra.mxu0 %v18538_v29 }
 0xe28   : > { %v13314_v57 = vpop.f32.mrb[133].mxu1  ;;  %v10981_v59 = vmax.f32 %v10919_v44, 0.0  ;;  %v15451_v44 = vld [vmem:[%s18763_s7 + $0x4] ss:$8 sps:$4 sm:$0xff]  }
 0xe29   : > { %v10922_v42 = vpop.f32.mrb[134].mxu1 }
 0xe2a   : > { %v10982_v1 = vmax.f32 %v10922_v42, 0.0  ;;  %v13315_v13 = vpop.f32.mrb[135].mxu1 }
 0xe2c   : > { %v11002_v47 = vpack.c.bf16 %v10982_v1, %v10981_v59 }
 0xe2e   : > { %13000 = vmatprep.subr.bf16.mxu0 %v11002_v47 }
 0xe2f   : > { %v10927_v43 = vpop.f32.mrb[136].mxu1  ;;  %13001 = vmatpush3.bf16.msra.mxu0 %v18540_v7 }
 0xe30   : > { %v13318_v51 = vpop.f32.mrb[137].mxu1  ;;  %v10983_v14 = vmax.f32 %v10927_v43, 0.0 }
 0xe31   : > { %v10930_v24 = vpop.f32.mrb[138].mxu1 }
 0xe32   : > { %v10984_v11 = vmax.f32 %v10930_v24, 0.0  ;;  %v13319_v58 = vpop.f32.mrb[139].mxu1 }
 0xe34   : > { %v11003_v45 = vpack.c.bf16 %v10984_v11, %v10983_v14 }
 0xe36   : > { %13002 = vmatprep.subr.bf16.mxu0 %v11003_v45 }
 0xe37   : > { %v10935_v30 = vpop.f32.mrb[140].mxu1  ;;  %13003 = vmatpush3.bf16.msra.mxu0 %v18542_v0  ;;  %v15414_v0 = vld [vmem:[%s18762_s6] ss:$12 sps:$4 sm:$0xff]  }
 0xe38   : > { %v13322_v29 = vpop.f32.mrb[141].mxu1  ;;  %v10985_v27 = vmax.f32 %v10935_v30, 0.0 }
 0xe39   : > { %v10938_v38 = vpop.f32.mrb[142].mxu1 }
 0xe3a   : > { %v10986_v32 = vmax.f32 %v10938_v38, 0.0  ;;  %v13323_v39 = vpop.f32.mrb[143].mxu1 }
 0xe3c   : > { %v11004_v50 = vpack.c.bf16 %v10986_v32, %v10985_v27 }
 0xe3e   : > { %13004 = vmatprep.subr.bf16.mxu0 %v11004_v50 }
 0xe3f   : > { %v10943_v25 = vpop.f32.mrb[144].mxu1  ;;  %13005 = vmatpush3.bf16.msra.mxu0 %v18544_v63 }
 0xe40   : > { %v13326_v7 = vpop.f32.mrb[145].mxu1  ;;  %v10987_v31 = vmax.f32 %v10943_v25, 0.0 }
 0xe41   : > { %v10946_v40 = vpop.f32.mrb[146].mxu1 }
 0xe42   : > { %v10988_v46 = vmax.f32 %v10946_v40, 0.0  ;;  %v13327_v12 = vpop.f32.mrb[147].mxu1 }
 0xe44   : > { %v11005_v35 = vpack.c.bf16 %v10988_v46, %v10987_v31 }
 0xe46   : > { %13006 = vmatprep.subr.bf16.mxu0 %v11005_v35 }
 0xe47   : > { %v10951_v56 = vpop.f32.mrb[148].mxu1  ;;  %13007 = vmatpush3.bf16.msra.mxu0 %v18546_v3  ;;  %v15418_v3 = vld [vmem:[%s18762_s6 + $0x18] ss:$12 sps:$4 sm:$0xff]  }
 0xe48   : > { %v10989_v8 = vmax.f32 %v10951_v56, 0.0  ;;  %v13330_v63 = vpop.f32.mrb[149].mxu1  ;;  %11504 = vmatprep.subr.bf16.mxu0 %v18816_v34 }
 0xe49   : > { %v10954_v4 = vpop.f32.mrb[150].mxu1 }
 0xe4a   : > { %v11006_v10 = vpack.c.bf16 %v10989_v8, %v10989_v8  ;;  %v13331_v9 = vpop.f32.mrb[151].mxu1  ;;  %11234 = vmatmul.mubr.bf16.vlgmr.msra.gmra.mrb[76].mxu0 %v15414_v0 }
 0xe4b   : > { %11241 = vmatprep.mubr.bf16.mxu0 %v15420_v55 }
 0xe4c   : > { %v11199_v60 = vsel %vm1606_vm1, %v11006_v10, 0 }
 0xe4d   : > { %13333 = vmatpush3.bf16.msra.mxu1 %v11199_v60 }
 0xe50   : > { %13335 = vmatmul.mubr.msk.bf16.vlgmr.msra.gmra.mrb[152].mxu1 %vm10398_vm5, %v15417_v21 }
 0xe51   : > { %13338 = vmatprep.mubr.msk.bf16.mxu1 %vm15628_vm4, %v15627_v16 }
 0xe52   : > { %11242 = vmatmul.mubr.bf16.gmra.mrb[80].mxu0 %v15418_v3 }
 0xe53   : > { %11249 = vmatprep.mubr.bf16.mxu0 %v15424_v62 }
 0xe58   : > { %13339 = vmatmul.mubr.msk.bf16.gmra.mrb[156].mxu1 %vm10398_vm5, %v15421_v33 }
 0xe59   : > { %13342 = vmatprep.mubr.msk.bf16.mxu1 %vm15628_vm4, %v15627_v16 }
 0xe5a   : > { %11250 = vmatmul.mubr.bf16.gmra.mrb[84].mxu0 %v15422_v23 }
 0xe5b   : > { %11257 = vmatprep.mubr.bf16.mxu0 %v15428_v2 }
 0xe60   : > { %13343 = vmatmul.mubr.msk.bf16.gmra.mrb[160].mxu1 %vm10398_vm5, %v15425_v26 }
 0xe61   : > { %13346 = vmatprep.mubr.msk.bf16.mxu1 %vm15628_vm4, %v15627_v16 }
 0xe62   : > { %11258 = vmatmul.mubr.bf16.gmra.mrb[88].mxu0 %v15426_v6 }
 0xe63   : > { %11265 = vmatprep.mubr.bf16.mxu0 %v15432_v41 }
 0xe68   : > { %13347 = vmatmul.mubr.msk.bf16.gmra.mrb[168].mxu1 %vm10398_vm5, %v15429_v53 }
 0xe69   : > { %13350 = vmatprep.mubr.msk.bf16.mxu1 %vm15628_vm4, %v15627_v16 }
 0xe6a   : > { %11266 = vmatmul.mubr.bf16.gmra.mrb[92].mxu0 %v15430_v48 }
 0xe6b   : > { %11273 = vmatprep.mubr.bf16.mxu0 %v15436_v52 }
 0xe70   : > { %13351 = vmatmul.mubr.msk.bf16.gmra.mrb[76].mxu1 %vm10398_vm5, %v15433_v20 }
 0xe71   : > { %13354 = vmatprep.mubr.msk.bf16.mxu1 %vm15628_vm4, %v15627_v16 }
 0xe72   : > { %11274 = vmatmul.mubr.bf16.gmra.mrb[96].mxu0 %v15434_v28 }
 0xe73   : > { %11281 = vmatprep.mubr.bf16.mxu0 %v15440_v54 }
 0xe78   : > { %13355 = vmatmul.mubr.msk.bf16.gmra.mrb[172].mxu1 %vm10398_vm5, %v15437_v18 }
 0xe79   : > { %13358 = vmatprep.mubr.msk.bf16.mxu1 %vm15628_vm4, %v15627_v16 }
 0xe7a   : > { %11282 = vmatmul.mubr.bf16.gmra.mrb[100].mxu0 %v15438_v36 }
 0xe7b   : > { %11289 = vmatprep.mubr.bf16.mxu0 %v15444_v49 }
 0xe80   : > { %13359 = vmatmul.mubr.msk.bf16.gmra.mrb[176].mxu1 %vm10398_vm5, %v15441_v22 }
 0xe81   : > { %13362 = vmatprep.mubr.msk.bf16.mxu1 %vm15628_vm4, %v15627_v16 }
 0xe82   : > { %11290 = vmatmul.mubr.bf16.gmra.mrb[104].mxu0 %v15442_v15 }
 0xe83   : > { %11297 = vmatprep.mubr.bf16.mxu0 %v12851_v61 }
 0xe88   : > { %13363 = vmatmul.mubr.msk.bf16.gmra.mrb[180].mxu1 %vm10398_vm5, %v15445_v5 }
 0xe89   : > { %13366 = vmatprep.mubr.msk.bf16.mxu1 %vm15628_vm4, %v15627_v16 }
 0xe8a   : > { %11298 = vmatmul.mubr.bf16.gmra.mrb[108].mxu0 %v12850_v17 }
 0xe8b   : > { %12872 = vmatprep.mubr.msk.bf16.mxu0 %vm10398_vm5, %v15451_v44 }
 0xe90   : > { %13367 = vmatmul.mubr.msk.bf16.gmra.mrb[184].mxu1 %vm10398_vm5, %v15448_v19 }
 0xf1d   : > { %v13008_v57 = vpop.f32.mrb[76].mxu0 }
 0xf1e   : > { %v13009_v42 = vpop.f32.mrb[77].mxu0 }
 0xf1f   : > { %v13010_v59 = vadd.f32 %v13009_v42, %v13008_v57  ;;  %v13011_v1 = vpop.f32.mrb[78].mxu0 }
 0xf20   : > { %v13012_v13 = vpop.f32.mrb[79].mxu0 }
 0xf21   : > { %v13013_v47 = vadd.f32 %v13012_v13, %v13011_v1 }
 0xf23   : > { %v11339_v43 = vpop.f32.mrb[152].mxu1 }
 0xf24   : > { %v11340_v51 = vadd.f32 %v13010_v59, %v11339_v43  ;;  %v13336_v24 = vpop.f32.mrb[153].mxu1 }
 0xf25   : > { %v11342_v14 = vpop.f32.mrb[154].mxu1  ;;  %v13014_v11 = vpop.f32.mrb[80].mxu0 }
 0xf26   : > { %v11343_v58 = vadd.f32 %v13013_v47, %v11342_v14  ;;  %v13337_v45 = vpop.f32.mrb[155].mxu1  ;;  %v13015_v30 = vpop.f32.mrb[81].mxu0  ;;  %v11409_v27 = vmax.f32 %v11340_v51, 0.0 }
 0xf27   : > { %v13016_v29 = vadd.f32 %v13015_v30, %v13014_v11  ;;  %v13017_v38 = vpop.f32.mrb[82].mxu0 }
 0xf28   : > { %v11410_v32 = vmax.f32 %v11343_v58, 0.0  ;;  %v13018_v39 = vpop.f32.mrb[83].mxu0 }
 0xf29   : > { %v13019_v50 = vadd.f32 %v13018_v39, %v13017_v38 }
 0xf2a   : > { %v11426_v25 = vpack.c.bf16 %v11410_v32, %v11409_v27 }
 0xf2b   : > { %v11347_v7 = vpop.f32.mrb[156].mxu1 }
 0xf2c   : > { %v11348_v40 = vadd.f32 %v13016_v29, %v11347_v7  ;;  %v13340_v31 = vpop.f32.mrb[157].mxu1  ;;  %11505 = vmatpush1.bf16.msra.mxu0 %v11426_v25 }
 0xf2d   : > { %v11350_v46 = vpop.f32.mrb[158].mxu1  ;;  %v13020_v12 = vpop.f32.mrb[84].mxu0  ;;  %11506 = vmatprep.subr.bf16.mxu0 %v18816_v34 }
 0xf2e   : > { %v11351_v35 = vadd.f32 %v13019_v50, %v11350_v46  ;;  %v13341_v0 = vpop.f32.mrb[159].mxu1  ;;  %v13021_v56 = vpop.f32.mrb[85].mxu0  ;;  %v11411_v63 = vmax.f32 %v11348_v40, 0.0 }
 0xf2f   : > { %v13022_v55 = vadd.f32 %v13021_v56, %v13020_v12  ;;  %v13023_v8 = vpop.f32.mrb[86].mxu0 }
 0xf30   : > { %v11412_v4 = vmax.f32 %v11351_v35, 0.0  ;;  %v13024_v10 = vpop.f32.mrb[87].mxu0 }
 0xf31   : > { %v13025_v9 = vadd.f32 %v13024_v10, %v13023_v8 }
 0xf32   : > { %v11427_v60 = vpack.c.bf16 %v11412_v4, %v11411_v63 }
 0xf33   : > { %v11355_v21 = vpop.f32.mrb[160].mxu1 }
 0xf34   : > { %v11356_v3 = vadd.f32 %v13022_v55, %v11355_v21  ;;  %v13344_v62 = vpop.f32.mrb[161].mxu1  ;;  %11507 = vmatpush1.bf16.msra.mxu0 %v11427_v60 }
 0xf35   : > { %v11358_v33 = vpop.f32.mrb[162].mxu1  ;;  %v13026_v23 = vpop.f32.mrb[88].mxu0  ;;  %11508 = vmatprep.subr.bf16.mxu0 %v18816_v34 }
 0xf36   : > { %v11359_v2 = vadd.f32 %v13025_v9, %v11358_v33  ;;  %v13345_v26 = vpop.f32.mrb[163].mxu1  ;;  %v13027_v6 = vpop.f32.mrb[89].mxu0  ;;  %v11413_v48 = vmax.f32 %v11356_v3, 0.0 }
 0xf37   : > { %v13028_v41 = vadd.f32 %v13027_v6, %v13026_v23  ;;  %v13029_v53 = vpop.f32.mrb[90].mxu0 }
 0xf38   : > { %v11414_v52 = vmax.f32 %v11359_v2, 0.0  ;;  %v13030_v20 = vpop.f32.mrb[91].mxu0 }
 0xf39   : > { %v13031_v28 = vadd.f32 %v13030_v20, %v13029_v53 }
 0xf3a   : > { %v11428_v54 = vpack.c.bf16 %v11414_v52, %v11413_v48 }
 0xf3b   : > { %v11363_v18 = vpop.f32.mrb[168].mxu1 }
 0xf3c   : > { %v11364_v36 = vadd.f32 %v13028_v41, %v11363_v18  ;;  %v13348_v49 = vpop.f32.mrb[169].mxu1  ;;  %11509 = vmatpush1.bf16.msra.mxu0 %v11428_v54 }
 0xf3d   : > { %v11366_v22 = vpop.f32.mrb[170].mxu1  ;;  %v13032_v37 = vpop.f32.mrb[92].mxu0  ;;  %11510 = vmatprep.subr.bf16.mxu0 %v18816_v34 }
 0xf3e   : > { %v11367_v15 = vadd.f32 %v13031_v28, %v11366_v22  ;;  %v13349_v61 = vpop.f32.mrb[171].mxu1  ;;  %v13033_v5 = vpop.f32.mrb[93].mxu0  ;;  %v11415_v44 = vmax.f32 %v11364_v36, 0.0 }
 0xf3f   : > { %v13034_v17 = vadd.f32 %v13033_v5, %v13032_v37  ;;  %v13035_v19 = vpop.f32.mrb[94].mxu0 }
 0xf40   : > { %v11416_v57 = vmax.f32 %v11367_v15, 0.0  ;;  %v13036_v42 = vpop.f32.mrb[95].mxu0 }
 0xf41   : > { %v13037_v59 = vadd.f32 %v13036_v42, %v13035_v19 }
 0xf42   : > { %v11429_v1 = vpack.c.bf16 %v11416_v57, %v11415_v44 }
 0xf43   : > { %v11371_v13 = vpop.f32.mrb[76].mxu1 }
 0xf44   : > { %v11372_v47 = vadd.f32 %v13034_v17, %v11371_v13  ;;  %v13352_v43 = vpop.f32.mrb[77].mxu1  ;;  %11511 = vmatpush1.bf16.msra.mxu0 %v11429_v1 }
 0xf45   : > { %v11374_v51 = vpop.f32.mrb[78].mxu1  ;;  %v13038_v24 = vpop.f32.mrb[96].mxu0  ;;  %11512 = vmatprep.subr.bf16.mxu0 %v18816_v34 }
 0xf46   : > { %v11375_v14 = vadd.f32 %v13037_v59, %v11374_v51  ;;  %v13353_v11 = vpop.f32.mrb[79].mxu1  ;;  %v13039_v58 = vpop.f32.mrb[97].mxu0  ;;  %v11417_v29 = vmax.f32 %v11372_v47, 0.0 }
 0xf47   : > { %v13040_v45 = vadd.f32 %v13039_v58, %v13038_v24  ;;  %v13041_v30 = vpop.f32.mrb[98].mxu0  ;;  %v15454_v11 = vld [vmem:[%s18763_s7 + $0x14] ss:$8 sps:$4 sm:$0xff]   ;;  %v15457_v58 = vld [vmem:[%s18763_s7 + $0x24] ss:$8 sps:$4 sm:$0xff]  }
 0xf48   : > { %v11418_v38 = vmax.f32 %v11375_v14, 0.0  ;;  %v13042_v27 = vpop.f32.mrb[99].mxu0  ;;  %v15449_v14 = vld [vmem:[%s18763_s7] ss:$8 sps:$4 sm:$0xff]  }
 0xf49   : > { %v13043_v32 = vadd.f32 %v13042_v27, %v13041_v30  ;;  %v15460_v30 = vld [vmem:[%s18763_s7 + $0x34] ss:$8 sps:$4 sm:$0xff]  }
 0xf4a   : > { %v11430_v39 = vpack.c.bf16 %v11418_v38, %v11417_v29  ;;  %v11443_v29 = vld [vmem:[%s18763_s7 + $0x40] sm:$0xff]  ;;  %v15458_v38 = vld [vmem:[%s18763_s7 + $0x30] ss:$8 sps:$4 sm:$0xff]  }
 0xf4b   : > { %v11379_v50 = vpop.f32.mrb[172].mxu1  ;;  %v12871_v27 = vcombine.high %v11443_v29, %v11443_v29 }
 0xf4c   : > { %v11380_v25 = vadd.f32 %v13040_v45, %v11379_v50  ;;  %v13356_v7 = vpop.f32.mrb[173].mxu1  ;;  %11513 = vmatpush1.bf16.msra.mxu0 %v11430_v39  ;;  %v15455_v45 = vld [vmem:[%s18763_s7 + $0x20] ss:$8 sps:$4 sm:$0xff]  }
 0xf4d   : > { %v11382_v40 = vpop.f32.mrb[174].mxu1  ;;  %v13044_v31 = vpop.f32.mrb[100].mxu0  ;;  %11514 = vmatprep.subr.bf16.mxu0 %v18816_v34 }
 0xf4e   : > { %v11383_v46 = vadd.f32 %v13043_v32, %v11382_v40  ;;  %v13357_v12 = vpop.f32.mrb[175].mxu1  ;;  %v13045_v35 = vpop.f32.mrb[101].mxu0  ;;  %v11419_v55 = vmax.f32 %v11380_v25, 0.0  ;;  %v12870_v32 = vcombine.low %v11443_v29, %v11443_v29 }
 0xf4f   : > { %v13046_v0 = vadd.f32 %v13045_v35, %v13044_v31  ;;  %v13047_v56 = vpop.f32.mrb[102].mxu0 }
 0xf50   : > { %v11420_v8 = vmax.f32 %v11383_v46, 0.0  ;;  %v13048_v63 = vpop.f32.mrb[103].mxu0 }
 0xf51   : > { %v13049_v4 = vadd.f32 %v13048_v63, %v13047_v56 }
 0xf52   : > { %v11431_v10 = vpack.c.bf16 %v11420_v8, %v11419_v55 }
 0xf53   : > { %v11387_v9 = vpop.f32.mrb[176].mxu1 }
 0xf54   : > { %v11388_v60 = vadd.f32 %v13046_v0, %v11387_v9  ;;  %v13360_v21 = vpop.f32.mrb[177].mxu1  ;;  %11515 = vmatpush1.bf16.msra.mxu0 %v11431_v10 }
 0xf55   : > { %v11390_v3 = vpop.f32.mrb[178].mxu1  ;;  %v13050_v62 = vpop.f32.mrb[104].mxu0  ;;  %11516 = vmatprep.subr.bf16.mxu0 %v18816_v34 }
 0xf56   : > { %v11391_v33 = vadd.f32 %v13049_v4, %v11390_v3  ;;  %v13361_v23 = vpop.f32.mrb[179].mxu1  ;;  %v13051_v2 = vpop.f32.mrb[105].mxu0  ;;  %v11421_v41 = vmax.f32 %v11388_v60, 0.0 }
 0xf57   : > { %v13052_v26 = vadd.f32 %v13051_v2, %v13050_v62  ;;  %v13053_v6 = vpop.f32.mrb[106].mxu0 }
 0xf58   : > { %v11422_v53 = vmax.f32 %v11391_v33, 0.0  ;;  %v13054_v48 = vpop.f32.mrb[107].mxu0 }
 0xf59   : > { %v13055_v52 = vadd.f32 %v13054_v48, %v13053_v6 }
 0xf5a   : > { %v11432_v20 = vpack.c.bf16 %v11422_v53, %v11421_v41 }
 0xf5b   : > { %v11395_v28 = vpop.f32.mrb[180].mxu1 }
 0xf5c   : > { %v11396_v54 = vadd.f32 %v13052_v26, %v11395_v28  ;;  %v13364_v18 = vpop.f32.mrb[181].mxu1  ;;  %11517 = vmatpush1.bf16.msra.mxu0 %v11432_v20 }
 0xf5d   : > { %v11398_v36 = vpop.f32.mrb[182].mxu1  ;;  %v13056_v49 = vpop.f32.mrb[108].mxu0  ;;  %11518 = vmatprep.subr.bf16.mxu0 %v18816_v34 }
 0xf5e   : > { %v11399_v22 = vadd.f32 %v13055_v52, %v11398_v36  ;;  %v13365_v37 = vpop.f32.mrb[183].mxu1  ;;  %v13057_v15 = vpop.f32.mrb[109].mxu0  ;;  %v11423_v17 = vmax.f32 %v11396_v54, 0.0 }
 0xf5f   : > { %v13058_v61 = vadd.f32 %v13057_v15, %v13056_v49  ;;  %v13059_v5 = vpop.f32.mrb[110].mxu0  ;;  %v11590_v49 = vld [vmem:[%s18764_s8] sm:$0xf] }
 0xf60   : > { %v11424_v19 = vmax.f32 %v11399_v22, 0.0  ;;  %v13060_v44 = vpop.f32.mrb[111].mxu0 }
 0xf62   : > { %v11433_v57 = vpack.c.bf16 %v11424_v19, %v11423_v17 }
 0xf63   : > { %v11403_v42 = vpop.f32.mrb[184].mxu1 }
 0xf64   : > { %v11404_v59 = vadd.f32 %v13058_v61, %v11403_v42  ;;  %v13368_v1 = vpop.f32.mrb[185].mxu1  ;;  %11519 = vmatpush1.bf16.msra.mxu0 %v11433_v57 }
 0xf65   : > { %v11406_v13 = vpop.f32.mrb[186].mxu1  ;;  %11520 = vmatprep.subr.bf16.mxu0 %v18816_v34  ;;  %v15452_v34 = vld [vmem:[%s18763_s7 + $0x10] ss:$8 sps:$4 sm:$0xff]  }
 0xf66   : > { %v11425_v47 = vmax.f32 %v11404_v59, 0.0  ;;  %v13369_v43 = vpop.f32.mrb[187].mxu1 }
 0xf68   : > { %v11434_v51 = vpack.c.bf16 %v11425_v47, %v11425_v47 }
 0xf6a   : > { %v11502_v24 = vsel %vm1606_vm1, %v11434_v51, 0 }
 0xf6b   : > { %11521 = vmatpush1.bf16.msra.mxu0 %v11502_v24 }
 0xf6c   : > { %13370 = vmatprep.subr.bf16.mxu0 %v15627_v16 }
 0xf6e   : > { %11537 = vmatmul.mubr.bf16.vlgmr.msra.gmra.mrb[112].mxu0 %v15449_v14 }
 0xf6f   : > { %12873 = vmatprep.mubr.msk.bf16.mxu0 %vm10398_vm5, %v15454_v11 }
 0xf76   : > { %11545 = vmatmul.mubr.bf16.gmra.mrb[116].mxu0 %v15452_v34 }
 0xf77   : > { %12874 = vmatprep.mubr.msk.bf16.mxu0 %vm10398_vm5, %v15457_v58 }
 0xf7e   : > { %11553 = vmatmul.mubr.bf16.gmra.mrb[120].mxu0 %v15455_v45 }
 0xf7f   : > { %12875 = vmatprep.mubr.msk.bf16.mxu0 %vm10398_vm5, %v15460_v30 }
 0xf86   : > { %11561 = vmatmul.mubr.bf16.gmra.mrb[124].mxu0 %v15458_v38 }
 0xf87   : > { %12876 = vmatprep.mubr.msk.bf16.mxu0 %vm10398_vm5, %v12871_v27 }
 0xf8e   : > { %11569 = vmatmul.mubr.bf16.gmra.mrb[128].mxu0 %v12870_v32 }
 0xf8f   : > { %13380 = vmatprep.mubr.msk.bf16.mxu0 %vm15628_vm4, %v15627_v16 }
0x1041   : > { %v11538_v39 = vpop.f32.mrb[112].mxu0 }
0x1042   : > { %v11540_v50 = vpop.f32.mrb[113].mxu0  ;;  %v11576_v7 = vmax.f32 %v11538_v39, 0.0 }
0x1043   : > { %v11541_v25 = vpop.f32.mrb[114].mxu0 }
0x1044   : > { %v11577_v40 = vmax.f32 %v11541_v25, 0.0  ;;  %v11543_v31 = vpop.f32.mrb[115].mxu0 }
0x1046   : > { %v11585_v46 = vpack.c.bf16 %v11577_v40, %v11576_v7 }
0x1048   : > { %13371 = vmatpush3.bf16.msra.mxu0 %v11585_v46 }
0x1049   : > { %v11546_v12 = vpop.f32.mrb[116].mxu0  ;;  %13372 = vmatprep.subr.bf16.mxu0 %v15627_v16 }
0x104a   : > { %v11548_v35 = vpop.f32.mrb[117].mxu0  ;;  %v11578_v56 = vmax.f32 %v11546_v12, 0.0 }
0x104b   : > { %v11549_v0 = vpop.f32.mrb[118].mxu0 }
0x104c   : > { %v11579_v55 = vmax.f32 %v11549_v0, 0.0  ;;  %v11551_v8 = vpop.f32.mrb[119].mxu0 }
0x104e   : > { %v11586_v63 = vpack.c.bf16 %v11579_v55, %v11578_v56 }
0x1050   : > { %13373 = vmatpush3.bf16.msra.mxu0 %v11586_v63 }
0x1051   : > { %v11554_v4 = vpop.f32.mrb[120].mxu0  ;;  %13374 = vmatprep.subr.bf16.mxu0 %v15627_v16 }
0x1052   : > { %v11556_v10 = vpop.f32.mrb[121].mxu0  ;;  %v11580_v60 = vmax.f32 %v11554_v4, 0.0 }
0x1053   : > { %v11557_v9 = vpop.f32.mrb[122].mxu0 }
0x1054   : > { %v11581_v21 = vmax.f32 %v11557_v9, 0.0  ;;  %v11559_v3 = vpop.f32.mrb[123].mxu0 }
0x1056   : > { %v11587_v62 = vpack.c.bf16 %v11581_v21, %v11580_v60 }
0x1058   : > { %13375 = vmatpush3.bf16.msra.mxu0 %v11587_v62 }
0x1059   : > { %v11562_v33 = vpop.f32.mrb[124].mxu0  ;;  %13376 = vmatprep.subr.bf16.mxu0 %v15627_v16 }
0x105a   : > { %v11564_v23 = vpop.f32.mrb[125].mxu0  ;;  %v11582_v26 = vmax.f32 %v11562_v33, 0.0 }
0x105b   : > { %v11565_v2 = vpop.f32.mrb[126].mxu0 }
0x105c   : > { %v11583_v6 = vmax.f32 %v11565_v2, 0.0  ;;  %v11567_v41 = vpop.f32.mrb[127].mxu0 }
0x105e   : > { %v11588_v53 = vpack.c.bf16 %v11583_v6, %v11582_v26 }
0x1060   : > { %13377 = vmatpush3.bf16.msra.mxu0 %v11588_v53 }
0x1061   : > { %v11570_v48 = vpop.f32.mrb[128].mxu0  ;;  %13378 = vmatprep.subr.bf16.mxu0 %v15627_v16 }
0x1062   : > { %v11584_v52 = vmax.f32 %v11570_v48, 0.0  ;;  %v11572_v20 = vpop.f32.mrb[129].mxu0 }
0x1063   : > { %v11573_v28 = vpop.f32.mrb[130].mxu0 }
0x1064   : > { %v11589_v54 = vpack.c.bf16 %v11584_v52, %v11584_v52  ;;  %v11574_v18 = vpop.f32.mrb[131].mxu0 }
0x1066   : > { %v11596_v36 = vsel %vm1606_vm1, %v11589_v54, 0 }
0x1067   : > { %13379 = vmatpush3.bf16.msra.mxu0 %v11596_v36 }
0x106a   : > { %13381 = vmatmul.mubr.msk.bf16.vlgmr.msra.gmra.mrb[132].mxu0 %vm11591_vm6, %v11590_v49 }
0x113d   : > { %v11632_v16 = vpop.f32.mrb[132].mxu0 }
0x113e   : > { %11638 = vst [vmem:[%s503_s14] sm:$0xff] %v11632_v16  ;;  %v13382_v22 = vpop.f32.mrb[133].mxu0 }
0x113f   : > { %v11635_v37 = vpop.f32.mrb[134].mxu0 }
0x1140   : > { %15560 = shalt.err (!%p15557_p6)
}
0x1141   : > { %s15561_s30 = scalar_lea.hbm %s18714_s17, 128  ;;  %s15565_s4 = scalar_lea.hbm %s18994_s22, 256 }
0x1142   : > { %p15562_p0 = scmp.ne.s32.totalorder %s18714_s17, %s15561_s30  ;;  %p15566_p10 = scmp.lt.u32.totalorder %s18714_s17, %s18994_s22 }
0x1143   : > { %p15567_p11 = scmp.lt.u32.totalorder %s15565_s4, %s15561_s30  ;;  %p15569_p4 = scmp.lt.u32.totalorder %s15561_s30, %s18714_s17 }
0x1144   : > { %p15563_p2 = pnand %p15562_p0, %p18995_p3 }
0x1145   : > { %p15568_p12 = por %p15567_p11, %p15566_p10 }
0x1146   : > { %p15564_p5 = pneg %p15563_p2 }
0x1147   : > { %p15570_p7 = por %p15569_p4, %p15568_p12 }
0x1149   : > { %p15571_p8 = pnand %p15570_p7, %p15564_p5 }
0x114b   : > { %15574 = shalt.err (!%p15571_p8)
}
0x114c   : > { %14126 = dma.vmem_to_hbm [thread:$0]  (%p18995_p3), %s18709_s25, 128, %s18714_s17, %s11640_s26   ;;  %v13383_v15 = vpop.f32.mrb[135].mxu0 }
0x114d PF: > { %s18996_s18 = sld [smem:[#allocation13_spill]]  ;;  %s18997_s14 = sld [smem:[#allocation16_spill]] }
0x1153   : > { %s11665_s19 = sand.u32 1, %s18996_s18   ;;  %p18998_p9 = scmp.ne.s32.totalorder %s18997_s14, 0 }
0x1154   : > { %s11666_s9 = scalar_lea.sflag [#allocation5], %s11665_s19 }
0x1155   : > { %p14139_p13 = pnand %p11754_p1, %p18998_p9 }
0x1157   : > { %15600 = dma.done.wait (!%p14139_p13), %s11666_s9, 128  }
0x1158   : > { %15602 = vsyncadd (!%p14139_p13), %s11666_s9, 4294967168  ;;  %s18999_s12 = sld [smem:[#allocation14_spill]]  ;;  %s19000_s16 = sld [smem:[#allocation15_spill]] }
0x1159   : > { %s19001_s30 = smov %s15609_s10  ;;  %s19002_s10 = smov %s15613_s11 }
0x115e   : > { %p21_p6 = scmp.ge.s32.totalorder %s18999_s12, 4   ;;  %s19003_s11 = smov %s19000_s16 }
0x1160   :  { %23 = sbr.rel (!%p21_p6) target bundleno = 8 (0x8), region = 150 }
0x1167   :  { %11671 = vsyncpa [#allocation4], 1 }
0x1168   :  { %11673 = vsyncpa [#allocation4 + $0x1], 1 }
0x1169   :  { %11674 = vsyncpa [#allocation7], 1 }
0x116a   :  { %11675 = vsyncpa [#allocation5], 1 }
0x116b   :  { %11677 = vsyncpa [#allocation5 + $0x1], 1 }

</bundles_post_ra>
